<compile_context>
chip_gen: v6e
topology: v6e:2x2x1
jax: 0.10.0
libtpu: 0.0.40
codegen_flags: <defaults>
</compile_context>

<pallas_src>
import functools

import jax
import jax.numpy as jnp
from jax import lax
from jax.experimental import pallas as pl
from jax.experimental.pallas import tpu as pltpu


# ---------------------------------------------------------------------------
# Small helpers
# ---------------------------------------------------------------------------

def _fold_bn(weight, gamma, beta, mean, var, eps):
    """Fold eval-mode BN scale into the conv weights; keep only the per-channel shift."""
    scale = gamma / jnp.sqrt(var + eps)
    shift = (beta - mean * scale).reshape(-1, 1).astype(jnp.float32)
    w = (weight.astype(jnp.float32) * scale[:, None, None, None])
    return w, shift


def _col_masks(S, W, dws, dtype=jnp.bfloat16):
    """Per-tap lane masks zeroing kw-shifts that would wrap across an image row."""
    ow = jnp.arange(S, dtype=jnp.int32) % W
    return jnp.stack([((ow + dw >= 0) & (ow + dw < W)) for dw in dws]).astype(dtype)


# ---------------------------------------------------------------------------
# Kernels
# ---------------------------------------------------------------------------

def _stem_1x1_kernel(x_ref, w_ref, s_ref, o1_ref, o2_ref, o3_ref, *, c1, c2):
    """Three fused 1x1 conv+BN+ReLU branches sharing one input read and one MXU matmul.

    x_ref: (1, Cin, S) bf16    w_ref: (Ctot, Cin) bf16    s_ref: (Ctot, 1) f32
    """
    y = jnp.dot(w_ref[...], x_ref[0], preferred_element_type=jnp.float32)
    y = jnp.maximum(y + s_ref[...], 0.0)
    o1_ref[0] = y[:c1].astype(o1_ref.dtype)
    o2_ref[0] = y[c1:c1 + c2].astype(o2_ref.dtype)
    o3_ref[0] = y[c1 + c2:].astype(o3_ref.dtype)


def _conv_tap_kernel(*refs, offsets, needs_mask, S, A, F, has_mask):
    """KHxKW stride-1 'same' conv + folded BN + ReLU via per-tap MXU accumulation.

    refs (with mask):    x(1,Cin,S), w(T,co,Cin), shift(co,1), mask(T,S), out(1,co,S), xpad
    refs (without mask): x(1,Cin,S), w(T,co,Cin), shift(co,1),            out(1,co,S), xpad
    xpad scratch: (Cin, A + S + F) bf16, zero halos + 128-aligned interior.
    """
    if has_mask:
        x_ref, w_ref, s_ref, m_ref, o_ref, xpad_ref = refs
    else:
        x_ref, w_ref, s_ref, o_ref, xpad_ref = refs
        m_ref = None

    # Build the zero-padded flat input once per batch element (Cout-tile j == 0) and reuse
    # it across the remaining Cout tiles.  Only the halos are zeroed; the interior store is
    # 128-lane aligned and fully overwrites the previous batch element.
    @pl.when(pl.program_id(1) == 0)
    def _build_xpad():
        cin = xpad_ref.shape[0]
        if A > 0:
            xpad_ref[:, :A] = jnp.zeros((cin, A), xpad_ref.dtype)
        if F > 0:
            xpad_ref[:, A + S:] = jnp.zeros((cin, F), xpad_ref.dtype)
        xpad_ref[:, A:A + S] = x_ref[0]

    acc = None
    for t, off in enumerate(offsets):
        tap = xpad_ref[:, off:off + S]                 # lane-shifted window (bf16)
        if has_mask and needs_mask[t]:                 # kw-shift crosses an image row
            tap = tap * m_ref[t:t + 1, :]
        part = jnp.dot(w_ref[t], tap, preferred_element_type=jnp.float32)
        acc = part if acc is None else acc + part
    y = jnp.maximum(acc + s_ref[...], 0.0)
    o_ref[0] = y.astype(o_ref.dtype)


def _pool_conv1x1_kernel(x_ref, w_ref, s_ref, m_ref, o_ref, xpad_ref, pooled_ref,
                         *, offsets, needs_mask, S, A, F):
    """avg_pool2d(3, stride=1, pad=1, count_include_pad) + 1x1 conv + BN + ReLU.

    Pooling is 9 shifted VPU adds in f32 on a zero-padded flat buffer; the conv is ONE
    (co, Cin) x (Cin, S) bf16 MXU matmul (no 3x3 weight expansion).
    """
    @pl.when(pl.program_id(1) == 0)
    def _build_pooled():
        cin = xpad_ref.shape[0]
        xpad_ref[:, :A] = jnp.zeros((cin, A), xpad_ref.dtype)
        xpad_ref[:, A + S:] = jnp.zeros((cin, F), xpad_ref.dtype)
        xpad_ref[:, A:A + S] = x_ref[0]
        acc = None
        for t, off in enumerate(offsets):
            tap = xpad_ref[:, off:off + S]
            if needs_mask[t]:
                tap = tap * m_ref[t:t + 1, :]
            tap = tap.astype(jnp.float32)
            acc = tap if acc is None else acc + tap
        pooled_ref[...] = (acc * (1.0 / 9.0)).astype(pooled_ref.dtype)

    y = jnp.dot(w_ref[...], pooled_ref[...], preferred_element_type=jnp.float32)
    y = jnp.maximum(y + s_ref[...], 0.0)
    o_ref[0] = y.astype(o_ref.dtype)


# ---------------------------------------------------------------------------
# Wrappers (pallas_call builders)
# ---------------------------------------------------------------------------

def fused_stem_1x1(xf, p_list, out_dtypes, *, eps=1e-3):
    """The three 1x1 BasicConv2d that consume x, fused into one pallas_call."""
    N, Cin, S = xf.shape
    ws, shifts, couts = [], [], []
    for p in p_list:
        w, s = _fold_bn(p['weight'], p['gamma'], p['beta'], p['mean'], p['var'], eps)
        ws.append(w.reshape(w.shape[0], Cin))
        shifts.append(s)
        couts.append(w.shape[0])
    w_cat = jnp.concatenate(ws, axis=0).astype(jnp.bfloat16)     # (Ctot, Cin)
    s_cat = jnp.concatenate(shifts, axis=0)                      # (Ctot, 1) f32
    ctot = sum(couts)

    kernel = functools.partial(_stem_1x1_kernel, c1=couts[0], c2=couts[1])
    return pl.pallas_call(
        kernel,
        out_shape=tuple(jax.ShapeDtypeStruct((N, c, S), dt)
                        for c, dt in zip(couts, out_dtypes)),
        grid=(N,),
        in_specs=[
            pl.BlockSpec((1, Cin, S), lambda n: (n, 0, 0)),
            pl.BlockSpec((ctot, Cin), lambda n: (0, 0)),
            pl.BlockSpec((ctot, 1), lambda n: (0, 0)),
        ],
        out_specs=tuple(pl.BlockSpec((1, c, S), lambda n: (n, 0, 0)) for c in couts),
        compiler_params=pltpu.CompilerParams(dimension_semantics=("parallel",)),
    )(xf, w_cat, s_cat)


def conv_kxk_bn_relu(xf, weight, gamma, beta, mean, var, *, H, W, padding,
                     out_dtype, eps=1e-3, cout_block=192):
    """Fused KHxKW stride-1 'same' conv + BN + ReLU on flattened-spatial bf16 activations.

    xf: (N, Cin, H*W) bfloat16, weight: (Cout, Cin, KH, KW) f32.  Returns (N, Cout, H*W).
    """
    N, Cin, S = xf.shape
    Cout, Cin_w, KH, KW = weight.shape
    ph, pw = padding
    assert S == H * W and Cin == Cin_w
    assert 2 * ph == KH - 1 and 2 * pw == KW - 1, "stride-1 'same' convs only"

    w_folded, shift = _fold_bn(weight, gamma, beta, mean, var, eps)
    # Tap-major weights (T, Cout, Cin) so the kernel picks one tap with a cheap leading-axis
    # index instead of an unaligned lane slice.
    w_taps = jnp.transpose(w_folded, (2, 3, 0, 1)).reshape(KH * KW, Cout, Cin)
    w_taps = w_taps.astype(jnp.bfloat16)

    # 192 fills the v6e/v7x MXU result tile (use 128 on v5e); fall back to one tile if not
    # divisible so the block index map stays trivial.
    co_blk = cout_block if Cout % cout_block == 0 else Cout
    nco = Cout // co_blk

    T = KH * KW
    F = ph * W + pw                           # flat halo half-width
    A = ((F + 127) // 128) * 128              # 128-aligned interior offset
    offsets = tuple(A + (kh - ph) * W + (kw - pw)
                    for kh in range(KH) for kw in range(KW))
    dws = tuple(kw - pw for kh in range(KH) for kw in range(KW))
    needs_mask = tuple(dw != 0 for dw in dws)
    has_mask = any(needs_mask)                # 7x1 convs skip the mask operand entirely

    args = [xf, w_taps, shift]
    in_specs = [
        pl.BlockSpec((1, Cin, S), lambda n, j: (n, 0, 0)),
        pl.BlockSpec((T, co_blk, Cin), lambda n, j: (0, j, 0)),
        pl.BlockSpec((co_blk, 1), lambda n, j: (j, 0)),
    ]
    if has_mask:
        args.append(_col_masks(S, W, dws))
        in_specs.append(pl.BlockSpec((T, S), lambda n, j: (0, 0)))

    kernel = functools.partial(_conv_tap_kernel, offsets=offsets,
                               needs_mask=needs_mask, S=S, A=A, F=F,
                               has_mask=has_mask)
    return pl.pallas_call(
        kernel,
        out_shape=jax.ShapeDtypeStruct((N, Cout, S), out_dtype),
        grid=(N, nco),
        in_specs=in_specs,
        out_specs=pl.BlockSpec((1, co_blk, S), lambda n, j: (n, j, 0)),
        scratch_shapes=[pltpu.VMEM((Cin, A + S + F), jnp.bfloat16)],
        # The Cout-tile axis reuses the xpad scratch built at j == 0, so it must stay
        # sequential ("arbitrary"); N shards across TensorCores on v7x.
        compiler_params=pltpu.CompilerParams(
            dimension_semantics=("parallel", "arbitrary")),
    )(*args)


def avgpool3_conv1x1_bn_relu(xf, weight, gamma, beta, mean, var, *, H, W,
                             out_dtype, eps=1e-3, cout_block=192):
    """Fused avg_pool2d(3, stride=1, pad=1, count_include_pad=True) + 1x1 conv + BN + ReLU."""
    N, Cin, S = xf.shape
    Cout = weight.shape[0]
    w_folded, shift = _fold_bn(weight, gamma, beta, mean, var, eps)
    w_mat = w_folded.reshape(Cout, Cin).astype(jnp.bfloat16)

    co_blk = cout_block if Cout % cout_block == 0 else Cout
    nco = Cout // co_blk

    F = W + 1
    A = ((F + 127) // 128) * 128
    taps = tuple((dh, dw) for dh in (-1, 0, 1) for dw in (-1, 0, 1))
    offsets = tuple(A + dh * W + dw for dh, dw in taps)
    dws = tuple(dw for _, dw in taps)
    needs_mask = tuple(dw != 0 for dw in dws)
    masks = _col_masks(S, W, dws)

    kernel = functools.partial(_pool_conv1x1_kernel, offsets=offsets,
                               needs_mask=needs_mask, S=S, A=A, F=F)
    return pl.pallas_call(
        kernel,
        out_shape=jax.ShapeDtypeStruct((N, Cout, S), out_dtype),
        grid=(N, nco),
        in_specs=[
            pl.BlockSpec((1, Cin, S), lambda n, j: (n, 0, 0)),
            pl.BlockSpec((co_blk, Cin), lambda n, j: (j, 0)),
            pl.BlockSpec((co_blk, 1), lambda n, j: (j, 0)),
            pl.BlockSpec((9, S), lambda n, j: (0, 0)),
        ],
        out_specs=pl.BlockSpec((1, co_blk, S), lambda n, j: (n, j, 0)),
        scratch_shapes=[
            pltpu.VMEM((Cin, A + S + F), jnp.bfloat16),   # zero-padded flat input
            pltpu.VMEM((Cin, S), jnp.bfloat16),           # pooled activations
        ],
        compiler_params=pltpu.CompilerParams(
            dimension_semantics=("parallel", "arbitrary")),
    )(xf, w_mat, shift, masks)


# ---------------------------------------------------------------------------
# InceptionC forward
# ---------------------------------------------------------------------------

def inception_c_forward(x, params, *, eps=1e-3, cout_block=192):
    """Full InceptionC forward (eval-mode BN).  x: (N, Cin, H, W) NCHW float32."""
    N, Cin, H, W = x.shape
    S = H * W
    # One cast of the input to bf16; inter-layer activations stay bf16 (half the DMA
    # bytes), matmuls accumulate in f32, branch-final outputs are written in f32.
    xf = x.reshape(N, Cin, S).astype(jnp.bfloat16)

    # Fused 1x1 stem: branch1x1 (branch-final, f32) + the two 7x7-chain stems (bf16).
    b1, t7, t7d = fused_stem_1x1(
        xf,
        [params['branch1x1'], params['branch7x7_1'], params['branch7x7dbl_1']],
        out_dtypes=(jnp.float32, jnp.bfloat16, jnp.bfloat16), eps=eps)

    def conv(xin, name, padding, out_dtype):
        p = params[name]
        return conv_kxk_bn_relu(xin, p['weight'], p['gamma'], p['beta'],
                                p['mean'], p['var'], H=H, W=W, padding=padding,
                                out_dtype=out_dtype, eps=eps, cout_block=cout_block)

    b7 = conv(t7, 'branch7x7_2', (0, 3), jnp.bfloat16)
    b7 = conv(b7, 'branch7x7_3', (3, 0), jnp.float32)

    b7d = conv(t7d, 'branch7x7dbl_2', (3, 0), jnp.bfloat16)
    b7d = conv(b7d, 'branch7x7dbl_3', (0, 3), jnp.bfloat16)
    b7d = conv(b7d, 'branch7x7dbl_4', (3, 0), jnp.bfloat16)
    b7d = conv(b7d, 'branch7x7dbl_5', (0, 3), jnp.float32)

    pp = params['branch_pool']
    bp = avgpool3_conv1x1_bn_relu(xf, pp['weight'], pp['gamma'], pp['beta'],
                                  pp['mean'], pp['var'], H=H, W=W,
                                  out_dtype=jnp.float32, eps=eps,
                                  cout_block=cout_block)

    # TODO(synk): alias each branch-final conv into a channel slice of one preallocated
    #             (N, 768, S) buffer to remove this concat.
    out = jnp.concatenate([b1, b7, b7d, bp], axis=1)
    return out.reshape(N, out.shape[1], H, W)   # free reshape back to NCHW


# ---------------------------------------------------------------------------
# Deterministic parameters + references
# ---------------------------------------------------------------------------

def make_params(key, in_channels, c7):
    shapes = {
        'branch1x1':      (192, in_channels, 1, 1),
        'branch7x7_1':    (c7, in_channels, 1, 1),
        'branch7x7_2':    (c7, c7, 1, 7),
        'branch7x7_3':    (192, c7, 7, 1),
        'branch7x7dbl_1': (c7, in_channels, 1, 1),
        'branch7x7dbl_2': (c7, c7, 7, 1),
        'branch7x7dbl_3': (c7, c7, 1, 7),
        'branch7x7dbl_4': (c7, c7, 7, 1),
        'branch7x7dbl_5': (192, c7, 1, 7),
        'branch_pool':    (192, in_channels, 1, 1),
    }
    params = {}
    keys = jax.random.split(key, len(shapes))
    for k, (name, (cout, cin, kh, kw)) in zip(keys, shapes.items()):
        k1, k2, k3, k4, k5 = jax.random.split(k, 5)
        params[name] = dict(
            weight=jax.random.normal(k1, (cout, cin, kh, kw), jnp.float32)
                   / jnp.sqrt(float(cin * kh * kw)),
            gamma=jax.random.uniform(k2, (cout,), jnp.float32, 0.5, 1.5),
            beta=jax.random.normal(k3, (cout,), jnp.float32) * 0.1,
            mean=jax.random.normal(k4, (cout,), jnp.float32) * 0.1,
            var=jax.random.uniform(k5, (cout,), jnp.float32, 0.5, 1.5),
        )
    return params


def _ref_basic_conv2d(x, p, padding, eps=1e-3):
    """Exact f32 BasicConv2d reference."""
    ph, pw = padding
    y = lax.conv_general_dilated(
        x, p['weight'], window_strides=(1, 1), padding=((ph, ph), (pw, pw)),
        dimension_numbers=("NCHW", "OIHW", "NCHW"),
        precision=lax.Precision.HIGHEST)
    scale = p['gamma'] / jnp.sqrt(p['var'] + eps)
    shift = p['beta'] - p['mean'] * scale
    return jnp.maximum(y * scale[None, :, None, None] + shift[None, :, None, None], 0.0)


def _ref_inception_c(x, params, eps=1e-3):
    b1 = _ref_basic_conv2d(x, params['branch1x1'], (0, 0), eps)
    b7 = _ref_basic_conv2d(x, params['branch7x7_1'], (0, 0), eps)
    b7 = _ref_basic_conv2d(b7, params['branch7x7_2'], (0, 3), eps)
    b7 = _ref_basic_conv2d(b7, params['branch7x7_3'], (3, 0), eps)
    b7d = _ref_basic_conv2d(x, params['branch7x7dbl_1'], (0, 0), eps)
    b7d = _ref_basic_conv2d(b7d, params['branch7x7dbl_2'], (3, 0), eps)
    b7d = _ref_basic_conv2d(b7d, params['branch7x7dbl_3'], (0, 3), eps)
    b7d = _ref_basic_conv2d(b7d, params['branch7x7dbl_4'], (3, 0), eps)
    b7d = _ref_basic_conv2d(b7d, params['branch7x7dbl_5'], (0, 3), eps)
    pooled = lax.reduce_window(x, 0.0, lax.add, (1, 1, 3, 3), (1, 1, 1, 1),
                               [(0, 0), (0, 0), (1, 1), (1, 1)]) / 9.0
    bp = _ref_basic_conv2d(pooled, params['branch_pool'], (0, 0), eps)
    return jnp.concatenate([b1, b7, b7d, bp], axis=1)


def _bf16(x):
    return x.astype(jnp.bfloat16).astype(jnp.float32)


def _refq_conv(x, p, padding, eps, out_bf16):
    """Mirrors the kernel math: bf16 inputs / folded weights, f32 accumulate + epilogue."""
    ph, pw = padding
    scale = p['gamma'] / jnp.sqrt(p['var'] + eps)
    w = _bf16(p['weight'] * scale[:, None, None, None])
    shift = p['beta'] - p['mean'] * scale
    y = lax.conv_general_dilated(
        x, w, window_strides=(1, 1), padding=((ph, ph), (pw, pw)),
        dimension_numbers=("NCHW", "OIHW", "NCHW"),
        precision=lax.Precision.HIGHEST)
    y = jnp.maximum(y + shift[None, :, None, None], 0.0)
    return _bf16(y) if out_bf16 else y


def _refq_inception_c(x, params, eps=1e-3):
    xq = _bf16(x)
    b1 = _refq_conv(xq, params['branch1x1'], (0, 0), eps, False)
    b7 = _refq_conv(xq, params['branch7x7_1'], (0, 0), eps, True)
    b7 = _refq_conv(b7, params['branch7x7_2'], (0, 3), eps, True)
    b7 = _refq_conv(b7, params['branch7x7_3'], (3, 0), eps, False)
    b7d = _refq_conv(xq, params['branch7x7dbl_1'], (0, 0), eps, True)
    b7d = _refq_conv(b7d, params['branch7x7dbl_2'], (3, 0), eps, True)
    b7d = _refq_conv(b7d, params['branch7x7dbl_3'], (0, 3), eps, True)
    b7d = _refq_conv(b7d, params['branch7x7dbl_4'], (3, 0), eps, True)
    b7d = _refq_conv(b7d, params['branch7x7dbl_5'], (0, 3), eps, False)
    pooled = lax.reduce_window(xq, 0.0, lax.add, (1, 1, 3, 3), (1, 1, 1, 1),
                               [(0, 0), (0, 0), (1, 1), (1, 1)]) * (1.0 / 9.0)
    bp = _refq_conv(_bf16(pooled), params['branch_pool'], (0, 0), eps, False)
    return jnp.concatenate([b1, b7, b7d, bp], axis=1)


if __name__ == "__main__":
    key = jax.random.PRNGKey(0)
    k_par, k_x = jax.random.split(key)

    # Small deterministic problem: N=2, in_channels=16, channels_7x7=8, 16x16 spatial.
    N, IN_CH, C7, H, W = 2, 16, 8, 16, 16
    params = make_params(k_par, IN_CH, C7)
    x = jax.random.normal(k_x, (N, IN_CH, H, W), dtype=jnp.float32)

    fwd = jax.jit(inception_c_forward)
    out = jax.block_until_ready(fwd(x, params))
    assert out.shape == (N, 192 * 4, H, W), out.shape
    assert out.dtype == jnp.float32

    # (1) Tight check against a reference that mirrors the kernels' bf16 math exactly.
    ref_q = _refq_inception_c(x, params)
    err_q = float(jnp.max(jnp.abs(out - ref_q)))
    assert jnp.allclose(out, ref_q, atol=2e-2, rtol=2e-2), err_q

    # (2) Loose check against the exact f32 module (bounds bf16 quantization error over
    #     the deepest 5-conv chain).
    ref = _ref_inception_c(x, params)
    err = float(jnp.max(jnp.abs(out - ref)))
    assert jnp.allclose(out, ref, atol=1e-1, rtol=1e-1), err

    print("KERNEL_OK")
</pallas_src>

<mosaic_0001>
module attributes {stable_mosaic.version = 11 : i64} {
  func.func @_pool_conv1x1_kernel(%arg0: i32, %arg1: i32, %arg2: memref<1x16x256xbf16, #tpu.memory_space<vmem>>, %arg3: memref<192x16xbf16, #tpu.memory_space<vmem>>, %arg4: memref<192x1xf32, #tpu.memory_space<vmem>>, %arg5: memref<9x256xbf16, #tpu.memory_space<vmem>>, %arg6: memref<1x192x256xf32, #tpu.memory_space<vmem>>, %arg7: memref<16x401xbf16, #tpu.memory_space<vmem>>, %arg8: memref<16x256xbf16, #tpu.memory_space<vmem>>) attributes {dimension_semantics = [#tpu.dimension_semantics<parallel>, #tpu.dimension_semantics<arbitrary>], iteration_bounds = array<i64: 2, 1>, scalar_prefetch = 0 : i64, scratch_operands = 2 : i64, tpu.core_type = #tpu.core_type<tc>, window_params = [{transform_indices = @transform_0, window_bounds = array<i64: 1, 16, 256>}, {transform_indices = @transform_1, window_bounds = array<i64: 192, 16>}, {transform_indices = @transform_2, window_bounds = array<i64: 192, 1>}, {pipeline_mode = #tpu.pipeline_mode<synchronous>, transform_indices = @transform_3, window_bounds = array<i64: 9, 256>}, {transform_indices = @transform_4, window_bounds = array<i64: 1, 192, 256>}]} {
    %c0_i32 = arith.constant 0 : i32
    %0 = arith.cmpi eq, %arg1, %c0_i32 : i32
    %1 = arith.extui %0 : i1 to i32
    %c0_i32_0 = arith.constant 0 : i32
    %2 = arith.cmpi ne, %1, %c0_i32_0 : i32
    scf.if %2 {
      %cst_10 = arith.constant 0.000000e+00 : bf16
      %14 = vector.broadcast %cst_10 : bf16 to vector<16x128xbf16>
      %c0_11 = arith.constant 0 : index
      %c0_12 = arith.constant 0 : index
      %15 = vector.load %arg7[%c0_11, %c0_12] : memref<16x401xbf16, #tpu.memory_space<vmem>>, vector<16x128xbf16>
      tpu.vector_store %arg7[%c0_11, %c0_12], %14 {strides = array<i32>} : memref<16x401xbf16, #tpu.memory_space<vmem>>, vector<16x128xbf16>,
      %cst_13 = arith.constant 0.000000e+00 : bf16
      %16 = vector.broadcast %cst_13 : bf16 to vector<16x17xbf16>
      %c0_14 = arith.constant 0 : index
      %c384 = arith.constant 384 : index
      %17 = vector.load %arg7[%c0_14, %c384] : memref<16x401xbf16, #tpu.memory_space<vmem>>, vector<16x17xbf16>
      tpu.vector_store %arg7[%c0_14, %c384], %16 {strides = array<i32>} : memref<16x401xbf16, #tpu.memory_space<vmem>>, vector<16x17xbf16>,
      %c0_15 = arith.constant 0 : index
      %c0_16 = arith.constant 0 : index
      %c0_17 = arith.constant 0 : index
      %18 = vector.load %arg2[%c0_15, %c0_16, %c0_17] : memref<1x16x256xbf16, #tpu.memory_space<vmem>>, vector<1x16x256xbf16>
      %19 = vector.shape_cast %18 : vector<1x16x256xbf16> to vector<16x256xbf16>
      %c0_18 = arith.constant 0 : index
      %c128 = arith.constant 128 : index
      %20 = vector.load %arg7[%c0_18, %c128] : memref<16x401xbf16, #tpu.memory_space<vmem>>, vector<16x256xbf16>
      tpu.vector_store %arg7[%c0_18, %c128], %19 {strides = array<i32>} : memref<16x401xbf16, #tpu.memory_space<vmem>>, vector<16x256xbf16>,
      %c0_19 = arith.constant 0 : index
      %c111 = arith.constant 111 : index
      %21 = vector.load %arg7[%c0_19, %c111] : memref<16x401xbf16, #tpu.memory_space<vmem>>, vector<16x256xbf16>
      %c0_20 = arith.constant 0 : index
      %c0_21 = arith.constant 0 : index
      %22 = vector.load %arg5[%c0_20, %c0_21] : memref<9x256xbf16, #tpu.memory_space<vmem>>, vector<1x256xbf16>
      %23 = vector.broadcast %22 : vector<1x256xbf16> to vector<16x256xbf16>
      %24 = arith.mulf %21, %23 : vector<16x256xbf16>
      %25 = arith.extf %24 : vector<16x256xbf16> to vector<16x256xf32>
      %c0_22 = arith.constant 0 : index
      %c112 = arith.constant 112 : index
      %26 = vector.load %arg7[%c0_22, %c112] : memref<16x401xbf16, #tpu.memory_space<vmem>>, vector<16x256xbf16>
      %27 = arith.extf %26 : vector<16x256xbf16> to vector<16x256xf32>
      %28 = arith.addf %25, %27 : vector<16x256xf32>
      %c0_23 = arith.constant 0 : index
      %c113 = arith.constant 113 : index
      %29 = vector.load %arg7[%c0_23, %c113] : memref<16x401xbf16, #tpu.memory_space<vmem>>, vector<16x256xbf16>
      %c2 = arith.constant 2 : index
      %c0_24 = arith.constant 0 : index
      %30 = vector.load %arg5[%c2, %c0_24] : memref<9x256xbf16, #tpu.memory_space<vmem>>, vector<1x256xbf16>
      %31 = vector.broadcast %30 : vector<1x256xbf16> to vector<16x256xbf16>
      %32 = arith.mulf %29, %31 : vector<16x256xbf16>
      %33 = arith.extf %32 : vector<16x256xbf16> to vector<16x256xf32>
      %34 = arith.addf %28, %33 : vector<16x256xf32>
      %c0_25 = arith.constant 0 : index
      %c127 = arith.constant 127 : index
      %35 = vector.load %arg7[%c0_25, %c127] : memref<16x401xbf16, #tpu.memory_space<vmem>>, vector<16x256xbf16>
      %c3 = arith.constant 3 : index
      %c0_26 = arith.constant 0 : index
      %36 = vector.load %arg5[%c3, %c0_26] : memref<9x256xbf16, #tpu.memory_space<vmem>>, vector<1x256xbf16>
      %37 = vector.broadcast %36 : vector<1x256xbf16> to vector<16x256xbf16>
      %38 = arith.mulf %35, %37 : vector<16x256xbf16>
      %39 = arith.extf %38 : vector<16x256xbf16> to vector<16x256xf32>
      %40 = arith.addf %34, %39 : vector<16x256xf32>
      %c0_27 = arith.constant 0 : index
      %c128_28 = arith.constant 128 : index
      %41 = vector.load %arg7[%c0_27, %c128_28] : memref<16x401xbf16, #tpu.memory_space<vmem>>, vector<16x256xbf16>
      %42 = arith.extf %41 : vector<16x256xbf16> to vector<16x256xf32>
      %43 = arith.addf %40, %42 : vector<16x256xf32>
      %c0_29 = arith.constant 0 : index
      %c129 = arith.constant 129 : index
      %44 = vector.load %arg7[%c0_29, %c129] : memref<16x401xbf16, #tpu.memory_space<vmem>>, vector<16x256xbf16>
      %c5 = arith.constant 5 : index
      %c0_30 = arith.constant 0 : index
      %45 = vector.load %arg5[%c5, %c0_30] : memref<9x256xbf16, #tpu.memory_space<vmem>>, vector<1x256xbf16>
      %46 = vector.broadcast %45 : vector<1x256xbf16> to vector<16x256xbf16>
      %47 = arith.mulf %44, %46 : vector<16x256xbf16>
      %48 = arith.extf %47 : vector<16x256xbf16> to vector<16x256xf32>
      %49 = arith.addf %43, %48 : vector<16x256xf32>
      %c0_31 = arith.constant 0 : index
      %c143 = arith.constant 143 : index
      %50 = vector.load %arg7[%c0_31, %c143] : memref<16x401xbf16, #tpu.memory_space<vmem>>, vector<16x256xbf16>
      %c6 = arith.constant 6 : index
      %c0_32 = arith.constant 0 : index
      %51 = vector.load %arg5[%c6, %c0_32] : memref<9x256xbf16, #tpu.memory_space<vmem>>, vector<1x256xbf16>
      %52 = vector.broadcast %51 : vector<1x256xbf16> to vector<16x256xbf16>
      %53 = arith.mulf %50, %52 : vector<16x256xbf16>
      %54 = arith.extf %53 : vector<16x256xbf16> to vector<16x256xf32>
      %55 = arith.addf %49, %54 : vector<16x256xf32>
      %c0_33 = arith.constant 0 : index
      %c144 = arith.constant 144 : index
      %56 = vector.load %arg7[%c0_33, %c144] : memref<16x401xbf16, #tpu.memory_space<vmem>>, vector<16x256xbf16>
      %57 = arith.extf %56 : vector<16x256xbf16> to vector<16x256xf32>
      %58 = arith.addf %55, %57 : vector<16x256xf32>
      %c0_34 = arith.constant 0 : index
      %c145 = arith.constant 145 : index
      %59 = vector.load %arg7[%c0_34, %c145] : memref<16x401xbf16, #tpu.memory_space<vmem>>, vector<16x256xbf16>
      %c8 = arith.constant 8 : index
      %c0_35 = arith.constant 0 : index
      %60 = vector.load %arg5[%c8, %c0_35] : memref<9x256xbf16, #tpu.memory_space<vmem>>, vector<1x256xbf16>
      %61 = vector.broadcast %60 : vector<1x256xbf16> to vector<16x256xbf16>
      %62 = arith.mulf %59, %61 : vector<16x256xbf16>
      %63 = arith.extf %62 : vector<16x256xbf16> to vector<16x256xf32>
      %64 = arith.addf %58, %63 : vector<16x256xf32>
      %cst_36 = arith.constant 0.111111112 : f32
      %65 = vector.broadcast %cst_36 : f32 to vector<16x256xf32>
      %66 = arith.mulf %64, %65 : vector<16x256xf32>
      %67 = arith.truncf %66 : vector<16x256xf32> to vector<16x256xbf16>
      %c0_37 = arith.constant 0 : index
      %c0_38 = arith.constant 0 : index
      %68 = vector.load %arg8[%c0_37, %c0_38] : memref<16x256xbf16, #tpu.memory_space<vmem>>, vector<16x256xbf16>
      tpu.vector_store %arg8[%c0_37, %c0_38], %67 {strides = array<i32>} : memref<16x256xbf16, #tpu.memory_space<vmem>>, vector<16x256xbf16>,
    } else {
    }
    %c0 = arith.constant 0 : index
    %c0_1 = arith.constant 0 : index
    %3 = vector.load %arg3[%c0, %c0_1] : memref<192x16xbf16, #tpu.memory_space<vmem>>, vector<192x16xbf16>
    %c0_2 = arith.constant 0 : index
    %c0_3 = arith.constant 0 : index
    %4 = vector.load %arg8[%c0_2, %c0_3] : memref<16x256xbf16, #tpu.memory_space<vmem>>, vector<16x256xbf16>
    %cst = arith.constant dense<0.000000e+00> : vector<192x256xf32>
    %5 = tpu.matmul %3, %4, %cst {dimension_numbers = #tpu.dot_dimension_numbers<[1], [0], [0], [1], [0, 0, 1, 1], [], []>} : vector<192x16xbf16>, vector<16x256xbf16>, vector<192x256xf32> -> vector<192x256xf32>
    %c0_4 = arith.constant 0 : index
    %c0_5 = arith.constant 0 : index
    %6 = vector.load %arg4[%c0_4, %c0_5] : memref<192x1xf32, #tpu.memory_space<vmem>>, vector<192x1xf32>
    %7 = vector.broadcast %6 : vector<192x1xf32> to vector<192x256xf32>
    %8 = arith.addf %5, %7 : vector<192x256xf32>
    %cst_6 = arith.constant 0.000000e+00 : f32
    %9 = vector.broadcast %cst_6 : f32 to vector<192x256xf32>
    %10 = arith.maximumf %8, %9 : vector<192x256xf32>
    %c0_7 = arith.constant 0 : index
    %c0_8 = arith.constant 0 : index
    %c0_9 = arith.constant 0 : index
    %11 = vector.load %arg6[%c0_7, %c0_8, %c0_9] : memref<1x192x256xf32, #tpu.memory_space<vmem>>, vector<1x192x256xf32>
    %12 = vector.shape_cast %11 : vector<1x192x256xf32> to vector<192x256xf32>
    %13 = vector.shape_cast %10 : vector<192x256xf32> to vector<1x192x256xf32>
    tpu.vector_store %arg6[%c0_7, %c0_8, %c0_9], %13 {strides = array<i32>} : memref<1x192x256xf32, #tpu.memory_space<vmem>>, vector<1x192x256xf32>,
    return
  }
  func.func @transform_0(%arg0: i32, %arg1: i32) -> (i32, i32, i32) {
    %c0_i32 = arith.constant 0 : i32
    %c0_i32_0 = arith.constant 0 : i32
    %c0_i32_1 = arith.constant 0 : i32
    return %arg0, %c0_i32, %c0_i32_0 : i32, i32, i32
  }
  func.func @transform_1(%arg0: i32, %arg1: i32) -> (i32, i32) {
    %c0_i32 = arith.constant 0 : i32
    %c0_i32_0 = arith.constant 0 : i32
    return %arg1, %c0_i32 : i32, i32
  }
  func.func @transform_2(%arg0: i32, %arg1: i32) -> (i32, i32) {
    %c0_i32 = arith.constant 0 : i32
    %c0_i32_0 = arith.constant 0 : i32
    return %arg1, %c0_i32 : i32, i32
  }
  func.func @transform_3(%arg0: i32, %arg1: i32) -> (i32, i32) {
    %c0_i32 = arith.constant 0 : i32
    %c0_i32_0 = arith.constant 0 : i32
    %c0_i32_1 = arith.constant 0 : i32
    return %c0_i32, %c0_i32_0 : i32, i32
  }
  func.func @transform_4(%arg0: i32, %arg1: i32) -> (i32, i32, i32) {
    %c0_i32 = arith.constant 0 : i32
    %c0_i32_0 = arith.constant 0 : i32
    return %arg0, %arg1, %c0_i32 : i32, i32, i32
  }
}

module attributes {stable_mosaic.version = 11 : i64} {
  func.func @_stem_1x1_kernel(%arg0: i32, %arg1: memref<1x16x256xbf16, #tpu.memory_space<vmem>>, %arg2: memref<208x16xbf16, #tpu.memory_space<vmem>>, %arg3: memref<208x1xf32, #tpu.memory_space<vmem>>, %arg4: memref<1x192x256xf32, #tpu.memory_space<vmem>>, %arg5: memref<1x8x256xbf16, #tpu.memory_space<vmem>>, %arg6: memref<1x8x256xbf16, #tpu.memory_space<vmem>>) attributes {dimension_semantics = [#tpu.dimension_semantics<parallel>], iteration_bounds = array<i64: 2>, scalar_prefetch = 0 : i64, scratch_operands = 0 : i64, tpu.core_type = #tpu.core_type<tc>, window_params = [{transform_indices = @transform_0, window_bounds = array<i64: 1, 16, 256>}, {pipeline_mode = #tpu.pipeline_mode<synchronous>, transform_indices = @transform_1, window_bounds = array<i64: 208, 16>}, {pipeline_mode = #tpu.pipeline_mode<synchronous>, transform_indices = @transform_2, window_bounds = array<i64: 208, 1>}, {transform_indices = @transform_3, window_bounds = array<i64: 1, 192, 256>}, {transform_indices = @transform_4, window_bounds = array<i64: 1, 8, 256>}, {transform_indices = @transform_5, window_bounds = array<i64: 1, 8, 256>}]} {
    %c0 = arith.constant 0 : index
    %c0_0 = arith.constant 0 : index
    %0 = vector.load %arg2[%c0, %c0_0] : memref<208x16xbf16, #tpu.memory_space<vmem>>, vector<208x16xbf16>
    %c0_1 = arith.constant 0 : index
    %c0_2 = arith.constant 0 : index
    %c0_3 = arith.constant 0 : index
    %1 = vector.load %arg1[%c0_1, %c0_2, %c0_3] : memref<1x16x256xbf16, #tpu.memory_space<vmem>>, vector<1x16x256xbf16>
    %2 = vector.shape_cast %1 : vector<1x16x256xbf16> to vector<16x256xbf16>
    %cst = arith.constant dense<0.000000e+00> : vector<208x256xf32>
    %3 = tpu.matmul %0, %2, %cst {dimension_numbers = #tpu.dot_dimension_numbers<[1], [0], [0], [1], [0, 0, 1, 1], [], []>} : vector<208x16xbf16>, vector<16x256xbf16>, vector<208x256xf32> -> vector<208x256xf32>
    %c0_4 = arith.constant 0 : index
    %c0_5 = arith.constant 0 : index
    %4 = vector.load %arg3[%c0_4, %c0_5] : memref<208x1xf32, #tpu.memory_space<vmem>>, vector<208x1xf32>
    %5 = vector.broadcast %4 : vector<208x1xf32> to vector<208x256xf32>
    %6 = arith.addf %3, %5 : vector<208x256xf32>
    %cst_6 = arith.constant 0.000000e+00 : f32
    %7 = vector.broadcast %cst_6 : f32 to vector<208x256xf32>
    %8 = arith.maximumf %6, %7 : vector<208x256xf32>
    %9 = vector.extract_strided_slice %8 {offsets = [0, 0], sizes = [192, 256], strides = [1, 1]} : vector<208x256xf32> to vector<192x256xf32>
    %c0_7 = arith.constant 0 : index
    %c0_8 = arith.constant 0 : index
    %c0_9 = arith.constant 0 : index
    %10 = vector.load %arg4[%c0_7, %c0_8, %c0_9] : memref<1x192x256xf32, #tpu.memory_space<vmem>>, vector<1x192x256xf32>
    %11 = vector.shape_cast %10 : vector<1x192x256xf32> to vector<192x256xf32>
    %12 = vector.shape_cast %9 : vector<192x256xf32> to vector<1x192x256xf32>
    tpu.vector_store %arg4[%c0_7, %c0_8, %c0_9], %12 {strides = array<i32>} : memref<1x192x256xf32, #tpu.memory_space<vmem>>, vector<1x192x256xf32>,
    %13 = vector.extract_strided_slice %8 {offsets = [192, 0], sizes = [8, 256], strides = [1, 1]} : vector<208x256xf32> to vector<8x256xf32>
    %14 = arith.truncf %13 : vector<8x256xf32> to vector<8x256xbf16>
    %c0_10 = arith.constant 0 : index
    %c0_11 = arith.constant 0 : index
    %c0_12 = arith.constant 0 : index
    %15 = vector.load %arg5[%c0_10, %c0_11, %c0_12] : memref<1x8x256xbf16, #tpu.memory_space<vmem>>, vector<1x8x256xbf16>
    %16 = vector.shape_cast %15 : vector<1x8x256xbf16> to vector<8x256xbf16>
    %17 = vector.shape_cast %14 : vector<8x256xbf16> to vector<1x8x256xbf16>
    tpu.vector_store %arg5[%c0_10, %c0_11, %c0_12], %17 {strides = array<i32>} : memref<1x8x256xbf16, #tpu.memory_space<vmem>>, vector<1x8x256xbf16>,
    %18 = vector.extract_strided_slice %8 {offsets = [200, 0], sizes = [8, 256], strides = [1, 1]} : vector<208x256xf32> to vector<8x256xf32>
    %19 = arith.truncf %18 : vector<8x256xf32> to vector<8x256xbf16>
    %c0_13 = arith.constant 0 : index
    %c0_14 = arith.constant 0 : index
    %c0_15 = arith.constant 0 : index
    %20 = vector.load %arg6[%c0_13, %c0_14, %c0_15] : memref<1x8x256xbf16, #tpu.memory_space<vmem>>, vector<1x8x256xbf16>
    %21 = vector.shape_cast %20 : vector<1x8x256xbf16> to vector<8x256xbf16>
    %22 = vector.shape_cast %19 : vector<8x256xbf16> to vector<1x8x256xbf16>
    tpu.vector_store %arg6[%c0_13, %c0_14, %c0_15], %22 {strides = array<i32>} : memref<1x8x256xbf16, #tpu.memory_space<vmem>>, vector<1x8x256xbf16>,
    return
  }
  func.func @transform_0(%arg0: i32) -> (i32, i32, i32) {
    %c0_i32 = arith.constant 0 : i32
    %c0_i32_0 = arith.constant 0 : i32
    %c0_i32_1 = arith.constant 0 : i32
    return %arg0, %c0_i32, %c0_i32_0 : i32, i32, i32
  }
  func.func @transform_1(%arg0: i32) -> (i32, i32) {
    %c0_i32 = arith.constant 0 : i32
    %c0_i32_0 = arith.constant 0 : i32
    %c0_i32_1 = arith.constant 0 : i32
    return %c0_i32, %c0_i32_0 : i32, i32
  }
  func.func @transform_2(%arg0: i32) -> (i32, i32) {
    %c0_i32 = arith.constant 0 : i32
    %c0_i32_0 = arith.constant 0 : i32
    %c0_i32_1 = arith.constant 0 : i32
    return %c0_i32, %c0_i32_0 : i32, i32
  }
  func.func @transform_3(%arg0: i32) -> (i32, i32, i32) {
    %c0_i32 = arith.constant 0 : i32
    %c0_i32_0 = arith.constant 0 : i32
    %c0_i32_1 = arith.constant 0 : i32
    return %arg0, %c0_i32, %c0_i32_0 : i32, i32, i32
  }
  func.func @transform_4(%arg0: i32) -> (i32, i32, i32) {
    %c0_i32 = arith.constant 0 : i32
    %c0_i32_0 = arith.constant 0 : i32
    %c0_i32_1 = arith.constant 0 : i32
    return %arg0, %c0_i32, %c0_i32_0 : i32, i32, i32
  }
  func.func @transform_5(%arg0: i32) -> (i32, i32, i32) {
    %c0_i32 = arith.constant 0 : i32
    %c0_i32_0 = arith.constant 0 : i32
    %c0_i32_1 = arith.constant 0 : i32
    return %arg0, %c0_i32, %c0_i32_0 : i32, i32, i32
  }
}

module attributes {stable_mosaic.version = 11 : i64} {
  func.func @_conv_tap_kernel(%arg0: i32, %arg1: i32, %arg2: memref<1x8x256xbf16, #tpu.memory_space<vmem>>, %arg3: memref<7x8x8xbf16, #tpu.memory_space<vmem>>, %arg4: memref<8x1xf32, #tpu.memory_space<vmem>>, %arg5: memref<1x8x256xbf16, #tpu.memory_space<vmem>>, %arg6: memref<8x432xbf16, #tpu.memory_space<vmem>>) attributes {dimension_semantics = [#tpu.dimension_semantics<parallel>, #tpu.dimension_semantics<arbitrary>], iteration_bounds = array<i64: 2, 1>, scalar_prefetch = 0 : i64, scratch_operands = 1 : i64, tpu.core_type = #tpu.core_type<tc>, window_params = [{transform_indices = @transform_0, window_bounds = array<i64: 1, 8, 256>}, {transform_indices = @transform_1, window_bounds = array<i64: 7, 8, 8>}, {transform_indices = @transform_2, window_bounds = array<i64: 8, 1>}, {transform_indices = @transform_3, window_bounds = array<i64: 1, 8, 256>}]} {
    %c0_i32 = arith.constant 0 : i32
    %0 = arith.cmpi eq, %arg1, %c0_i32 : i32
    %1 = arith.extui %0 : i1 to i32
    %c0_i32_0 = arith.constant 0 : i32
    %2 = arith.cmpi ne, %1, %c0_i32_0 : i32
    scf.if %2 {
      %cst_34 = arith.constant 0.000000e+00 : bf16
      %46 = vector.broadcast %cst_34 : bf16 to vector<8x128xbf16>
      %c0_35 = arith.constant 0 : index
      %c0_36 = arith.constant 0 : index
      %47 = vector.load %arg6[%c0_35, %c0_36] : memref<8x432xbf16, #tpu.memory_space<vmem>>, vector<8x128xbf16>
      tpu.vector_store %arg6[%c0_35, %c0_36], %46 {strides = array<i32>} : memref<8x432xbf16, #tpu.memory_space<vmem>>, vector<8x128xbf16>,
      %cst_37 = arith.constant 0.000000e+00 : bf16
      %48 = vector.broadcast %cst_37 : bf16 to vector<8x48xbf16>
      %c0_38 = arith.constant 0 : index
      %c384 = arith.constant 384 : index
      %49 = vector.load %arg6[%c0_38, %c384] : memref<8x432xbf16, #tpu.memory_space<vmem>>, vector<8x48xbf16>
      tpu.vector_store %arg6[%c0_38, %c384], %48 {strides = array<i32>} : memref<8x432xbf16, #tpu.memory_space<vmem>>, vector<8x48xbf16>,
      %c0_39 = arith.constant 0 : index
      %c0_40 = arith.constant 0 : index
      %c0_41 = arith.constant 0 : index
      %50 = vector.load %arg2[%c0_39, %c0_40, %c0_41] : memref<1x8x256xbf16, #tpu.memory_space<vmem>>, vector<1x8x256xbf16>
      %51 = vector.shape_cast %50 : vector<1x8x256xbf16> to vector<8x256xbf16>
      %c0_42 = arith.constant 0 : index
      %c128_43 = arith.constant 128 : index
      %52 = vector.load %arg6[%c0_42, %c128_43] : memref<8x432xbf16, #tpu.memory_space<vmem>>, vector<8x256xbf16>
      tpu.vector_store %arg6[%c0_42, %c128_43], %51 {strides = array<i32>} : memref<8x432xbf16, #tpu.memory_space<vmem>>, vector<8x256xbf16>,
    } else {
    }
    %c0 = arith.constant 0 : index
    %c80 = arith.constant 80 : index
    %3 = vector.load %arg6[%c0, %c80] : memref<8x432xbf16, #tpu.memory_space<vmem>>, vector<8x256xbf16>
    %c0_1 = arith.constant 0 : index
    %c0_2 = arith.constant 0 : index
    %c0_3 = arith.constant 0 : index
    %4 = vector.load %arg3[%c0_1, %c0_2, %c0_3] : memref<7x8x8xbf16, #tpu.memory_space<vmem>>, vector<1x8x8xbf16>
    %5 = vector.shape_cast %4 : vector<1x8x8xbf16> to vector<8x8xbf16>
    %cst = arith.constant dense<0.000000e+00> : vector<8x256xf32>
    %6 = tpu.matmul %5, %3, %cst {dimension_numbers = #tpu.dot_dimension_numbers<[1], [0], [0], [1], [0, 0, 1, 1], [], []>} : vector<8x8xbf16>, vector<8x256xbf16>, vector<8x256xf32> -> vector<8x256xf32>
    %c0_4 = arith.constant 0 : index
    %c96 = arith.constant 96 : index
    %7 = vector.load %arg6[%c0_4, %c96] : memref<8x432xbf16, #tpu.memory_space<vmem>>, vector<8x256xbf16>
    %c1 = arith.constant 1 : index
    %c0_5 = arith.constant 0 : index
    %c0_6 = arith.constant 0 : index
    %8 = vector.load %arg3[%c1, %c0_5, %c0_6] : memref<7x8x8xbf16, #tpu.memory_space<vmem>>, vector<1x8x8xbf16>
    %9 = vector.shape_cast %8 : vector<1x8x8xbf16> to vector<8x8xbf16>
    %cst_7 = arith.constant dense<0.000000e+00> : vector<8x256xf32>
    %10 = tpu.matmul %9, %7, %cst_7 {dimension_numbers = #tpu.dot_dimension_numbers<[1], [0], [0], [1], [0, 0, 1, 1], [], []>} : vector<8x8xbf16>, vector<8x256xbf16>, vector<8x256xf32> -> vector<8x256xf32>
    %11 = arith.addf %6, %10 : vector<8x256xf32>
    %c0_8 = arith.constant 0 : index
    %c112 = arith.constant 112 : index
    %12 = vector.load %arg6[%c0_8, %c112] : memref<8x432xbf16, #tpu.memory_space<vmem>>, vector<8x256xbf16>
    %c2 = arith.constant 2 : index
    %c0_9 = arith.constant 0 : index
    %c0_10 = arith.constant 0 : index
    %13 = vector.load %arg3[%c2, %c0_9, %c0_10] : memref<7x8x8xbf16, #tpu.memory_space<vmem>>, vector<1x8x8xbf16>
    %14 = vector.shape_cast %13 : vector<1x8x8xbf16> to vector<8x8xbf16>
    %cst_11 = arith.constant dense<0.000000e+00> : vector<8x256xf32>
    %15 = tpu.matmul %14, %12, %cst_11 {dimension_numbers = #tpu.dot_dimension_numbers<[1], [0], [0], [1], [0, 0, 1, 1], [], []>} : vector<8x8xbf16>, vector<8x256xbf16>, vector<8x256xf32> -> vector<8x256xf32>
    %16 = arith.addf %11, %15 : vector<8x256xf32>
    %c0_12 = arith.constant 0 : index
    %c128 = arith.constant 128 : index
    %17 = vector.load %arg6[%c0_12, %c128] : memref<8x432xbf16, #tpu.memory_space<vmem>>, vector<8x256xbf16>
    %c3 = arith.constant 3 : index
    %c0_13 = arith.constant 0 : index
    %c0_14 = arith.constant 0 : index
    %18 = vector.load %arg3[%c3, %c0_13, %c0_14] : memref<7x8x8xbf16, #tpu.memory_space<vmem>>, vector<1x8x8xbf16>
    %19 = vector.shape_cast %18 : vector<1x8x8xbf16> to vector<8x8xbf16>
    %cst_15 = arith.constant dense<0.000000e+00> : vector<8x256xf32>
    %20 = tpu.matmul %19, %17, %cst_15 {dimension_numbers = #tpu.dot_dimension_numbers<[1], [0], [0], [1], [0, 0, 1, 1], [], []>} : vector<8x8xbf16>, vector<8x256xbf16>, vector<8x256xf32> -> vector<8x256xf32>
    %21 = arith.addf %16, %20 : vector<8x256xf32>
    %c0_16 = arith.constant 0 : index
    %c144 = arith.constant 144 : index
    %22 = vector.load %arg6[%c0_16, %c144] : memref<8x432xbf16, #tpu.memory_space<vmem>>, vector<8x256xbf16>
    %c4 = arith.constant 4 : index
    %c0_17 = arith.constant 0 : index
    %c0_18 = arith.constant 0 : index
    %23 = vector.load %arg3[%c4, %c0_17, %c0_18] : memref<7x8x8xbf16, #tpu.memory_space<vmem>>, vector<1x8x8xbf16>
    %24 = vector.shape_cast %23 : vector<1x8x8xbf16> to vector<8x8xbf16>
    %cst_19 = arith.constant dense<0.000000e+00> : vector<8x256xf32>
    %25 = tpu.matmul %24, %22, %cst_19 {dimension_numbers = #tpu.dot_dimension_numbers<[1], [0], [0], [1], [0, 0, 1, 1], [], []>} : vector<8x8xbf16>, vector<8x256xbf16>, vector<8x256xf32> -> vector<8x256xf32>
    %26 = arith.addf %21, %25 : vector<8x256xf32>
    %c0_20 = arith.constant 0 : index
    %c160 = arith.constant 160 : index
    %27 = vector.load %arg6[%c0_20, %c160] : memref<8x432xbf16, #tpu.memory_space<vmem>>, vector<8x256xbf16>
    %c5 = arith.constant 5 : index
    %c0_21 = arith.constant 0 : index
    %c0_22 = arith.constant 0 : index
    %28 = vector.load %arg3[%c5, %c0_21, %c0_22] : memref<7x8x8xbf16, #tpu.memory_space<vmem>>, vector<1x8x8xbf16>
    %29 = vector.shape_cast %28 : vector<1x8x8xbf16> to vector<8x8xbf16>
    %cst_23 = arith.constant dense<0.000000e+00> : vector<8x256xf32>
    %30 = tpu.matmul %29, %27, %cst_23 {dimension_numbers = #tpu.dot_dimension_numbers<[1], [0], [0], [1], [0, 0, 1, 1], [], []>} : vector<8x8xbf16>, vector<8x256xbf16>, vector<8x256xf32> -> vector<8x256xf32>
    %31 = arith.addf %26, %30 : vector<8x256xf32>
    %c0_24 = arith.constant 0 : index
    %c176 = arith.constant 176 : index
    %32 = vector.load %arg6[%c0_24, %c176] : memref<8x432xbf16, #tpu.memory_space<vmem>>, vector<8x256xbf16>
    %c6 = arith.constant 6 : index
    %c0_25 = arith.constant 0 : index
    %c0_26 = arith.constant 0 : index
    %33 = vector.load %arg3[%c6, %c0_25, %c0_26] : memref<7x8x8xbf16, #tpu.memory_space<vmem>>, vector<1x8x8xbf16>
    %34 = vector.shape_cast %33 : vector<1x8x8xbf16> to vector<8x8xbf16>
    %cst_27 = arith.constant dense<0.000000e+00> : vector<8x256xf32>
    %35 = tpu.matmul %34, %32, %cst_27 {dimension_numbers = #tpu.dot_dimension_numbers<[1], [0], [0], [1], [0, 0, 1, 1], [], []>} : vector<8x8xbf16>, vector<8x256xbf16>, vector<8x256xf32> -> vector<8x256xf32>
    %36 = arith.addf %31, %35 : vector<8x256xf32>
    %c0_28 = arith.constant 0 : index
    %c0_29 = arith.constant 0 : index
    %37 = vector.load %arg4[%c0_28, %c0_29] : memref<8x1xf32, #tpu.memory_space<vmem>>, vector<8x1xf32>
    %38 = vector.broadcast %37 : vector<8x1xf32> to vector<8x256xf32>
    %39 = arith.addf %36, %38 : vector<8x256xf32>
    %cst_30 = arith.constant 0.000000e+00 : f32
    %40 = vector.broadcast %cst_30 : f32 to vector<8x256xf32>
    %41 = arith.maximumf %39, %40 : vector<8x256xf32>
    %42 = arith.truncf %41 : vector<8x256xf32> to vector<8x256xbf16>
    %c0_31 = arith.constant 0 : index
    %c0_32 = arith.constant 0 : index
    %c0_33 = arith.constant 0 : index
    %43 = vector.load %arg5[%c0_31, %c0_32, %c0_33] : memref<1x8x256xbf16, #tpu.memory_space<vmem>>, vector<1x8x256xbf16>
    %44 = vector.shape_cast %43 : vector<1x8x256xbf16> to vector<8x256xbf16>
    %45 = vector.shape_cast %42 : vector<8x256xbf16> to vector<1x8x256xbf16>
    tpu.vector_store %arg5[%c0_31, %c0_32, %c0_33], %45 {strides = array<i32>} : memref<1x8x256xbf16, #tpu.memory_space<vmem>>, vector<1x8x256xbf16>,
    return
  }
  func.func @transform_0(%arg0: i32, %arg1: i32) -> (i32, i32, i32) {
    %c0_i32 = arith.constant 0 : i32
    %c0_i32_0 = arith.constant 0 : i32
    %c0_i32_1 = arith.constant 0 : i32
    return %arg0, %c0_i32, %c0_i32_0 : i32, i32, i32
  }
  func.func @transform_1(%arg0: i32, %arg1: i32) -> (i32, i32, i32) {
    %c0_i32 = arith.constant 0 : i32
    %c0_i32_0 = arith.constant 0 : i32
    %c0_i32_1 = arith.constant 0 : i32
    return %c0_i32, %arg1, %c0_i32_0 : i32, i32, i32
  }
  func.func @transform_2(%arg0: i32, %arg1: i32) -> (i32, i32) {
    %c0_i32 = arith.constant 0 : i32
    %c0_i32_0 = arith.constant 0 : i32
    return %arg1, %c0_i32 : i32, i32
  }
  func.func @transform_3(%arg0: i32, %arg1: i32) -> (i32, i32, i32) {
    %c0_i32 = arith.constant 0 : i32
    %c0_i32_0 = arith.constant 0 : i32
    return %arg0, %arg1, %c0_i32 : i32, i32, i32
  }
}

module attributes {stable_mosaic.version = 11 : i64} {
  func.func @_conv_tap_kernel(%arg0: i32, %arg1: i32, %arg2: memref<1x8x256xbf16, #tpu.memory_space<vmem>>, %arg3: memref<7x8x8xbf16, #tpu.memory_space<vmem>>, %arg4: memref<8x1xf32, #tpu.memory_space<vmem>>, %arg5: memref<7x256xbf16, #tpu.memory_space<vmem>>, %arg6: memref<1x8x256xbf16, #tpu.memory_space<vmem>>, %arg7: memref<8x387xbf16, #tpu.memory_space<vmem>>) attributes {dimension_semantics = [#tpu.dimension_semantics<parallel>, #tpu.dimension_semantics<arbitrary>], iteration_bounds = array<i64: 2, 1>, scalar_prefetch = 0 : i64, scratch_operands = 1 : i64, tpu.core_type = #tpu.core_type<tc>, window_params = [{transform_indices = @transform_0, window_bounds = array<i64: 1, 8, 256>}, {transform_indices = @transform_1, window_bounds = array<i64: 7, 8, 8>}, {transform_indices = @transform_2, window_bounds = array<i64: 8, 1>}, {pipeline_mode = #tpu.pipeline_mode<synchronous>, transform_indices = @transform_3, window_bounds = array<i64: 7, 256>}, {transform_indices = @transform_4, window_bounds = array<i64: 1, 8, 256>}]} {
    %c0_i32 = arith.constant 0 : i32
    %0 = arith.cmpi eq, %arg1, %c0_i32 : i32
    %1 = arith.extui %0 : i1 to i32
    %c0_i32_0 = arith.constant 0 : i32
    %2 = arith.cmpi ne, %1, %c0_i32_0 : i32
    scf.if %2 {
      %cst_46 = arith.constant 0.000000e+00 : bf16
      %64 = vector.broadcast %cst_46 : bf16 to vector<8x128xbf16>
      %c0_47 = arith.constant 0 : index
      %c0_48 = arith.constant 0 : index
      %65 = vector.load %arg7[%c0_47, %c0_48] : memref<8x387xbf16, #tpu.memory_space<vmem>>, vector<8x128xbf16>
      tpu.vector_store %arg7[%c0_47, %c0_48], %64 {strides = array<i32>} : memref<8x387xbf16, #tpu.memory_space<vmem>>, vector<8x128xbf16>,
      %cst_49 = arith.constant 0.000000e+00 : bf16
      %66 = vector.broadcast %cst_49 : bf16 to vector<8x3xbf16>
      %c0_50 = arith.constant 0 : index
      %c384 = arith.constant 384 : index
      %67 = vector.load %arg7[%c0_50, %c384] : memref<8x387xbf16, #tpu.memory_space<vmem>>, vector<8x3xbf16>
      tpu.vector_store %arg7[%c0_50, %c384], %66 {strides = array<i32>} : memref<8x387xbf16, #tpu.memory_space<vmem>>, vector<8x3xbf16>,
      %c0_51 = arith.constant 0 : index
      %c0_52 = arith.constant 0 : index
      %c0_53 = arith.constant 0 : index
      %68 = vector.load %arg2[%c0_51, %c0_52, %c0_53] : memref<1x8x256xbf16, #tpu.memory_space<vmem>>, vector<1x8x256xbf16>
      %69 = vector.shape_cast %68 : vector<1x8x256xbf16> to vector<8x256xbf16>
      %c0_54 = arith.constant 0 : index
      %c128_55 = arith.constant 128 : index
      %70 = vector.load %arg7[%c0_54, %c128_55] : memref<8x387xbf16, #tpu.memory_space<vmem>>, vector<8x256xbf16>
      tpu.vector_store %arg7[%c0_54, %c128_55], %69 {strides = array<i32>} : memref<8x387xbf16, #tpu.memory_space<vmem>>, vector<8x256xbf16>,
    } else {
    }
    %c0 = arith.constant 0 : index
    %c125 = arith.constant 125 : index
    %3 = vector.load %arg7[%c0, %c125] : memref<8x387xbf16, #tpu.memory_space<vmem>>, vector<8x256xbf16>
    %c0_1 = arith.constant 0 : index
    %c0_2 = arith.constant 0 : index
    %4 = vector.load %arg5[%c0_1, %c0_2] : memref<7x256xbf16, #tpu.memory_space<vmem>>, vector<1x256xbf16>
    %5 = vector.broadcast %4 : vector<1x256xbf16> to vector<8x256xbf16>
    %6 = arith.mulf %3, %5 : vector<8x256xbf16>
    %c0_3 = arith.constant 0 : index
    %c0_4 = arith.constant 0 : index
    %c0_5 = arith.constant 0 : index
    %7 = vector.load %arg3[%c0_3, %c0_4, %c0_5] : memref<7x8x8xbf16, #tpu.memory_space<vmem>>, vector<1x8x8xbf16>
    %8 = vector.shape_cast %7 : vector<1x8x8xbf16> to vector<8x8xbf16>
    %cst = arith.constant dense<0.000000e+00> : vector<8x256xf32>
    %9 = tpu.matmul %8, %6, %cst {dimension_numbers = #tpu.dot_dimension_numbers<[1], [0], [0], [1], [0, 0, 1, 1], [], []>} : vector<8x8xbf16>, vector<8x256xbf16>, vector<8x256xf32> -> vector<8x256xf32>
    %c0_6 = arith.constant 0 : index
    %c126 = arith.constant 126 : index
    %10 = vector.load %arg7[%c0_6, %c126] : memref<8x387xbf16, #tpu.memory_space<vmem>>, vector<8x256xbf16>
    %c1 = arith.constant 1 : index
    %c0_7 = arith.constant 0 : index
    %11 = vector.load %arg5[%c1, %c0_7] : memref<7x256xbf16, #tpu.memory_space<vmem>>, vector<1x256xbf16>
    %12 = vector.broadcast %11 : vector<1x256xbf16> to vector<8x256xbf16>
    %13 = arith.mulf %10, %12 : vector<8x256xbf16>
    %c1_8 = arith.constant 1 : index
    %c0_9 = arith.constant 0 : index
    %c0_10 = arith.constant 0 : index
    %14 = vector.load %arg3[%c1_8, %c0_9, %c0_10] : memref<7x8x8xbf16, #tpu.memory_space<vmem>>, vector<1x8x8xbf16>
    %15 = vector.shape_cast %14 : vector<1x8x8xbf16> to vector<8x8xbf16>
    %cst_11 = arith.constant dense<0.000000e+00> : vector<8x256xf32>
    %16 = tpu.matmul %15, %13, %cst_11 {dimension_numbers = #tpu.dot_dimension_numbers<[1], [0], [0], [1], [0, 0, 1, 1], [], []>} : vector<8x8xbf16>, vector<8x256xbf16>, vector<8x256xf32> -> vector<8x256xf32>
    %17 = arith.addf %9, %16 : vector<8x256xf32>
    %c0_12 = arith.constant 0 : index
    %c127 = arith.constant 127 : index
    %18 = vector.load %arg7[%c0_12, %c127] : memref<8x387xbf16, #tpu.memory_space<vmem>>, vector<8x256xbf16>
    %c2 = arith.constant 2 : index
    %c0_13 = arith.constant 0 : index
    %19 = vector.load %arg5[%c2, %c0_13] : memref<7x256xbf16, #tpu.memory_space<vmem>>, vector<1x256xbf16>
    %20 = vector.broadcast %19 : vector<1x256xbf16> to vector<8x256xbf16>
    %21 = arith.mulf %18, %20 : vector<8x256xbf16>
    %c2_14 = arith.constant 2 : index
    %c0_15 = arith.constant 0 : index
    %c0_16 = arith.constant 0 : index
    %22 = vector.load %arg3[%c2_14, %c0_15, %c0_16] : memref<7x8x8xbf16, #tpu.memory_space<vmem>>, vector<1x8x8xbf16>
    %23 = vector.shape_cast %22 : vector<1x8x8xbf16> to vector<8x8xbf16>
    %cst_17 = arith.constant dense<0.000000e+00> : vector<8x256xf32>
    %24 = tpu.matmul %23, %21, %cst_17 {dimension_numbers = #tpu.dot_dimension_numbers<[1], [0], [0], [1], [0, 0, 1, 1], [], []>} : vector<8x8xbf16>, vector<8x256xbf16>, vector<8x256xf32> -> vector<8x256xf32>
    %25 = arith.addf %17, %24 : vector<8x256xf32>
    %c0_18 = arith.constant 0 : index
    %c128 = arith.constant 128 : index
    %26 = vector.load %arg7[%c0_18, %c128] : memref<8x387xbf16, #tpu.memory_space<vmem>>, vector<8x256xbf16>
    %c3 = arith.constant 3 : index
    %c0_19 = arith.constant 0 : index
    %c0_20 = arith.constant 0 : index
    %27 = vector.load %arg3[%c3, %c0_19, %c0_20] : memref<7x8x8xbf16, #tpu.memory_space<vmem>>, vector<1x8x8xbf16>
    %28 = vector.shape_cast %27 : vector<1x8x8xbf16> to vector<8x8xbf16>
    %cst_21 = arith.constant dense<0.000000e+00> : vector<8x256xf32>
    %29 = tpu.matmul %28, %26, %cst_21 {dimension_numbers = #tpu.dot_dimension_numbers<[1], [0], [0], [1], [0, 0, 1, 1], [], []>} : vector<8x8xbf16>, vector<8x256xbf16>, vector<8x256xf32> -> vector<8x256xf32>
    %30 = arith.addf %25, %29 : vector<8x256xf32>
    %c0_22 = arith.constant 0 : index
    %c129 = arith.constant 129 : index
    %31 = vector.load %arg7[%c0_22, %c129] : memref<8x387xbf16, #tpu.memory_space<vmem>>, vector<8x256xbf16>
    %c4 = arith.constant 4 : index
    %c0_23 = arith.constant 0 : index
    %32 = vector.load %arg5[%c4, %c0_23] : memref<7x256xbf16, #tpu.memory_space<vmem>>, vector<1x256xbf16>
    %33 = vector.broadcast %32 : vector<1x256xbf16> to vector<8x256xbf16>
    %34 = arith.mulf %31, %33 : vector<8x256xbf16>
    %c4_24 = arith.constant 4 : index
    %c0_25 = arith.constant 0 : index
    %c0_26 = arith.constant 0 : index
    %35 = vector.load %arg3[%c4_24, %c0_25, %c0_26] : memref<7x8x8xbf16, #tpu.memory_space<vmem>>, vector<1x8x8xbf16>
    %36 = vector.shape_cast %35 : vector<1x8x8xbf16> to vector<8x8xbf16>
    %cst_27 = arith.constant dense<0.000000e+00> : vector<8x256xf32>
    %37 = tpu.matmul %36, %34, %cst_27 {dimension_numbers = #tpu.dot_dimension_numbers<[1], [0], [0], [1], [0, 0, 1, 1], [], []>} : vector<8x8xbf16>, vector<8x256xbf16>, vector<8x256xf32> -> vector<8x256xf32>
    %38 = arith.addf %30, %37 : vector<8x256xf32>
    %c0_28 = arith.constant 0 : index
    %c130 = arith.constant 130 : index
    %39 = vector.load %arg7[%c0_28, %c130] : memref<8x387xbf16, #tpu.memory_space<vmem>>, vector<8x256xbf16>
    %c5 = arith.constant 5 : index
    %c0_29 = arith.constant 0 : index
    %40 = vector.load %arg5[%c5, %c0_29] : memref<7x256xbf16, #tpu.memory_space<vmem>>, vector<1x256xbf16>
    %41 = vector.broadcast %40 : vector<1x256xbf16> to vector<8x256xbf16>
    %42 = arith.mulf %39, %41 : vector<8x256xbf16>
    %c5_30 = arith.constant 5 : index
    %c0_31 = arith.constant 0 : index
    %c0_32 = arith.constant 0 : index
    %43 = vector.load %arg3[%c5_30, %c0_31, %c0_32] : memref<7x8x8xbf16, #tpu.memory_space<vmem>>, vector<1x8x8xbf16>
    %44 = vector.shape_cast %43 : vector<1x8x8xbf16> to vector<8x8xbf16>
    %cst_33 = arith.constant dense<0.000000e+00> : vector<8x256xf32>
    %45 = tpu.matmul %44, %42, %cst_33 {dimension_numbers = #tpu.dot_dimension_numbers<[1], [0], [0], [1], [0, 0, 1, 1], [], []>} : vector<8x8xbf16>, vector<8x256xbf16>, vector<8x256xf32> -> vector<8x256xf32>
    %46 = arith.addf %38, %45 : vector<8x256xf32>
    %c0_34 = arith.constant 0 : index
    %c131 = arith.constant 131 : index
    %47 = vector.load %arg7[%c0_34, %c131] : memref<8x387xbf16, #tpu.memory_space<vmem>>, vector<8x256xbf16>
    %c6 = arith.constant 6 : index
    %c0_35 = arith.constant 0 : index
    %48 = vector.load %arg5[%c6, %c0_35] : memref<7x256xbf16, #tpu.memory_space<vmem>>, vector<1x256xbf16>
    %49 = vector.broadcast %48 : vector<1x256xbf16> to vector<8x256xbf16>
    %50 = arith.mulf %47, %49 : vector<8x256xbf16>
    %c6_36 = arith.constant 6 : index
    %c0_37 = arith.constant 0 : index
    %c0_38 = arith.constant 0 : index
    %51 = vector.load %arg3[%c6_36, %c0_37, %c0_38] : memref<7x8x8xbf16, #tpu.memory_space<vmem>>, vector<1x8x8xbf16>
    %52 = vector.shape_cast %51 : vector<1x8x8xbf16> to vector<8x8xbf16>
    %cst_39 = arith.constant dense<0.000000e+00> : vector<8x256xf32>
    %53 = tpu.matmul %52, %50, %cst_39 {dimension_numbers = #tpu.dot_dimension_numbers<[1], [0], [0], [1], [0, 0, 1, 1], [], []>} : vector<8x8xbf16>, vector<8x256xbf16>, vector<8x256xf32> -> vector<8x256xf32>
    %54 = arith.addf %46, %53 : vector<8x256xf32>
    %c0_40 = arith.constant 0 : index
    %c0_41 = arith.constant 0 : index
    %55 = vector.load %arg4[%c0_40, %c0_41] : memref<8x1xf32, #tpu.memory_space<vmem>>, vector<8x1xf32>
    %56 = vector.broadcast %55 : vector<8x1xf32> to vector<8x256xf32>
    %57 = arith.addf %54, %56 : vector<8x256xf32>
    %cst_42 = arith.constant 0.000000e+00 : f32
    %58 = vector.broadcast %cst_42 : f32 to vector<8x256xf32>
    %59 = arith.maximumf %57, %58 : vector<8x256xf32>
    %60 = arith.truncf %59 : vector<8x256xf32> to vector<8x256xbf16>
    %c0_43 = arith.constant 0 : index
    %c0_44 = arith.constant 0 : index
    %c0_45 = arith.constant 0 : index
    %61 = vector.load %arg6[%c0_43, %c0_44, %c0_45] : memref<1x8x256xbf16, #tpu.memory_space<vmem>>, vector<1x8x256xbf16>
    %62 = vector.shape_cast %61 : vector<1x8x256xbf16> to vector<8x256xbf16>
    %63 = vector.shape_cast %60 : vector<8x256xbf16> to vector<1x8x256xbf16>
    tpu.vector_store %arg6[%c0_43, %c0_44, %c0_45], %63 {strides = array<i32>} : memref<1x8x256xbf16, #tpu.memory_space<vmem>>, vector<1x8x256xbf16>,
    return
  }
  func.func @transform_0(%arg0: i32, %arg1: i32) -> (i32, i32, i32) {
    %c0_i32 = arith.constant 0 : i32
    %c0_i32_0 = arith.constant 0 : i32
    %c0_i32_1 = arith.constant 0 : i32
    return %arg0, %c0_i32, %c0_i32_0 : i32, i32, i32
  }
  func.func @transform_1(%arg0: i32, %arg1: i32) -> (i32, i32, i32) {
    %c0_i32 = arith.constant 0 : i32
    %c0_i32_0 = arith.constant 0 : i32
    %c0_i32_1 = arith.constant 0 : i32
    return %c0_i32, %arg1, %c0_i32_0 : i32, i32, i32
  }
  func.func @transform_2(%arg0: i32, %arg1: i32) -> (i32, i32) {
    %c0_i32 = arith.constant 0 : i32
    %c0_i32_0 = arith.constant 0 : i32
    return %arg1, %c0_i32 : i32, i32
  }
  func.func @transform_3(%arg0: i32, %arg1: i32) -> (i32, i32) {
    %c0_i32 = arith.constant 0 : i32
    %c0_i32_0 = arith.constant 0 : i32
    %c0_i32_1 = arith.constant 0 : i32
    return %c0_i32, %c0_i32_0 : i32, i32
  }
  func.func @transform_4(%arg0: i32, %arg1: i32) -> (i32, i32, i32) {
    %c0_i32 = arith.constant 0 : i32
    %c0_i32_0 = arith.constant 0 : i32
    return %arg0, %arg1, %c0_i32 : i32, i32, i32
  }
}

module attributes {stable_mosaic.version = 11 : i64} {
  func.func @_conv_tap_kernel(%arg0: i32, %arg1: i32, %arg2: memref<1x8x256xbf16, #tpu.memory_space<vmem>>, %arg3: memref<7x192x8xbf16, #tpu.memory_space<vmem>>, %arg4: memref<192x1xf32, #tpu.memory_space<vmem>>, %arg5: memref<1x192x256xf32, #tpu.memory_space<vmem>>, %arg6: memref<8x432xbf16, #tpu.memory_space<vmem>>) attributes {dimension_semantics = [#tpu.dimension_semantics<parallel>, #tpu.dimension_semantics<arbitrary>], iteration_bounds = array<i64: 2, 1>, scalar_prefetch = 0 : i64, scratch_operands = 1 : i64, tpu.core_type = #tpu.core_type<tc>, window_params = [{transform_indices = @transform_0, window_bounds = array<i64: 1, 8, 256>}, {transform_indices = @transform_1, window_bounds = array<i64: 7, 192, 8>}, {transform_indices = @transform_2, window_bounds = array<i64: 192, 1>}, {transform_indices = @transform_3, window_bounds = array<i64: 1, 192, 256>}]} {
    %c0_i32 = arith.constant 0 : i32
    %0 = arith.cmpi eq, %arg1, %c0_i32 : i32
    %1 = arith.extui %0 : i1 to i32
    %c0_i32_0 = arith.constant 0 : i32
    %2 = arith.cmpi ne, %1, %c0_i32_0 : i32
    scf.if %2 {
      %cst_34 = arith.constant 0.000000e+00 : bf16
      %45 = vector.broadcast %cst_34 : bf16 to vector<8x128xbf16>
      %c0_35 = arith.constant 0 : index
      %c0_36 = arith.constant 0 : index
      %46 = vector.load %arg6[%c0_35, %c0_36] : memref<8x432xbf16, #tpu.memory_space<vmem>>, vector<8x128xbf16>
      tpu.vector_store %arg6[%c0_35, %c0_36], %45 {strides = array<i32>} : memref<8x432xbf16, #tpu.memory_space<vmem>>, vector<8x128xbf16>,
      %cst_37 = arith.constant 0.000000e+00 : bf16
      %47 = vector.broadcast %cst_37 : bf16 to vector<8x48xbf16>
      %c0_38 = arith.constant 0 : index
      %c384 = arith.constant 384 : index
      %48 = vector.load %arg6[%c0_38, %c384] : memref<8x432xbf16, #tpu.memory_space<vmem>>, vector<8x48xbf16>
      tpu.vector_store %arg6[%c0_38, %c384], %47 {strides = array<i32>} : memref<8x432xbf16, #tpu.memory_space<vmem>>, vector<8x48xbf16>,
      %c0_39 = arith.constant 0 : index
      %c0_40 = arith.constant 0 : index
      %c0_41 = arith.constant 0 : index
      %49 = vector.load %arg2[%c0_39, %c0_40, %c0_41] : memref<1x8x256xbf16, #tpu.memory_space<vmem>>, vector<1x8x256xbf16>
      %50 = vector.shape_cast %49 : vector<1x8x256xbf16> to vector<8x256xbf16>
      %c0_42 = arith.constant 0 : index
      %c128_43 = arith.constant 128 : index
      %51 = vector.load %arg6[%c0_42, %c128_43] : memref<8x432xbf16, #tpu.memory_space<vmem>>, vector<8x256xbf16>
      tpu.vector_store %arg6[%c0_42, %c128_43], %50 {strides = array<i32>} : memref<8x432xbf16, #tpu.memory_space<vmem>>, vector<8x256xbf16>,
    } else {
    }
    %c0 = arith.constant 0 : index
    %c80 = arith.constant 80 : index
    %3 = vector.load %arg6[%c0, %c80] : memref<8x432xbf16, #tpu.memory_space<vmem>>, vector<8x256xbf16>
    %c0_1 = arith.constant 0 : index
    %c0_2 = arith.constant 0 : index
    %c0_3 = arith.constant 0 : index
    %4 = vector.load %arg3[%c0_1, %c0_2, %c0_3] : memref<7x192x8xbf16, #tpu.memory_space<vmem>>, vector<1x192x8xbf16>
    %5 = vector.shape_cast %4 : vector<1x192x8xbf16> to vector<192x8xbf16>
    %cst = arith.constant dense<0.000000e+00> : vector<192x256xf32>
    %6 = tpu.matmul %5, %3, %cst {dimension_numbers = #tpu.dot_dimension_numbers<[1], [0], [0], [1], [0, 0, 1, 1], [], []>} : vector<192x8xbf16>, vector<8x256xbf16>, vector<192x256xf32> -> vector<192x256xf32>
    %c0_4 = arith.constant 0 : index
    %c96 = arith.constant 96 : index
    %7 = vector.load %arg6[%c0_4, %c96] : memref<8x432xbf16, #tpu.memory_space<vmem>>, vector<8x256xbf16>
    %c1 = arith.constant 1 : index
    %c0_5 = arith.constant 0 : index
    %c0_6 = arith.constant 0 : index
    %8 = vector.load %arg3[%c1, %c0_5, %c0_6] : memref<7x192x8xbf16, #tpu.memory_space<vmem>>, vector<1x192x8xbf16>
    %9 = vector.shape_cast %8 : vector<1x192x8xbf16> to vector<192x8xbf16>
    %cst_7 = arith.constant dense<0.000000e+00> : vector<192x256xf32>
    %10 = tpu.matmul %9, %7, %cst_7 {dimension_numbers = #tpu.dot_dimension_numbers<[1], [0], [0], [1], [0, 0, 1, 1], [], []>} : vector<192x8xbf16>, vector<8x256xbf16>, vector<192x256xf32> -> vector<192x256xf32>
    %11 = arith.addf %6, %10 : vector<192x256xf32>
    %c0_8 = arith.constant 0 : index
    %c112 = arith.constant 112 : index
    %12 = vector.load %arg6[%c0_8, %c112] : memref<8x432xbf16, #tpu.memory_space<vmem>>, vector<8x256xbf16>
    %c2 = arith.constant 2 : index
    %c0_9 = arith.constant 0 : index
    %c0_10 = arith.constant 0 : index
    %13 = vector.load %arg3[%c2, %c0_9, %c0_10] : memref<7x192x8xbf16, #tpu.memory_space<vmem>>, vector<1x192x8xbf16>
    %14 = vector.shape_cast %13 : vector<1x192x8xbf16> to vector<192x8xbf16>
    %cst_11 = arith.constant dense<0.000000e+00> : vector<192x256xf32>
    %15 = tpu.matmul %14, %12, %cst_11 {dimension_numbers = #tpu.dot_dimension_numbers<[1], [0], [0], [1], [0, 0, 1, 1], [], []>} : vector<192x8xbf16>, vector<8x256xbf16>, vector<192x256xf32> -> vector<192x256xf32>
    %16 = arith.addf %11, %15 : vector<192x256xf32>
    %c0_12 = arith.constant 0 : index
    %c128 = arith.constant 128 : index
    %17 = vector.load %arg6[%c0_12, %c128] : memref<8x432xbf16, #tpu.memory_space<vmem>>, vector<8x256xbf16>
    %c3 = arith.constant 3 : index
    %c0_13 = arith.constant 0 : index
    %c0_14 = arith.constant 0 : index
    %18 = vector.load %arg3[%c3, %c0_13, %c0_14] : memref<7x192x8xbf16, #tpu.memory_space<vmem>>, vector<1x192x8xbf16>
    %19 = vector.shape_cast %18 : vector<1x192x8xbf16> to vector<192x8xbf16>
    %cst_15 = arith.constant dense<0.000000e+00> : vector<192x256xf32>
    %20 = tpu.matmul %19, %17, %cst_15 {dimension_numbers = #tpu.dot_dimension_numbers<[1], [0], [0], [1], [0, 0, 1, 1], [], []>} : vector<192x8xbf16>, vector<8x256xbf16>, vector<192x256xf32> -> vector<192x256xf32>
    %21 = arith.addf %16, %20 : vector<192x256xf32>
    %c0_16 = arith.constant 0 : index
    %c144 = arith.constant 144 : index
    %22 = vector.load %arg6[%c0_16, %c144] : memref<8x432xbf16, #tpu.memory_space<vmem>>, vector<8x256xbf16>
    %c4 = arith.constant 4 : index
    %c0_17 = arith.constant 0 : index
    %c0_18 = arith.constant 0 : index
    %23 = vector.load %arg3[%c4, %c0_17, %c0_18] : memref<7x192x8xbf16, #tpu.memory_space<vmem>>, vector<1x192x8xbf16>
    %24 = vector.shape_cast %23 : vector<1x192x8xbf16> to vector<192x8xbf16>
    %cst_19 = arith.constant dense<0.000000e+00> : vector<192x256xf32>
    %25 = tpu.matmul %24, %22, %cst_19 {dimension_numbers = #tpu.dot_dimension_numbers<[1], [0], [0], [1], [0, 0, 1, 1], [], []>} : vector<192x8xbf16>, vector<8x256xbf16>, vector<192x256xf32> -> vector<192x256xf32>
    %26 = arith.addf %21, %25 : vector<192x256xf32>
    %c0_20 = arith.constant 0 : index
    %c160 = arith.constant 160 : index
    %27 = vector.load %arg6[%c0_20, %c160] : memref<8x432xbf16, #tpu.memory_space<vmem>>, vector<8x256xbf16>
    %c5 = arith.constant 5 : index
    %c0_21 = arith.constant 0 : index
    %c0_22 = arith.constant 0 : index
    %28 = vector.load %arg3[%c5, %c0_21, %c0_22] : memref<7x192x8xbf16, #tpu.memory_space<vmem>>, vector<1x192x8xbf16>
    %29 = vector.shape_cast %28 : vector<1x192x8xbf16> to vector<192x8xbf16>
    %cst_23 = arith.constant dense<0.000000e+00> : vector<192x256xf32>
    %30 = tpu.matmul %29, %27, %cst_23 {dimension_numbers = #tpu.dot_dimension_numbers<[1], [0], [0], [1], [0, 0, 1, 1], [], []>} : vector<192x8xbf16>, vector<8x256xbf16>, vector<192x256xf32> -> vector<192x256xf32>
    %31 = arith.addf %26, %30 : vector<192x256xf32>
    %c0_24 = arith.constant 0 : index
    %c176 = arith.constant 176 : index
    %32 = vector.load %arg6[%c0_24, %c176] : memref<8x432xbf16, #tpu.memory_space<vmem>>, vector<8x256xbf16>
    %c6 = arith.constant 6 : index
    %c0_25 = arith.constant 0 : index
    %c0_26 = arith.constant 0 : index
    %33 = vector.load %arg3[%c6, %c0_25, %c0_26] : memref<7x192x8xbf16, #tpu.memory_space<vmem>>, vector<1x192x8xbf16>
    %34 = vector.shape_cast %33 : vector<1x192x8xbf16> to vector<192x8xbf16>
    %cst_27 = arith.constant dense<0.000000e+00> : vector<192x256xf32>
    %35 = tpu.matmul %34, %32, %cst_27 {dimension_numbers = #tpu.dot_dimension_numbers<[1], [0], [0], [1], [0, 0, 1, 1], [], []>} : vector<192x8xbf16>, vector<8x256xbf16>, vector<192x256xf32> -> vector<192x256xf32>
    %36 = arith.addf %31, %35 : vector<192x256xf32>
    %c0_28 = arith.constant 0 : index
    %c0_29 = arith.constant 0 : index
    %37 = vector.load %arg4[%c0_28, %c0_29] : memref<192x1xf32, #tpu.memory_space<vmem>>, vector<192x1xf32>
    %38 = vector.broadcast %37 : vector<192x1xf32> to vector<192x256xf32>
    %39 = arith.addf %36, %38 : vector<192x256xf32>
    %cst_30 = arith.constant 0.000000e+00 : f32
    %40 = vector.broadcast %cst_30 : f32 to vector<192x256xf32>
    %41 = arith.maximumf %39, %40 : vector<192x256xf32>
    %c0_31 = arith.constant 0 : index
    %c0_32 = arith.constant 0 : index
    %c0_33 = arith.constant 0 : index
    %42 = vector.load %arg5[%c0_31, %c0_32, %c0_33] : memref<1x192x256xf32, #tpu.memory_space<vmem>>, vector<1x192x256xf32>
    %43 = vector.shape_cast %42 : vector<1x192x256xf32> to vector<192x256xf32>
    %44 = vector.shape_cast %41 : vector<192x256xf32> to vector<1x192x256xf32>
    tpu.vector_store %arg5[%c0_31, %c0_32, %c0_33], %44 {strides = array<i32>} : memref<1x192x256xf32, #tpu.memory_space<vmem>>, vector<1x192x256xf32>,
    return
  }
  func.func @transform_0(%arg0: i32, %arg1: i32) -> (i32, i32, i32) {
    %c0_i32 = arith.constant 0 : i32
    %c0_i32_0 = arith.constant 0 : i32
    %c0_i32_1 = arith.constant 0 : i32
    return %arg0, %c0_i32, %c0_i32_0 : i32, i32, i32
  }
  func.func @transform_1(%arg0: i32, %arg1: i32) -> (i32, i32, i32) {
    %c0_i32 = arith.constant 0 : i32
    %c0_i32_0 = arith.constant 0 : i32
    %c0_i32_1 = arith.constant 0 : i32
    return %c0_i32, %arg1, %c0_i32_0 : i32, i32, i32
  }
  func.func @transform_2(%arg0: i32, %arg1: i32) -> (i32, i32) {
    %c0_i32 = arith.constant 0 : i32
    %c0_i32_0 = arith.constant 0 : i32
    return %arg1, %c0_i32 : i32, i32
  }
  func.func @transform_3(%arg0: i32, %arg1: i32) -> (i32, i32, i32) {
    %c0_i32 = arith.constant 0 : i32
    %c0_i32_0 = arith.constant 0 : i32
    return %arg0, %arg1, %c0_i32 : i32, i32, i32
  }
}

module attributes {stable_mosaic.version = 11 : i64} {
  func.func @_conv_tap_kernel(%arg0: i32, %arg1: i32, %arg2: memref<1x8x256xbf16, #tpu.memory_space<vmem>>, %arg3: memref<7x192x8xbf16, #tpu.memory_space<vmem>>, %arg4: memref<192x1xf32, #tpu.memory_space<vmem>>, %arg5: memref<7x256xbf16, #tpu.memory_space<vmem>>, %arg6: memref<1x192x256xf32, #tpu.memory_space<vmem>>, %arg7: memref<8x387xbf16, #tpu.memory_space<vmem>>) attributes {dimension_semantics = [#tpu.dimension_semantics<parallel>, #tpu.dimension_semantics<arbitrary>], iteration_bounds = array<i64: 2, 1>, scalar_prefetch = 0 : i64, scratch_operands = 1 : i64, tpu.core_type = #tpu.core_type<tc>, window_params = [{transform_indices = @transform_0, window_bounds = array<i64: 1, 8, 256>}, {transform_indices = @transform_1, window_bounds = array<i64: 7, 192, 8>}, {transform_indices = @transform_2, window_bounds = array<i64: 192, 1>}, {pipeline_mode = #tpu.pipeline_mode<synchronous>, transform_indices = @transform_3, window_bounds = array<i64: 7, 256>}, {transform_indices = @transform_4, window_bounds = array<i64: 1, 192, 256>}]} {
    %c0_i32 = arith.constant 0 : i32
    %0 = arith.cmpi eq, %arg1, %c0_i32 : i32
    %1 = arith.extui %0 : i1 to i32
    %c0_i32_0 = arith.constant 0 : i32
    %2 = arith.cmpi ne, %1, %c0_i32_0 : i32
    scf.if %2 {
      %cst_46 = arith.constant 0.000000e+00 : bf16
      %63 = vector.broadcast %cst_46 : bf16 to vector<8x128xbf16>
      %c0_47 = arith.constant 0 : index
      %c0_48 = arith.constant 0 : index
      %64 = vector.load %arg7[%c0_47, %c0_48] : memref<8x387xbf16, #tpu.memory_space<vmem>>, vector<8x128xbf16>
      tpu.vector_store %arg7[%c0_47, %c0_48], %63 {strides = array<i32>} : memref<8x387xbf16, #tpu.memory_space<vmem>>, vector<8x128xbf16>,
      %cst_49 = arith.constant 0.000000e+00 : bf16
      %65 = vector.broadcast %cst_49 : bf16 to vector<8x3xbf16>
      %c0_50 = arith.constant 0 : index
      %c384 = arith.constant 384 : index
      %66 = vector.load %arg7[%c0_50, %c384] : memref<8x387xbf16, #tpu.memory_space<vmem>>, vector<8x3xbf16>
      tpu.vector_store %arg7[%c0_50, %c384], %65 {strides = array<i32>} : memref<8x387xbf16, #tpu.memory_space<vmem>>, vector<8x3xbf16>,
      %c0_51 = arith.constant 0 : index
      %c0_52 = arith.constant 0 : index
      %c0_53 = arith.constant 0 : index
      %67 = vector.load %arg2[%c0_51, %c0_52, %c0_53] : memref<1x8x256xbf16, #tpu.memory_space<vmem>>, vector<1x8x256xbf16>
      %68 = vector.shape_cast %67 : vector<1x8x256xbf16> to vector<8x256xbf16>
      %c0_54 = arith.constant 0 : index
      %c128_55 = arith.constant 128 : index
      %69 = vector.load %arg7[%c0_54, %c128_55] : memref<8x387xbf16, #tpu.memory_space<vmem>>, vector<8x256xbf16>
      tpu.vector_store %arg7[%c0_54, %c128_55], %68 {strides = array<i32>} : memref<8x387xbf16, #tpu.memory_space<vmem>>, vector<8x256xbf16>,
    } else {
    }
    %c0 = arith.constant 0 : index
    %c125 = arith.constant 125 : index
    %3 = vector.load %arg7[%c0, %c125] : memref<8x387xbf16, #tpu.memory_space<vmem>>, vector<8x256xbf16>
    %c0_1 = arith.constant 0 : index
    %c0_2 = arith.constant 0 : index
    %4 = vector.load %arg5[%c0_1, %c0_2] : memref<7x256xbf16, #tpu.memory_space<vmem>>, vector<1x256xbf16>
    %5 = vector.broadcast %4 : vector<1x256xbf16> to vector<8x256xbf16>
    %6 = arith.mulf %3, %5 : vector<8x256xbf16>
    %c0_3 = arith.constant 0 : index
    %c0_4 = arith.constant 0 : index
    %c0_5 = arith.constant 0 : index
    %7 = vector.load %arg3[%c0_3, %c0_4, %c0_5] : memref<7x192x8xbf16, #tpu.memory_space<vmem>>, vector<1x192x8xbf16>
    %8 = vector.shape_cast %7 : vector<1x192x8xbf16> to vector<192x8xbf16>
    %cst = arith.constant dense<0.000000e+00> : vector<192x256xf32>
    %9 = tpu.matmul %8, %6, %cst {dimension_numbers = #tpu.dot_dimension_numbers<[1], [0], [0], [1], [0, 0, 1, 1], [], []>} : vector<192x8xbf16>, vector<8x256xbf16>, vector<192x256xf32> -> vector<192x256xf32>
    %c0_6 = arith.constant 0 : index
    %c126 = arith.constant 126 : index
    %10 = vector.load %arg7[%c0_6, %c126] : memref<8x387xbf16, #tpu.memory_space<vmem>>, vector<8x256xbf16>
    %c1 = arith.constant 1 : index
    %c0_7 = arith.constant 0 : index
    %11 = vector.load %arg5[%c1, %c0_7] : memref<7x256xbf16, #tpu.memory_space<vmem>>, vector<1x256xbf16>
    %12 = vector.broadcast %11 : vector<1x256xbf16> to vector<8x256xbf16>
    %13 = arith.mulf %10, %12 : vector<8x256xbf16>
    %c1_8 = arith.constant 1 : index
    %c0_9 = arith.constant 0 : index
    %c0_10 = arith.constant 0 : index
    %14 = vector.load %arg3[%c1_8, %c0_9, %c0_10] : memref<7x192x8xbf16, #tpu.memory_space<vmem>>, vector<1x192x8xbf16>
    %15 = vector.shape_cast %14 : vector<1x192x8xbf16> to vector<192x8xbf16>
    %cst_11 = arith.constant dense<0.000000e+00> : vector<192x256xf32>
    %16 = tpu.matmul %15, %13, %cst_11 {dimension_numbers = #tpu.dot_dimension_numbers<[1], [0], [0], [1], [0, 0, 1, 1], [], []>} : vector<192x8xbf16>, vector<8x256xbf16>, vector<192x256xf32> -> vector<192x256xf32>
    %17 = arith.addf %9, %16 : vector<192x256xf32>
    %c0_12 = arith.constant 0 : index
    %c127 = arith.constant 127 : index
    %18 = vector.load %arg7[%c0_12, %c127] : memref<8x387xbf16, #tpu.memory_space<vmem>>, vector<8x256xbf16>
    %c2 = arith.constant 2 : index
    %c0_13 = arith.constant 0 : index
    %19 = vector.load %arg5[%c2, %c0_13] : memref<7x256xbf16, #tpu.memory_space<vmem>>, vector<1x256xbf16>
    %20 = vector.broadcast %19 : vector<1x256xbf16> to vector<8x256xbf16>
    %21 = arith.mulf %18, %20 : vector<8x256xbf16>
    %c2_14 = arith.constant 2 : index
    %c0_15 = arith.constant 0 : index
    %c0_16 = arith.constant 0 : index
    %22 = vector.load %arg3[%c2_14, %c0_15, %c0_16] : memref<7x192x8xbf16, #tpu.memory_space<vmem>>, vector<1x192x8xbf16>
    %23 = vector.shape_cast %22 : vector<1x192x8xbf16> to vector<192x8xbf16>
    %cst_17 = arith.constant dense<0.000000e+00> : vector<192x256xf32>
    %24 = tpu.matmul %23, %21, %cst_17 {dimension_numbers = #tpu.dot_dimension_numbers<[1], [0], [0], [1], [0, 0, 1, 1], [], []>} : vector<192x8xbf16>, vector<8x256xbf16>, vector<192x256xf32> -> vector<192x256xf32>
    %25 = arith.addf %17, %24 : vector<192x256xf32>
    %c0_18 = arith.constant 0 : index
    %c128 = arith.constant 128 : index
    %26 = vector.load %arg7[%c0_18, %c128] : memref<8x387xbf16, #tpu.memory_space<vmem>>, vector<8x256xbf16>
    %c3 = arith.constant 3 : index
    %c0_19 = arith.constant 0 : index
    %c0_20 = arith.constant 0 : index
    %27 = vector.load %arg3[%c3, %c0_19, %c0_20] : memref<7x192x8xbf16, #tpu.memory_space<vmem>>, vector<1x192x8xbf16>
    %28 = vector.shape_cast %27 : vector<1x192x8xbf16> to vector<192x8xbf16>
    %cst_21 = arith.constant dense<0.000000e+00> : vector<192x256xf32>
    %29 = tpu.matmul %28, %26, %cst_21 {dimension_numbers = #tpu.dot_dimension_numbers<[1], [0], [0], [1], [0, 0, 1, 1], [], []>} : vector<192x8xbf16>, vector<8x256xbf16>, vector<192x256xf32> -> vector<192x256xf32>
    %30 = arith.addf %25, %29 : vector<192x256xf32>
    %c0_22 = arith.constant 0 : index
    %c129 = arith.constant 129 : index
    %31 = vector.load %arg7[%c0_22, %c129] : memref<8x387xbf16, #tpu.memory_space<vmem>>, vector<8x256xbf16>
    %c4 = arith.constant 4 : index
    %c0_23 = arith.constant 0 : index
    %32 = vector.load %arg5[%c4, %c0_23] : memref<7x256xbf16, #tpu.memory_space<vmem>>, vector<1x256xbf16>
    %33 = vector.broadcast %32 : vector<1x256xbf16> to vector<8x256xbf16>
    %34 = arith.mulf %31, %33 : vector<8x256xbf16>
    %c4_24 = arith.constant 4 : index
    %c0_25 = arith.constant 0 : index
    %c0_26 = arith.constant 0 : index
    %35 = vector.load %arg3[%c4_24, %c0_25, %c0_26] : memref<7x192x8xbf16, #tpu.memory_space<vmem>>, vector<1x192x8xbf16>
    %36 = vector.shape_cast %35 : vector<1x192x8xbf16> to vector<192x8xbf16>
    %cst_27 = arith.constant dense<0.000000e+00> : vector<192x256xf32>
    %37 = tpu.matmul %36, %34, %cst_27 {dimension_numbers = #tpu.dot_dimension_numbers<[1], [0], [0], [1], [0, 0, 1, 1], [], []>} : vector<192x8xbf16>, vector<8x256xbf16>, vector<192x256xf32> -> vector<192x256xf32>
    %38 = arith.addf %30, %37 : vector<192x256xf32>
    %c0_28 = arith.constant 0 : index
    %c130 = arith.constant 130 : index
    %39 = vector.load %arg7[%c0_28, %c130] : memref<8x387xbf16, #tpu.memory_space<vmem>>, vector<8x256xbf16>
    %c5 = arith.constant 5 : index
    %c0_29 = arith.constant 0 : index
    %40 = vector.load %arg5[%c5, %c0_29] : memref<7x256xbf16, #tpu.memory_space<vmem>>, vector<1x256xbf16>
    %41 = vector.broadcast %40 : vector<1x256xbf16> to vector<8x256xbf16>
    %42 = arith.mulf %39, %41 : vector<8x256xbf16>
    %c5_30 = arith.constant 5 : index
    %c0_31 = arith.constant 0 : index
    %c0_32 = arith.constant 0 : index
    %43 = vector.load %arg3[%c5_30, %c0_31, %c0_32] : memref<7x192x8xbf16, #tpu.memory_space<vmem>>, vector<1x192x8xbf16>
    %44 = vector.shape_cast %43 : vector<1x192x8xbf16> to vector<192x8xbf16>
    %cst_33 = arith.constant dense<0.000000e+00> : vector<192x256xf32>
    %45 = tpu.matmul %44, %42, %cst_33 {dimension_numbers = #tpu.dot_dimension_numbers<[1], [0], [0], [1], [0, 0, 1, 1], [], []>} : vector<192x8xbf16>, vector<8x256xbf16>, vector<192x256xf32> -> vector<192x256xf32>
    %46 = arith.addf %38, %45 : vector<192x256xf32>
    %c0_34 = arith.constant 0 : index
    %c131 = arith.constant 131 : index
    %47 = vector.load %arg7[%c0_34, %c131] : memref<8x387xbf16, #tpu.memory_space<vmem>>, vector<8x256xbf16>
    %c6 = arith.constant 6 : index
    %c0_35 = arith.constant 0 : index
    %48 = vector.load %arg5[%c6, %c0_35] : memref<7x256xbf16, #tpu.memory_space<vmem>>, vector<1x256xbf16>
    %49 = vector.broadcast %48 : vector<1x256xbf16> to vector<8x256xbf16>
    %50 = arith.mulf %47, %49 : vector<8x256xbf16>
    %c6_36 = arith.constant 6 : index
    %c0_37 = arith.constant 0 : index
    %c0_38 = arith.constant 0 : index
    %51 = vector.load %arg3[%c6_36, %c0_37, %c0_38] : memref<7x192x8xbf16, #tpu.memory_space<vmem>>, vector<1x192x8xbf16>
    %52 = vector.shape_cast %51 : vector<1x192x8xbf16> to vector<192x8xbf16>
    %cst_39 = arith.constant dense<0.000000e+00> : vector<192x256xf32>
    %53 = tpu.matmul %52, %50, %cst_39 {dimension_numbers = #tpu.dot_dimension_numbers<[1], [0], [0], [1], [0, 0, 1, 1], [], []>} : vector<192x8xbf16>, vector<8x256xbf16>, vector<192x256xf32> -> vector<192x256xf32>
    %54 = arith.addf %46, %53 : vector<192x256xf32>
    %c0_40 = arith.constant 0 : index
    %c0_41 = arith.constant 0 : index
    %55 = vector.load %arg4[%c0_40, %c0_41] : memref<192x1xf32, #tpu.memory_space<vmem>>, vector<192x1xf32>
    %56 = vector.broadcast %55 : vector<192x1xf32> to vector<192x256xf32>
    %57 = arith.addf %54, %56 : vector<192x256xf32>
    %cst_42 = arith.constant 0.000000e+00 : f32
    %58 = vector.broadcast %cst_42 : f32 to vector<192x256xf32>
    %59 = arith.maximumf %57, %58 : vector<192x256xf32>
    %c0_43 = arith.constant 0 : index
    %c0_44 = arith.constant 0 : index
    %c0_45 = arith.constant 0 : index
    %60 = vector.load %arg6[%c0_43, %c0_44, %c0_45] : memref<1x192x256xf32, #tpu.memory_space<vmem>>, vector<1x192x256xf32>
    %61 = vector.shape_cast %60 : vector<1x192x256xf32> to vector<192x256xf32>
    %62 = vector.shape_cast %59 : vector<192x256xf32> to vector<1x192x256xf32>
    tpu.vector_store %arg6[%c0_43, %c0_44, %c0_45], %62 {strides = array<i32>} : memref<1x192x256xf32, #tpu.memory_space<vmem>>, vector<1x192x256xf32>,
    return
  }
  func.func @transform_0(%arg0: i32, %arg1: i32) -> (i32, i32, i32) {
    %c0_i32 = arith.constant 0 : i32
    %c0_i32_0 = arith.constant 0 : i32
    %c0_i32_1 = arith.constant 0 : i32
    return %arg0, %c0_i32, %c0_i32_0 : i32, i32, i32
  }
  func.func @transform_1(%arg0: i32, %arg1: i32) -> (i32, i32, i32) {
    %c0_i32 = arith.constant 0 : i32
    %c0_i32_0 = arith.constant 0 : i32
    %c0_i32_1 = arith.constant 0 : i32
    return %c0_i32, %arg1, %c0_i32_0 : i32, i32, i32
  }
  func.func @transform_2(%arg0: i32, %arg1: i32) -> (i32, i32) {
    %c0_i32 = arith.constant 0 : i32
    %c0_i32_0 = arith.constant 0 : i32
    return %arg1, %c0_i32 : i32, i32
  }
  func.func @transform_3(%arg0: i32, %arg1: i32) -> (i32, i32) {
    %c0_i32 = arith.constant 0 : i32
    %c0_i32_0 = arith.constant 0 : i32
    %c0_i32_1 = arith.constant 0 : i32
    return %c0_i32, %c0_i32_0 : i32, i32
  }
  func.func @transform_4(%arg0: i32, %arg1: i32) -> (i32, i32, i32) {
    %c0_i32 = arith.constant 0 : i32
    %c0_i32_0 = arith.constant 0 : i32
    return %arg0, %arg1, %c0_i32 : i32, i32, i32
  }
}

</mosaic_0001>

<bundles_post_ra>
// kernel: inception_c_forward.11
= control target key start
LH: loop header
LB: loop body
LE: loop exit
PB: predicated region body
PF: predicated region fallthrough
CT: control target
= control target key end

     0   :  { %s958_s12 = smov 0   ;;  %s960_s13 = smov 0   ;;  %s1053_s0 = inlined_call_operand.vmem [shape: bf16[2,8,256], index: 0, kind: input, shape index: {}]   ;;  %s1054_s1 = inlined_call_operand.vmem [shape: bf16[7,8,8], index: 1, kind: input, shape index: {}]   ;;  %s1055_s2 = inlined_call_operand.vmem [shape: f32[8,1], index: 2, kind: input, shape index: {}]   ;;  %s1056_s3 = inlined_call_operand.vmem [shape: bf16[2,8,256], index: 3, kind: output, shape index: {}]  }
   0x1   :  { %s962_s14 = smov 0  }
   0x2 LB: > { %s25_s15 = sadd.s32 1, %s925_s13  ;;  %p831_p0 = scmp.ge.s32.totalorder %s929_s14, 1  ;;  %s929_s14 = sphi %s962_s14, %s13_s14   ;;  %s925_s13 = sphi %s960_s13, %s1058_s13   ;;  %s921_s12 = sphi %s958_s12, %s1057_s12  }
   0x3   : > { %p27_p1 = scmp.ge.s32.totalorder %s25_s15, 2  ;;  %p169_p2 = scmp.lt.s32.totalorder %s929_s14, 3 }
   0x5   : > { %s1060_s15 = smov (%p27_p1, %s25_s15), 0  ;;  %p170_p3 = pnand %p831_p0, %p169_p2 }
   0x6   : > { %p205_p4 = scmp.lt.s32.totalorder (!%p170_p3), %s921_s12, 1  ;;  %s932_s20 = smov (!%p170_p3), 32  }
   0x7   : > { %173 = sbr.rel (%p170_p3) target bundleno = 382 (0x17e), region = 32  ;;  %s933_s21 = smov (!%p170_p3), 48  }
   0x8   : > { %s934_s22 = smov (!%p170_p3), 16   ;;  %s935_s23 = smov (!%p170_p3), 112  }
   0x9   : > { %s936_s24 = smov (!%p170_p3), 96   ;;  %s937_s25 = smov (!%p170_p3), 80  }
   0xc   : > { %vm233_vm0 = vcmask 388096   ;;  %v931_v0 = vmov 0   ;;  %s1062_s12 = smov (!%p205_p4, %s921_s12), 1  ;;  %v692_v9 = vld [vmem:[%s1055_s2] sm:$0xff]  ;;  %vm256_vm1 = vcmask 261120   ;;  %vm263_vm2 = vcmask 1043456  }
   0xd   : > { %232 = vst [vmem:[#allocation2] sm:$0xf] %v931_v0  ;;  %234 = vst.msk [vmem:[#allocation2 + $0xc] sm:$0xf] %vm233_vm0, %v931_v0  ;;  %302 = vmatprep.mubr.bf16.mxu0 %v931_v0  ;;  %361 = vmatprep.mubr.bf16.mxu1 %v931_v0  ;;  %s867_s16 = sshll.u32 %s1062_s12, 3  ;;  %vm317_vm3 = vcmask 392192  }
   0xe   : > { %901 = vset.pattern.permute.xlu0 %v931_v0  ;;  %s209_s19 = scalar_lea.vmem %s1053_s0, %s867_s16  ;;  %v836_v18 = vld [vmem:[%s1054_s1 + $0x4] sm:$0xf]  ;;  %vm259_vm4 = vcmask 64512   ;;  %v239_v24 = vld [vmem:[%s1054_s1] sm:$0xf]  ;;  %vm378_vm5 = vcmask 130048  }
   0xf   : > { %v235_v1 = vld [vmem:[%s209_s19] sm:$0xff]  ;;  %vm511_vm6 = vcmask 916480   ;;  %v844_v33 = vld [vmem:[%s1054_s1 + $0x8] sm:$0xf]  ;;  %v847_v35 = vld [vmem:[%s1054_s1 + $0xc] sm:$0xf] }
  0x10   : > { %236 = vst [vmem:[#allocation2 + $0x4] sm:$0xff] %v235_v1  ;;  %v853_v6 = vcombine.low %v235_v1, %v235_v1  ;;  %v854_v8 = vcombine.high %v235_v1, %v235_v1  ;;  %vm574_vm7 = vcmask 785408   ;;  %v852_v43 = vld [vmem:[%s1054_s1 + $0x10] sm:$0xf]  ;;  %vm637_vm8 = vcmask 654336  }
  0x11   : > { %v858_v48 = vld [vmem:[%s1054_s1 + $0x14] sm:$0xf]  ;;  %v861_v53 = vld [vmem:[%s1054_s1 + $0x18] sm:$0xf] }
  0x12   : > { %v445_v26 = vsel %vm263_vm2, %v853_v6, 0 }
  0x14   : > { %v906_v7 = vld [vmem:[#allocation2 + $0xc] ss:$0 sps:$4 sm:$0xff]  }
  0x17   : > { %v902_v2 = vld [vmem:[#allocation2 + $0x8] ss:$0 sps:$4 sm:$0xff]   ;;  %v237_v3 = vld [vmem:[#allocation2] sm:$0xff] }
  0x18   : > { %v837_v4 = vcombine.low %v237_v3, %v237_v3  ;;  %254 = vrot.lane.b32.xlu1 %v902_v2, %s932_s20  ;;  %v838_v5 = vcombine.high %v237_v3, %v237_v3 }
  0x1a   : > { %250 = vrot.lane.b32.xlu0 %v837_v4, %s932_s20 }
  0x1c   : > { %311 = vrot.lane.b32.xlu1 %v837_v4, %s933_s21 }
  0x1e   : > { %252 = vrot.lane.b32.xlu0 %v838_v5, %s932_s20 }
  0x20   : > { %315 = vrot.lane.b32.xlu1 %v902_v2, %s933_s21 }
  0x22   : > { %313 = vrot.lane.b32.xlu0 %v838_v5, %s933_s21 }
  0x24   : > { %374 = vrot.lane.b32.xlu1 %v838_v5, %s934_s22 }
  0x26   : > { %372 = vrot.lane.b32.xlu0 %v837_v4, %s934_s22 }
  0x28   : > { %505 = vrot.lane.b32.xlu1 %v853_v6, %s935_s23 }
  0x2a   : > { %376 = vrot.lane.b32.xlu0 %v902_v2, %s934_s22  ;;  %s226_s22 = scalar_lea.vmem %s1056_s3, %s867_s16 }
  0x2c   : > { %509 = vrot.lane.b32.xlu1 %v906_v7, %s935_s23 }
  0x2e   : > { %507 = vrot.lane.b32.xlu0 %v854_v8, %s935_s23 }
  0x30   : > { %570 = vrot.lane.b32.xlu1 %v854_v8, %s936_s24 }
  0x32   : > { %568 = vrot.lane.b32.xlu0 %v853_v6, %s936_s24 }
  0x34   : > { %631 = vrot.lane.b32.xlu1 %v853_v6, %s937_s25 }
  0x36   : > { %572 = vrot.lane.b32.xlu0 %v906_v7, %s936_s24 }
  0x38   : > { %635 = vrot.lane.b32.xlu1 %v906_v7, %s937_s25 }
  0x3a   : > { %633 = vrot.lane.b32.xlu0 %v854_v8, %s937_s25 }
  0x3e   : > { %695 = vperm.xlu0 %901, %v692_v9  }
  0x8a   : > { %v255_v10 = vpop.permute.xlu1 %254 }
  0x8c   : > { %v251_v11 = vpop.permute.xlu0 %250 }
  0x8e   : > { %v312_v12 = vpop.permute.xlu1 %311 }
  0x90   : > { %v253_v13 = vpop.permute.xlu0 %252 }
  0x91   : > { %v258_v14 = vsel %vm256_vm1, %v253_v13, %v255_v10  ;;  %v257_v15 = vsel %vm256_vm1, %v251_v11, %v253_v13 }
  0x92   : > { %840 = vmatprep.subr.msk.bf16.mxu0 %vm263_vm2, %v258_v14  ;;  %v265_v16 = vsel %vm263_vm2, %v257_v15, 0  ;;  %v316_v17 = vpop.permute.xlu1 %315 }
  0x93   : > { %285 = vmatpush1.bf16.msra.mxu0 %v265_v16 }
  0x94   : > { %v314_v19 = vpop.permute.xlu0 %313 }
  0x95   : > { %v319_v20 = vsel %vm317_vm3, %v314_v19, %v316_v17  ;;  %v318_v21 = vsel %vm317_vm3, %v312_v12, %v314_v19 }
  0x96   : > { %842 = vmatprep.subr.msk.bf16.mxu1 %vm263_vm2, %v319_v20  ;;  %v324_v22 = vsel %vm263_vm2, %v318_v21, 0  ;;  %841 = vmatmul.mubr.msk.bf16.vlgmr.msra.gmra.mxu0 %vm259_vm4, %v836_v18  ;;  %v375_v23 = vpop.permute.xlu1 %374 }
  0x97   : > { %344 = vmatpush1.bf16.msra.mxu1 %v324_v22  ;;  %422 = vmatprep.mubr.bf16.mxu0 %v931_v0 }
  0x98   : > { %v373_v25 = vpop.permute.xlu0 %372  ;;  %850 = vmatprep.subr.msk.bf16.mxu1 %vm263_vm2, %v854_v8 }
  0x99   : > { %v379_v27 = vsel %vm378_vm5, %v373_v25, %v375_v23 }
  0x9a   : > { %843 = vmatmul.mubr.msk.bf16.vlgmr.msra.gmra.mxu1 %vm259_vm4, %v239_v24  ;;  %v506_v28 = vpop.permute.xlu1 %505  ;;  %v385_v31 = vsel %vm263_vm2, %v379_v27, 0 }
  0x9b   : > { %465 = vmatpush1.bf16.msra.mxu1 %v445_v26  ;;  %482 = vmatprep.mubr.bf16.mxu1 %v931_v0 }
  0x9c   : > { %v377_v29 = vpop.permute.xlu0 %376 }
  0x9d   : > { %v380_v30 = vsel %vm378_vm5, %v375_v23, %v377_v29 }
  0x9e   : > { %845 = vmatprep.subr.msk.bf16.mxu0 %vm263_vm2, %v380_v30  ;;  %v510_v32 = vpop.permute.xlu1 %509 }
  0x9f   : > { %405 = vmatpush1.bf16.msra.mxu0 %v385_v31 }
  0xa0   : > { %v508_v34 = vpop.permute.xlu0 %507 }
  0xa1   : > { %v512_v36 = vsel %vm511_vm6, %v506_v28, %v508_v34  ;;  %v513_v37 = vsel %vm511_vm6, %v508_v34, %v510_v32 }
  0xa2   : > { %v518_v38 = vsel %vm263_vm2, %v512_v36, 0  ;;  %846 = vmatmul.mubr.msk.bf16.vlgmr.msra.gmra.mxu0 %vm259_vm4, %v844_v33  ;;  %856 = vmatprep.subr.msk.bf16.mxu0 %vm263_vm2, %v513_v37  ;;  %v571_v39 = vpop.permute.xlu1 %570 }
  0xa3   : > { %538 = vmatpush1.bf16.msra.mxu0 %v518_v38  ;;  %851 = vmatmul.mubr.msk.bf16.vlgmr.msra.gmra.mxu1 %vm259_vm4, %v847_v35 }
  0xa4   : > { %v569_v40 = vpop.permute.xlu0 %568  ;;  %555 = vmatprep.mubr.bf16.mxu0 %v931_v0  ;;  %618 = vmatprep.mubr.bf16.mxu1 %v931_v0 }
  0xa5   : > { %v575_v41 = vsel %vm574_vm7, %v569_v40, %v571_v39 }
  0xa6   : > { %v632_v42 = vpop.permute.xlu1 %631  ;;  %v581_v46 = vsel %vm263_vm2, %v575_v41, 0 }
  0xa8   : > { %v573_v44 = vpop.permute.xlu0 %572 }
  0xa9   : > { %v576_v45 = vsel %vm574_vm7, %v571_v39, %v573_v44 }
  0xaa   : > { %857 = vmatmul.mubr.msk.bf16.vlgmr.msra.gmra.mxu0 %vm259_vm4, %v852_v43  ;;  %859 = vmatprep.subr.msk.bf16.mxu1 %vm263_vm2, %v576_v45  ;;  %v636_v47 = vpop.permute.xlu1 %635 }
  0xab   : > { %601 = vmatpush1.bf16.msra.mxu1 %v581_v46  ;;  %681 = vmatprep.mubr.bf16.mxu0 %v931_v0 }
  0xac   : > { %v634_v49 = vpop.permute.xlu0 %633 }
  0xad   : > { %v638_v50 = vsel %vm637_vm8, %v632_v42, %v634_v49  ;;  %v639_v51 = vsel %vm637_vm8, %v634_v49, %v636_v47 }
  0xae   : > { %v644_v52 = vsel %vm263_vm2, %v638_v50, 0  ;;  %860 = vmatmul.mubr.msk.bf16.vlgmr.msra.gmra.mxu1 %vm259_vm4, %v858_v48  ;;  %862 = vmatprep.subr.msk.bf16.mxu0 %vm263_vm2, %v639_v51 }
  0xaf   : > { %664 = vmatpush1.bf16.msra.mxu0 %v644_v52 }
  0xb2   : > { %863 = vmatmul.mubr.msk.bf16.vlgmr.msra.gmra.mxu0 %vm259_vm4, %v861_v53 }
  0xb9   : > { %v696_v21 = vpop.permute.xlu0 %695 }
 0x156   : > { %v304_v54 = vpop.f32.mrf.mxu0 }
 0x158   : > { %v306_v55 = vpop.f32.mrf.mxu0 }
 0x15a   : > { %v363_v56 = vpop.f32.mrf.mxu1  ;;  %v308_v57 = vpop.f32.mrf.mxu0 }
 0x15b   : > { %v364_v3 = vadd.f32 %v363_v56, %v304_v54 }
 0x15c   : > { %v365_v58 = vpop.f32.mrf.mxu1  ;;  %v309_v59 = vpop.f32.mrf.mxu0 }
 0x15d   : > { %v366_v6 = vadd.f32 %v365_v58, %v306_v55 }
 0x15e   : > { %v367_v60 = vpop.f32.mrf.mxu1 }
 0x160   : > { %v368_v61 = vpop.f32.mrf.mxu1 }
 0x162   : > { %v424_v62 = vpop.f32.mrf.mxu0 }
 0x163   : > { %v484_v63 = vpop.f32.mrf.mxu1  ;;  %v431_v7 = vadd.f32 %v424_v62, %v364_v3 }
 0x164   : > { %v426_v0 = vpop.f32.mrf.mxu0 }
 0x165   : > { %v486_v1 = vpop.f32.mrf.mxu1  ;;  %v432_v10 = vadd.f32 %v426_v0, %v366_v6  ;;  %v491_v12 = vadd.f32 %v484_v63, %v431_v7 }
 0x166   : > { %v428_v2 = vpop.f32.mrf.mxu0 }
 0x167   : > { %v488_v4 = vpop.f32.mrf.mxu1  ;;  %v492_v15 = vadd.f32 %v486_v1, %v432_v10 }
 0x168   : > { %v429_v5 = vpop.f32.mrf.mxu0 }
 0x169   : > { %v489_v8 = vpop.f32.mrf.mxu1 }
 0x16a   : > { %v557_v9 = vpop.f32.mrf.mxu0 }
 0x16b   : > { %v564_v16 = vadd.f32 %v557_v9, %v491_v12 }
 0x16c   : > { %v559_v11 = vpop.f32.mrf.mxu0 }
 0x16d   : > { %v565_v19 = vadd.f32 %v559_v11, %v492_v15 }
 0x16e   : > { %v561_v13 = vpop.f32.mrf.mxu0  ;;  %v620_v14 = vpop.f32.mrf.mxu1 }
 0x16f   : > { %v627_v20 = vadd.f32 %v620_v14, %v564_v16 }
 0x170   : > { %v562_v17 = vpop.f32.mrf.mxu0  ;;  %v622_v18 = vpop.f32.mrf.mxu1 }
 0x171   : > { %v628_v24 = vadd.f32 %v622_v18, %v565_v19 }
 0x172   : > { %v683_v22 = vpop.f32.mrf.mxu0  ;;  %v624_v23 = vpop.f32.mrf.mxu1 }
 0x173   : > { %v690_v25 = vadd.f32 %v683_v22, %v627_v20 }
 0x174   : > { %v685_v26 = vpop.f32.mrf.mxu0  ;;  %v625_v27 = vpop.f32.mrf.mxu1 }
 0x175   : > { %v691_v28 = vadd.f32 %v685_v26, %v628_v24  ;;  %v698_v29 = vadd.f32 %v696_v21, %v690_v25 }
 0x176   : > { %v687_v30 = vpop.f32.mrf.mxu0 }
 0x177   : > { %v699_v31 = vadd.f32 %v696_v21, %v691_v28  ;;  %v700_v33 = vmax.f32 %v698_v29, 0.0 }
 0x178   : > { %v688_v32 = vpop.f32.mrf.mxu0 }
 0x179   : > { %v701_v34 = vmax.f32 %v699_v31, 0.0 }
 0x17b   : > { %v869_v35 = vpack.c.bf16 %v701_v34, %v700_v33 }
 0x17d   : > { %710 = vst [vmem:[%s226_s22] sm:$0xff] %v869_v35 }
 0x17e PF: > { %s13_s14 = sadd.s32 1, %s929_s14   ;;  %s1057_s12 = smov %s925_s13 }
 0x17f   : > { %p10_p5 = scmp.ge.s32.totalorder %s13_s14, 4   ;;  %s1058_s13 = smov %s1060_s15 }
 0x181   :  { %12 = sbr.rel (!%p10_p5) target bundleno = 2 (0x2), region = 78 }

// kernel: inception_c_forward.8
= control target key start
LH: loop header
LB: loop body
LE: loop exit
PB: predicated region body
PF: predicated region fallthrough
CT: control target
= control target key end

     0   :  { %s1070_s18 = smov 0   ;;  %s1345_s0 = inlined_call_operand.vmem [shape: bf16[2,16,256], index: 0, kind: input, shape index: {}]   ;;  %s1346_s1 = inlined_call_operand.vmem [shape: bf16[208,16], index: 1, kind: input, shape index: {}]   ;;  %s1347_s2 = inlined_call_operand.vmem [shape: f32[208,1], index: 2, kind: input, shape index: {}]   ;;  %s1348_s3 = inlined_call_operand.vmem [shape: f32[2,192,256], index: 3, kind: output, shape index: {0}]   ;;  %s1349_s4 = inlined_call_operand.vmem [shape: bf16[2,8,256], index: 4, kind: output, shape index: {1}]   ;;  %s1350_s5 = inlined_call_operand.vmem [shape: bf16[2,8,256], index: 5, kind: output, shape index: {2}]  }
   0x1 LB: > { %s952_s19 = sadd.s32 4294967295, %s1037_s18   ;;  %p956_p0 = scmp.ge.s32.totalorder %s1037_s18, 1  ;;  %s1037_s18 = sphi %s1070_s18, %s16_s18  }
   0x2   : > { %p192_p1 = scmp.lt.s32.totalorder %s1037_s18, 3 }
   0x4   : > { %p193_p2 = pnand %p956_p0, %p192_p1 }
   0x5   : > { %p230_p3 = scmp.lt.s32.totalorder (!%p193_p2), %s952_s19, 1 }
   0x6   : > { %196 = sbr.rel (%p193_p2) target bundleno = 271 (0x10f), region = 32 }
   0xb   : > { %v1039_v0 = vmov 0   ;;  %s1352_s19 = smov (!%p230_p3, %s952_s19), 1  ;;  %v1018_v3 = vld [vmem:[%s1346_s1] sm:$0xff]   ;;  %v1019_v4 = vld [vmem:[%s1346_s1 + $0x38] sm:$0xff]   ;;  %vm510_vm0 = vcmask 130048   ;;  %v281_v5 = vld [vmem:[%s1347_s2 + $0x10] sm:$0xff] }
   0xc   : > { %582 = vmatprep.mubr.bf16.mxu0 %v1039_v0  ;;  %652 = vmatprep.mubr.bf16.mxu1 %v1039_v0  ;;  %s996_s20 = sshll.u32 %s1352_s19, 4  ;;  %v279_v6 = vld [vmem:[%s1347_s2] sm:$0xff]  ;;  %v282_v7 = vld [vmem:[%s1347_s2 + $0x18] sm:$0xff]  ;;  %v280_v8 = vld [vmem:[%s1347_s2 + $0x8] sm:$0xff]  ;;  %s1003_s8 = smul.u32 384, %s1352_s19 }
   0xd   : > { %1014 = vset.pattern.permute.xlu1 %v1039_v0  ;;  %1013 = vset.pattern.permute.xlu0 %v1039_v0  ;;  %s234_s23 = scalar_lea.vmem %s1345_s0, %s996_s20  ;;  %v284_v9 = vld [vmem:[%s1347_s2 + $0x28] sm:$0xff]  ;;  %v1021_v11 = vld [vmem:[%s1346_s1 + $0x40] sm:$0xff]   ;;  %v286_v13 = vld [vmem:[%s1347_s2 + $0x38] sm:$0xff]  ;;  %s997_s12 = sshll.u32 %s1352_s19, 3 }
   0xe   : > { %v1015_v1 = vld [vmem:[%s234_s23 + $0x4] ss:$8 sps:$4 sm:$0xff]   ;;  %v1017_v2 = vld [vmem:[%s234_s23] ss:$8 sps:$4 sm:$0xff]   ;;  %317 = vperm.xlu1 %1014, %v281_v5   ;;  %307 = vperm.xlu0 %1013, %v279_v6   ;;  %v285_v14 = vld [vmem:[%s1347_s2 + $0x30] sm:$0xff]  ;;  %s1259_s11 = scalar_lea.vmem %s1348_s3, %s1003_s8  ;;  %s244_s15 = scalar_lea.vmem %s1349_s4, %s997_s12 }
   0xf   : > { %564 = vmatprep.subr.bf16.mxu0 %v1015_v1  ;;  %1001 = vmatprep.subr.bf16.mxu1 %v1015_v1  ;;  %v1020_v10 = vld [vmem:[%s1346_s1 + $0x8] sm:$0xff]   ;;  %v283_v12 = vld [vmem:[%s1347_s2 + $0x20] sm:$0xff]  ;;  %v1022_v16 = vld [vmem:[%s1346_s1 + $0x10] sm:$0xff]   ;;  %s249_s17 = scalar_lea.vmem %s1350_s5, %s997_s12 }
  0x10   : > { %565 = vmatpush1.bf16.msra.mxu0 %v1017_v2  ;;  %1002 = vmatpush1.bf16.msra.mxu1 %v1017_v2  ;;  %v303_v15 = vld [vmem:[%s1347_s2 + $0xc0] sm:$0xff]  ;;  %v1023_v17 = vld [vmem:[%s1346_s1 + $0x48] sm:$0xff]   ;;  %v290_v21 = vld [vmem:[%s1347_s2 + $0x58] sm:$0xff] }
  0x11   : > { %v287_v18 = vld [vmem:[%s1347_s2 + $0x40] sm:$0xff]  ;;  %v288_v19 = vld [vmem:[%s1347_s2 + $0x48] sm:$0xff]  ;;  %v1024_v22 = vld [vmem:[%s1346_s1 + $0x18] sm:$0xff]  }
  0x12   : > { %322 = vperm.xlu1 %1014, %v282_v7   ;;  %312 = vperm.xlu0 %1013, %v280_v8   ;;  %v304_v20 = vld [vmem:[%s1347_s2 + $0xc8] sm:$0xff]  ;;  %v1025_v23 = vld [vmem:[%s1346_s1 + $0x50] sm:$0xff]   ;;  %v291_v26 = vld [vmem:[%s1347_s2 + $0x60] sm:$0xff] }
  0x13   : > { %979 = vmatmul.mubr.msk.bf16.vlgmr.msra.gmra.mxu0 %vm510_vm0, %v1018_v3  ;;  %986 = vmatmul.mubr.msk.bf16.vlgmr.msra.gmra.mxu1 %vm510_vm0, %v1019_v4  ;;  %v289_v24 = vld [vmem:[%s1347_s2 + $0x50] sm:$0xff]  ;;  %v292_v25 = vld [vmem:[%s1347_s2 + $0x68] sm:$0xff]  ;;  %v294_v27 = vld [vmem:[%s1347_s2 + $0x78] sm:$0xff] }
  0x14   : > { %592 = vmatprep.mubr.bf16.mxu0 %v1039_v0  ;;  %662 = vmatprep.mubr.bf16.mxu1 %v1039_v0  ;;  %v1026_v28 = vld [vmem:[%s1346_s1 + $0x20] sm:$0xff]   ;;  %v1027_v29 = vld [vmem:[%s1346_s1 + $0x58] sm:$0xff]   ;;  %v293_v30 = vld [vmem:[%s1347_s2 + $0x70] sm:$0xff] }
  0x15   : > { %v296_v31 = vld [vmem:[%s1347_s2 + $0x88] sm:$0xff]  ;;  %v295_v32 = vld [vmem:[%s1347_s2 + $0x80] sm:$0xff]  ;;  %v298_v33 = vld [vmem:[%s1347_s2 + $0x98] sm:$0xff] }
  0x16   : > { %332 = vperm.xlu1 %1014, %v284_v9   ;;  %327 = vperm.xlu0 %1013, %v283_v12   ;;  %v1028_v34 = vld [vmem:[%s1346_s1 + $0x28] sm:$0xff]   ;;  %v1029_v35 = vld [vmem:[%s1346_s1 + $0x60] sm:$0xff]   ;;  %v297_v36 = vld [vmem:[%s1347_s2 + $0x90] sm:$0xff] }
  0x17   : > { %v300_v37 = vld [vmem:[%s1347_s2 + $0xa8] sm:$0xff]  ;;  %v299_v38 = vld [vmem:[%s1347_s2 + $0xa0] sm:$0xff]  ;;  %v302_v39 = vld [vmem:[%s1347_s2 + $0xb8] sm:$0xff] }
  0x18   : > { %v1030_v40 = vld [vmem:[%s1346_s1 + $0x30] sm:$0xff]  }
  0x19   : > { %v301_v41 = vld [vmem:[%s1347_s2 + $0xb0] sm:$0xff] }
  0x1a   : > { %342 = vperm.xlu1 %1014, %v286_v13   ;;  %337 = vperm.xlu0 %1013, %v285_v14  }
  0x1b   : > { %980 = vmatmul.mubr.msk.bf16.gmra.mxu0 %vm510_vm0, %v1020_v10  ;;  %987 = vmatmul.mubr.msk.bf16.gmra.mxu1 %vm510_vm0, %v1021_v11 }
  0x1c   : > { %602 = vmatprep.mubr.bf16.mxu0 %v1039_v0  ;;  %672 = vmatprep.mubr.bf16.mxu1 %v1039_v0 }
  0x1e   : > { %427 = vperm.xlu1 %1014, %v303_v15   ;;  %347 = vperm.xlu0 %1013, %v287_v18  }
  0x22   : > { %352 = vperm.xlu1 %1014, %v288_v19   ;;  %432 = vperm.xlu0 %1013, %v304_v20  }
  0x23   : > { %981 = vmatmul.mubr.msk.bf16.gmra.mxu0 %vm510_vm0, %v1022_v16  ;;  %988 = vmatmul.mubr.msk.bf16.gmra.mxu1 %vm510_vm0, %v1023_v17 }
  0x24   : > { %612 = vmatprep.mubr.bf16.mxu0 %v1039_v0  ;;  %682 = vmatprep.mubr.bf16.mxu1 %v1039_v0 }
  0x26   : > { %362 = vperm.xlu1 %1014, %v290_v21   ;;  %357 = vperm.xlu0 %1013, %v289_v24  }
  0x2a   : > { %372 = vperm.xlu1 %1014, %v292_v25   ;;  %367 = vperm.xlu0 %1013, %v291_v26  }
  0x2b   : > { %982 = vmatmul.mubr.msk.bf16.gmra.mxu0 %vm510_vm0, %v1024_v22  ;;  %989 = vmatmul.mubr.msk.bf16.gmra.mxu1 %vm510_vm0, %v1025_v23 }
  0x2c   : > { %622 = vmatprep.mubr.bf16.mxu0 %v1039_v0  ;;  %692 = vmatprep.mubr.bf16.mxu1 %v1039_v0 }
  0x2e   : > { %382 = vperm.xlu1 %1014, %v294_v27   ;;  %377 = vperm.xlu0 %1013, %v293_v30  }
  0x32   : > { %392 = vperm.xlu1 %1014, %v296_v31   ;;  %387 = vperm.xlu0 %1013, %v295_v32  }
  0x33   : > { %983 = vmatmul.mubr.msk.bf16.gmra.mxu0 %vm510_vm0, %v1026_v28  ;;  %990 = vmatmul.mubr.msk.bf16.gmra.mxu1 %vm510_vm0, %v1027_v29 }
  0x34   : > { %632 = vmatprep.mubr.bf16.mxu0 %v1039_v0  ;;  %702 = vmatprep.mubr.bf16.mxu1 %v1039_v0 }
  0x36   : > { %402 = vperm.xlu1 %1014, %v298_v33   ;;  %397 = vperm.xlu0 %1013, %v297_v36  }
  0x3a   : > { %412 = vperm.xlu1 %1014, %v300_v37   ;;  %407 = vperm.xlu0 %1013, %v299_v38  }
  0x3b   : > { %984 = vmatmul.mubr.msk.bf16.gmra.mxu0 %vm510_vm0, %v1028_v34  ;;  %991 = vmatmul.mubr.msk.bf16.gmra.mxu1 %vm510_vm0, %v1029_v35 }
  0x3c   : > { %642 = vmatprep.mubr.bf16.mxu0 %v1039_v0 }
  0x3e   : > { %422 = vperm.xlu1 %1014, %v302_v39   ;;  %417 = vperm.xlu0 %1013, %v301_v41  }
  0x43   : > { %985 = vmatmul.mubr.msk.bf16.gmra.mxu0 %vm510_vm0, %v1030_v40 }
  0x89   : > { %v308_v42 = vpop.permute.xlu0 %307  ;;  %v318_v43 = vpop.permute.xlu1 %317 }
  0x8d   : > { %v313_v44 = vpop.permute.xlu0 %312  ;;  %v1229_v45 = vpop.permute.xlu1 %322 }
  0x91   : > { %v1231_v46 = vpop.permute.xlu0 %327  ;;  %v1233_v47 = vpop.permute.xlu1 %332 }
  0x95   : > { %v1235_v48 = vpop.permute.xlu0 %337  ;;  %v1237_v49 = vpop.permute.xlu1 %342 }
  0x99   : > { %v1239_v50 = vpop.permute.xlu0 %347  ;;  %v1241_v51 = vpop.permute.xlu1 %427 }
  0x9d   : > { %v1243_v52 = vpop.permute.xlu0 %432  ;;  %v1245_v53 = vpop.permute.xlu1 %352 }
  0xa1   : > { %v1247_v54 = vpop.permute.xlu0 %357  ;;  %v1249_v55 = vpop.permute.xlu1 %362 }
  0xa5   : > { %v1251_v56 = vpop.permute.xlu0 %367  ;;  %v1253_v57 = vpop.permute.xlu1 %372 }
  0xa9   : > { %v378_v58 = vpop.permute.xlu0 %377  ;;  %v383_v1 = vpop.permute.xlu1 %382 }
  0xad   : > { %v388_v14 = vpop.permute.xlu0 %387  ;;  %v393_v27 = vpop.permute.xlu1 %392 }
  0xb1   : > { %v398_v40 = vpop.permute.xlu0 %397 }
  0xd3   : > { %v584_v59 = vpop.f32.mrf.mxu0  ;;  %v654_v60 = vpop.f32.mrf.mxu1 }
  0xd4   : > { %v585_v61 = vadd.f32 %v584_v59, %v308_v42  ;;  %v655_v62 = vadd.f32 %v654_v60, %v378_v58 }
  0xd5   : > { %v586_v63 = vpop.f32.mrf.mxu0  ;;  %v656_v0 = vpop.f32.mrf.mxu1 }
  0xd6   : > { %v713_v2 = vmax.f32 %v585_v61, 0.0  ;;  %v741_v3 = vmax.f32 %v655_v62, 0.0  ;;  %v587_v4 = vadd.f32 %v586_v63, %v308_v42  ;;  %v657_v5 = vadd.f32 %v656_v0, %v378_v58 }
  0xd7   : > { %v588_v6 = vpop.f32.mrf.mxu0  ;;  %v658_v7 = vpop.f32.mrf.mxu1 }
  0xd8   : > { %765 = vst [vmem:[%s1259_s11] sm:$0xff] %v713_v2  ;;  %793 = vst [vmem:[%s1259_s11 + $0xe0] sm:$0xff] %v741_v3  ;;  %v714_v8 = vmax.f32 %v587_v4, 0.0  ;;  %v742_v9 = vmax.f32 %v657_v5, 0.0  ;;  %v589_v10 = vadd.f32 %v588_v6, %v313_v44  ;;  %v659_v11 = vadd.f32 %v658_v7, %v383_v1  ;;  %v403_v2 = vpop.permute.xlu1 %402 }
  0xd9   : > { %v590_v12 = vpop.f32.mrf.mxu0  ;;  %v660_v13 = vpop.f32.mrf.mxu1 }
  0xda   : > { %766 = vst [vmem:[%s1259_s11 + $0x8] sm:$0xff] %v714_v8  ;;  %794 = vst [vmem:[%s1259_s11 + $0xe8] sm:$0xff] %v742_v9  ;;  %v715_v15 = vmax.f32 %v589_v10, 0.0  ;;  %v743_v16 = vmax.f32 %v659_v11, 0.0  ;;  %v591_v17 = vadd.f32 %v590_v12, %v313_v44  ;;  %v661_v18 = vadd.f32 %v660_v13, %v383_v1 }
  0xdb   : > { %v594_v19 = vpop.f32.mrf.mxu0  ;;  %v664_v20 = vpop.f32.mrf.mxu1 }
  0xdc   : > { %767 = vst [vmem:[%s1259_s11 + $0x10] sm:$0xff] %v715_v15  ;;  %795 = vst [vmem:[%s1259_s11 + $0xf0] sm:$0xff] %v743_v16  ;;  %v716_v21 = vmax.f32 %v591_v17, 0.0  ;;  %v744_v22 = vmax.f32 %v661_v18, 0.0  ;;  %v595_v23 = vadd.f32 %v594_v19, %v318_v43  ;;  %v665_v24 = vadd.f32 %v664_v20, %v388_v14 }
  0xdd   : > { %v596_v25 = vpop.f32.mrf.mxu0  ;;  %v666_v26 = vpop.f32.mrf.mxu1 }
  0xde   : > { %768 = vst [vmem:[%s1259_s11 + $0x18] sm:$0xff] %v716_v21  ;;  %796 = vst [vmem:[%s1259_s11 + $0xf8] sm:$0xff] %v744_v22  ;;  %v717_v28 = vmax.f32 %v595_v23, 0.0  ;;  %v745_v29 = vmax.f32 %v665_v24, 0.0  ;;  %v597_v30 = vadd.f32 %v596_v25, %v318_v43  ;;  %v667_v31 = vadd.f32 %v666_v26, %v388_v14  ;;  %v408_v14 = vpop.permute.xlu0 %407  ;;  %v413_v26 = vpop.permute.xlu1 %412 }
  0xdf   : > { %v598_v32 = vpop.f32.mrf.mxu0  ;;  %v668_v33 = vpop.f32.mrf.mxu1 }
  0xe0   : > { %769 = vst [vmem:[%s1259_s11 + $0x20] sm:$0xff] %v717_v28  ;;  %797 = vst [vmem:[%s1259_s11 + $0x100] sm:$0xff] %v745_v29  ;;  %v718_v34 = vmax.f32 %v597_v30, 0.0  ;;  %v746_v35 = vmax.f32 %v667_v31, 0.0  ;;  %v599_v36 = vadd.f32 %v598_v32, %v1229_v45  ;;  %v669_v37 = vadd.f32 %v668_v33, %v393_v27 }
  0xe1   : > { %v600_v38 = vpop.f32.mrf.mxu0  ;;  %v670_v39 = vpop.f32.mrf.mxu1 }
  0xe2   : > { %770 = vst [vmem:[%s1259_s11 + $0x28] sm:$0xff] %v718_v34  ;;  %798 = vst [vmem:[%s1259_s11 + $0x108] sm:$0xff] %v746_v35  ;;  %v719_v41 = vmax.f32 %v599_v36, 0.0  ;;  %v747_v42 = vmax.f32 %v669_v37, 0.0  ;;  %v601_v43 = vadd.f32 %v600_v38, %v1229_v45  ;;  %v671_v44 = vadd.f32 %v670_v39, %v393_v27  ;;  %v418_v38 = vpop.permute.xlu0 %417 }
  0xe3   : > { %v604_v58 = vpop.f32.mrf.mxu0  ;;  %v674_v59 = vpop.f32.mrf.mxu1 }
  0xe4   : > { %771 = vst [vmem:[%s1259_s11 + $0x30] sm:$0xff] %v719_v41  ;;  %799 = vst [vmem:[%s1259_s11 + $0x110] sm:$0xff] %v747_v42  ;;  %v720_v60 = vmax.f32 %v601_v43, 0.0  ;;  %v748_v61 = vmax.f32 %v671_v44, 0.0  ;;  %v605_v62 = vadd.f32 %v604_v58, %v1231_v46  ;;  %v675_v63 = vadd.f32 %v674_v59, %v398_v40 }
  0xe5   : > { %v606_v0 = vpop.f32.mrf.mxu0  ;;  %v676_v1 = vpop.f32.mrf.mxu1 }
  0xe6   : > { %772 = vst [vmem:[%s1259_s11 + $0x38] sm:$0xff] %v720_v60  ;;  %800 = vst [vmem:[%s1259_s11 + $0x118] sm:$0xff] %v748_v61  ;;  %v721_v3 = vmax.f32 %v605_v62, 0.0  ;;  %v749_v45 = vmax.f32 %v675_v63, 0.0  ;;  %v607_v4 = vadd.f32 %v606_v0, %v1231_v46  ;;  %v677_v5 = vadd.f32 %v676_v1, %v398_v40  ;;  %v423_v63 = vpop.permute.xlu1 %422 }
  0xe7   : > { %v608_v6 = vpop.f32.mrf.mxu0  ;;  %v678_v7 = vpop.f32.mrf.mxu1 }
  0xe8   : > { %773 = vst [vmem:[%s1259_s11 + $0x40] sm:$0xff] %v721_v3  ;;  %801 = vst [vmem:[%s1259_s11 + $0x120] sm:$0xff] %v749_v45  ;;  %v722_v8 = vmax.f32 %v607_v4, 0.0  ;;  %v750_v9 = vmax.f32 %v677_v5, 0.0  ;;  %v609_v10 = vadd.f32 %v608_v6, %v1233_v47  ;;  %v679_v11 = vadd.f32 %v678_v7, %v403_v2 }
  0xe9   : > { %v610_v12 = vpop.f32.mrf.mxu0  ;;  %v680_v13 = vpop.f32.mrf.mxu1 }
  0xea   : > { %774 = vst [vmem:[%s1259_s11 + $0x48] sm:$0xff] %v722_v8  ;;  %802 = vst [vmem:[%s1259_s11 + $0x128] sm:$0xff] %v750_v9  ;;  %v723_v15 = vmax.f32 %v609_v10, 0.0  ;;  %v751_v46 = vmax.f32 %v679_v11, 0.0  ;;  %v611_v16 = vadd.f32 %v610_v12, %v1233_v47  ;;  %v681_v17 = vadd.f32 %v680_v13, %v403_v2 }
  0xeb   : > { %v614_v18 = vpop.f32.mrf.mxu0  ;;  %v684_v19 = vpop.f32.mrf.mxu1 }
  0xec   : > { %775 = vst [vmem:[%s1259_s11 + $0x50] sm:$0xff] %v723_v15  ;;  %803 = vst [vmem:[%s1259_s11 + $0x130] sm:$0xff] %v751_v46  ;;  %v724_v20 = vmax.f32 %v611_v16, 0.0  ;;  %v752_v21 = vmax.f32 %v681_v17, 0.0  ;;  %v615_v22 = vadd.f32 %v614_v18, %v1235_v48  ;;  %v685_v23 = vadd.f32 %v684_v19, %v408_v14 }
  0xed   : > { %v616_v24 = vpop.f32.mrf.mxu0  ;;  %v686_v25 = vpop.f32.mrf.mxu1 }
  0xee   : > { %776 = vst [vmem:[%s1259_s11 + $0x58] sm:$0xff] %v724_v20  ;;  %804 = vst [vmem:[%s1259_s11 + $0x138] sm:$0xff] %v752_v21  ;;  %v725_v27 = vmax.f32 %v615_v22, 0.0  ;;  %v753_v47 = vmax.f32 %v685_v23, 0.0  ;;  %v617_v28 = vadd.f32 %v616_v24, %v1235_v48  ;;  %v687_v29 = vadd.f32 %v686_v25, %v408_v14 }
  0xef   : > { %v618_v30 = vpop.f32.mrf.mxu0  ;;  %v688_v31 = vpop.f32.mrf.mxu1 }
  0xf0   : > { %777 = vst [vmem:[%s1259_s11 + $0x60] sm:$0xff] %v725_v27  ;;  %805 = vst [vmem:[%s1259_s11 + $0x140] sm:$0xff] %v753_v47  ;;  %v726_v32 = vmax.f32 %v617_v28, 0.0  ;;  %v754_v33 = vmax.f32 %v687_v29, 0.0  ;;  %v619_v34 = vadd.f32 %v618_v30, %v1237_v49  ;;  %v689_v35 = vadd.f32 %v688_v31, %v413_v26 }
  0xf1   : > { %v620_v36 = vpop.f32.mrf.mxu0  ;;  %v690_v37 = vpop.f32.mrf.mxu1 }
  0xf2   : > { %778 = vst [vmem:[%s1259_s11 + $0x68] sm:$0xff] %v726_v32  ;;  %806 = vst [vmem:[%s1259_s11 + $0x148] sm:$0xff] %v754_v33  ;;  %v727_v39 = vmax.f32 %v619_v34, 0.0  ;;  %v755_v48 = vmax.f32 %v689_v35, 0.0  ;;  %v621_v40 = vadd.f32 %v620_v36, %v1237_v49  ;;  %v691_v41 = vadd.f32 %v690_v37, %v413_v26 }
  0xf3   : > { %v624_v42 = vpop.f32.mrf.mxu0  ;;  %v694_v43 = vpop.f32.mrf.mxu1 }
  0xf4   : > { %779 = vst [vmem:[%s1259_s11 + $0x70] sm:$0xff] %v727_v39  ;;  %807 = vst [vmem:[%s1259_s11 + $0x150] sm:$0xff] %v755_v48  ;;  %v728_v44 = vmax.f32 %v621_v40, 0.0  ;;  %v756_v58 = vmax.f32 %v691_v41, 0.0  ;;  %v625_v59 = vadd.f32 %v624_v42, %v1239_v50  ;;  %v695_v60 = vadd.f32 %v694_v43, %v418_v38 }
  0xf5   : > { %v626_v61 = vpop.f32.mrf.mxu0  ;;  %v696_v62 = vpop.f32.mrf.mxu1 }
  0xf6   : > { %780 = vst [vmem:[%s1259_s11 + $0x78] sm:$0xff] %v728_v44  ;;  %808 = vst [vmem:[%s1259_s11 + $0x158] sm:$0xff] %v756_v58  ;;  %v729_v49 = vmax.f32 %v625_v59, 0.0  ;;  %v757_v0 = vmax.f32 %v695_v60, 0.0  ;;  %v627_v1 = vadd.f32 %v626_v61, %v1239_v50  ;;  %v697_v2 = vadd.f32 %v696_v62, %v418_v38 }
  0xf7   : > { %v628_v3 = vpop.f32.mrf.mxu0  ;;  %v698_v45 = vpop.f32.mrf.mxu1 }
  0xf8   : > { %781 = vst [vmem:[%s1259_s11 + $0x80] sm:$0xff] %v729_v49  ;;  %809 = vst [vmem:[%s1259_s11 + $0x160] sm:$0xff] %v757_v0  ;;  %v730_v4 = vmax.f32 %v627_v1, 0.0  ;;  %v758_v5 = vmax.f32 %v697_v2, 0.0  ;;  %v629_v6 = vadd.f32 %v628_v3, %v1245_v53  ;;  %v699_v7 = vadd.f32 %v698_v45, %v423_v63 }
  0xf9   : > { %v630_v8 = vpop.f32.mrf.mxu0  ;;  %v700_v9 = vpop.f32.mrf.mxu1 }
  0xfa   : > { %782 = vst [vmem:[%s1259_s11 + $0x88] sm:$0xff] %v730_v4  ;;  %810 = vst [vmem:[%s1259_s11 + $0x168] sm:$0xff] %v758_v5  ;;  %v731_v10 = vmax.f32 %v629_v6, 0.0  ;;  %v759_v50 = vmax.f32 %v699_v7, 0.0  ;;  %v631_v11 = vadd.f32 %v630_v8, %v1245_v53  ;;  %v701_v12 = vadd.f32 %v700_v9, %v423_v63 }
  0xfb   : > { %v634_v13 = vpop.f32.mrf.mxu0  ;;  %v704_v14 = vpop.f32.mrf.mxu1 }
  0xfc   : > { %783 = vst [vmem:[%s1259_s11 + $0x90] sm:$0xff] %v731_v10  ;;  %811 = vst [vmem:[%s1259_s11 + $0x170] sm:$0xff] %v759_v50  ;;  %v732_v15 = vmax.f32 %v631_v11, 0.0  ;;  %v760_v46 = vmax.f32 %v701_v12, 0.0  ;;  %v635_v16 = vadd.f32 %v634_v13, %v1247_v54  ;;  %v705_v17 = vadd.f32 %v704_v14, %v1241_v51 }
  0xfd   : > { %v636_v18 = vpop.f32.mrf.mxu0  ;;  %v706_v19 = vpop.f32.mrf.mxu1 }
  0xfe   : > { %784 = vst [vmem:[%s1259_s11 + $0x98] sm:$0xff] %v732_v15  ;;  %812 = vst [vmem:[%s1259_s11 + $0x178] sm:$0xff] %v760_v46  ;;  %v733_v20 = vmax.f32 %v635_v16, 0.0  ;;  %v637_v53 = vadd.f32 %v636_v18, %v1247_v54  ;;  %v707_v21 = vadd.f32 %v706_v19, %v1241_v51  ;;  %v761_v24 = vmax.f32 %v705_v17, 0.0 }
  0xff   : > { %v638_v22 = vpop.f32.mrf.mxu0  ;;  %v708_v23 = vpop.f32.mrf.mxu1 }
 0x100   : > { %785 = vst [vmem:[%s1259_s11 + $0xa0] sm:$0xff] %v733_v20  ;;  %v734_v25 = vmax.f32 %v637_v53, 0.0  ;;  %v762_v26 = vmax.f32 %v707_v21, 0.0  ;;  %v639_v27 = vadd.f32 %v638_v22, %v1249_v55  ;;  %v709_v47 = vadd.f32 %v708_v23, %v1243_v52 }
 0x101   : > { %v640_v54 = vpop.f32.mrf.mxu0  ;;  %v710_v28 = vpop.f32.mrf.mxu1 }
 0x102   : > { %786 = vst [vmem:[%s1259_s11 + $0xa8] sm:$0xff] %v734_v25  ;;  %v999_v51 = vpack.c.bf16 %v762_v26, %v761_v24  ;;  %v735_v29 = vmax.f32 %v639_v27, 0.0  ;;  %v641_v30 = vadd.f32 %v640_v54, %v1249_v55  ;;  %v711_v31 = vadd.f32 %v710_v28, %v1243_v52 }
 0x103   : > { %v644_v32 = vpop.f32.mrf.mxu0  ;;  %v763_v35 = vmax.f32 %v709_v47, 0.0 }
 0x104   : > { %821 = vst [vmem:[%s244_s15] sm:$0xff] %v999_v51  ;;  %787 = vst [vmem:[%s1259_s11 + $0xb0] sm:$0xff] %v735_v29  ;;  %v736_v33 = vmax.f32 %v641_v30, 0.0  ;;  %v645_v34 = vadd.f32 %v644_v32, %v1251_v56  ;;  %v764_v36 = vmax.f32 %v711_v31, 0.0 }
 0x105   : > { %v646_v37 = vpop.f32.mrf.mxu0 }
 0x106   : > { %788 = vst [vmem:[%s1259_s11 + $0xb8] sm:$0xff] %v736_v33  ;;  %v737_v55 = vmax.f32 %v645_v34, 0.0  ;;  %v647_v52 = vadd.f32 %v646_v37, %v1251_v56  ;;  %v1000_v38 = vpack.c.bf16 %v764_v36, %v763_v35 }
 0x107   : > { %v648_v39 = vpop.f32.mrf.mxu0 }
 0x108   : > { %789 = vst [vmem:[%s1259_s11 + $0xc0] sm:$0xff] %v737_v55  ;;  %v738_v48 = vmax.f32 %v647_v52, 0.0  ;;  %v649_v40 = vadd.f32 %v648_v39, %v1253_v57  ;;  %830 = vst [vmem:[%s249_s17] sm:$0xff] %v1000_v38 }
 0x109   : > { %v650_v41 = vpop.f32.mrf.mxu0 }
 0x10a   : > { %790 = vst [vmem:[%s1259_s11 + $0xc8] sm:$0xff] %v738_v48  ;;  %v739_v42 = vmax.f32 %v649_v40, 0.0  ;;  %v651_v43 = vadd.f32 %v650_v41, %v1253_v57 }
 0x10c   : > { %791 = vst [vmem:[%s1259_s11 + $0xd0] sm:$0xff] %v739_v42  ;;  %v740_v44 = vmax.f32 %v651_v43, 0.0 }
 0x10e   : > { %792 = vst [vmem:[%s1259_s11 + $0xd8] sm:$0xff] %v740_v44 }
 0x10f PF: > { %s16_s18 = sadd.s32 1, %s1037_s18  }
 0x110   : > { %p13_p4 = scmp.ge.s32.totalorder %s16_s18, 4  }
 0x112   :  { %15 = sbr.rel (!%p13_p4) target bundleno = 1 (0x1), region = 86 }

// kernel: inception_c_forward.15
= control target key start
LH: loop header
LB: loop body
LE: loop exit
PB: predicated region body
PF: predicated region fallthrough
CT: control target
= control target key end

     0   :  { %s1807_s15 = smov 0   ;;  %s1809_s16 = smov 0   ;;  %s2266_s0 = inlined_call_operand.vmem [shape: bf16[2,16,256], index: 0, kind: input, shape index: {}]   ;;  %s2267_s1 = inlined_call_operand.vmem [shape: bf16[192,16], index: 1, kind: input, shape index: {}]   ;;  %s2268_s2 = inlined_call_operand.vmem [shape: f32[192,1], index: 2, kind: input, shape index: {}]   ;;  %s2269_s3 = inlined_call_operand.vmem [shape: bf16[9,256], index: 3, kind: input, shape index: {}]   ;;  %s2270_s4 = inlined_call_operand.vmem [shape: f32[2,192,256], index: 4, kind: output, shape index: {}]  }
   0x1   :  { %s1811_s17 = smov 0  }
   0x2 LB: > { %s26_s18 = sadd.s32 1, %s1763_s16  ;;  %p1509_p0 = scmp.ge.s32.totalorder %s1767_s17, 1  ;;  %s1767_s17 = sphi %s1811_s17, %s14_s17   ;;  %s1763_s16 = sphi %s1809_s16, %s2272_s16   ;;  %s1759_s15 = sphi %s1807_s15, %s2271_s15  }
   0x3   : > { %p28_p1 = scmp.ge.s32.totalorder %s26_s18, 2  ;;  %p198_p2 = scmp.lt.s32.totalorder %s1767_s17, 3 }
   0x5   : > { %s2274_s18 = smov (%p28_p1, %s26_s18), 0  ;;  %p199_p3 = pnand %p1509_p0, %p198_p2 }
   0x6   : > { %p239_p4 = scmp.lt.s32.totalorder (!%p199_p3), %s1759_s15, 1  ;;  %s1769_s7 = smov (!%p199_p3), 113  }
   0x7   : > { %202 = sbr.rel (%p199_p3) target bundleno = 672 (0x2a0), region = 36  ;;  %s1770_s8 = smov (!%p199_p3), 1  }
   0x8   : > { %s1772_s9 = smov (!%p199_p3), 127   ;;  %s1773_s10 = smov (!%p199_p3), 15  }
   0x9   : > { %s1774_s11 = smov (!%p199_p3), 17   ;;  %s1775_s12 = smov (!%p199_p3), 111  }
   0xa   : > { %s1776_s13 = smov (!%p199_p3), 95   ;;  %s1777_s14 = smov (!%p199_p3), 126  }
   0xb   : > { %s1778_s19 = smov (!%p199_p3), 96   ;;  %s1779_s20 = smov (!%p199_p3), 112  }
   0xc   : > { %v294_v0 = vlaneseq  ;;  %v368_v1 = vld [vmem:[%s2269_s3] sm:$0x22]  ;;  %v551_v2 = vld [vmem:[%s2269_s3] sm:$0x44]  ;;  %v630_v7 = vld [vmem:[%s2269_s3] sm:$0x88] }
   0xd   : > { %v1516_v3 = vcombine.low %v368_v1, %v368_v1  ;;  %v1517_v4 = vcombine.high %v368_v1, %v368_v1  ;;  %v1520_v5 = vcombine.low %v551_v2, %v551_v2  ;;  %v1521_v6 = vcombine.high %v551_v2, %v551_v2  ;;  %v740_v8 = vld [vmem:[%s2269_s3 + $0x8] sm:$0x11]  ;;  %v285_v25 = vld [vmem:[%s2269_s3] sm:$0x11]  ;;  %s2276_s15 = smov (!%p239_p4, %s1759_s15), 1  ;;  %s1780_s21 = smov 110  }
   0xe   : > { %v295_v9 = vshrl.u32 %v294_v0, 7  ;;  %v1523_v10 = vcombine.low %v630_v7, %v630_v7  ;;  %v1524_v11 = vcombine.high %v630_v7, %v630_v7  ;;  %v1526_v12 = vcombine.low %v740_v8, %v740_v8  ;;  %s1561_s29 = sshll.u32 %s2276_s15, 4  ;;  %s1781_s22 = smov 94  }
   0xf   : > { %v375_v13 = vpack.i.b16 %v1516_v3, %v1516_v3  ;;  %v382_v14 = vpack.i.b16 %v1517_v4, %v1517_v4  ;;  %v558_v15 = vshrl.u32 %v1520_v5, 16  ;;  %v566_v16 = vshrl.u32 %v1521_v6, 16  ;;  %s243_s6 = scalar_lea.vmem %s2266_s0, %s1561_s29  ;;  %s1568_s29 = smul.u32 384, %s2276_s15 }
  0x10   : > { %v379_v17 = vsub.s32 1, %v295_v9  ;;  %v563_v18 = vsub.s32 2, %v295_v9  ;;  %v637_v19 = vpack.i.b16 %v1523_v10, %v1523_v10  ;;  %v641_v20 = vsub.s32 3, %v295_v9  ;;  %v1850_v41 = vld [vmem:[%s243_s6] sm:$0xff]  ;;  %v1852_v42 = vld [vmem:[%s243_s6 + $0x8] sm:$0xff] }
  0x11   : > { %v559_v21 = vpack.i.b16 %v558_v15, %v558_v15  ;;  %v567_v22 = vpack.i.b16 %v566_v16, %v566_v16  ;;  %v644_v23 = vpack.i.b16 %v1524_v11, %v1524_v11  ;;  %v445_v24 = vshrl.u32 %v1516_v3, 16  ;;  %279 = vst [vmem:[#allocation2 + $0x4] sm:$0xff] %v1850_v41  ;;  %280 = vst [vmem:[#allocation2 + $0x14] sm:$0xff] %v1852_v42  ;;  %s2189_s6 = scalar_lea.vmem %s2270_s4, %s1568_s29 }
  0x12   : > { %v380_v26 = vrot.slane %v375_v13, %v379_v17  ;;  %v387_v27 = vrot.slane %v382_v14, %v379_v17  ;;  %v642_v28 = vrot.slane %v637_v19, %v641_v20  ;;  %v452_v29 = vshrl.u32 %v1517_v4, 16 }
  0x13   : > { %v564_v30 = vrot.slane %v559_v21, %v563_v18  ;;  %v572_v31 = vrot.slane %v567_v22, %v563_v18  ;;  %v649_v32 = vrot.slane %v644_v23, %v641_v20  ;;  %v446_v33 = vpack.i.b16 %v445_v24, %v445_v24 }
  0x14   : > { %v1518_v34 = vcombine.low %v380_v26, %v387_v27  ;;  %v453_v35 = vpack.i.b16 %v452_v29, %v452_v29  ;;  %v296_v36 = vsub.s32 0, %v295_v9  ;;  %v1527_v37 = vcombine.high %v740_v8, %v740_v8 }
  0x15   : > { %v1522_v38 = vcombine.low %v564_v30, %v572_v31  ;;  %v451_v39 = vrot.slane %v446_v33, %v379_v17  ;;  %v747_v40 = vpack.i.b16 %v1526_v12, %v1526_v12  ;;  %v1513_v45 = vcombine.low %v285_v25, %v285_v25 }
  0x16   : > { %393 = vrot.lane.b32.xlu0 %v1518_v34, %s1769_s7  ;;  %v458_v43 = vrot.slane %v453_v35, %v379_v17  ;;  %v754_v44 = vpack.i.b16 %v1527_v37, %v1527_v37  ;;  %v1514_v46 = vcombine.high %v285_v25, %v285_v25  ;;  %v1525_v47 = vcombine.low %v642_v28, %v649_v32 }
  0x17   : > { %578 = vrot.lane.b32.xlu1 %v1522_v38, %s1770_s8  ;;  %v752_v48 = vrot.slane %v747_v40, %v296_v36  ;;  %v292_v51 = vpack.i.b16 %v1513_v45, %v1513_v45  ;;  %v1771_v53 = vmov 0   ;;  %vm274_vm0 = vcmask 134144  }
  0x18   : > { %v1519_v49 = vcombine.low %v451_v39, %v458_v43  ;;  %v759_v50 = vrot.slane %v754_v44, %v296_v36  ;;  %v299_v52 = vpack.i.b16 %v1514_v46, %v1514_v46  ;;  %272 = vst [vmem:[#allocation2] sm:$0xf] %v1771_v53  ;;  %273 = vst [vmem:[#allocation2 + $0x10] sm:$0xf] %v1771_v53  ;;  %1169 = vmatprep.mubr.bf16.mxu0 %v1771_v53  ;;  %v1865_v58 = vld [vmem:[#allocation2 + $0x8] sm:$0xf] }
  0x19   : > { %1229 = vmatprep.mubr.bf16.mxu1 %v1771_v53  ;;  %1721 = vset.pattern.permute.xlu1 %v1771_v53  ;;  %v297_v55 = vrot.slane %v292_v51, %v296_v36  ;;  %275 = vst.msk [vmem:[#allocation2 + $0xc] sm:$0xf] %vm274_vm0, %v1771_v53  ;;  %276 = vst.msk [vmem:[#allocation2 + $0x1c] sm:$0xf] %vm274_vm0, %v1771_v53  ;;  %v1867_v59 = vld [vmem:[#allocation2 + $0x18] sm:$0xf]  ;;  %v329_v60 = vunpack.c.l.bf16 %v1865_v58  ;;  %v518_v0 = vunpack.c.l.bf16 %v1850_v41  ;;  %v519_v1 = vunpack.c.h.bf16 %v1850_v41 }
  0x1a   : > { %464 = vrot.lane.b32.xlu0 %v1519_v49, %s1772_s9  ;;  %v1528_v54 = vcombine.low %v752_v48, %v759_v50  ;;  %v304_v56 = vrot.slane %v299_v52, %v296_v36  ;;  %v332_v63 = vunpack.c.l.bf16 %v1867_v59  ;;  %v520_v10 = vunpack.c.l.bf16 %v1852_v42 }
  0x1b   : > { %655 = vrot.lane.b32.xlu1 %v1525_v47, %s1773_s10  ;;  %1722 = vset.pattern.permute.xlu0 %v1771_v53  ;;  %v1621_v9 = vpack.i.bf16 %v519_v1, %v518_v0  ;;  %v521_v11 = vunpack.c.h.bf16 %v1852_v42  ;;  %vm396_vm1 = vcmask 924672   ;;  %vm351_vm2 = vcmask 1039360  }
  0x1c   : > { %v1515_v57 = vcombine.low %v297_v55, %v304_v56  ;;  %vm658_vm3 = vcmask 121856   ;;  %vm581_vm4 = vcmask 7168   ;;  %vm768_vm5 = vcmask 138240  }
  0x1d   : > { %v1626_v13 = vpack.i.bf16 %v521_v11, %v520_v10  ;;  %vm313_vm6 = vcmask 908288   ;;  %vm723_vm7 = vcmask 777216   ;;  %vm428_vm8 = vcmask 1031168  }
  0x1e   : > { %765 = vrot.lane.b32.xlu0 %v1528_v54, %s1774_s11  ;;  %vm690_vm9 = vcmask 785408   ;;  %vm499_vm10 = vcmask 916480   ;;  %vm613_vm11 = vcmask 900096   ;;  %vm800_vm12 = vcmask 769024  }
  0x1f   : > { %310 = vrot.lane.b32.xlu1 %v1515_v57, %s1775_s12  ;;  %v1871_v61 = vld [vmem:[#allocation2] sm:$0xff]  ;;  %v1873_v62 = vld [vmem:[#allocation2 + $0x10] sm:$0xff]  ;;  %vm851_vm13 = vcmask 1043456   ;;  %vm1100_vm14 = vcmask 130048  }
  0x20   : > { %v327_v2 = vunpack.c.l.bf16 %v1871_v61  ;;  %v328_v3 = vunpack.c.h.bf16 %v1871_v61  ;;  %v330_v4 = vunpack.c.l.bf16 %v1873_v62  ;;  %v331_v5 = vunpack.c.h.bf16 %v1873_v62  ;;  %v1886_v12 = vld [vmem:[#allocation2 + $0xc] sm:$0xf]  ;;  %v1905_v39 = vld [vmem:[#allocation2 + $0x1c] sm:$0xf] }
  0x21   : > { %v707_v14 = vunpack.c.l.bf16 %v1886_v12 }
  0x22   : > { %v1606_v6 = vpack.i.bf16 %v328_v3, %v327_v2  ;;  %v1611_v7 = vpack.i.bf16 %v330_v4, %v329_v60  ;;  %v1616_v8 = vpack.i.bf16 %v332_v63, %v331_v5 }
  0x23   : > { %v1636_v15 = vpack.i.bf16 %v520_v10, %v707_v14 }
  0x24   : > { %1607 = vrot.lane.b32.xlu0 %v1606_v6, %s1772_s9  ;;  %1612 = vrot.lane.b32.xlu1 %v1611_v7, %s1772_s9 }
  0x28   : > { %1617 = vrot.lane.b32.xlu0 %v1616_v8, %s1772_s9  ;;  %1622 = vrot.lane.b32.xlu1 %v1621_v9, %s1775_s12 }
  0x2c   : > { %1627 = vrot.lane.b32.xlu0 %v1626_v13, %s1775_s12  ;;  %1632 = vrot.lane.b32.xlu1 %v1621_v9, %s1776_s13 }
  0x30   : > { %1637 = vrot.lane.b32.xlu0 %v1636_v15, %s1776_s13 }
  0x88   : > { %v394_v16 = vpop.permute.xlu0 %393 }
  0x89   : > { %v395_v17 = vrot.slane %v394_v16, 4  ;;  %v579_v18 = vpop.permute.xlu1 %578 }
  0x8a   : > { %v1902_v35 = vrot.slane %v579_v18, 4 }
  0x8b   : > { %v397_v19 = vsel %vm396_vm1, %v395_v17, %v394_v16  ;;  %v401_v23 = vmul.bf16 %v395_v17, %v1865_v58  ;;  %v403_v26 = vmul.bf16 %v395_v17, %v1867_v59 }
  0x8c   : > { %v400_v20 = vmul.bf16 %v397_v19, %v1871_v61  ;;  %v402_v21 = vmul.bf16 %v397_v19, %v1873_v62  ;;  %v465_v22 = vpop.permute.xlu0 %464  ;;  %v582_v52 = vsel %vm581_vm4, %v1902_v35, %v579_v18  ;;  %v588_v10 = vmul.bf16 %v1902_v35, %v1905_v39 }
  0x8d   : > { %v656_v24 = vpop.permute.xlu1 %655  ;;  %v1897_v25 = vrot.slane %v465_v22, 4  ;;  %v406_v34 = vunpack.c.l.bf16 %v401_v23  ;;  %v409_v38 = vunpack.c.l.bf16 %v403_v26  ;;  %v585_v0 = vmul.bf16 %v582_v52, %v1850_v41 }
  0x8e   : > { %v404_v27 = vunpack.c.l.bf16 %v400_v20  ;;  %v405_v28 = vunpack.c.h.bf16 %v400_v20  ;;  %v407_v29 = vunpack.c.l.bf16 %v402_v21  ;;  %v657_v30 = vrot.slane %v656_v24, 4 }
  0x8f   : > { %v408_v31 = vunpack.c.h.bf16 %v402_v21  ;;  %v468_v32 = vsel %vm351_vm2, %v1897_v25, %v465_v22  ;;  %v472_v45 = vmul.bf16 %v1897_v25, %v1865_v58  ;;  %v587_v4 = vmul.bf16 %v582_v52, %v1852_v42 }
  0x90   : > { %v1641_v33 = vpack.i.bf16 %v405_v28, %v404_v27  ;;  %v659_v36 = vsel %vm658_vm3, %v657_v30, %v656_v24  ;;  %v663_v37 = vmul.bf16 %v657_v30, %v1886_v12  ;;  %v665_v44 = vmul.bf16 %v657_v30, %v1905_v39  ;;  %v766_v63 = vpop.permute.xlu0 %765 }
  0x91   : > { %v662_v40 = vmul.bf16 %v659_v36, %v1850_v41  ;;  %v664_v43 = vmul.bf16 %v659_v36, %v1852_v42  ;;  %v473_v46 = vmul.bf16 %v468_v32, %v1873_v62  ;;  %v1646_v47 = vpack.i.bf16 %v407_v29, %v406_v34 }
  0x92   : > { %1642 = vrot.lane.b32.xlu1 %v1641_v33, %s1777_s14  ;;  %v1651_v51 = vpack.i.bf16 %v409_v38, %v408_v31  ;;  %v668_v54 = vunpack.c.l.bf16 %v663_v37  ;;  %v471_v57 = vmul.bf16 %v468_v32, %v1871_v61  ;;  %v671_v60 = vunpack.c.l.bf16 %v665_v44 }
  0x93   : > { %v666_v48 = vunpack.c.l.bf16 %v662_v40  ;;  %v667_v49 = vunpack.c.h.bf16 %v662_v40  ;;  %v669_v50 = vunpack.c.l.bf16 %v664_v43  ;;  %1647 = vrot.lane.b32.xlu0 %v1646_v47, %s1777_s14  ;;  %v670_v56 = vunpack.c.h.bf16 %v664_v43 }
  0x94   : > { %v478_v1 = vunpack.c.l.bf16 %v473_v46  ;;  %v477_v3 = vunpack.c.l.bf16 %v472_v45  ;;  %v767_v5 = vrot.slane %v766_v63, 4  ;;  %v474_v6 = vmul.bf16 %v1897_v25, %v1867_v59  ;;  %v311_v45 = vpop.permute.xlu1 %310 }
  0x95   : > { %v1656_v55 = vpack.i.bf16 %v667_v49, %v666_v48  ;;  %v1661_v2 = vpack.i.bf16 %v669_v50, %v668_v54  ;;  %v475_v7 = vunpack.c.l.bf16 %v471_v57  ;;  %v476_v8 = vunpack.c.h.bf16 %v471_v57 }
  0x96   : > { %1652 = vrot.lane.b32.xlu1 %v1651_v51, %s1777_s14  ;;  %v1666_v9 = vpack.i.bf16 %v671_v60, %v670_v56  ;;  %v589_v13 = vunpack.c.l.bf16 %v585_v0  ;;  %v590_v14 = vunpack.c.h.bf16 %v585_v0  ;;  %v1676_v15 = vpack.i.bf16 %v478_v1, %v477_v3 }
  0x97   : > { %1657 = vrot.lane.b32.xlu0 %v1656_v55, %s1778_s19  ;;  %v769_v16 = vsel %vm768_vm5, %v767_v5, %v766_v63  ;;  %v586_v17 = vmul.bf16 %v1902_v35, %v1886_v12  ;;  %v479_v18 = vunpack.c.h.bf16 %v473_v46  ;;  %v1671_v19 = vpack.i.bf16 %v476_v8, %v475_v7 }
  0x98   : > { %v480_v20 = vunpack.c.l.bf16 %v474_v6  ;;  %v593_v21 = vunpack.c.h.bf16 %v587_v4  ;;  %v1686_v22 = vpack.i.bf16 %v590_v14, %v589_v13  ;;  %v594_v23 = vunpack.c.l.bf16 %v588_v10 }
  0x99   : > { %v772_v24 = vmul.bf16 %v769_v16, %v1850_v41  ;;  %v708_v25 = vunpack.c.l.bf16 %v1905_v39  ;;  %v592_v26 = vunpack.c.l.bf16 %v587_v4  ;;  %v591_v28 = vunpack.c.l.bf16 %v586_v17 }
  0x9a   : > { %1662 = vrot.lane.b32.xlu1 %v1661_v2, %s1778_s19  ;;  %v1681_v27 = vpack.i.bf16 %v480_v20, %v479_v18  ;;  %v773_v29 = vmul.bf16 %v767_v5, %v1886_v12  ;;  %v774_v30 = vmul.bf16 %v769_v16, %v1852_v42  ;;  %v1696_v31 = vpack.i.bf16 %v594_v23, %v593_v21  ;;  %v1608_v42 = vpop.permute.xlu0 %1607 }
  0x9b   : > { %1667 = vrot.lane.b32.xlu0 %v1666_v9, %s1778_s19  ;;  %v776_v32 = vunpack.c.l.bf16 %v772_v24  ;;  %v777_v33 = vunpack.c.h.bf16 %v772_v24  ;;  %v1701_v34 = vpack.i.bf16 %v708_v25, %v521_v11  ;;  %v775_v41 = vmul.bf16 %v767_v5, %v1905_v39  ;;  %v1613_v11 = vpop.permute.xlu1 %1612 }
  0x9c   : > { %v1691_v35 = vpack.i.bf16 %v592_v26, %v591_v28  ;;  %v779_v36 = vunpack.c.l.bf16 %v774_v30  ;;  %v778_v37 = vunpack.c.l.bf16 %v773_v29  ;;  %v780_v12 = vunpack.c.h.bf16 %v774_v30 }
  0x9d   : > { %v1706_v38 = vpack.i.bf16 %v777_v33, %v776_v32  ;;  %v781_v40 = vunpack.c.l.bf16 %v775_v41  ;;  %v312_v48 = vrot.slane %v311_v45, 4  ;;  %v1610_v54 = vunpack.i.h.bf16 %v1608_v42 }
  0x9e   : > { %1677 = vrot.lane.b32.xlu1 %v1676_v15, %s1779_s20  ;;  %v1711_v43 = vpack.i.bf16 %v779_v36, %v778_v37  ;;  %v1618_v46 = vpop.permute.xlu0 %1617  ;;  %v1609_v55 = vunpack.i.l.bf16 %v1608_v42  ;;  %v1614_v60 = vunpack.i.l.bf16 %v1613_v11  ;;  %v1615_v1 = vunpack.i.h.bf16 %v1613_v11 }
  0x9f   : > { %1672 = vrot.lane.b32.xlu0 %v1671_v19, %s1779_s20  ;;  %v1716_v44 = vpack.i.bf16 %v781_v40, %v780_v12  ;;  %v1932_v39 = vpop.permute.xlu1 %1622  ;;  %v314_v50 = vsel %vm313_vm6, %v312_v48, %v311_v45  ;;  %v318_v56 = vmul.bf16 %v312_v48, %v1865_v58  ;;  %v320_v63 = vmul.bf16 %v312_v48, %v1867_v59 }
  0xa0   : > { %v317_v52 = vmul.bf16 %v314_v50, %v1871_v61  ;;  %v319_v57 = vmul.bf16 %v314_v50, %v1873_v62  ;;  %v1619_v2 = vunpack.i.l.bf16 %v1618_v46  ;;  %v1620_v3 = vunpack.i.h.bf16 %v1618_v46 }
  0xa1   : > { %v352_v6 = vsel %vm351_vm2, %v1609_v55, %v1610_v54  ;;  %v323_v7 = vunpack.c.l.bf16 %v318_v56  ;;  %v353_v58 = vsel %vm351_vm2, %v1610_v54, %v1614_v60  ;;  %v326_v10 = vunpack.c.l.bf16 %v320_v63 }
  0xa2   : > { %1687 = vrot.lane.b32.xlu1 %v1686_v22, %s1780_s21  ;;  %v1934_v47 = vpop.permute.xlu0 %1627  ;;  %v321_v4 = vunpack.c.l.bf16 %v317_v52  ;;  %v322_v5 = vunpack.c.h.bf16 %v317_v52  ;;  %v324_v8 = vunpack.c.l.bf16 %v319_v57  ;;  %v325_v9 = vunpack.c.h.bf16 %v319_v57 }
  0xa3   : > { %1682 = vrot.lane.b32.xlu0 %v1681_v27, %s1779_s20  ;;  %v1936_v49 = vpop.permute.xlu1 %1632  ;;  %v354_v13 = vsel %vm351_vm2, %v1615_v1, %v1619_v2  ;;  %v1625_v59 = vunpack.i.h.bf16 %v1932_v39  ;;  %v1624_v14 = vunpack.i.l.bf16 %v1932_v39  ;;  %v1630_v15 = vunpack.i.h.bf16 %v1934_v47 }
  0xa4   : > { %v355_v16 = vsel %vm351_vm2, %v1619_v2, %v1620_v3  ;;  %v1629_v17 = vunpack.i.l.bf16 %v1934_v47  ;;  %v362_v20 = vadd.f32 %v352_v6, %v321_v4  ;;  %v363_v21 = vadd.f32 %v353_v58, %v322_v5 }
  0xa5   : > { %v364_v22 = vadd.f32 %v1614_v60, %v323_v7  ;;  %v1635_v24 = vunpack.i.h.bf16 %v1936_v49  ;;  %v1634_v25 = vunpack.i.l.bf16 %v1936_v49  ;;  %v367_v29 = vadd.f32 %v1620_v3, %v326_v10 }
  0xa6   : > { %1697 = vrot.lane.b32.xlu1 %v1696_v31, %s1780_s21  ;;  %v1939_v51 = vpop.permute.xlu0 %1637  ;;  %v365_v30 = vadd.f32 %v354_v13, %v324_v8  ;;  %v366_v31 = vadd.f32 %v355_v16, %v325_v9  ;;  %v535_v33 = vsel %vm313_vm6, %v1624_v14, %v1625_v59 }
  0xa7   : > { %1692 = vrot.lane.b32.xlu0 %v1691_v35, %s1780_s21  ;;  %v1639_v26 = vunpack.i.l.bf16 %v1939_v51  ;;  %v1640_v36 = vunpack.i.h.bf16 %v1939_v51  ;;  %v1977_v12 = vsel %vm723_vm7, %v1634_v25, %v1635_v24 }
  0xa9   : > { %v1980_v40 = vsel %vm723_vm7, %v1635_v24, %v1639_v26 }
  0xaa   : > { %1702 = vrot.lane.b32.xlu1 %v1701_v34, %s1776_s13  ;;  %v1970_v34 = vsel %vm313_vm6, %v1629_v17, %v1630_v15 }
  0xab   : > { %1707 = vrot.lane.b32.xlu0 %v1706_v38, %s1781_s22 }
  0xae   : > { %1712 = vrot.lane.b32.xlu1 %v1711_v43, %s1781_s22 }
  0xaf   : > { %1717 = vrot.lane.b32.xlu0 %v1716_v44, %s1781_s22 }
 0x104   : > { %v1643_v0 = vpop.permute.xlu1 %1642 }
 0x105   : > { %v1648_v61 = vpop.permute.xlu0 %1647  ;;  %v1645_v18 = vunpack.i.h.bf16 %v1643_v0  ;;  %v1644_v19 = vunpack.i.l.bf16 %v1643_v0 }
 0x106   : > { %v1649_v27 = vunpack.i.l.bf16 %v1648_v61  ;;  %v1650_v37 = vunpack.i.h.bf16 %v1648_v61 }
 0x107   : > { %v429_v41 = vsel %vm428_vm8, %v1644_v19, %v1645_v18 }
 0x108   : > { %v1653_v62 = vpop.permute.xlu1 %1652  ;;  %v430_v43 = vsel %vm428_vm8, %v1645_v18, %v1649_v27  ;;  %v439_v45 = vadd.f32 %v429_v41, %v362_v20  ;;  %v441_v48 = vadd.f32 %v1649_v27, %v364_v22 }
 0x109   : > { %v1953_v23 = vpop.permute.xlu0 %1657  ;;  %v1654_v32 = vunpack.i.l.bf16 %v1653_v62  ;;  %v1655_v35 = vunpack.i.h.bf16 %v1653_v62  ;;  %v440_v55 = vadd.f32 %v430_v43, %v363_v21 }
 0x10a   : > { %v1660_v11 = vunpack.i.h.bf16 %v1953_v23  ;;  %v1659_v46 = vunpack.i.l.bf16 %v1953_v23 }
 0x10b   : > { %v431_v42 = vsel %vm428_vm8, %v1650_v37, %v1654_v32  ;;  %v432_v50 = vsel %vm428_vm8, %v1654_v32, %v1655_v35  ;;  %v444_v56 = vadd.f32 %v1655_v35, %v367_v29 }
 0x10c   : > { %v1958_v28 = vpop.permute.xlu1 %1662  ;;  %v442_v0 = vadd.f32 %v431_v42, %v365_v30  ;;  %v443_v5 = vadd.f32 %v432_v50, %v366_v31  ;;  %v691_v6 = vsel %vm690_vm9, %v1659_v46, %v1660_v11 }
 0x10d   : > { %v1668_v38 = vpop.permute.xlu0 %1667  ;;  %v1664_v52 = vunpack.i.l.bf16 %v1958_v28  ;;  %v1665_v57 = vunpack.i.h.bf16 %v1958_v28 }
 0x10e   : > { %v1669_v60 = vunpack.i.l.bf16 %v1668_v38  ;;  %v1670_v1 = vunpack.i.h.bf16 %v1668_v38 }
 0x10f   : > { %v1991_v8 = vsel %vm690_vm9, %v1660_v11, %v1664_v52 }
 0x110   : > { %v1678_v44 = vpop.permute.xlu1 %1677  ;;  %v693_v62 = vsel %vm690_vm9, %v1665_v57, %v1669_v60  ;;  %v694_v20 = vsel %vm690_vm9, %v1669_v60, %v1670_v1 }
 0x111   : > { %v1679_v54 = vunpack.i.l.bf16 %v1678_v44  ;;  %v1673_v63 = vpop.permute.xlu0 %1672  ;;  %v1680_v13 = vunpack.i.h.bf16 %v1678_v44 }
 0x112   : > { %v1675_v2 = vunpack.i.h.bf16 %v1673_v63  ;;  %v1674_v3 = vunpack.i.l.bf16 %v1673_v63 }
 0x113   : > { %v512_v9 = vadd.f32 %v1679_v54, %v441_v48 }
 0x114   : > { %v1688_v4 = vpop.permute.xlu1 %1687  ;;  %v501_v58 = vsel %vm499_vm10, %v1675_v2, %v1679_v54  ;;  %v500_v10 = vsel %vm499_vm10, %v1674_v3, %v1675_v2 }
 0x115   : > { %v1690_v7 = vunpack.i.h.bf16 %v1688_v4  ;;  %v1689_v61 = vunpack.i.l.bf16 %v1688_v4  ;;  %v510_v16 = vadd.f32 %v500_v10, %v439_v45  ;;  %v511_v18 = vadd.f32 %v501_v58, %v440_v55  ;;  %v1683_v19 = vpop.permute.xlu0 %1682 }
 0x116   : > { %v1685_v22 = vunpack.i.h.bf16 %v1683_v19  ;;  %v1684_v23 = vunpack.i.l.bf16 %v1683_v19  ;;  %v545_v31 = vadd.f32 %v1625_v59, %v512_v9 }
 0x117   : > { %v614_v21 = vsel %vm613_vm11, %v1689_v61, %v1690_v7  ;;  %v543_v26 = vadd.f32 %v1624_v14, %v510_v16  ;;  %v544_v27 = vadd.f32 %v535_v33, %v511_v18 }
 0x118   : > { %v1698_v24 = vpop.permute.xlu1 %1697  ;;  %v502_v32 = vsel %vm499_vm10, %v1680_v13, %v1684_v23  ;;  %v503_v41 = vsel %vm499_vm10, %v1684_v23, %v1685_v22  ;;  %v515_v35 = vadd.f32 %v1685_v22, %v444_v56 }
 0x119   : > { %v1700_v29 = vunpack.i.h.bf16 %v1698_v24  ;;  %v1699_v30 = vunpack.i.l.bf16 %v1698_v24  ;;  %v624_v37 = vadd.f32 %v1689_v61, %v543_v26  ;;  %v625_v38 = vadd.f32 %v614_v21, %v544_v27  ;;  %v1693_v45 = vpop.permute.xlu0 %1692 }
 0x11a   : > { %v513_v43 = vadd.f32 %v502_v32, %v442_v0  ;;  %v514_v44 = vadd.f32 %v503_v41, %v443_v5  ;;  %v548_v42 = vadd.f32 %v1630_v15, %v515_v35  ;;  %v1695_v33 = vunpack.i.h.bf16 %v1693_v45 }
 0x11b   : > { %v617_v14 = vsel %vm613_vm11, %v1699_v30, %v1700_v29  ;;  %v1694_v11 = vunpack.i.l.bf16 %v1693_v45  ;;  %v701_v39 = vadd.f32 %v1659_v46, %v624_v37  ;;  %v702_v59 = vadd.f32 %v691_v6, %v625_v38  ;;  %v888_v38 = vld [vmem:[%s2268_s2 + $0x10] sm:$0xff]  ;;  %v887_v45 = vld [vmem:[%s2268_s2 + $0x8] sm:$0xff] }
 0x11c   : > { %v1703_v48 = vpop.permute.xlu1 %1702  ;;  %v546_v50 = vadd.f32 %v1629_v17, %v513_v43  ;;  %v547_v52 = vadd.f32 %v1970_v34, %v514_v44  ;;  %v629_v54 = vadd.f32 %v617_v14, %v548_v42  ;;  %v616_v55 = vsel %vm613_vm11, %v1695_v33, %v1699_v30  ;;  %v889_v43 = vld [vmem:[%s2268_s2 + $0x18] sm:$0xff]  ;;  %v891_v44 = vld [vmem:[%s2268_s2 + $0x28] sm:$0xff]  ;;  %v890_v14 = vld [vmem:[%s2268_s2 + $0x20] sm:$0xff] }
 0x11d   : > { %v615_v56 = vsel %vm613_vm11, %v1690_v7, %v1694_v11  ;;  %v1705_v60 = vunpack.i.h.bf16 %v1703_v48  ;;  %v1704_v1 = vunpack.i.l.bf16 %v1703_v48  ;;  %v1708_v2 = vpop.permute.xlu0 %1707  ;;  %v734_v46 = vadd.f32 %v1634_v25, %v701_v39  ;;  %v893_v42 = vld [vmem:[%s2268_s2 + $0x38] sm:$0xff]  ;;  %v892_v11 = vld [vmem:[%s2268_s2 + $0x30] sm:$0xff]  ;;  %v894_v39 = vld [vmem:[%s2268_s2 + $0x40] sm:$0xff] }
 0x11e   : > { %v626_v63 = vadd.f32 %v615_v56, %v545_v31  ;;  %v627_v15 = vadd.f32 %v1695_v33, %v546_v50  ;;  %v628_v0 = vadd.f32 %v616_v55, %v547_v52  ;;  %v1710_v3 = vunpack.i.h.bf16 %v1708_v2  ;;  %v895_v33 = vld [vmem:[%s2268_s2 + $0x48] sm:$0xff]  ;;  %v897_v48 = vld [vmem:[%s2268_s2 + $0x58] sm:$0xff]  ;;  %v896_v50 = vld [vmem:[%s2268_s2 + $0x50] sm:$0xff] }
 0x11f   : > { %v1709_v4 = vunpack.i.l.bf16 %v1708_v2  ;;  %v735_v17 = vadd.f32 %v1977_v12, %v702_v59  ;;  %v726_v6 = vsel %vm723_vm7, %v1640_v36, %v1704_v1  ;;  %v727_v7 = vsel %vm723_vm7, %v1704_v1, %v1705_v60  ;;  %v899_v59 = vld [vmem:[%s2268_s2 + $0x68] sm:$0xff]  ;;  %v901_v52 = vld [vmem:[%s2268_s2 + $0x78] sm:$0xff]  ;;  %v900_v56 = vld [vmem:[%s2268_s2 + $0x70] sm:$0xff] }
 0x120   : > { %v1713_v47 = vpop.permute.xlu1 %1712  ;;  %v704_v34 = vadd.f32 %v1665_v57, %v627_v15  ;;  %v705_v5 = vadd.f32 %v693_v62, %v628_v0  ;;  %v703_v28 = vadd.f32 %v1991_v8, %v626_v63  ;;  %v706_v23 = vadd.f32 %v694_v20, %v629_v54  ;;  %v886_v20 = vld [vmem:[%s2268_s2] sm:$0xff]  ;;  %v903_v55 = vld [vmem:[%s2268_s2 + $0x88] sm:$0xff]  ;;  %v905_v60 = vld [vmem:[%s2268_s2 + $0x98] sm:$0xff] }
 0x121   : > { %v801_v61 = vsel %vm800_vm12, %v1709_v4, %v1710_v3  ;;  %v811_v9 = vadd.f32 %v1709_v4, %v734_v46  ;;  %v1715_v58 = vunpack.i.h.bf16 %v1713_v47  ;;  %v1714_v10 = vunpack.i.l.bf16 %v1713_v47  ;;  %v1718_v12 = vpop.permute.xlu0 %1717  ;;  %v898_v54 = vld [vmem:[%s2268_s2 + $0x60] sm:$0xff]  ;;  %v907_v15 = vld [vmem:[%s2268_s2 + $0xa8] sm:$0xff]  ;;  %v904_v0 = vld [vmem:[%s2268_s2 + $0x90] sm:$0xff] }
 0x122   : > { %v738_v49 = vadd.f32 %v726_v6, %v705_v5  ;;  %v737_v25 = vadd.f32 %v1640_v36, %v704_v34  ;;  %v812_v13 = vadd.f32 %v801_v61, %v735_v17  ;;  %v1720_v62 = vunpack.i.h.bf16 %v1718_v12  ;;  %v902_v63 = vld [vmem:[%s2268_s2 + $0x80] sm:$0xff]  ;;  %v909_v1 = vld [vmem:[%s2268_s2 + $0xb8] sm:$0xff] }
 0x123   : > { %v817_v57 = vmul.f32 0.11111111, %v811_v9  ;;  %v1719_v16 = vunpack.i.l.bf16 %v1718_v12  ;;  %v802_v18 = vsel %vm800_vm12, %v1710_v3, %v1714_v10  ;;  %v736_v22 = vadd.f32 %v1980_v40, %v703_v28  ;;  %v906_v2 = vld [vmem:[%s2268_s2 + $0xa0] sm:$0xff]  ;;  %v908_v3 = vld [vmem:[%s2268_s2 + $0xb0] sm:$0xff]  ;;  %v1735_v28 = vld [vmem:[%s2267_s1 + $0x8] sm:$0xff]  }
 0x124   : > { %v814_v19 = vadd.f32 %v1715_v58, %v737_v25  ;;  %v818_v21 = vmul.f32 0.11111111, %v812_v13  ;;  %v739_v29 = vadd.f32 %v727_v7, %v706_v23  ;;  %v1733_v12 = vld [vmem:[%s2267_s1] sm:$0xff]   ;;  %v1734_v13 = vld [vmem:[%s2267_s1 + $0x30] sm:$0xff]   ;;  %v1743_v23 = vld [vmem:[%s2267_s1 + $0x28] sm:$0xff]  }
 0x125   : > { %v803_v24 = vsel %vm800_vm12, %v1715_v58, %v1719_v16  ;;  %v813_v27 = vadd.f32 %v802_v18, %v736_v22  ;;  %v804_v36 = vsel %vm800_vm12, %v1719_v16, %v1720_v62  ;;  %v1737_v62 = vld [vmem:[%s2267_s1 + $0x10] sm:$0xff]   ;;  %v1738_v16 = vld [vmem:[%s2267_s1 + $0x40] sm:$0xff]   ;;  %v1739_v18 = vld [vmem:[%s2267_s1 + $0x18] sm:$0xff]  }
 0x126   : > { %v1562_v26 = vpack.c.bf16 %v818_v21, %v817_v57  ;;  %v815_v51 = vadd.f32 %v803_v24, %v738_v49  ;;  %v820_v30 = vmul.f32 0.11111111, %v814_v19  ;;  %v816_v32 = vadd.f32 %v804_v36, %v739_v29  ;;  %v1736_v57 = vld [vmem:[%s2267_s1 + $0x38] sm:$0xff]   ;;  %v1740_v19 = vld [vmem:[%s2267_s1 + $0x48] sm:$0xff]   ;;  %v1741_v21 = vld [vmem:[%s2267_s1 + $0x20] sm:$0xff]  }
 0x127   : > { %v819_v8 = vmul.f32 0.11111111, %v813_v27  ;;  %v1742_v22 = vld [vmem:[%s2267_s1 + $0x50] sm:$0xff]   ;;  %v1744_v24 = vld [vmem:[%s2267_s1 + $0x58] sm:$0xff]  }
 0x128   : > { %839 = vrot.lane.b32.xlu1 %v1562_v26, %s1774_s11  ;;  %v821_v31 = vmul.f32 0.11111111, %v815_v51  ;;  %v822_v37 = vmul.f32 0.11111111, %v816_v32 }
 0x129   : > { %v1563_v41 = vpack.c.bf16 %v819_v8, %v819_v8 }
 0x12a   : > { %v1564_v35 = vpack.c.bf16 %v821_v31, %v820_v30  ;;  %v1565_v40 = vpack.c.bf16 %v822_v37, %v822_v37 }
 0x12b   : > { %841 = vrot.lane.b32.xlu0 %v1563_v41, %s1774_s11 }
 0x12c   : > { %843 = vrot.lane.b32.xlu1 %v1564_v35, %s1774_s11 }
 0x12f   : > { %845 = vrot.lane.b32.xlu0 %v1565_v40, %s1774_s11 }
 0x130   : > { %912 = vperm.xlu1 %1721, %v886_v20  }
 0x133   : > { %917 = vperm.xlu0 %1722, %v887_v45  }
 0x134   : > { %922 = vperm.xlu1 %1721, %v888_v38  }
 0x137   : > { %932 = vperm.xlu0 %1722, %v890_v14  }
 0x138   : > { %927 = vperm.xlu1 %1721, %v889_v43  }
 0x13b   : > { %942 = vperm.xlu0 %1722, %v892_v11  }
 0x13c   : > { %937 = vperm.xlu1 %1721, %v891_v44  }
 0x13f   : > { %952 = vperm.xlu0 %1722, %v894_v39  }
 0x140   : > { %947 = vperm.xlu1 %1721, %v893_v42  }
 0x143   : > { %962 = vperm.xlu0 %1722, %v896_v50  }
 0x144   : > { %957 = vperm.xlu1 %1721, %v895_v33  }
 0x147   : > { %972 = vperm.xlu0 %1722, %v898_v54  }
 0x148   : > { %967 = vperm.xlu1 %1721, %v897_v48  }
 0x14b   : > { %982 = vperm.xlu0 %1722, %v900_v56  }
 0x14c   : > { %977 = vperm.xlu1 %1721, %v899_v59  }
 0x14f   : > { %992 = vperm.xlu0 %1722, %v902_v63  }
 0x150   : > { %987 = vperm.xlu1 %1721, %v901_v52  }
 0x153   : > { %1002 = vperm.xlu0 %1722, %v904_v0  }
 0x154   : > { %997 = vperm.xlu1 %1721, %v903_v55  }
 0x157   : > { %1012 = vperm.xlu0 %1722, %v906_v2  }
 0x158   : > { %1007 = vperm.xlu1 %1721, %v905_v60  }
 0x15b   : > { %1022 = vperm.xlu0 %1722, %v908_v3  }
 0x15c   : > { %1017 = vperm.xlu1 %1721, %v907_v15  }
 0x160   : > { %1027 = vperm.xlu1 %1721, %v909_v1  }
 0x19a   : > { %v840_v4 = vpop.permute.xlu1 %839 }
 0x19b   : > { %v847_v34 = vrot.slane %v840_v4, 4 }
 0x19d   : > { %v842_v46 = vpop.permute.xlu0 %841 }
 0x19e   : > { %v848_v47 = vrot.slane %v842_v46, 4  ;;  %v844_v17 = vpop.permute.xlu1 %843 }
 0x19f   : > { %v849_v6 = vrot.slane %v844_v17, 4 }
 0x1a0   : > { %v852_v61 = vsel %vm851_vm13, %v847_v34, %v848_v47 }
 0x1a1   : > { %v846_v5 = vpop.permute.xlu0 %845  ;;  %v853_v58 = vsel %vm768_vm5, %v840_v4, %v852_v61 }
 0x1a2   : > { %v850_v7 = vrot.slane %v846_v5, 4 }
 0x1a4   : > { %v854_v9 = vsel %vm851_vm13, %v849_v6, %v850_v7 }
 0x1a5   : > { %v855_v10 = vsel %vm768_vm5, %v844_v17, %v854_v9 }
 0x1a6   : > { %v1546_v49 = vcombine.high %v853_v58, %v855_v10  ;;  %v1545_v25 = vcombine.low %v853_v58, %v855_v10 }
 0x1a8   : > { %1151 = vmatprep.subr.bf16.mxu0 %v1546_v49  ;;  %1566 = vmatprep.subr.bf16.mxu1 %v1546_v49 }
 0x1a9   : > { %1152 = vmatpush1.bf16.msra.mxu0 %v1545_v25  ;;  %1567 = vmatpush1.bf16.msra.mxu1 %v1545_v25 }
 0x1ab   : > { %v913_v26 = vpop.permute.xlu1 %912 }
 0x1ac   : > { %1547 = vmatmul.mubr.msk.bf16.vlgmr.msra.gmra.mxu0 %vm1100_vm14, %v1733_v12  ;;  %1553 = vmatmul.mubr.msk.bf16.vlgmr.msra.gmra.mxu1 %vm1100_vm14, %v1734_v13 }
 0x1ad   : > { %1179 = vmatprep.mubr.bf16.mxu0 %v1771_v53  ;;  %1239 = vmatprep.mubr.bf16.mxu1 %v1771_v53 }
 0x1ae   : > { %v918_v51 = vpop.permute.xlu0 %917 }
 0x1af   : > { %v923_v27 = vpop.permute.xlu1 %922 }
 0x1b2   : > { %v2169_v29 = vpop.permute.xlu0 %932 }
 0x1b3   : > { %v2167_v36 = vpop.permute.xlu1 %927 }
 0x1b4   : > { %1548 = vmatmul.mubr.msk.bf16.gmra.mxu0 %vm1100_vm14, %v1735_v28  ;;  %1554 = vmatmul.mubr.msk.bf16.gmra.mxu1 %vm1100_vm14, %v1736_v57 }
 0x1b5   : > { %1189 = vmatprep.mubr.bf16.mxu0 %v1771_v53  ;;  %1249 = vmatprep.mubr.bf16.mxu1 %v1771_v53 }
 0x1b6   : > { %v2173_v30 = vpop.permute.xlu0 %942 }
 0x1ba   : > { %v2177_v31 = vpop.permute.xlu0 %952 }
 0x1bc   : > { %1549 = vmatmul.mubr.msk.bf16.gmra.mxu0 %vm1100_vm14, %v1737_v62  ;;  %1555 = vmatmul.mubr.msk.bf16.gmra.mxu1 %vm1100_vm14, %v1738_v16 }
 0x1bd   : > { %1199 = vmatprep.mubr.bf16.mxu0 %v1771_v53  ;;  %1259 = vmatprep.mubr.bf16.mxu1 %v1771_v53 }
 0x1be   : > { %v2181_v41 = vpop.permute.xlu0 %962 }
 0x1c2   : > { %v973_v37 = vpop.permute.xlu0 %972 }
 0x1c4   : > { %1550 = vmatmul.mubr.msk.bf16.gmra.mxu0 %vm1100_vm14, %v1739_v18  ;;  %1556 = vmatmul.mubr.msk.bf16.gmra.mxu1 %vm1100_vm14, %v1740_v19 }
 0x1c5   : > { %1209 = vmatprep.mubr.bf16.mxu0 %v1771_v53  ;;  %1269 = vmatprep.mubr.bf16.mxu1 %v1771_v53 }
 0x1c6   : > { %v983_v63 = vpop.permute.xlu0 %982 }
 0x1ca   : > { %v993_v18 = vpop.permute.xlu0 %992 }
 0x1cc   : > { %1551 = vmatmul.mubr.msk.bf16.gmra.mxu0 %vm1100_vm14, %v1741_v21  ;;  %1557 = vmatmul.mubr.msk.bf16.gmra.mxu1 %vm1100_vm14, %v1742_v22 }
 0x1cd   : > { %1219 = vmatprep.mubr.bf16.mxu0 %v1771_v53  ;;  %1279 = vmatprep.mubr.bf16.mxu1 %v1771_v53  ;;  %v2171_v53 = vpop.permute.xlu1 %937 }
 0x1d1   : > { %v2175_v8 = vpop.permute.xlu1 %947 }
 0x1d4   : > { %1552 = vmatmul.mubr.msk.bf16.gmra.mxu0 %vm1100_vm14, %v1743_v23  ;;  %1558 = vmatmul.mubr.msk.bf16.gmra.mxu1 %vm1100_vm14, %v1744_v24 }
 0x1d5   : > { %v2179_v32 = vpop.permute.xlu1 %957 }
 0x1d9   : > { %v2183_v35 = vpop.permute.xlu1 %967 }
 0x1dd   : > { %v978_v42 = vpop.permute.xlu1 %977 }
 0x1e1   : > { %v988_v7 = vpop.permute.xlu1 %987 }
 0x26c   : > { %v1171_v40 = vpop.f32.mrf.mxu0  ;;  %v1231_v20 = vpop.f32.mrf.mxu1 }
 0x26d   : > { %v1172_v38 = vadd.f32 %v1171_v40, %v913_v26  ;;  %v1232_v43 = vadd.f32 %v1231_v20, %v973_v37 }
 0x26e   : > { %v1173_v44 = vpop.f32.mrf.mxu0  ;;  %v1233_v45 = vpop.f32.mrf.mxu1 }
 0x26f   : > { %v1290_v14 = vmax.f32 %v1172_v38, 0.0  ;;  %v1314_v33 = vmax.f32 %v1232_v43, 0.0  ;;  %v1174_v11 = vadd.f32 %v1173_v44, %v913_v26  ;;  %v1234_v48 = vadd.f32 %v1233_v45, %v973_v37  ;;  %v998_v43 = vpop.permute.xlu1 %997 }
 0x270   : > { %v1175_v39 = vpop.f32.mrf.mxu0  ;;  %v1235_v59 = vpop.f32.mrf.mxu1 }
 0x271   : > { %1338 = vst [vmem:[%s2189_s6] sm:$0xff] %v1290_v14  ;;  %1362 = vst [vmem:[%s2189_s6 + $0xc0] sm:$0xff] %v1314_v33  ;;  %v1291_v50 = vmax.f32 %v1174_v11, 0.0  ;;  %v1315_v52 = vmax.f32 %v1234_v48, 0.0  ;;  %v1176_v54 = vadd.f32 %v1175_v39, %v918_v51  ;;  %v1236_v55 = vadd.f32 %v1235_v59, %v978_v42 }
 0x272   : > { %v1177_v56 = vpop.f32.mrf.mxu0  ;;  %v1237_v60 = vpop.f32.mrf.mxu1 }
 0x273   : > { %1339 = vst [vmem:[%s2189_s6 + $0x8] sm:$0xff] %v1291_v50  ;;  %1363 = vst [vmem:[%s2189_s6 + $0xc8] sm:$0xff] %v1315_v52  ;;  %v1292_v15 = vmax.f32 %v1176_v54, 0.0  ;;  %v1316_v0 = vmax.f32 %v1236_v55, 0.0  ;;  %v1178_v1 = vadd.f32 %v1177_v56, %v918_v51  ;;  %v1238_v2 = vadd.f32 %v1237_v60, %v978_v42  ;;  %v1003_v54 = vpop.permute.xlu0 %1002 }
 0x274   : > { %v1181_v3 = vpop.f32.mrf.mxu0  ;;  %v1241_v4 = vpop.f32.mrf.mxu1 }
 0x275   : > { %1340 = vst [vmem:[%s2189_s6 + $0x10] sm:$0xff] %v1292_v15  ;;  %1364 = vst [vmem:[%s2189_s6 + $0xd0] sm:$0xff] %v1316_v0  ;;  %v1293_v46 = vmax.f32 %v1178_v1, 0.0  ;;  %v1317_v47 = vmax.f32 %v1238_v2, 0.0  ;;  %v1182_v17 = vadd.f32 %v1181_v3, %v923_v27  ;;  %v1242_v34 = vadd.f32 %v1241_v4, %v983_v63 }
 0x276   : > { %v1183_v5 = vpop.f32.mrf.mxu0  ;;  %v1243_v6 = vpop.f32.mrf.mxu1 }
 0x277   : > { %1341 = vst [vmem:[%s2189_s6 + $0x18] sm:$0xff] %v1293_v46  ;;  %1365 = vst [vmem:[%s2189_s6 + $0xd8] sm:$0xff] %v1317_v47  ;;  %v1294_v61 = vmax.f32 %v1182_v17, 0.0  ;;  %v1318_v9 = vmax.f32 %v1242_v34, 0.0  ;;  %v1184_v58 = vadd.f32 %v1183_v5, %v923_v27  ;;  %v1244_v10 = vadd.f32 %v1243_v6, %v983_v63  ;;  %v1008_v47 = vpop.permute.xlu1 %1007 }
 0x278   : > { %v1185_v49 = vpop.f32.mrf.mxu0  ;;  %v1245_v25 = vpop.f32.mrf.mxu1 }
 0x279   : > { %1342 = vst [vmem:[%s2189_s6 + $0x20] sm:$0xff] %v1294_v61  ;;  %1366 = vst [vmem:[%s2189_s6 + $0xe0] sm:$0xff] %v1318_v9  ;;  %v1295_v12 = vmax.f32 %v1184_v58, 0.0  ;;  %v1319_v13 = vmax.f32 %v1244_v10, 0.0  ;;  %v1186_v28 = vadd.f32 %v1185_v49, %v2167_v36  ;;  %v1246_v57 = vadd.f32 %v1245_v25, %v988_v7 }
 0x27a   : > { %v1187_v62 = vpop.f32.mrf.mxu0  ;;  %v1247_v16 = vpop.f32.mrf.mxu1 }
 0x27b   : > { %1343 = vst [vmem:[%s2189_s6 + $0x28] sm:$0xff] %v1295_v12  ;;  %1367 = vst [vmem:[%s2189_s6 + $0xe8] sm:$0xff] %v1319_v13  ;;  %v1296_v19 = vmax.f32 %v1186_v28, 0.0  ;;  %v1320_v21 = vmax.f32 %v1246_v57, 0.0  ;;  %v1188_v22 = vadd.f32 %v1187_v62, %v2167_v36  ;;  %v1248_v23 = vadd.f32 %v1247_v16, %v988_v7  ;;  %v1013_v12 = vpop.permute.xlu0 %1012 }
 0x27c   : > { %v1191_v24 = vpop.f32.mrf.mxu0  ;;  %v1251_v26 = vpop.f32.mrf.mxu1 }
 0x27d   : > { %1344 = vst [vmem:[%s2189_s6 + $0x30] sm:$0xff] %v1296_v19  ;;  %1368 = vst [vmem:[%s2189_s6 + $0xf0] sm:$0xff] %v1320_v21  ;;  %v1297_v27 = vmax.f32 %v1188_v22, 0.0  ;;  %v1321_v51 = vmax.f32 %v1248_v23, 0.0  ;;  %v1192_v37 = vadd.f32 %v1191_v24, %v2169_v29  ;;  %v1252_v40 = vadd.f32 %v1251_v26, %v993_v18  ;;  %v1018_v26 = vpop.permute.xlu1 %1017 }
 0x27e   : > { %v1193_v20 = vpop.f32.mrf.mxu0  ;;  %v1253_v38 = vpop.f32.mrf.mxu1 }
 0x27f   : > { %1345 = vst [vmem:[%s2189_s6 + $0x38] sm:$0xff] %v1297_v27  ;;  %1369 = vst [vmem:[%s2189_s6 + $0xf8] sm:$0xff] %v1321_v51  ;;  %v1298_v44 = vmax.f32 %v1192_v37, 0.0  ;;  %v1322_v36 = vmax.f32 %v1252_v40, 0.0  ;;  %v1194_v45 = vadd.f32 %v1193_v20, %v2169_v29  ;;  %v1254_v42 = vadd.f32 %v1253_v38, %v993_v18 }
 0x280   : > { %v1195_v14 = vpop.f32.mrf.mxu0  ;;  %v1255_v33 = vpop.f32.mrf.mxu1 }
 0x281   : > { %1346 = vst [vmem:[%s2189_s6 + $0x40] sm:$0xff] %v1298_v44  ;;  %1370 = vst [vmem:[%s2189_s6 + $0x100] sm:$0xff] %v1322_v36  ;;  %v1299_v11 = vmax.f32 %v1194_v45, 0.0  ;;  %v1323_v48 = vmax.f32 %v1254_v42, 0.0  ;;  %v1196_v39 = vadd.f32 %v1195_v14, %v2171_v53  ;;  %v1256_v59 = vadd.f32 %v1255_v33, %v998_v43  ;;  %v1023_v14 = vpop.permute.xlu0 %1022 }
 0x282   : > { %v1197_v50 = vpop.f32.mrf.mxu0  ;;  %v1257_v52 = vpop.f32.mrf.mxu1 }
 0x283   : > { %1347 = vst [vmem:[%s2189_s6 + $0x48] sm:$0xff] %v1299_v11  ;;  %1371 = vst [vmem:[%s2189_s6 + $0x108] sm:$0xff] %v1323_v48  ;;  %v1300_v55 = vmax.f32 %v1196_v39, 0.0  ;;  %v1324_v29 = vmax.f32 %v1256_v59, 0.0  ;;  %v1198_v56 = vadd.f32 %v1197_v50, %v2171_v53  ;;  %v1258_v60 = vadd.f32 %v1257_v52, %v998_v43 }
 0x284   : > { %v1201_v63 = vpop.f32.mrf.mxu0  ;;  %v1261_v15 = vpop.f32.mrf.mxu1 }
 0x285   : > { %1348 = vst [vmem:[%s2189_s6 + $0x50] sm:$0xff] %v1300_v55  ;;  %1372 = vst [vmem:[%s2189_s6 + $0x110] sm:$0xff] %v1324_v29  ;;  %v1301_v0 = vmax.f32 %v1198_v56, 0.0  ;;  %v1325_v1 = vmax.f32 %v1258_v60, 0.0  ;;  %v1202_v2 = vadd.f32 %v1201_v63, %v2173_v30  ;;  %v1262_v3 = vadd.f32 %v1261_v15, %v1003_v54  ;;  %v1028_v60 = vpop.permute.xlu1 %1027 }
 0x286   : > { %v1203_v4 = vpop.f32.mrf.mxu0  ;;  %v1263_v46 = vpop.f32.mrf.mxu1 }
 0x287   : > { %1349 = vst [vmem:[%s2189_s6 + $0x58] sm:$0xff] %v1301_v0  ;;  %1373 = vst [vmem:[%s2189_s6 + $0x118] sm:$0xff] %v1325_v1  ;;  %v1302_v17 = vmax.f32 %v1202_v2, 0.0  ;;  %v1326_v53 = vmax.f32 %v1262_v3, 0.0  ;;  %v1204_v34 = vadd.f32 %v1203_v4, %v2173_v30  ;;  %v1264_v5 = vadd.f32 %v1263_v46, %v1003_v54 }
 0x288   : > { %v1205_v6 = vpop.f32.mrf.mxu0  ;;  %v1265_v7 = vpop.f32.mrf.mxu1 }
 0x289   : > { %1350 = vst [vmem:[%s2189_s6 + $0x60] sm:$0xff] %v1302_v17  ;;  %1374 = vst [vmem:[%s2189_s6 + $0x120] sm:$0xff] %v1326_v53  ;;  %v1303_v61 = vmax.f32 %v1204_v34, 0.0  ;;  %v1327_v9 = vmax.f32 %v1264_v5, 0.0  ;;  %v1206_v58 = vadd.f32 %v1205_v6, %v2175_v8  ;;  %v1266_v10 = vadd.f32 %v1265_v7, %v1008_v47 }
 0x28a   : > { %v1207_v49 = vpop.f32.mrf.mxu0  ;;  %v1267_v25 = vpop.f32.mrf.mxu1 }
 0x28b   : > { %1351 = vst [vmem:[%s2189_s6 + $0x68] sm:$0xff] %v1303_v61  ;;  %1375 = vst [vmem:[%s2189_s6 + $0x128] sm:$0xff] %v1327_v9  ;;  %v1304_v13 = vmax.f32 %v1206_v58, 0.0  ;;  %v1328_v30 = vmax.f32 %v1266_v10, 0.0  ;;  %v1208_v28 = vadd.f32 %v1207_v49, %v2175_v8  ;;  %v1268_v57 = vadd.f32 %v1267_v25, %v1008_v47 }
 0x28c   : > { %v1211_v62 = vpop.f32.mrf.mxu0  ;;  %v1271_v16 = vpop.f32.mrf.mxu1 }
 0x28d   : > { %1352 = vst [vmem:[%s2189_s6 + $0x70] sm:$0xff] %v1304_v13  ;;  %1376 = vst [vmem:[%s2189_s6 + $0x130] sm:$0xff] %v1328_v30  ;;  %v1305_v18 = vmax.f32 %v1208_v28, 0.0  ;;  %v1329_v19 = vmax.f32 %v1268_v57, 0.0  ;;  %v1212_v21 = vadd.f32 %v1211_v62, %v2177_v31  ;;  %v1272_v22 = vadd.f32 %v1271_v16, %v1013_v12 }
 0x28e   : > { %v1213_v23 = vpop.f32.mrf.mxu0  ;;  %v1273_v24 = vpop.f32.mrf.mxu1 }
 0x28f   : > { %1353 = vst [vmem:[%s2189_s6 + $0x78] sm:$0xff] %v1305_v18  ;;  %1377 = vst [vmem:[%s2189_s6 + $0x138] sm:$0xff] %v1329_v19  ;;  %v1306_v27 = vmax.f32 %v1212_v21, 0.0  ;;  %v1330_v8 = vmax.f32 %v1272_v22, 0.0  ;;  %v1214_v51 = vadd.f32 %v1213_v23, %v2177_v31  ;;  %v1274_v37 = vadd.f32 %v1273_v24, %v1013_v12 }
 0x290   : > { %v1215_v40 = vpop.f32.mrf.mxu0  ;;  %v1275_v20 = vpop.f32.mrf.mxu1 }
 0x291   : > { %1354 = vst [vmem:[%s2189_s6 + $0x80] sm:$0xff] %v1306_v27  ;;  %1378 = vst [vmem:[%s2189_s6 + $0x140] sm:$0xff] %v1330_v8  ;;  %v1307_v38 = vmax.f32 %v1214_v51, 0.0  ;;  %v1331_v43 = vmax.f32 %v1274_v37, 0.0  ;;  %v1216_v44 = vadd.f32 %v1215_v40, %v2179_v32  ;;  %v1276_v36 = vadd.f32 %v1275_v20, %v1018_v26 }
 0x292   : > { %v1217_v45 = vpop.f32.mrf.mxu0  ;;  %v1277_v42 = vpop.f32.mrf.mxu1 }
 0x293   : > { %1355 = vst [vmem:[%s2189_s6 + $0x88] sm:$0xff] %v1307_v38  ;;  %1379 = vst [vmem:[%s2189_s6 + $0x148] sm:$0xff] %v1331_v43  ;;  %v1308_v33 = vmax.f32 %v1216_v44, 0.0  ;;  %v1332_v31 = vmax.f32 %v1276_v36, 0.0  ;;  %v1218_v11 = vadd.f32 %v1217_v45, %v2179_v32  ;;  %v1278_v48 = vadd.f32 %v1277_v42, %v1018_v26 }
 0x294   : > { %v1221_v39 = vpop.f32.mrf.mxu0  ;;  %v1281_v59 = vpop.f32.mrf.mxu1 }
 0x295   : > { %1356 = vst [vmem:[%s2189_s6 + $0x90] sm:$0xff] %v1308_v33  ;;  %1380 = vst [vmem:[%s2189_s6 + $0x150] sm:$0xff] %v1332_v31  ;;  %v1309_v50 = vmax.f32 %v1218_v11, 0.0  ;;  %v1333_v52 = vmax.f32 %v1278_v48, 0.0  ;;  %v1222_v54 = vadd.f32 %v1221_v39, %v2181_v41  ;;  %v1282_v55 = vadd.f32 %v1281_v59, %v1023_v14 }
 0x296   : > { %v1223_v29 = vpop.f32.mrf.mxu0  ;;  %v1283_v56 = vpop.f32.mrf.mxu1 }
 0x297   : > { %1357 = vst [vmem:[%s2189_s6 + $0x98] sm:$0xff] %v1309_v50  ;;  %1381 = vst [vmem:[%s2189_s6 + $0x158] sm:$0xff] %v1333_v52  ;;  %v1310_v32 = vmax.f32 %v1222_v54, 0.0  ;;  %v1334_v63 = vmax.f32 %v1282_v55, 0.0  ;;  %v1224_v15 = vadd.f32 %v1223_v29, %v2181_v41  ;;  %v1284_v0 = vadd.f32 %v1283_v56, %v1023_v14 }
 0x298   : > { %v1225_v1 = vpop.f32.mrf.mxu0  ;;  %v1285_v2 = vpop.f32.mrf.mxu1 }
 0x299   : > { %1358 = vst [vmem:[%s2189_s6 + $0xa0] sm:$0xff] %v1310_v32  ;;  %1382 = vst [vmem:[%s2189_s6 + $0x160] sm:$0xff] %v1334_v63  ;;  %v1311_v3 = vmax.f32 %v1224_v15, 0.0  ;;  %v1335_v4 = vmax.f32 %v1284_v0, 0.0  ;;  %v1226_v46 = vadd.f32 %v1225_v1, %v2183_v35  ;;  %v1286_v47 = vadd.f32 %v1285_v2, %v1028_v60 }
 0x29a   : > { %v1227_v17 = vpop.f32.mrf.mxu0  ;;  %v1287_v53 = vpop.f32.mrf.mxu1 }
 0x29b   : > { %1359 = vst [vmem:[%s2189_s6 + $0xa8] sm:$0xff] %v1311_v3  ;;  %1383 = vst [vmem:[%s2189_s6 + $0x168] sm:$0xff] %v1335_v4  ;;  %v1312_v34 = vmax.f32 %v1226_v46, 0.0  ;;  %v1336_v41 = vmax.f32 %v1286_v47, 0.0  ;;  %v1228_v5 = vadd.f32 %v1227_v17, %v2183_v35  ;;  %v1288_v6 = vadd.f32 %v1287_v53, %v1028_v60 }
 0x29d   : > { %1360 = vst [vmem:[%s2189_s6 + $0xb0] sm:$0xff] %v1312_v34  ;;  %1384 = vst [vmem:[%s2189_s6 + $0x170] sm:$0xff] %v1336_v41  ;;  %v1313_v7 = vmax.f32 %v1228_v5, 0.0  ;;  %v1337_v61 = vmax.f32 %v1288_v6, 0.0 }
 0x29f   : > { %1361 = vst [vmem:[%s2189_s6 + $0xb8] sm:$0xff] %v1313_v7  ;;  %1385 = vst [vmem:[%s2189_s6 + $0x178] sm:$0xff] %v1337_v61 }
 0x2a0 PF: > { %s14_s17 = sadd.s32 1, %s1767_s17   ;;  %s2271_s15 = smov %s1763_s16 }
 0x2a1   : > { %p11_p5 = scmp.ge.s32.totalorder %s14_s17, 4   ;;  %s2272_s16 = smov %s2274_s18 }
 0x2a3   :  { %13 = sbr.rel (!%p11_p5) target bundleno = 2 (0x2), region = 76 }

// kernel: inception_c_forward.12
= control target key start
LH: loop header
LB: loop body
LE: loop exit
PB: predicated region body
PF: predicated region fallthrough
CT: control target
= control target key end

     0   :  { %s1237_s15 = smov 0   ;;  %s1239_s16 = smov 0   ;;  %s1400_s0 = inlined_call_operand.vmem [shape: bf16[2,8,256], index: 0, kind: input, shape index: {}]   ;;  %s1401_s1 = inlined_call_operand.vmem [shape: bf16[7,8,8], index: 1, kind: input, shape index: {}]   ;;  %s1402_s2 = inlined_call_operand.vmem [shape: f32[8,1], index: 2, kind: input, shape index: {}]   ;;  %s1403_s3 = inlined_call_operand.vmem [shape: bf16[7,256], index: 3, kind: input, shape index: {}]   ;;  %s1404_s4 = inlined_call_operand.vmem [shape: bf16[2,8,256], index: 4, kind: output, shape index: {}]  }
   0x1   :  { %s1241_s17 = smov 0  }
   0x2 LB: > { %s26_s18 = sadd.s32 1, %s1199_s16  ;;  %p1076_p0 = scmp.ge.s32.totalorder %s1203_s17, 1  ;;  %s1203_s17 = sphi %s1241_s17, %s14_s17   ;;  %s1199_s16 = sphi %s1239_s16, %s1406_s16   ;;  %s1195_s15 = sphi %s1237_s15, %s1405_s15  }
   0x3   : > { %p28_p1 = scmp.ge.s32.totalorder %s26_s18, 2  ;;  %p194_p2 = scmp.lt.s32.totalorder %s1203_s17, 3 }
   0x5   : > { %s1408_s18 = smov (%p28_p1, %s26_s18), 0  ;;  %p195_p3 = pnand %p1076_p0, %p194_p2 }
   0x6   : > { %p232_p4 = scmp.lt.s32.totalorder (!%p195_p3), %s1195_s15, 1  ;;  %s1205_s5 = smov (!%p195_p3), 127  }
   0x7   : > { %198 = sbr.rel (%p195_p3) target bundleno = 504 (0x1f8), region = 36  ;;  %s1206_s6 = smov (!%p195_p3), 126  }
   0x8   : > { %s1208_s7 = smov (!%p195_p3), 1   ;;  %s1209_s8 = smov (!%p195_p3), 125  }
   0x9   : > { %s1210_s9 = smov (!%p195_p3), 3   ;;  %s1211_s10 = smov (!%p195_p3), 2  }
   0xc   : > { %v266_v0 = vld [vmem:[%s1403_s3] sm:$0x11]  ;;  %v275_v1 = vlaneseq  ;;  %v467_v2 = vld [vmem:[%s1403_s3] sm:$0x22]  ;;  %v634_v7 = vld [vmem:[%s1403_s3] sm:$0x44] }
   0xd   : > { %v1081_v3 = vcombine.low %v266_v0, %v266_v0  ;;  %v1082_v4 = vcombine.high %v266_v0, %v266_v0  ;;  %v1096_v5 = vcombine.low %v467_v2, %v467_v2  ;;  %v1097_v6 = vcombine.high %v467_v2, %v467_v2  ;;  %v834_v8 = vld [vmem:[%s1403_s3] sm:$0x88]  ;;  %s1410_s15 = smov (!%p232_p4, %s1195_s15), 1 }
   0xe   : > { %v276_v9 = vshrl.u32 %v275_v1, 7  ;;  %v1110_v10 = vcombine.low %v634_v7, %v634_v7  ;;  %v1111_v11 = vcombine.high %v634_v7, %v634_v7  ;;  %v1126_v12 = vcombine.low %v834_v8, %v834_v8  ;;  %s1138_s27 = sshll.u32 %s1410_s15, 3 }
   0xf   : > { %v301_v13 = vshrl.u32 %v1081_v3, 16  ;;  %v308_v14 = vshrl.u32 %v1082_v4, 16  ;;  %v273_v15 = vpack.i.b16 %v1081_v3, %v1081_v3  ;;  %v280_v16 = vpack.i.b16 %v1082_v4, %v1082_v4  ;;  %s236_s30 = scalar_lea.vmem %s1400_s0, %s1138_s27 }
  0x10   : > { %v277_v17 = vsub.s32 0, %v276_v9  ;;  %v474_v18 = vpack.i.b16 %v1096_v5, %v1096_v5  ;;  %v478_v19 = vsub.s32 1, %v276_v9  ;;  %v481_v20 = vpack.i.b16 %v1097_v6, %v1097_v6  ;;  %v1279_v40 = vld [vmem:[%s236_s30] sm:$0xff] }
  0x11   : > { %v302_v21 = vpack.i.b16 %v301_v13, %v301_v13  ;;  %v309_v22 = vpack.i.b16 %v308_v14, %v308_v14  ;;  %v641_v23 = vpack.i.b16 %v1110_v10, %v1110_v10  ;;  %v645_v24 = vsub.s32 2, %v276_v9  ;;  %263 = vst [vmem:[#allocation2 + $0x4] sm:$0xff] %v1279_v40 }
  0x12   : > { %v278_v25 = vrot.slane %v273_v15, %v277_v17  ;;  %v285_v26 = vrot.slane %v280_v16, %v277_v17  ;;  %v479_v27 = vrot.slane %v474_v18, %v478_v19  ;;  %v486_v28 = vrot.slane %v481_v20, %v478_v19 }
  0x13   : > { %v307_v29 = vrot.slane %v302_v21, %v277_v17  ;;  %v314_v30 = vrot.slane %v309_v22, %v277_v17  ;;  %v646_v31 = vrot.slane %v641_v23, %v645_v24  ;;  %v648_v32 = vpack.i.b16 %v1111_v11, %v1111_v11 }
  0x14   : > { %v1098_v33 = vcombine.low %v479_v27, %v486_v28  ;;  %v1127_v34 = vcombine.high %v834_v8, %v834_v8  ;;  %v841_v35 = vpack.i.b16 %v1126_v12, %v1126_v12  ;;  %v845_v38 = vsub.s32 3, %v276_v9 }
  0x15   : > { %v1084_v36 = vcombine.low %v307_v29, %v314_v30  ;;  %v653_v37 = vrot.slane %v648_v32, %v645_v24  ;;  %v737_v39 = vshrl.u32 %v1110_v10, 16  ;;  %v1083_v41 = vcombine.low %v278_v25, %v285_v26 }
  0x16   : > { %492 = vrot.lane.b32.xlu1 %v1098_v33, %s1205_s5  ;;  %v848_v42 = vpack.i.b16 %v1127_v34, %v1127_v34  ;;  %v744_v43 = vshrl.u32 %v1111_v11, 16  ;;  %v846_v45 = vrot.slane %v841_v35, %v845_v38  ;;  %v1207_v47 = vmov 0  }
  0x17   : > { %320 = vrot.lane.b32.xlu0 %v1084_v36, %s1206_s6  ;;  %v1112_v44 = vcombine.low %v646_v31, %v653_v37  ;;  %v738_v46 = vpack.i.b16 %v737_v39, %v737_v39  ;;  %259 = vst [vmem:[#allocation2] sm:$0xf] %v1207_v47  ;;  %391 = vmatprep.mubr.bf16.mxu0 %v1207_v47  ;;  %vm260_vm0 = vcmask 19456   ;;  %vm323_vm1 = vcmask 1031168  }
  0x18   : > { %v853_v48 = vrot.slane %v848_v42, %v845_v38  ;;  %v745_v49 = vpack.i.b16 %v744_v43, %v744_v43  ;;  %458 = vmatprep.mubr.bf16.mxu1 %v1207_v47  ;;  %1172 = vset.pattern.permute.xlu0 %v1207_v47  ;;  %261 = vst.msk [vmem:[#allocation2 + $0xc] sm:$0xf] %vm260_vm0, %v1207_v47  ;;  %v265_v55 = vld [vmem:[#allocation2 + $0x8] sm:$0xf]  ;;  %vm294_vm2 = vcmask 1022976   ;;  %vm495_vm3 = vcmask 1039360  }
  0x19   : > { %v743_v50 = vrot.slane %v738_v46, %v645_v24  ;;  %vm517_vm4 = vcmask 7168   ;;  %vm414_vm5 = vcmask 23552   ;;  %vm345_vm6 = vcmask 15360   ;;  %v937_v42 = vld [vmem:[%s1402_s2] sm:$0xff] }
  0x1a   : > { %659 = vrot.lane.b32.xlu1 %v1112_v44, %s1208_s7  ;;  %v1128_v51 = vcombine.low %v846_v45, %v853_v48  ;;  %v750_v52 = vrot.slane %v745_v49, %v645_v24  ;;  %vm352_vm7 = vcmask 1043456   ;;  %v1107_v49 = vcombine.high %v1279_v40, %v1279_v40 }
  0x1b   : > { %291 = vrot.lane.b32.xlu0 %v1083_v41, %s1209_s8  ;;  %vm348_vm8 = vcmask 64512  }
  0x1c   : > { %v1119_v53 = vcombine.low %v743_v50, %v750_v52  ;;  %v1106_v50 = vcombine.low %v1279_v40, %v1279_v40 }
  0x1e   : > { %859 = vrot.lane.b32.xlu1 %v1128_v51, %s1210_s9  ;;  %v264_v63 = vld [vmem:[#allocation2] sm:$0xff] }
  0x1f   : > { %756 = vrot.lane.b32.xlu0 %v1119_v53, %s1211_s10  ;;  %v633_v22 = vld [vmem:[#allocation2 + $0xc] sm:$0xf] }
  0x88   : > { %v493_v57 = vpop.permute.xlu1 %492 }
  0x89   : > { %v321_v54 = vpop.permute.xlu0 %320  ;;  %v494_v62 = vrot.slane %v493_v57, 4 }
  0x8a   : > { %v322_v56 = vrot.slane %v321_v54, 4 }
  0x8b   : > { %v496_v5 = vsel %vm495_vm3, %v494_v62, %v493_v57  ;;  %v500_v16 = vmul.bf16 %v494_v62, %v265_v55 }
  0x8c   : > { %v328_v58 = vmul.bf16 %v322_v56, %v265_v55  ;;  %v324_v0 = vsel %vm323_vm1, %v322_v56, %v321_v54  ;;  %v660_v8 = vpop.permute.xlu1 %659  ;;  %v499_v9 = vmul.bf16 %v496_v5, %v264_v63  ;;  %v300_v54 = vld [vmem:[%s1401_s1] sm:$0xf]  ;;  %v584_v56 = vsel %vm352_vm7, %v1106_v50, 0 }
  0x8d   : > { %v292_v59 = vpop.permute.xlu0 %291  ;;  %v327_v6 = vmul.bf16 %v324_v0, %v264_v63  ;;  %v661_v12 = vrot.slane %v660_v8, 4  ;;  %v1102_v23 = vcombine.low %v500_v16, %v500_v16 }
  0x8e   : > { %v293_v60 = vrot.slane %v292_v59, 4  ;;  %v1088_v61 = vcombine.low %v328_v58, %v328_v58  ;;  %v1100_v13 = vcombine.low %v499_v9, %v499_v9  ;;  %v1101_v21 = vcombine.high %v499_v9, %v499_v9 }
  0x8f   : > { %v1086_v11 = vcombine.low %v327_v6, %v327_v6  ;;  %v1087_v14 = vcombine.high %v327_v6, %v327_v6  ;;  %v662_v17 = vsel %vm517_vm4, %v661_v12, %v660_v8  ;;  %v666_v26 = vmul.bf16 %v661_v12, %v633_v22  ;;  %v1099_v6 = vld [vmem:[%s1401_s1 + $0x8] sm:$0xf] }
  0x90   : > { %v295_v1 = vsel %vm294_vm2, %v293_v60, %v292_v59  ;;  %v299_v2 = vmul.bf16 %v293_v60, %v265_v55  ;;  %343 = vrot.lane.b32.xlu0 %v1088_v61, %s1211_s10  ;;  %v860_v18 = vpop.permute.xlu1 %859  ;;  %v665_v20 = vmul.bf16 %v662_v17, %v1279_v40  ;;  %v1085_v60 = vld [vmem:[%s1401_s1 + $0x4] sm:$0xf] }
  0x91   : > { %v298_v3 = vmul.bf16 %v295_v1, %v264_v63  ;;  %v757_v15 = vpop.permute.xlu0 %756  ;;  %v861_v24 = vrot.slane %v860_v18, 4  ;;  %v1116_v33 = vcombine.low %v666_v26, %v666_v26 }
  0x92   : > { %v1093_v4 = vcombine.low %v299_v2, %v299_v2  ;;  %v758_v19 = vrot.slane %v757_v15, 4  ;;  %v1114_v27 = vcombine.low %v665_v20, %v665_v20  ;;  %v1115_v29 = vcombine.high %v665_v20, %v665_v20  ;;  %v1105_v2 = vld [vmem:[%s1401_s1 + $0xc] sm:$0xf]  ;;  %v1120_v20 = vld [vmem:[%s1401_s1 + $0x14] sm:$0xf] }
  0x93   : > { %v1092_v7 = vcombine.high %v298_v3, %v298_v3  ;;  %v1091_v10 = vcombine.low %v298_v3, %v298_v3  ;;  %v862_v28 = vsel %vm414_vm5, %v861_v24, %v860_v18  ;;  %v866_v37 = vmul.bf16 %v861_v24, %v633_v22  ;;  %v1129_v24 = vld [vmem:[%s1401_s1 + $0x18] sm:$0xf] }
  0x94   : > { %412 = vrot.lane.b32.xlu1 %v1093_v4, %s1210_s9  ;;  %v763_v25 = vmul.bf16 %v758_v19, %v633_v22  ;;  %v759_v30 = vsel %vm345_vm6, %v758_v19, %v757_v15  ;;  %v865_v32 = vmul.bf16 %v862_v28, %v1279_v40 }
  0x95   : > { %410 = vrot.lane.b32.xlu0 %v1092_v7, %s1210_s9  ;;  %v762_v34 = vmul.bf16 %v759_v30, %v1279_v40  ;;  %v1132_v41 = vcombine.low %v866_v37, %v866_v37 }
  0x96   : > { %v1123_v31 = vcombine.low %v763_v25, %v763_v25  ;;  %v1130_v35 = vcombine.low %v865_v32, %v865_v32  ;;  %v1131_v39 = vcombine.high %v865_v32, %v865_v32 }
  0x97   : > { %v1121_v36 = vcombine.low %v762_v34, %v762_v34  ;;  %v1122_v38 = vcombine.high %v762_v34, %v762_v34 }
  0x98   : > { %408 = vrot.lane.b32.xlu1 %v1091_v10, %s1210_s9 }
  0x99   : > { %339 = vrot.lane.b32.xlu0 %v1086_v11, %s1211_s10 }
  0x9c   : > { %341 = vrot.lane.b32.xlu1 %v1087_v14, %s1211_s10 }
  0x9d   : > { %511 = vrot.lane.b32.xlu0 %v1100_v13, %s1208_s7  ;;  %v1113_v13 = vld [vmem:[%s1401_s1 + $0x10] sm:$0xf] }
  0xa0   : > { %513 = vrot.lane.b32.xlu1 %v1101_v21, %s1208_s7 }
  0xa1   : > { %515 = vrot.lane.b32.xlu0 %v1102_v23, %s1208_s7 }
  0xa4   : > { %677 = vrot.lane.b32.xlu1 %v1114_v27, %s1205_s5 }
  0xa5   : > { %679 = vrot.lane.b32.xlu0 %v1115_v29, %s1205_s5 }
  0xa8   : > { %681 = vrot.lane.b32.xlu1 %v1116_v33, %s1205_s5 }
  0xa9   : > { %778 = vrot.lane.b32.xlu0 %v1123_v31, %s1206_s6 }
  0xac   : > { %877 = vrot.lane.b32.xlu1 %v1130_v35, %s1209_s8 }
  0xad   : > { %774 = vrot.lane.b32.xlu0 %v1121_v36, %s1206_s6 }
  0xb0   : > { %776 = vrot.lane.b32.xlu1 %v1122_v38, %s1206_s6 }
  0xb1   : > { %879 = vrot.lane.b32.xlu0 %v1131_v39, %s1209_s8 }
  0xb4   : > { %881 = vrot.lane.b32.xlu1 %v1132_v41, %s1209_s8  ;;  %s253_s8 = scalar_lea.vmem %s1404_s4, %s1138_s27 }
  0xb5   : > { %940 = vperm.xlu0 %1172, %v937_v42  }
 0x102   : > { %v344_v43 = vpop.permute.xlu0 %343 }
 0x106   : > { %v413_v44 = vpop.permute.xlu1 %412 }
 0x107   : > { %v411_v45 = vpop.permute.xlu0 %410 }
 0x108   : > { %v416_v46 = vsel %vm414_vm5, %v411_v45, %v413_v44 }
 0x109   : > { %1094 = vmatprep.subr.msk.bf16.mxu1 %vm352_vm7, %v416_v46 }
 0x10a   : > { %v409_v48 = vpop.permute.xlu1 %408 }
 0x10b   : > { %v340_v51 = vpop.permute.xlu0 %339  ;;  %v415_v52 = vsel %vm414_vm5, %v409_v48, %v411_v45 }
 0x10c   : > { %v421_v53 = vsel %vm352_vm7, %v415_v52, 0 }
 0x10d   : > { %441 = vmatpush1.bf16.msra.mxu1 %v421_v53 }
 0x10e   : > { %v342_v55 = vpop.permute.xlu1 %341  ;;  %1108 = vmatprep.subr.msk.bf16.mxu1 %vm352_vm7, %v1107_v49 }
 0x10f   : > { %v512_v57 = vpop.permute.xlu0 %511  ;;  %v347_v58 = vsel %vm345_vm6, %v342_v55, %v344_v43  ;;  %v346_v40 = vsel %vm345_vm6, %v340_v51, %v342_v55 }
 0x110   : > { %1089 = vmatprep.subr.msk.bf16.mxu0 %vm352_vm7, %v347_v58  ;;  %v354_v59 = vsel %vm352_vm7, %v346_v40, 0  ;;  %1095 = vmatmul.mubr.msk.bf16.vlgmr.msra.gmra.mxu1 %vm348_vm8, %v300_v54 }
 0x111   : > { %374 = vmatpush1.bf16.msra.mxu0 %v354_v59  ;;  %604 = vmatpush1.bf16.msra.mxu1 %v584_v56 }
 0x112   : > { %v514_v61 = vpop.permute.xlu1 %513  ;;  %621 = vmatprep.mubr.bf16.mxu1 %v1207_v47 }
 0x113   : > { %v518_v62 = vsel %vm517_vm4, %v512_v57, %v514_v61  ;;  %v516_v63 = vpop.permute.xlu0 %515 }
 0x114   : > { %v524_v0 = vsel %vm352_vm7, %v518_v62, 0  ;;  %v519_v1 = vsel %vm517_vm4, %v514_v61, %v516_v63  ;;  %1090 = vmatmul.mubr.msk.bf16.vlgmr.msra.gmra.mxu0 %vm348_vm8, %v1085_v60 }
 0x115   : > { %1103 = vmatprep.subr.msk.bf16.mxu0 %vm352_vm7, %v519_v1  ;;  %561 = vmatprep.mubr.bf16.mxu0 %v1207_v47 }
 0x116   : > { %544 = vmatpush1.bf16.msra.mxu0 %v524_v0  ;;  %v678_v3 = vpop.permute.xlu1 %677 }
 0x117   : > { %v680_v4 = vpop.permute.xlu0 %679 }
 0x118   : > { %1109 = vmatmul.mubr.msk.bf16.vlgmr.msra.gmra.mxu1 %vm348_vm8, %v1105_v2  ;;  %v683_v5 = vsel %vm495_vm3, %v678_v3, %v680_v4 }
 0x119   : > { %823 = vmatprep.mubr.bf16.mxu1 %v1207_v47  ;;  %v689_v10 = vsel %vm352_vm7, %v683_v5, 0 }
 0x11a   : > { %v682_v7 = vpop.permute.xlu1 %681 }
 0x11b   : > { %v684_v8 = vsel %vm495_vm3, %v680_v4, %v682_v7  ;;  %v779_v9 = vpop.permute.xlu0 %778 }
 0x11c   : > { %1104 = vmatmul.mubr.msk.bf16.vlgmr.msra.gmra.mxu0 %vm348_vm8, %v1099_v6  ;;  %1117 = vmatprep.subr.msk.bf16.mxu0 %vm352_vm7, %v684_v8 }
 0x11d   : > { %709 = vmatpush1.bf16.msra.mxu0 %v689_v10  ;;  %726 = vmatprep.mubr.bf16.mxu0 %v1207_v47 }
 0x11e   : > { %v878_v11 = vpop.permute.xlu1 %877 }
 0x11f   : > { %v775_v12 = vpop.permute.xlu0 %774 }
 0x122   : > { %v777_v14 = vpop.permute.xlu1 %776 }
 0x123   : > { %v780_v15 = vsel %vm323_vm1, %v775_v12, %v777_v14  ;;  %v781_v16 = vsel %vm323_vm1, %v777_v14, %v779_v9  ;;  %v880_v17 = vpop.permute.xlu0 %879 }
 0x124   : > { %v786_v18 = vsel %vm352_vm7, %v780_v15, 0  ;;  %1118 = vmatmul.mubr.msk.bf16.vlgmr.msra.gmra.mxu0 %vm348_vm8, %v1113_v13  ;;  %1124 = vmatprep.subr.msk.bf16.mxu1 %vm352_vm7, %v781_v16  ;;  %v883_v19 = vsel %vm294_vm2, %v878_v11, %v880_v17 }
 0x125   : > { %806 = vmatpush1.bf16.msra.mxu1 %v786_v18  ;;  %926 = vmatprep.mubr.bf16.mxu0 %v1207_v47  ;;  %v889_v23 = vsel %vm352_vm7, %v883_v19, 0 }
 0x126   : > { %v882_v21 = vpop.permute.xlu1 %881 }
 0x127   : > { %v884_v22 = vsel %vm294_vm2, %v880_v17, %v882_v21 }
 0x128   : > { %1125 = vmatmul.mubr.msk.bf16.vlgmr.msra.gmra.mxu1 %vm348_vm8, %v1120_v20  ;;  %1133 = vmatprep.subr.msk.bf16.mxu0 %vm352_vm7, %v884_v22 }
 0x129   : > { %909 = vmatpush1.bf16.msra.mxu0 %v889_v23 }
 0x12c   : > { %1134 = vmatmul.mubr.msk.bf16.vlgmr.msra.gmra.mxu0 %vm348_vm8, %v1129_v24 }
 0x130   : > { %v941_v57 = vpop.permute.xlu0 %940 }
 0x1d0   : > { %v460_v25 = vpop.f32.mrf.mxu1 }
 0x1d2   : > { %v462_v26 = vpop.f32.mrf.mxu1 }
 0x1d4   : > { %v393_v27 = vpop.f32.mrf.mxu0  ;;  %v464_v47 = vpop.f32.mrf.mxu1 }
 0x1d5   : > { %v461_v39 = vadd.f32 %v460_v25, %v393_v27 }
 0x1d6   : > { %v395_v28 = vpop.f32.mrf.mxu0  ;;  %v465_v29 = vpop.f32.mrf.mxu1 }
 0x1d7   : > { %v463_v42 = vadd.f32 %v462_v26, %v395_v28 }
 0x1d8   : > { %v397_v30 = vpop.f32.mrf.mxu0  ;;  %v623_v31 = vpop.f32.mrf.mxu1 }
 0x1da   : > { %v398_v32 = vpop.f32.mrf.mxu0  ;;  %v625_v33 = vpop.f32.mrf.mxu1 }
 0x1dc   : > { %v563_v34 = vpop.f32.mrf.mxu0  ;;  %v627_v35 = vpop.f32.mrf.mxu1 }
 0x1dd   : > { %v570_v43 = vadd.f32 %v563_v34, %v461_v39 }
 0x1de   : > { %v565_v36 = vpop.f32.mrf.mxu0  ;;  %v628_v37 = vpop.f32.mrf.mxu1 }
 0x1df   : > { %v571_v45 = vadd.f32 %v565_v36, %v463_v42  ;;  %v630_v48 = vadd.f32 %v623_v31, %v570_v43 }
 0x1e0   : > { %v567_v38 = vpop.f32.mrf.mxu0 }
 0x1e1   : > { %v631_v51 = vadd.f32 %v625_v33, %v571_v45 }
 0x1e2   : > { %v568_v41 = vpop.f32.mrf.mxu0 }
 0x1e4   : > { %v728_v44 = vpop.f32.mrf.mxu0 }
 0x1e5   : > { %v735_v52 = vadd.f32 %v728_v44, %v630_v48 }
 0x1e6   : > { %v730_v46 = vpop.f32.mrf.mxu0 }
 0x1e7   : > { %v736_v55 = vadd.f32 %v730_v46, %v631_v51 }
 0x1e8   : > { %v732_v49 = vpop.f32.mrf.mxu0  ;;  %v825_v50 = vpop.f32.mrf.mxu1 }
 0x1e9   : > { %v832_v56 = vadd.f32 %v825_v50, %v735_v52 }
 0x1ea   : > { %v733_v53 = vpop.f32.mrf.mxu0  ;;  %v827_v54 = vpop.f32.mrf.mxu1 }
 0x1eb   : > { %v833_v59 = vadd.f32 %v827_v54, %v736_v55 }
 0x1ec   : > { %v928_v58 = vpop.f32.mrf.mxu0  ;;  %v829_v40 = vpop.f32.mrf.mxu1 }
 0x1ed   : > { %v935_v60 = vadd.f32 %v928_v58, %v832_v56 }
 0x1ee   : > { %v930_v61 = vpop.f32.mrf.mxu0  ;;  %v830_v62 = vpop.f32.mrf.mxu1 }
 0x1ef   : > { %v943_v63 = vadd.f32 %v941_v57, %v935_v60  ;;  %v936_v0 = vadd.f32 %v930_v61, %v833_v59 }
 0x1f0   : > { %v932_v1 = vpop.f32.mrf.mxu0 }
 0x1f1   : > { %v944_v2 = vadd.f32 %v941_v57, %v936_v0  ;;  %v945_v4 = vmax.f32 %v943_v63, 0.0 }
 0x1f2   : > { %v933_v3 = vpop.f32.mrf.mxu0 }
 0x1f3   : > { %v946_v5 = vmax.f32 %v944_v2, 0.0 }
 0x1f5   : > { %v1140_v6 = vpack.c.bf16 %v946_v5, %v945_v4 }
 0x1f7   : > { %955 = vst [vmem:[%s253_s8] sm:$0xff] %v1140_v6 }
 0x1f8 PF: > { %s14_s17 = sadd.s32 1, %s1203_s17   ;;  %s1405_s15 = smov %s1199_s16 }
 0x1f9   : > { %p11_p5 = scmp.ge.s32.totalorder %s14_s17, 4   ;;  %s1406_s16 = smov %s1408_s18 }
 0x1fb   :  { %13 = sbr.rel (!%p11_p5) target bundleno = 2 (0x2), region = 82 }

// kernel: inception_c_forward.10
= control target key start
LH: loop header
LB: loop body
LE: loop exit
PB: predicated region body
PF: predicated region fallthrough
CT: control target
= control target key end

     0   :  { %s3452_s12 = smov 0   ;;  %s3454_s13 = smov 0   ;;  %s4500_s0 = inlined_call_operand.vmem [shape: bf16[2,8,256], index: 0, kind: input, shape index: {}]   ;;  %s4501_s1 = inlined_call_operand.vmem [shape: bf16[7,192,8], index: 1, kind: input, shape index: {}]   ;;  %s4502_s2 = inlined_call_operand.vmem [shape: f32[192,1], index: 2, kind: input, shape index: {}]   ;;  %s4503_s3 = inlined_call_operand.vmem [shape: f32[2,192,256], index: 3, kind: output, shape index: {}]  }
   0x1   :  { %s3456_s14 = smov 0  }
   0x2 LB: > { %s25_s15 = sadd.s32 1, %s3419_s13  ;;  %p2942_p0 = scmp.ge.s32.totalorder %s3423_s14, 1  ;;  %s3423_s14 = sphi %s3456_s14, %s13_s14   ;;  %s3419_s13 = sphi %s3454_s13, %s4509_s13   ;;  %s3415_s12 = sphi %s3452_s12, %s4508_s12  }
   0x3   : > { %p27_p1 = scmp.ge.s32.totalorder %s25_s15, 2  ;;  %p173_p2 = scmp.lt.s32.totalorder %s3423_s14, 3 }
   0x5   : > { %s4511_s15 = smov (%p27_p1, %s25_s15), 0  ;;  %p174_p3 = pnand %p2942_p0, %p173_p2 }
   0x7   : > { %177 = sbr.rel (%p174_p3) target bundleno = 688 (0x2b0), region = 32 }
   0xc   : > { %p212_p4 = scmp.lt.s32.totalorder %s3415_s12, 1  ;;  %vm246_vm0 = vcmask 388096   ;;  %v3425_v0 = vmov 0   ;;  %s3426_s20 = smov 32   ;;  %vm375_vm1 = vcmask 261120   ;;  %vm415_vm2 = vcmask 1043456  }
   0xd   : > { %245 = vst [vmem:[#allocation2] sm:$0xf] %v3425_v0  ;;  %247 = vst.msk [vmem:[#allocation2 + $0xc] sm:$0xf] %vm246_vm0, %v3425_v0  ;;  %514 = vmatprep.mubr.bf16.mxu1 %v3425_v0  ;;  %454 = vmatprep.mubr.bf16.mxu0 %v3425_v0  ;;  %s3427_s21 = smov 48   ;;  %s3428_s22 = smov 16  }
   0xe   : > { %s4513_s12 = smov (!%p212_p4, %s3415_s12), 1  ;;  %3310 = vset.pattern.permute.xlu0 %v3425_v0  ;;  %3311 = vset.pattern.permute.xlu1 %v3425_v0  ;;  %s3429_s23 = smov 112   ;;  %vm641_vm3 = vcmask 392192   ;;  %v3317_v16 = vld [vmem:[%s4501_s1 + $0x90] sm:$0xff]   ;;  %vm378_vm4 = vcmask 64512   ;;  %v3318_v18 = vld [vmem:[%s4501_s1 + $0x60] sm:$0xff]  }
   0xf   : > { %s3275_s16 = sshll.u32 %s4513_s12, 3  ;;  %s3430_s24 = smov 96   ;;  %vm930_vm5 = vcmask 130048   ;;  %v3319_v26 = vld [vmem:[%s4501_s1 + $0x98] sm:$0xff]   ;;  %v3320_v30 = vld [vmem:[%s4501_s1 + $0x68] sm:$0xff]   ;;  %vm1611_vm6 = vcmask 916480  }
  0x10   : > { %s216_s19 = scalar_lea.vmem %s4500_s0, %s3275_s16  ;;  %s3431_s25 = smov 80   ;;  %v3321_v35 = vld [vmem:[%s4501_s1 + $0xa0] sm:$0xff]   ;;  %vm1948_vm7 = vcmask 785408   ;;  %v3322_v36 = vld [vmem:[%s4501_s1 + $0x70] sm:$0xff]   ;;  %v3323_v41 = vld [vmem:[%s4501_s1 + $0xa8] sm:$0xff]   ;;  %vm2285_vm8 = vcmask 654336  }
  0x11   : > { %v248_v1 = vld [vmem:[%s216_s19] sm:$0xff]  ;;  %v3324_v42 = vld [vmem:[%s4501_s1 + $0x78] sm:$0xff]   ;;  %v3325_v46 = vld [vmem:[%s4501_s1 + $0xb0] sm:$0xff]   ;;  %s3278_s8 = smul.u32 384, %s4513_s12 }
  0x12   : > { %249 = vst [vmem:[#allocation2 + $0x4] sm:$0xff] %v248_v1  ;;  %v3482_v6 = vcombine.low %v248_v1, %v248_v1  ;;  %v3160_v8 = vcombine.high %v248_v1, %v248_v1  ;;  %v3326_v47 = vld [vmem:[%s4501_s1 + $0x80] sm:$0xff]   ;;  %v3327_v48 = vld [vmem:[%s4501_s1 + $0xb8] sm:$0xff]   ;;  %v3328_v49 = vld [vmem:[%s4501_s1 + $0x88] sm:$0xff]  }
  0x13   : > { %v3329_v50 = vld [vmem:[%s4501_s1] sm:$0xff]   ;;  %v3331_v58 = vld [vmem:[%s4501_s1 + $0x8] sm:$0xff]   ;;  %v3333_v60 = vld [vmem:[%s4501_s1 + $0x10] sm:$0xff]   ;;  %s4396_s11 = scalar_lea.vmem %s4503_s3, %s3278_s8 }
  0x14   : > { %v3316_v7 = vld [vmem:[#allocation2 + $0xc] ss:$0 sps:$4 sm:$0xff]   ;;  %v3330_v52 = vld [vmem:[%s4501_s1 + $0xc0] sm:$0xff]   ;;  %v1304_v53 = vsel %vm415_vm2, %v3482_v6, 0  ;;  %v3334_v61 = vld [vmem:[%s4501_s1 + $0xd0] sm:$0xff]  }
  0x15   : > { %v3332_v59 = vld [vmem:[%s4501_s1 + $0xc8] sm:$0xff]   ;;  %v3335_v62 = vld [vmem:[%s4501_s1 + $0x18] sm:$0xff]   ;;  %v3337_v1 = vld [vmem:[%s4501_s1 + $0x20] sm:$0xff]  }
  0x16   : > { %v3336_v63 = vld [vmem:[%s4501_s1 + $0xd8] sm:$0xff]  }
  0x19   : > { %v3312_v2 = vld [vmem:[#allocation2 + $0x8] ss:$0 sps:$4 sm:$0xff]   ;;  %v250_v3 = vld [vmem:[#allocation2] sm:$0xff] }
  0x1a   : > { %v2982_v4 = vcombine.low %v250_v3, %v250_v3  ;;  %373 = vrot.lane.b32.xlu1 %v3312_v2, %s3426_s20  ;;  %v2983_v5 = vcombine.high %v250_v3, %v250_v3  ;;  %v3339_v3 = vld [vmem:[%s4501_s1 + $0x28] sm:$0xff]  }
  0x1c   : > { %369 = vrot.lane.b32.xlu0 %v2982_v4, %s3426_s20 }
  0x1e   : > { %635 = vrot.lane.b32.xlu1 %v2982_v4, %s3427_s21 }
  0x20   : > { %371 = vrot.lane.b32.xlu0 %v2983_v5, %s3426_s20 }
  0x22   : > { %639 = vrot.lane.b32.xlu1 %v3312_v2, %s3427_s21 }
  0x24   : > { %637 = vrot.lane.b32.xlu0 %v2983_v5, %s3427_s21 }
  0x26   : > { %926 = vrot.lane.b32.xlu1 %v2983_v5, %s3428_s22  ;;  %v3341_v5 = vld [vmem:[%s4501_s1 + $0x30] sm:$0xff]  }
  0x28   : > { %924 = vrot.lane.b32.xlu0 %v2982_v4, %s3428_s22  ;;  %v3340_v4 = vld [vmem:[%s4501_s1 + $0xe8] sm:$0xff]  }
  0x2a   : > { %1605 = vrot.lane.b32.xlu1 %v3482_v6, %s3429_s23 }
  0x2c   : > { %928 = vrot.lane.b32.xlu0 %v3312_v2, %s3428_s22  ;;  %v3338_v2 = vld [vmem:[%s4501_s1 + $0xe0] sm:$0xff]  }
  0x2e   : > { %1609 = vrot.lane.b32.xlu1 %v3316_v7, %s3429_s23 }
  0x30   : > { %1607 = vrot.lane.b32.xlu0 %v3160_v8, %s3429_s23 }
  0x32   : > { %1944 = vrot.lane.b32.xlu1 %v3160_v8, %s3430_s24 }
  0x34   : > { %1942 = vrot.lane.b32.xlu0 %v3482_v6, %s3430_s24 }
  0x36   : > { %2279 = vrot.lane.b32.xlu1 %v3482_v6, %s3431_s25  ;;  %v3342_v6 = vld [vmem:[%s4501_s1 + $0xf0] sm:$0xff]  }
  0x38   : > { %1946 = vrot.lane.b32.xlu0 %v3316_v7, %s3430_s24 }
  0x3a   : > { %2283 = vrot.lane.b32.xlu1 %v3316_v7, %s3431_s25  ;;  %v3343_v7 = vld [vmem:[%s4501_s1 + $0x38] sm:$0xff]  }
  0x3c   : > { %2281 = vrot.lane.b32.xlu0 %v3160_v8, %s3431_s25 }
  0x8c   : > { %v374_v9 = vpop.permute.xlu1 %373 }
  0x8e   : > { %v370_v10 = vpop.permute.xlu0 %369 }
  0x90   : > { %v636_v11 = vpop.permute.xlu1 %635 }
  0x92   : > { %v372_v12 = vpop.permute.xlu0 %371 }
  0x93   : > { %v377_v13 = vsel %vm375_vm1, %v372_v12, %v374_v9  ;;  %v376_v14 = vsel %vm375_vm1, %v370_v10, %v372_v12  ;;  %v3345_v9 = vld [vmem:[%s4501_s1 + $0x40] sm:$0xff]   ;;  %v3348_v12 = vld [vmem:[%s4501_s1 + $0x108] sm:$0xff]  }
  0x94   : > { %2985 = vmatprep.subr.msk.bf16.mxu0 %vm415_vm2, %v377_v13  ;;  %3276 = vmatprep.subr.msk.bf16.mxu1 %vm415_vm2, %v377_v13  ;;  %v417_v15 = vsel %vm415_vm2, %v376_v14, 0  ;;  %v640_v17 = vpop.permute.xlu1 %639  ;;  %v3346_v10 = vld [vmem:[%s4501_s1 + $0x100] sm:$0xff]   ;;  %v3349_v13 = vld [vmem:[%s4501_s1 + $0x50] sm:$0xff]  }
  0x95   : > { %437 = vmatpush1.bf16.msra.mxu0 %v417_v15  ;;  %3277 = vmatpush1.bf16.msra.mxu1 %v417_v15  ;;  %v3350_v14 = vld [vmem:[%s4501_s1 + $0x110] sm:$0xff]   ;;  %v3351_v15 = vld [vmem:[%s4501_s1 + $0x58] sm:$0xff]  }
  0x96   : > { %v638_v19 = vpop.permute.xlu0 %637 }
  0x97   : > { %v642_v20 = vsel %vm641_vm3, %v636_v11, %v638_v19  ;;  %v643_v21 = vsel %vm641_vm3, %v638_v19, %v640_v17  ;;  %v3347_v11 = vld [vmem:[%s4501_s1 + $0x48] sm:$0xff]   ;;  %v3353_v17 = vld [vmem:[%s4501_s1 + $0x120] sm:$0xff]  }
  0x98   : > { %v681_v22 = vsel %vm415_vm2, %v642_v20, 0  ;;  %2992 = vmatmul.mubr.msk.bf16.vlgmr.msra.gmra.mxu1 %vm378_vm4, %v3317_v16  ;;  %3010 = vmatprep.subr.msk.bf16.mxu1 %vm415_vm2, %v643_v21  ;;  %v927_v23 = vpop.permute.xlu1 %926  ;;  %v3352_v16 = vld [vmem:[%s4501_s1 + $0x118] sm:$0xff]   ;;  %v3354_v19 = vld [vmem:[%s4501_s1 + $0x180] sm:$0xff]   ;;  %v3355_v21 = vld [vmem:[%s4501_s1 + $0x128] sm:$0xff]  }
  0x99   : > { %701 = vmatpush1.bf16.msra.mxu1 %v681_v22  ;;  %2986 = vmatmul.mubr.msk.bf16.vlgmr.msra.gmra.mxu0 %vm378_vm4, %v3318_v18  ;;  %v3356_v22 = vld [vmem:[%s4501_s1 + $0x188] sm:$0xff]  }
  0x9a   : > { %v925_v24 = vpop.permute.xlu0 %924  ;;  %524 = vmatprep.mubr.bf16.mxu1 %v3425_v0  ;;  %464 = vmatprep.mubr.bf16.mxu0 %v3425_v0 }
  0x9b   : > { %v931_v25 = vsel %vm930_vm5, %v925_v24, %v927_v23  ;;  %3110 = vmatprep.subr.msk.bf16.mxu1 %vm415_vm2, %v3160_v8  ;;  %v3344_v8 = vld [vmem:[%s4501_s1 + $0xf8] sm:$0xff]   ;;  %v3358_v24 = vld [vmem:[%s4501_s1 + $0x190] sm:$0xff]  }
  0x9c   : > { %v1606_v27 = vpop.permute.xlu1 %1605  ;;  %v970_v28 = vsel %vm415_vm2, %v931_v25, 0  ;;  %v3359_v25 = vld [vmem:[%s4501_s1 + $0x138] sm:$0xff]  }
  0x9e   : > { %v929_v29 = vpop.permute.xlu0 %928 }
  0x9f   : > { %v932_v31 = vsel %vm930_vm5, %v927_v23, %v929_v29  ;;  %v3357_v23 = vld [vmem:[%s4501_s1 + $0x130] sm:$0xff]   ;;  %v3363_v29 = vld [vmem:[%s4501_s1 + $0x148] sm:$0xff]  }
  0xa0   : > { %2993 = vmatmul.mubr.msk.bf16.gmra.mxu1 %vm378_vm4, %v3319_v26  ;;  %3059 = vmatprep.subr.msk.bf16.mxu0 %vm415_vm2, %v932_v31  ;;  %v1610_v32 = vpop.permute.xlu1 %1609  ;;  %v3360_v26 = vld [vmem:[%s4501_s1 + $0x198] sm:$0xff]   ;;  %v2531_v31 = vld [vmem:[%s4502_s2] sm:$0xff] }
  0xa1   : > { %990 = vmatpush1.bf16.msra.mxu0 %v970_v28  ;;  %534 = vmatprep.mubr.bf16.mxu1 %v3425_v0  ;;  %v3362_v28 = vld [vmem:[%s4501_s1 + $0x1a0] sm:$0xff]  }
  0xa2   : > { %2987 = vmatmul.mubr.msk.bf16.gmra.mxu0 %vm378_vm4, %v3320_v30  ;;  %v1608_v33 = vpop.permute.xlu0 %1607  ;;  %v3364_v30 = vld [vmem:[%s4501_s1 + $0x1a8] sm:$0xff]   ;;  %2557 = vperm.xlu0 %3310, %v2531_v31  }
  0xa3   : > { %474 = vmatprep.mubr.bf16.mxu0 %v3425_v0  ;;  %v1613_v34 = vsel %vm1611_vm6, %v1608_v33, %v1610_v32  ;;  %v1612_v51 = vsel %vm1611_vm6, %v1606_v27, %v1608_v33  ;;  %v3361_v27 = vld [vmem:[%s4501_s1 + $0x140] sm:$0xff]   ;;  %v3365_v32 = vld [vmem:[%s4501_s1 + $0x150] sm:$0xff]   ;;  %v2532_v33 = vld [vmem:[%s4502_s2 + $0x8] sm:$0xff] }
  0xa4   : > { %3162 = vmatprep.subr.msk.bf16.mxu0 %vm415_vm2, %v1613_v34  ;;  %v1945_v37 = vpop.permute.xlu1 %1944  ;;  %v1651_v56 = vsel %vm415_vm2, %v1612_v51, 0  ;;  %v3366_v34 = vld [vmem:[%s4501_s1 + $0x1b0] sm:$0xff]   ;;  %2562 = vperm.xlu1 %3311, %v2532_v33   ;;  %v3375_v33 = vld [vmem:[%s4501_s1 + $0x178] sm:$0xff]  }
  0xa6   : > { %v1943_v38 = vpop.permute.xlu0 %1942 }
  0xa7   : > { %v3524_v39 = vsel %vm1948_vm7, %v1943_v38, %v1945_v37 }
  0xa8   : > { %2994 = vmatmul.mubr.msk.bf16.gmra.mxu1 %vm378_vm4, %v3321_v35  ;;  %v2280_v43 = vpop.permute.xlu1 %2279  ;;  %v1988_v18 = vsel %vm415_vm2, %v3524_v39, 0 }
  0xa9   : > { %544 = vmatprep.mubr.bf16.mxu1 %v3425_v0 }
  0xaa   : > { %2988 = vmatmul.mubr.msk.bf16.gmra.mxu0 %vm378_vm4, %v3322_v36  ;;  %v1947_v40 = vpop.permute.xlu0 %1946 }
  0xab   : > { %484 = vmatprep.mubr.bf16.mxu0 %v3425_v0  ;;  %v1950_v55 = vsel %vm1948_vm7, %v1945_v37, %v1947_v40  ;;  %v2533_v37 = vld [vmem:[%s4502_s2 + $0x10] sm:$0xff] }
  0xac   : > { %v2284_v54 = vpop.permute.xlu1 %2283  ;;  %2567 = vperm.xlu1 %3311, %v2533_v37   ;;  %v2550_v37 = vld [vmem:[%s4502_s2 + $0x98] sm:$0xff] }
  0xae   : > { %v2282_v44 = vpop.permute.xlu0 %2281 }
  0xaf   : > { %v3537_v45 = vsel %vm2285_vm8, %v2280_v43, %v2282_v44  ;;  %v2287_v57 = vsel %vm2285_vm8, %v2282_v44, %v2284_v54  ;;  %v3369_v54 = vld [vmem:[%s4501_s1 + $0x160] sm:$0xff]  }
  0xb0   : > { %2995 = vmatmul.mubr.msk.bf16.gmra.mxu1 %vm378_vm4, %v3323_v41  ;;  %v2325_v20 = vsel %vm415_vm2, %v3537_v45, 0  ;;  %v3367_v41 = vld [vmem:[%s4501_s1 + $0x158] sm:$0xff]  }
  0xb1   : > { %554 = vmatprep.mubr.bf16.mxu1 %v3425_v0  ;;  %v3368_v45 = vld [vmem:[%s4501_s1 + $0x1b8] sm:$0xff]  }
  0xb2   : > { %2989 = vmatmul.mubr.msk.bf16.gmra.mxu0 %vm378_vm4, %v3324_v42  ;;  %v2534_v42 = vld [vmem:[%s4502_s2 + $0x18] sm:$0xff] }
  0xb3   : > { %494 = vmatprep.mubr.bf16.mxu0 %v3425_v0  ;;  %2572 = vperm.xlu0 %3310, %v2534_v42  }
  0xb8   : > { %2996 = vmatmul.mubr.msk.bf16.gmra.mxu1 %vm378_vm4, %v3325_v46 }
  0xb9   : > { %564 = vmatprep.mubr.bf16.mxu1 %v3425_v0 }
  0xba   : > { %2990 = vmatmul.mubr.msk.bf16.gmra.mxu0 %vm378_vm4, %v3326_v47 }
  0xbb   : > { %504 = vmatprep.mubr.bf16.mxu0 %v3425_v0 }
  0xc0   : > { %2997 = vmatmul.mubr.msk.bf16.gmra.mxu1 %vm378_vm4, %v3327_v48  ;;  %v2535_v48 = vld [vmem:[%s4502_s2 + $0x20] sm:$0xff] }
  0xc1   : > { %718 = vmatprep.mubr.bf16.mxu1 %v3425_v0  ;;  %2577 = vperm.xlu1 %3311, %v2535_v48  }
  0xc2   : > { %2991 = vmatmul.mubr.msk.bf16.gmra.mxu0 %vm378_vm4, %v3328_v49  ;;  %v2536_v49 = vld [vmem:[%s4502_s2 + $0x28] sm:$0xff] }
  0xc3   : > { %1007 = vmatprep.mubr.bf16.mxu0 %v3425_v0  ;;  %2582 = vperm.xlu0 %3310, %v2536_v49  }
  0xc8   : > { %3011 = vmatmul.mubr.msk.bf16.vlgmr.msra.gmra.mxu1 %vm378_vm4, %v3329_v50 }
  0xc9   : > { %728 = vmatprep.mubr.bf16.mxu1 %v3425_v0  ;;  %1324 = vmatpush1.bf16.msra.mxu1 %v1304_v53 }
  0xca   : > { %3060 = vmatmul.mubr.msk.bf16.vlgmr.msra.gmra.mxu0 %vm378_vm4, %v3330_v52  ;;  %3211 = vmatprep.subr.msk.bf16.mxu1 %vm415_vm2, %v1950_v55  ;;  %v2537_v55 = vld [vmem:[%s4502_s2 + $0x30] sm:$0xff] }
  0xcb   : > { %1671 = vmatpush1.bf16.msra.mxu0 %v1651_v56  ;;  %1017 = vmatprep.mubr.bf16.mxu0 %v3425_v0  ;;  %v2538_v56 = vld [vmem:[%s4502_s2 + $0x38] sm:$0xff] }
  0xcc   : > { %3260 = vmatprep.subr.msk.bf16.mxu0 %vm415_vm2, %v2287_v57  ;;  %2587 = vperm.xlu1 %3311, %v2537_v55   ;;  %v2552_v55 = vld [vmem:[%s4502_s2 + $0xa8] sm:$0xff] }
  0xcd   : > { %2592 = vperm.xlu0 %3310, %v2538_v56  }
  0xd0   : > { %3012 = vmatmul.mubr.msk.bf16.gmra.mxu1 %vm378_vm4, %v3331_v58 }
  0xd1   : > { %738 = vmatprep.mubr.bf16.mxu1 %v3425_v0 }
  0xd2   : > { %3061 = vmatmul.mubr.msk.bf16.gmra.mxu0 %vm378_vm4, %v3332_v59  ;;  %v3370_v59 = vld [vmem:[%s4501_s1 + $0x1c0] sm:$0xff]  }
  0xd3   : > { %1027 = vmatprep.mubr.bf16.mxu0 %v3425_v0 }
  0xd8   : > { %3013 = vmatmul.mubr.msk.bf16.gmra.mxu1 %vm378_vm4, %v3333_v60 }
  0xd9   : > { %748 = vmatprep.mubr.bf16.mxu1 %v3425_v0 }
  0xda   : > { %3062 = vmatmul.mubr.msk.bf16.gmra.mxu0 %vm378_vm4, %v3334_v61 }
  0xdb   : > { %1037 = vmatprep.mubr.bf16.mxu0 %v3425_v0 }
  0xe0   : > { %3014 = vmatmul.mubr.msk.bf16.gmra.mxu1 %vm378_vm4, %v3335_v62  ;;  %v2539_v62 = vld [vmem:[%s4502_s2 + $0x40] sm:$0xff] }
  0xe1   : > { %758 = vmatprep.mubr.bf16.mxu1 %v3425_v0  ;;  %2597 = vperm.xlu1 %3311, %v2539_v62  }
  0xe2   : > { %3063 = vmatmul.mubr.msk.bf16.gmra.mxu0 %vm378_vm4, %v3336_v63  ;;  %v2540_v63 = vld [vmem:[%s4502_s2 + $0x48] sm:$0xff] }
  0xe3   : > { %1047 = vmatprep.mubr.bf16.mxu0 %v3425_v0  ;;  %2602 = vperm.xlu0 %3310, %v2540_v63  }
  0xe8   : > { %3015 = vmatmul.mubr.msk.bf16.gmra.mxu1 %vm378_vm4, %v3337_v1 }
  0xe9   : > { %768 = vmatprep.mubr.bf16.mxu1 %v3425_v0 }
  0xea   : > { %3064 = vmatmul.mubr.msk.bf16.gmra.mxu0 %vm378_vm4, %v3338_v2 }
  0xeb   : > { %1057 = vmatprep.mubr.bf16.mxu0 %v3425_v0 }
  0xf0   : > { %3016 = vmatmul.mubr.msk.bf16.gmra.mxu1 %vm378_vm4, %v3339_v3 }
  0xf1   : > { %778 = vmatprep.mubr.bf16.mxu1 %v3425_v0 }
  0xf2   : > { %3065 = vmatmul.mubr.msk.bf16.gmra.mxu0 %vm378_vm4, %v3340_v4 }
  0xf3   : > { %1067 = vmatprep.mubr.bf16.mxu0 %v3425_v0 }
  0xf8   : > { %3017 = vmatmul.mubr.msk.bf16.gmra.mxu1 %vm378_vm4, %v3341_v5  ;;  %v3371_v5 = vld [vmem:[%s4501_s1 + $0x168] sm:$0xff]  }
  0xf9   : > { %788 = vmatprep.mubr.bf16.mxu1 %v3425_v0 }
  0xfa   : > { %3066 = vmatmul.mubr.msk.bf16.gmra.mxu0 %vm378_vm4, %v3342_v6  ;;  %v2541_v6 = vld [vmem:[%s4502_s2 + $0x50] sm:$0xff] }
  0xfb   : > { %1077 = vmatprep.mubr.bf16.mxu0 %v3425_v0  ;;  %2607 = vperm.xlu1 %3311, %v2541_v6   ;;  %v2553_v6 = vld [vmem:[%s4502_s2 + $0xb0] sm:$0xff] }
 0x100   : > { %3018 = vmatmul.mubr.msk.bf16.gmra.mxu1 %vm378_vm4, %v3343_v7  ;;  %v2542_v7 = vld [vmem:[%s4502_s2 + $0x58] sm:$0xff] }
 0x101   : > { %798 = vmatprep.mubr.bf16.mxu1 %v3425_v0  ;;  %2612 = vperm.xlu0 %3310, %v2542_v7   ;;  %v2554_v7 = vld [vmem:[%s4502_s2 + $0xb8] sm:$0xff] }
 0x102   : > { %3067 = vmatmul.mubr.msk.bf16.gmra.mxu0 %vm378_vm4, %v3344_v8 }
 0x103   : > { %1087 = vmatprep.mubr.bf16.mxu0 %v3425_v0 }
 0x108   : > { %3019 = vmatmul.mubr.msk.bf16.gmra.mxu1 %vm378_vm4, %v3345_v9 }
 0x109   : > { %808 = vmatprep.mubr.bf16.mxu1 %v3425_v0 }
 0x10a   : > { %3068 = vmatmul.mubr.msk.bf16.gmra.mxu0 %vm378_vm4, %v3346_v10  ;;  %v3372_v10 = vld [vmem:[%s4501_s1 + $0x1c8] sm:$0xff]  }
 0x10b   : > { %1097 = vmatprep.mubr.bf16.mxu0 %v3425_v0 }
 0x110   : > { %3020 = vmatmul.mubr.msk.bf16.gmra.mxu1 %vm378_vm4, %v3347_v11 }
 0x111   : > { %818 = vmatprep.mubr.bf16.mxu1 %v3425_v0 }
 0x112   : > { %3069 = vmatmul.mubr.msk.bf16.gmra.mxu0 %vm378_vm4, %v3348_v12 }
 0x113   : > { %1107 = vmatprep.mubr.bf16.mxu0 %v3425_v0 }
 0x118   : > { %3021 = vmatmul.mubr.msk.bf16.gmra.mxu1 %vm378_vm4, %v3349_v13  ;;  %v2543_v13 = vld [vmem:[%s4502_s2 + $0x60] sm:$0xff] }
 0x119   : > { %828 = vmatprep.mubr.bf16.mxu1 %v3425_v0  ;;  %2617 = vperm.xlu1 %3311, %v2543_v13  }
 0x11a   : > { %3070 = vmatmul.mubr.msk.bf16.gmra.mxu0 %vm378_vm4, %v3350_v14  ;;  %v2544_v14 = vld [vmem:[%s4502_s2 + $0x68] sm:$0xff] }
 0x11b   : > { %1117 = vmatprep.mubr.bf16.mxu0 %v3425_v0  ;;  %2622 = vperm.xlu0 %3310, %v2544_v14   ;;  %v3378_v14 = vld [vmem:[%s4501_s1 + $0x240] sm:$0xff]  }
 0x120   : > { %3022 = vmatmul.mubr.msk.bf16.gmra.mxu1 %vm378_vm4, %v3351_v15 }
 0x121   : > { %1341 = vmatprep.mubr.bf16.mxu1 %v3425_v0 }
 0x122   : > { %3071 = vmatmul.mubr.msk.bf16.gmra.mxu0 %vm378_vm4, %v3352_v16 }
 0x123   : > { %1688 = vmatprep.mubr.bf16.mxu0 %v3425_v0 }
 0x128   : > { %3111 = vmatmul.mubr.msk.bf16.vlgmr.msra.gmra.mxu1 %vm378_vm4, %v3353_v17 }
 0x129   : > { %2008 = vmatpush1.bf16.msra.mxu1 %v1988_v18  ;;  %1351 = vmatprep.mubr.bf16.mxu1 %v3425_v0 }
 0x12a   : > { %3163 = vmatmul.mubr.msk.bf16.vlgmr.msra.gmra.mxu0 %vm378_vm4, %v3354_v19  ;;  %v3373_v19 = vld [vmem:[%s4501_s1 + $0x170] sm:$0xff]  }
 0x12b   : > { %2345 = vmatpush1.bf16.msra.mxu0 %v2325_v20  ;;  %1698 = vmatprep.mubr.bf16.mxu0 %v3425_v0  ;;  %v2545_v20 = vld [vmem:[%s4502_s2 + $0x70] sm:$0xff] }
 0x12c   : > { %2627 = vperm.xlu1 %3311, %v2545_v20  }
 0x130   : > { %3112 = vmatmul.mubr.msk.bf16.gmra.mxu1 %vm378_vm4, %v3355_v21  ;;  %v2546_v21 = vld [vmem:[%s4502_s2 + $0x78] sm:$0xff] }
 0x131   : > { %1361 = vmatprep.mubr.bf16.mxu1 %v3425_v0  ;;  %2632 = vperm.xlu0 %3310, %v2546_v21  }
 0x132   : > { %3164 = vmatmul.mubr.msk.bf16.gmra.mxu0 %vm378_vm4, %v3356_v22 }
 0x133   : > { %1708 = vmatprep.mubr.bf16.mxu0 %v3425_v0 }
 0x138   : > { %3113 = vmatmul.mubr.msk.bf16.gmra.mxu1 %vm378_vm4, %v3357_v23 }
 0x139   : > { %1371 = vmatprep.mubr.bf16.mxu1 %v3425_v0 }
 0x13a   : > { %3165 = vmatmul.mubr.msk.bf16.gmra.mxu0 %vm378_vm4, %v3358_v24  ;;  %v3374_v24 = vld [vmem:[%s4501_s1 + $0x1d0] sm:$0xff]  }
 0x13b   : > { %1718 = vmatprep.mubr.bf16.mxu0 %v3425_v0 }
 0x140   : > { %3114 = vmatmul.mubr.msk.bf16.gmra.mxu1 %vm378_vm4, %v3359_v25 }
 0x141   : > { %1381 = vmatprep.mubr.bf16.mxu1 %v3425_v0 }
 0x142   : > { %3166 = vmatmul.mubr.msk.bf16.gmra.mxu0 %vm378_vm4, %v3360_v26 }
 0x143   : > { %1728 = vmatprep.mubr.bf16.mxu0 %v3425_v0 }
 0x148   : > { %3115 = vmatmul.mubr.msk.bf16.gmra.mxu1 %vm378_vm4, %v3361_v27  ;;  %v2547_v27 = vld [vmem:[%s4502_s2 + $0x80] sm:$0xff] }
 0x149   : > { %1391 = vmatprep.mubr.bf16.mxu1 %v3425_v0  ;;  %2637 = vperm.xlu1 %3311, %v2547_v27  }
 0x14a   : > { %3167 = vmatmul.mubr.msk.bf16.gmra.mxu0 %vm378_vm4, %v3362_v28  ;;  %v2548_v28 = vld [vmem:[%s4502_s2 + $0x88] sm:$0xff] }
 0x14b   : > { %1738 = vmatprep.mubr.bf16.mxu0 %v3425_v0  ;;  %2642 = vperm.xlu0 %3310, %v2548_v28  }
 0x14f   : > { %2652 = vperm.xlu0 %3310, %v2550_v37  }
 0x150   : > { %3116 = vmatmul.mubr.msk.bf16.gmra.mxu1 %vm378_vm4, %v3363_v29 }
 0x151   : > { %1401 = vmatprep.mubr.bf16.mxu1 %v3425_v0 }
 0x152   : > { %3168 = vmatmul.mubr.msk.bf16.gmra.mxu0 %vm378_vm4, %v3364_v30 }
 0x153   : > { %1748 = vmatprep.mubr.bf16.mxu0 %v3425_v0  ;;  %2662 = vperm.xlu0 %3310, %v2552_v55  }
 0x157   : > { %2672 = vperm.xlu0 %3310, %v2554_v7  }
 0x158   : > { %v3767_v35 = vpop.f32.mrf.mxu1  ;;  %3117 = vmatmul.mubr.msk.bf16.gmra.mxu1 %vm378_vm4, %v3365_v32 }
 0x159   : > { %v3770_v36 = vpop.f32.mrf.mxu0  ;;  %1411 = vmatprep.mubr.bf16.mxu1 %v3425_v0 }
 0x15a   : > { %v3776_v38 = vpop.f32.mrf.mxu1  ;;  %3169 = vmatmul.mubr.msk.bf16.gmra.mxu0 %vm378_vm4, %v3366_v34  ;;  %v2549_v34 = vld [vmem:[%s4502_s2 + $0x90] sm:$0xff] }
 0x15b   : > { %v3779_v39 = vpop.f32.mrf.mxu0  ;;  %1758 = vmatprep.mubr.bf16.mxu0 %v3425_v0  ;;  %2647 = vperm.xlu1 %3311, %v2549_v34  }
 0x15c   : > { %v3782_v40 = vpop.f32.mrf.mxu1 }
 0x15d   : > { %v3790_v43 = vpop.f32.mrf.mxu0 }
 0x15e   : > { %v3792_v44 = vpop.f32.mrf.mxu1 }
 0x15f   : > { %v3797_v46 = vpop.f32.mrf.mxu0 }
 0x160   : > { %v3799_v47 = vpop.f32.mrf.mxu1  ;;  %3118 = vmatmul.mubr.msk.bf16.gmra.mxu1 %vm378_vm4, %v3367_v41 }
 0x161   : > { %1421 = vmatprep.mubr.bf16.mxu1 %v3425_v0 }
 0x162   : > { %v3809_v50 = vpop.f32.mrf.mxu0  ;;  %v3811_v51 = vpop.f32.mrf.mxu1  ;;  %3170 = vmatmul.mubr.msk.bf16.gmra.mxu0 %vm378_vm4, %v3368_v45  ;;  %v3376_v45 = vld [vmem:[%s4501_s1 + $0x1d8] sm:$0xff]  }
 0x163   : > { %1768 = vmatprep.mubr.bf16.mxu0 %v3425_v0 }
 0x164   : > { %v3815_v52 = vpop.f32.mrf.mxu0  ;;  %v3817_v53 = vpop.f32.mrf.mxu1 }
 0x166   : > { %v3828_v57 = vpop.f32.mrf.mxu0  ;;  %v3830_v58 = vpop.f32.mrf.mxu1 }
 0x168   : > { %v3835_v60 = vpop.f32.mrf.mxu0  ;;  %v3837_v61 = vpop.f32.mrf.mxu1  ;;  %3119 = vmatmul.mubr.msk.bf16.gmra.mxu1 %vm378_vm4, %v3369_v54  ;;  %v2551_v54 = vld [vmem:[%s4502_s2 + $0xa0] sm:$0xff] }
 0x169   : > { %1431 = vmatprep.mubr.bf16.mxu1 %v3425_v0  ;;  %2657 = vperm.xlu1 %3311, %v2551_v54  }
 0x16a   : > { %v3847_v1 = vpop.f32.mrf.mxu0  ;;  %v3849_v2 = vpop.f32.mrf.mxu1  ;;  %3171 = vmatmul.mubr.msk.bf16.gmra.mxu0 %vm378_vm4, %v3370_v59 }
 0x16b   : > { %1778 = vmatprep.mubr.bf16.mxu0 %v3425_v0 }
 0x16c   : > { %v3853_v3 = vpop.f32.mrf.mxu0  ;;  %v3855_v4 = vpop.f32.mrf.mxu1 }
 0x16d   : > { %2667 = vperm.xlu1 %3311, %v2553_v6  }
 0x16e   : > { %v3866_v8 = vpop.f32.mrf.mxu0  ;;  %v3868_v9 = vpop.f32.mrf.mxu1 }
 0x170   : > { %v3873_v11 = vpop.f32.mrf.mxu0  ;;  %v3875_v12 = vpop.f32.mrf.mxu1  ;;  %3120 = vmatmul.mubr.msk.bf16.gmra.mxu1 %vm378_vm4, %v3371_v5  ;;  %v3377_v5 = vld [vmem:[%s4501_s1 + $0x1e0] sm:$0xff]  }
 0x171   : > { %1441 = vmatprep.mubr.bf16.mxu1 %v3425_v0 }
 0x172   : > { %v3885_v15 = vpop.f32.mrf.mxu0  ;;  %v3887_v16 = vpop.f32.mrf.mxu1  ;;  %3172 = vmatmul.mubr.msk.bf16.gmra.mxu0 %vm378_vm4, %v3372_v10 }
 0x173   : > { %1788 = vmatprep.mubr.bf16.mxu0 %v3425_v0 }
 0x174   : > { %v3891_v17 = vpop.f32.mrf.mxu0  ;;  %v3893_v18 = vpop.f32.mrf.mxu1 }
 0x176   : > { %v3904_v22 = vpop.f32.mrf.mxu0  ;;  %v3906_v23 = vpop.f32.mrf.mxu1 }
 0x178   : > { %v3911_v25 = vpop.f32.mrf.mxu0  ;;  %v3913_v26 = vpop.f32.mrf.mxu1  ;;  %3121 = vmatmul.mubr.msk.bf16.gmra.mxu1 %vm378_vm4, %v3373_v19 }
 0x179   : > { %1451 = vmatprep.mubr.bf16.mxu1 %v3425_v0 }
 0x17a   : > { %v3923_v29 = vpop.f32.mrf.mxu0  ;;  %v3925_v30 = vpop.f32.mrf.mxu1  ;;  %3173 = vmatmul.mubr.msk.bf16.gmra.mxu0 %vm378_vm4, %v3374_v24 }
 0x17b   : > { %1798 = vmatprep.mubr.bf16.mxu0 %v3425_v0 }
 0x17c   : > { %v3929_v31 = vpop.f32.mrf.mxu0  ;;  %v3931_v32 = vpop.f32.mrf.mxu1 }
 0x17e   : > { %v3942_v41 = vpop.f32.mrf.mxu0  ;;  %v3944_v42 = vpop.f32.mrf.mxu1 }
 0x180   : > { %v3949_v48 = vpop.f32.mrf.mxu0  ;;  %v3951_v49 = vpop.f32.mrf.mxu1  ;;  %3122 = vmatmul.mubr.msk.bf16.gmra.mxu1 %vm378_vm4, %v3375_v33 }
 0x181   : > { %2025 = vmatprep.mubr.bf16.mxu1 %v3425_v0 }
 0x182   : > { %v3961_v56 = vpop.f32.mrf.mxu0  ;;  %v3963_v59 = vpop.f32.mrf.mxu1  ;;  %3174 = vmatmul.mubr.msk.bf16.gmra.mxu0 %vm378_vm4, %v3376_v45  ;;  %v3379_v45 = vld [vmem:[%s4501_s1 + $0x1e8] sm:$0xff]  }
 0x183   : > { %2362 = vmatprep.mubr.bf16.mxu0 %v3425_v0 }
 0x184   : > { %v3967_v62 = vpop.f32.mrf.mxu0  ;;  %v3969_v63 = vpop.f32.mrf.mxu1 }
 0x186   : > { %v3980_v10 = vpop.f32.mrf.mxu0  ;;  %v3982_v13 = vpop.f32.mrf.mxu1 }
 0x188   : > { %v3987_v19 = vpop.f32.mrf.mxu0  ;;  %v720_v20 = vpop.f32.mrf.mxu1  ;;  %3212 = vmatmul.mubr.msk.bf16.vlgmr.msra.gmra.mxu1 %vm378_vm4, %v3377_v5 }
 0x189   : > { %v721_v21 = vadd.f32 %v720_v20, %v3770_v36  ;;  %2035 = vmatprep.mubr.bf16.mxu1 %v3425_v0 }
 0x18a   : > { %v722_v24 = vpop.f32.mrf.mxu1  ;;  %v1009_v27 = vpop.f32.mrf.mxu0  ;;  %3261 = vmatmul.mubr.msk.bf16.vlgmr.msra.gmra.mxu0 %vm378_vm4, %v3378_v14 }
 0x18b   : > { %v723_v28 = vadd.f32 %v722_v24, %v3779_v39  ;;  %v3994_v33 = vadd.f32 %v1009_v27, %v721_v21  ;;  %2372 = vmatprep.mubr.bf16.mxu0 %v3425_v0  ;;  %v3380_v39 = vld [vmem:[%s4501_s1 + $0x248] sm:$0xff]  }
 0x18c   : > { %v724_v34 = vpop.f32.mrf.mxu1  ;;  %v1011_v37 = vpop.f32.mrf.mxu0 }
 0x18d   : > { %v725_v36 = vadd.f32 %v724_v34, %v3790_v43  ;;  %v4001_v54 = vadd.f32 %v1011_v37, %v723_v28 }
 0x18e   : > { %v726_v55 = vpop.f32.mrf.mxu1  ;;  %v1013_v5 = vpop.f32.mrf.mxu0 }
 0x18f   : > { %v727_v6 = vadd.f32 %v726_v55, %v3797_v46  ;;  %v4007_v7 = vadd.f32 %v1013_v5, %v725_v36 }
 0x190   : > { %v730_v14 = vpop.f32.mrf.mxu1  ;;  %v1015_v20 = vpop.f32.mrf.mxu0  ;;  %3213 = vmatmul.mubr.msk.bf16.gmra.mxu1 %vm378_vm4, %v3379_v45 }
 0x191   : > { %v731_v21 = vadd.f32 %v730_v14, %v3809_v50  ;;  %v4011_v24 = vadd.f32 %v1015_v20, %v727_v6  ;;  %2045 = vmatprep.mubr.bf16.mxu1 %v3425_v0  ;;  %v3381_v50 = vld [vmem:[%s4501_s1 + $0x1f0] sm:$0xff]  }
 0x192   : > { %v732_v43 = vpop.f32.mrf.mxu1  ;;  %v1019_v27 = vpop.f32.mrf.mxu0  ;;  %3262 = vmatmul.mubr.msk.bf16.gmra.mxu0 %vm378_vm4, %v3380_v39 }
 0x193   : > { %v733_v28 = vadd.f32 %v732_v43, %v3815_v52  ;;  %v4016_v34 = vadd.f32 %v1019_v27, %v731_v21  ;;  %2382 = vmatprep.mubr.bf16.mxu0 %v3425_v0  ;;  %v3382_v52 = vld [vmem:[%s4501_s1 + $0x250] sm:$0xff]  }
 0x194   : > { %v734_v46 = vpop.f32.mrf.mxu1  ;;  %v1021_v37 = vpop.f32.mrf.mxu0 }
 0x195   : > { %v735_v45 = vadd.f32 %v734_v46, %v3828_v57  ;;  %v4023_v36 = vadd.f32 %v1021_v37, %v733_v28 }
 0x196   : > { %v736_v55 = vpop.f32.mrf.mxu1  ;;  %v1023_v5 = vpop.f32.mrf.mxu0 }
 0x197   : > { %v737_v39 = vadd.f32 %v736_v55, %v3835_v60  ;;  %v4029_v6 = vadd.f32 %v1023_v5, %v735_v45 }
 0x198   : > { %v740_v14 = vpop.f32.mrf.mxu1  ;;  %v1025_v20 = vpop.f32.mrf.mxu0  ;;  %3214 = vmatmul.mubr.msk.bf16.gmra.mxu1 %vm378_vm4, %v3381_v50 }
 0x199   : > { %v741_v21 = vadd.f32 %v740_v14, %v3847_v1  ;;  %v4033_v43 = vadd.f32 %v1025_v20, %v737_v39  ;;  %2055 = vmatprep.mubr.bf16.mxu1 %v3425_v0  ;;  %v3383_v1 = vld [vmem:[%s4501_s1 + $0x1f8] sm:$0xff]  }
 0x19a   : > { %v742_v57 = vpop.f32.mrf.mxu1  ;;  %v1029_v27 = vpop.f32.mrf.mxu0  ;;  %3263 = vmatmul.mubr.msk.bf16.gmra.mxu0 %vm378_vm4, %v3382_v52 }
 0x19b   : > { %v743_v28 = vadd.f32 %v742_v57, %v3853_v3  ;;  %v4038_v46 = vadd.f32 %v1029_v27, %v741_v21  ;;  %2392 = vmatprep.mubr.bf16.mxu0 %v3425_v0  ;;  %v3384_v3 = vld [vmem:[%s4501_s1 + $0x258] sm:$0xff]  }
 0x19c   : > { %v744_v60 = vpop.f32.mrf.mxu1  ;;  %v1031_v37 = vpop.f32.mrf.mxu0 }
 0x19d   : > { %v745_v50 = vadd.f32 %v744_v60, %v3866_v8  ;;  %v4045_v45 = vadd.f32 %v1031_v37, %v743_v28 }
 0x19e   : > { %v746_v55 = vpop.f32.mrf.mxu1  ;;  %v1033_v5 = vpop.f32.mrf.mxu0 }
 0x19f   : > { %v747_v52 = vadd.f32 %v746_v55, %v3873_v11  ;;  %v4051_v39 = vadd.f32 %v1033_v5, %v745_v50 }
 0x1a0   : > { %v750_v14 = vpop.f32.mrf.mxu1  ;;  %v1035_v20 = vpop.f32.mrf.mxu0  ;;  %3215 = vmatmul.mubr.msk.bf16.gmra.mxu1 %vm378_vm4, %v3383_v1 }
 0x1a1   : > { %v751_v21 = vadd.f32 %v750_v14, %v3885_v15  ;;  %v4055_v57 = vadd.f32 %v1035_v20, %v747_v52  ;;  %2065 = vmatprep.mubr.bf16.mxu1 %v3425_v0  ;;  %v3385_v15 = vld [vmem:[%s4501_s1 + $0x200] sm:$0xff]  }
 0x1a2   : > { %v752_v8 = vpop.f32.mrf.mxu1  ;;  %v1039_v27 = vpop.f32.mrf.mxu0  ;;  %3264 = vmatmul.mubr.msk.bf16.gmra.mxu0 %vm378_vm4, %v3384_v3 }
 0x1a3   : > { %v753_v28 = vadd.f32 %v752_v8, %v3891_v17  ;;  %v4060_v60 = vadd.f32 %v1039_v27, %v751_v21  ;;  %2402 = vmatprep.mubr.bf16.mxu0 %v3425_v0  ;;  %v3386_v17 = vld [vmem:[%s4501_s1 + $0x260] sm:$0xff]  }
 0x1a4   : > { %v754_v11 = vpop.f32.mrf.mxu1  ;;  %v1041_v37 = vpop.f32.mrf.mxu0 }
 0x1a5   : > { %v755_v1 = vadd.f32 %v754_v11, %v3904_v22  ;;  %v4067_v50 = vadd.f32 %v1041_v37, %v753_v28 }
 0x1a6   : > { %v756_v55 = vpop.f32.mrf.mxu1  ;;  %v1043_v5 = vpop.f32.mrf.mxu0 }
 0x1a7   : > { %v757_v3 = vadd.f32 %v756_v55, %v3911_v25  ;;  %v4073_v52 = vadd.f32 %v1043_v5, %v755_v1 }
 0x1a8   : > { %v760_v14 = vpop.f32.mrf.mxu1  ;;  %v1045_v20 = vpop.f32.mrf.mxu0  ;;  %3216 = vmatmul.mubr.msk.bf16.gmra.mxu1 %vm378_vm4, %v3385_v15 }
 0x1a9   : > { %v761_v21 = vadd.f32 %v760_v14, %v3923_v29  ;;  %v4077_v8 = vadd.f32 %v1045_v20, %v757_v3  ;;  %2075 = vmatprep.mubr.bf16.mxu1 %v3425_v0  ;;  %v3387_v29 = vld [vmem:[%s4501_s1 + $0x208] sm:$0xff]  }
 0x1aa   : > { %v762_v22 = vpop.f32.mrf.mxu1  ;;  %v1049_v27 = vpop.f32.mrf.mxu0  ;;  %3265 = vmatmul.mubr.msk.bf16.gmra.mxu0 %vm378_vm4, %v3386_v17 }
 0x1ab   : > { %v763_v28 = vadd.f32 %v762_v22, %v3929_v31  ;;  %v4082_v11 = vadd.f32 %v1049_v27, %v761_v21  ;;  %2412 = vmatprep.mubr.bf16.mxu0 %v3425_v0  ;;  %v3388_v31 = vld [vmem:[%s4501_s1 + $0x268] sm:$0xff]  }
 0x1ac   : > { %v764_v25 = vpop.f32.mrf.mxu1  ;;  %v1051_v37 = vpop.f32.mrf.mxu0 }
 0x1ad   : > { %v765_v15 = vadd.f32 %v764_v25, %v3942_v41  ;;  %v4089_v1 = vadd.f32 %v1051_v37, %v763_v28 }
 0x1ae   : > { %v766_v55 = vpop.f32.mrf.mxu1  ;;  %v1053_v5 = vpop.f32.mrf.mxu0 }
 0x1af   : > { %v767_v17 = vadd.f32 %v766_v55, %v3949_v48  ;;  %v4095_v3 = vadd.f32 %v1053_v5, %v765_v15 }
 0x1b0   : > { %v770_v14 = vpop.f32.mrf.mxu1  ;;  %v1055_v20 = vpop.f32.mrf.mxu0  ;;  %3217 = vmatmul.mubr.msk.bf16.gmra.mxu1 %vm378_vm4, %v3387_v29 }
 0x1b1   : > { %v771_v21 = vadd.f32 %v770_v14, %v3961_v56  ;;  %v4099_v22 = vadd.f32 %v1055_v20, %v767_v17  ;;  %2085 = vmatprep.mubr.bf16.mxu1 %v3425_v0  ;;  %v3389_v56 = vld [vmem:[%s4501_s1 + $0x210] sm:$0xff]  }
 0x1b2   : > { %v772_v41 = vpop.f32.mrf.mxu1  ;;  %v1059_v27 = vpop.f32.mrf.mxu0  ;;  %3266 = vmatmul.mubr.msk.bf16.gmra.mxu0 %vm378_vm4, %v3388_v31 }
 0x1b3   : > { %v773_v28 = vadd.f32 %v772_v41, %v3967_v62  ;;  %v4104_v25 = vadd.f32 %v1059_v27, %v771_v21  ;;  %2422 = vmatprep.mubr.bf16.mxu0 %v3425_v0  ;;  %v3390_v62 = vld [vmem:[%s4501_s1 + $0x270] sm:$0xff]  }
 0x1b4   : > { %v774_v48 = vpop.f32.mrf.mxu1  ;;  %v1061_v37 = vpop.f32.mrf.mxu0 }
 0x1b5   : > { %v775_v29 = vadd.f32 %v774_v48, %v3980_v10  ;;  %v4111_v15 = vadd.f32 %v1061_v37, %v773_v28 }
 0x1b6   : > { %v776_v55 = vpop.f32.mrf.mxu1  ;;  %v1063_v5 = vpop.f32.mrf.mxu0 }
 0x1b7   : > { %v777_v31 = vadd.f32 %v776_v55, %v3987_v19  ;;  %v4117_v17 = vadd.f32 %v1063_v5, %v775_v29 }
 0x1b8   : > { %v780_v14 = vpop.f32.mrf.mxu1  ;;  %v1065_v20 = vpop.f32.mrf.mxu0  ;;  %3218 = vmatmul.mubr.msk.bf16.gmra.mxu1 %vm378_vm4, %v3389_v56 }
 0x1b9   : > { %v781_v21 = vadd.f32 %v780_v14, %v3767_v35  ;;  %v4121_v41 = vadd.f32 %v1065_v20, %v777_v31  ;;  %2095 = vmatprep.mubr.bf16.mxu1 %v3425_v0  ;;  %v3391_v35 = vld [vmem:[%s4501_s1 + $0x218] sm:$0xff]  }
 0x1ba   : > { %v782_v10 = vpop.f32.mrf.mxu1  ;;  %v1069_v27 = vpop.f32.mrf.mxu0  ;;  %3267 = vmatmul.mubr.msk.bf16.gmra.mxu0 %vm378_vm4, %v3390_v62 }
 0x1bb   : > { %v783_v28 = vadd.f32 %v782_v10, %v3776_v38  ;;  %v4126_v48 = vadd.f32 %v1069_v27, %v781_v21  ;;  %2432 = vmatprep.mubr.bf16.mxu0 %v3425_v0  ;;  %v3392_v38 = vld [vmem:[%s4501_s1 + $0x278] sm:$0xff]  }
 0x1bc   : > { %v784_v19 = vpop.f32.mrf.mxu1  ;;  %v1071_v37 = vpop.f32.mrf.mxu0 }
 0x1bd   : > { %v785_v56 = vadd.f32 %v784_v19, %v3782_v40  ;;  %v4133_v29 = vadd.f32 %v1071_v37, %v783_v28 }
 0x1be   : > { %v786_v55 = vpop.f32.mrf.mxu1  ;;  %v1073_v5 = vpop.f32.mrf.mxu0 }
 0x1bf   : > { %v787_v62 = vadd.f32 %v786_v55, %v3792_v44  ;;  %v4139_v31 = vadd.f32 %v1073_v5, %v785_v56 }
 0x1c0   : > { %v790_v14 = vpop.f32.mrf.mxu1  ;;  %v1075_v20 = vpop.f32.mrf.mxu0  ;;  %3219 = vmatmul.mubr.msk.bf16.gmra.mxu1 %vm378_vm4, %v3391_v35 }
 0x1c1   : > { %v791_v21 = vadd.f32 %v790_v14, %v3799_v47  ;;  %v4143_v10 = vadd.f32 %v1075_v20, %v787_v62  ;;  %2105 = vmatprep.mubr.bf16.mxu1 %v3425_v0  ;;  %v3393_v47 = vld [vmem:[%s4501_s1 + $0x220] sm:$0xff]  }
 0x1c2   : > { %v792_v40 = vpop.f32.mrf.mxu1  ;;  %v1079_v27 = vpop.f32.mrf.mxu0  ;;  %3268 = vmatmul.mubr.msk.bf16.gmra.mxu0 %vm378_vm4, %v3392_v38 }
 0x1c3   : > { %v793_v28 = vadd.f32 %v792_v40, %v3811_v51  ;;  %v4148_v19 = vadd.f32 %v1079_v27, %v791_v21  ;;  %2442 = vmatprep.mubr.bf16.mxu0 %v3425_v0  ;;  %v3394_v51 = vld [vmem:[%s4501_s1 + $0x280] sm:$0xff]  }
 0x1c4   : > { %v794_v44 = vpop.f32.mrf.mxu1  ;;  %v1081_v37 = vpop.f32.mrf.mxu0 }
 0x1c5   : > { %v795_v35 = vadd.f32 %v794_v44, %v3817_v53  ;;  %v4155_v56 = vadd.f32 %v1081_v37, %v793_v28 }
 0x1c6   : > { %v796_v55 = vpop.f32.mrf.mxu1  ;;  %v1083_v5 = vpop.f32.mrf.mxu0 }
 0x1c7   : > { %v797_v38 = vadd.f32 %v796_v55, %v3830_v58  ;;  %v4161_v62 = vadd.f32 %v1083_v5, %v795_v35 }
 0x1c8   : > { %v800_v14 = vpop.f32.mrf.mxu1  ;;  %v1085_v20 = vpop.f32.mrf.mxu0  ;;  %3220 = vmatmul.mubr.msk.bf16.gmra.mxu1 %vm378_vm4, %v3393_v47 }
 0x1c9   : > { %v801_v21 = vadd.f32 %v800_v14, %v3837_v61  ;;  %v4165_v40 = vadd.f32 %v1085_v20, %v797_v38  ;;  %2115 = vmatprep.mubr.bf16.mxu1 %v3425_v0  ;;  %v3395_v61 = vld [vmem:[%s4501_s1 + $0x228] sm:$0xff]  }
 0x1ca   : > { %v802_v53 = vpop.f32.mrf.mxu1  ;;  %v1089_v27 = vpop.f32.mrf.mxu0  ;;  %3269 = vmatmul.mubr.msk.bf16.gmra.mxu0 %vm378_vm4, %v3394_v51 }
 0x1cb   : > { %v803_v28 = vadd.f32 %v802_v53, %v3849_v2  ;;  %v4170_v44 = vadd.f32 %v1089_v27, %v801_v21  ;;  %2452 = vmatprep.mubr.bf16.mxu0 %v3425_v0  ;;  %v3396_v2 = vld [vmem:[%s4501_s1 + $0x288] sm:$0xff]  }
 0x1cc   : > { %v804_v58 = vpop.f32.mrf.mxu1  ;;  %v1091_v37 = vpop.f32.mrf.mxu0 }
 0x1cd   : > { %v805_v47 = vadd.f32 %v804_v58, %v3855_v4  ;;  %v4177_v35 = vadd.f32 %v1091_v37, %v803_v28 }
 0x1ce   : > { %v806_v55 = vpop.f32.mrf.mxu1  ;;  %v1093_v5 = vpop.f32.mrf.mxu0 }
 0x1cf   : > { %v807_v51 = vadd.f32 %v806_v55, %v3868_v9  ;;  %v4183_v38 = vadd.f32 %v1093_v5, %v805_v47 }
 0x1d0   : > { %v810_v14 = vpop.f32.mrf.mxu1  ;;  %v1095_v20 = vpop.f32.mrf.mxu0  ;;  %3221 = vmatmul.mubr.msk.bf16.gmra.mxu1 %vm378_vm4, %v3395_v61 }
 0x1d1   : > { %v811_v21 = vadd.f32 %v810_v14, %v3875_v12  ;;  %v4187_v53 = vadd.f32 %v1095_v20, %v807_v51  ;;  %2125 = vmatprep.mubr.bf16.mxu1 %v3425_v0  ;;  %v3397_v12 = vld [vmem:[%s4501_s1 + $0x230] sm:$0xff]  }
 0x1d2   : > { %v812_v4 = vpop.f32.mrf.mxu1  ;;  %v1099_v27 = vpop.f32.mrf.mxu0  ;;  %3270 = vmatmul.mubr.msk.bf16.gmra.mxu0 %vm378_vm4, %v3396_v2 }
 0x1d3   : > { %v813_v28 = vadd.f32 %v812_v4, %v3887_v16  ;;  %v4192_v58 = vadd.f32 %v1099_v27, %v811_v21  ;;  %2462 = vmatprep.mubr.bf16.mxu0 %v3425_v0  ;;  %v3398_v16 = vld [vmem:[%s4501_s1 + $0x290] sm:$0xff]  }
 0x1d4   : > { %v814_v9 = vpop.f32.mrf.mxu1  ;;  %v1101_v37 = vpop.f32.mrf.mxu0 }
 0x1d5   : > { %v815_v61 = vadd.f32 %v814_v9, %v3893_v18  ;;  %v4199_v47 = vadd.f32 %v1101_v37, %v813_v28 }
 0x1d6   : > { %v816_v55 = vpop.f32.mrf.mxu1  ;;  %v1103_v5 = vpop.f32.mrf.mxu0 }
 0x1d7   : > { %v817_v2 = vadd.f32 %v816_v55, %v3906_v23  ;;  %v4205_v51 = vadd.f32 %v1103_v5, %v815_v61 }
 0x1d8   : > { %v820_v14 = vpop.f32.mrf.mxu1  ;;  %v1105_v20 = vpop.f32.mrf.mxu0  ;;  %3222 = vmatmul.mubr.msk.bf16.gmra.mxu1 %vm378_vm4, %v3397_v12 }
 0x1d9   : > { %v821_v21 = vadd.f32 %v820_v14, %v3913_v26  ;;  %v4209_v4 = vadd.f32 %v1105_v20, %v817_v2  ;;  %2135 = vmatprep.mubr.bf16.mxu1 %v3425_v0  ;;  %v3399_v26 = vld [vmem:[%s4501_s1 + $0x238] sm:$0xff]  }
 0x1da   : > { %v822_v18 = vpop.f32.mrf.mxu1  ;;  %v1109_v27 = vpop.f32.mrf.mxu0  ;;  %3271 = vmatmul.mubr.msk.bf16.gmra.mxu0 %vm378_vm4, %v3398_v16 }
 0x1db   : > { %v823_v28 = vadd.f32 %v822_v18, %v3925_v30  ;;  %v4214_v9 = vadd.f32 %v1109_v27, %v821_v21  ;;  %2472 = vmatprep.mubr.bf16.mxu0 %v3425_v0  ;;  %v3400_v30 = vld [vmem:[%s4501_s1 + $0x298] sm:$0xff]  }
 0x1dc   : > { %v824_v23 = vpop.f32.mrf.mxu1  ;;  %v1111_v37 = vpop.f32.mrf.mxu0 }
 0x1dd   : > { %v825_v12 = vadd.f32 %v824_v23, %v3931_v32  ;;  %v4221_v61 = vadd.f32 %v1111_v37, %v823_v28 }
 0x1de   : > { %v826_v55 = vpop.f32.mrf.mxu1  ;;  %v1113_v5 = vpop.f32.mrf.mxu0 }
 0x1df   : > { %v827_v16 = vadd.f32 %v826_v55, %v3944_v42  ;;  %v4227_v2 = vadd.f32 %v1113_v5, %v825_v12 }
 0x1e0   : > { %v830_v0 = vpop.f32.mrf.mxu1  ;;  %v1115_v14 = vpop.f32.mrf.mxu0  ;;  %3223 = vmatmul.mubr.msk.bf16.gmra.mxu1 %vm378_vm4, %v3399_v26 }
 0x1e1   : > { %v831_v20 = vadd.f32 %v830_v0, %v3951_v49  ;;  %v4231_v21 = vadd.f32 %v1115_v14, %v827_v16 }
 0x1e2   : > { %v832_v32 = vpop.f32.mrf.mxu1  ;;  %v1119_v18 = vpop.f32.mrf.mxu0  ;;  %3272 = vmatmul.mubr.msk.bf16.gmra.mxu0 %vm378_vm4, %v3400_v30 }
 0x1e3   : > { %v833_v27 = vadd.f32 %v832_v32, %v3963_v59  ;;  %v4235_v28 = vadd.f32 %v1119_v18, %v831_v20 }
 0x1e4   : > { %v834_v23 = vpop.f32.mrf.mxu1  ;;  %v1121_v42 = vpop.f32.mrf.mxu0 }
 0x1e5   : > { %v835_v37 = vadd.f32 %v834_v23, %v3969_v63  ;;  %v4238_v12 = vadd.f32 %v1121_v42, %v833_v27 }
 0x1e6   : > { %v836_v55 = vpop.f32.mrf.mxu1  ;;  %v1123_v26 = vpop.f32.mrf.mxu0 }
 0x1e7   : > { %v837_v49 = vadd.f32 %v836_v55, %v3982_v13  ;;  %v4241_v5 = vadd.f32 %v1123_v26, %v835_v37 }
 0x1e8   : > { %v1125_v16 = vpop.f32.mrf.mxu0  ;;  %v1343_v0 = vpop.f32.mrf.mxu1 }
 0x1e9   : > { %v4243_v14 = vadd.f32 %v1125_v16, %v837_v49  ;;  %v1462_v59 = vadd.f32 %v1343_v0, %v3994_v33 }
 0x1ea   : > { %v1345_v30 = vpop.f32.mrf.mxu1  ;;  %v1690_v20 = vpop.f32.mrf.mxu0 }
 0x1eb   : > { %v1463_v32 = vadd.f32 %v1345_v30, %v4001_v54  ;;  %v4247_v18 = vadd.f32 %v1690_v20, %v1462_v59 }
 0x1ec   : > { %v1347_v63 = vpop.f32.mrf.mxu1  ;;  %v1692_v27 = vpop.f32.mrf.mxu0 }
 0x1ed   : > { %v1464_v23 = vadd.f32 %v1347_v63, %v4007_v7  ;;  %v4250_v42 = vadd.f32 %v1692_v27, %v1463_v32 }
 0x1ee   : > { %v1349_v13 = vpop.f32.mrf.mxu1  ;;  %v1694_v37 = vpop.f32.mrf.mxu0 }
 0x1ef   : > { %v1465_v55 = vadd.f32 %v1349_v13, %v4011_v24  ;;  %v4253_v26 = vadd.f32 %v1694_v37, %v1464_v23 }
 0x1f0   : > { %v1353_v49 = vpop.f32.mrf.mxu1  ;;  %v1696_v33 = vpop.f32.mrf.mxu0 }
 0x1f1   : > { %v1466_v16 = vadd.f32 %v1353_v49, %v4016_v34  ;;  %v4256_v0 = vadd.f32 %v1696_v33, %v1465_v55 }
 0x1f2   : > { %v1355_v54 = vpop.f32.mrf.mxu1  ;;  %v1700_v59 = vpop.f32.mrf.mxu0 }
 0x1f3   : > { %v1467_v30 = vadd.f32 %v1355_v54, %v4023_v36  ;;  %v4259_v20 = vadd.f32 %v1700_v59, %v1466_v16 }
 0x1f4   : > { %v1357_v7 = vpop.f32.mrf.mxu1  ;;  %v1702_v32 = vpop.f32.mrf.mxu0 }
 0x1f5   : > { %v1468_v63 = vadd.f32 %v1357_v7, %v4029_v6  ;;  %v4262_v27 = vadd.f32 %v1702_v32, %v1467_v30 }
 0x1f6   : > { %v1359_v24 = vpop.f32.mrf.mxu1  ;;  %v1704_v23 = vpop.f32.mrf.mxu0 }
 0x1f7   : > { %v1469_v13 = vadd.f32 %v1359_v24, %v4033_v43  ;;  %v4265_v37 = vadd.f32 %v1704_v23, %v1468_v63 }
 0x1f8   : > { %v1363_v34 = vpop.f32.mrf.mxu1  ;;  %v1706_v55 = vpop.f32.mrf.mxu0 }
 0x1f9   : > { %v1470_v49 = vadd.f32 %v1363_v34, %v4038_v46  ;;  %v4268_v33 = vadd.f32 %v1706_v55, %v1469_v13 }
 0x1fa   : > { %v1365_v36 = vpop.f32.mrf.mxu1  ;;  %v1710_v16 = vpop.f32.mrf.mxu0 }
 0x1fb   : > { %v1471_v54 = vadd.f32 %v1365_v36, %v4045_v45  ;;  %v4271_v59 = vadd.f32 %v1710_v16, %v1470_v49 }
 0x1fc   : > { %v1367_v6 = vpop.f32.mrf.mxu1  ;;  %v1712_v30 = vpop.f32.mrf.mxu0 }
 0x1fd   : > { %v1472_v7 = vadd.f32 %v1367_v6, %v4051_v39  ;;  %v4274_v32 = vadd.f32 %v1712_v30, %v1471_v54 }
 0x1fe   : > { %v1369_v43 = vpop.f32.mrf.mxu1  ;;  %v1714_v63 = vpop.f32.mrf.mxu0 }
 0x1ff   : > { %v1473_v24 = vadd.f32 %v1369_v43, %v4055_v57  ;;  %v4277_v23 = vadd.f32 %v1714_v63, %v1472_v7 }
 0x200   : > { %v1373_v46 = vpop.f32.mrf.mxu1  ;;  %v1716_v13 = vpop.f32.mrf.mxu0 }
 0x201   : > { %v1474_v34 = vadd.f32 %v1373_v46, %v4060_v60  ;;  %v4280_v55 = vadd.f32 %v1716_v13, %v1473_v24 }
 0x202   : > { %v1375_v45 = vpop.f32.mrf.mxu1  ;;  %v1720_v49 = vpop.f32.mrf.mxu0 }
 0x203   : > { %v1475_v36 = vadd.f32 %v1375_v45, %v4067_v50  ;;  %v4283_v16 = vadd.f32 %v1720_v49, %v1474_v34 }
 0x204   : > { %v1377_v39 = vpop.f32.mrf.mxu1  ;;  %v1722_v54 = vpop.f32.mrf.mxu0 }
 0x205   : > { %v1476_v6 = vadd.f32 %v1377_v39, %v4073_v52  ;;  %v4286_v30 = vadd.f32 %v1722_v54, %v1475_v36 }
 0x206   : > { %v1379_v57 = vpop.f32.mrf.mxu1  ;;  %v1724_v7 = vpop.f32.mrf.mxu0 }
 0x207   : > { %v1477_v43 = vadd.f32 %v1379_v57, %v4077_v8  ;;  %v4289_v63 = vadd.f32 %v1724_v7, %v1476_v6 }
 0x208   : > { %v1383_v60 = vpop.f32.mrf.mxu1  ;;  %v1726_v24 = vpop.f32.mrf.mxu0 }
 0x209   : > { %v1478_v46 = vadd.f32 %v1383_v60, %v4082_v11  ;;  %v4292_v13 = vadd.f32 %v1726_v24, %v1477_v43 }
 0x20a   : > { %v1385_v50 = vpop.f32.mrf.mxu1  ;;  %v1730_v34 = vpop.f32.mrf.mxu0 }
 0x20b   : > { %v1479_v45 = vadd.f32 %v1385_v50, %v4089_v1  ;;  %v4295_v49 = vadd.f32 %v1730_v34, %v1478_v46 }
 0x20c   : > { %v1387_v52 = vpop.f32.mrf.mxu1  ;;  %v1732_v36 = vpop.f32.mrf.mxu0 }
 0x20d   : > { %v1480_v39 = vadd.f32 %v1387_v52, %v4095_v3  ;;  %v4298_v54 = vadd.f32 %v1732_v36, %v1479_v45 }
 0x20e   : > { %v1389_v8 = vpop.f32.mrf.mxu1  ;;  %v1734_v6 = vpop.f32.mrf.mxu0 }
 0x20f   : > { %v1481_v57 = vadd.f32 %v1389_v8, %v4099_v22  ;;  %v4301_v7 = vadd.f32 %v1734_v6, %v1480_v39 }
 0x210   : > { %v1393_v11 = vpop.f32.mrf.mxu1  ;;  %v1736_v43 = vpop.f32.mrf.mxu0 }
 0x211   : > { %v1482_v60 = vadd.f32 %v1393_v11, %v4104_v25  ;;  %v4304_v24 = vadd.f32 %v1736_v43, %v1481_v57 }
 0x212   : > { %v1395_v1 = vpop.f32.mrf.mxu1  ;;  %v1740_v46 = vpop.f32.mrf.mxu0 }
 0x213   : > { %v1483_v50 = vadd.f32 %v1395_v1, %v4111_v15  ;;  %v4307_v34 = vadd.f32 %v1740_v46, %v1482_v60 }
 0x214   : > { %v1397_v3 = vpop.f32.mrf.mxu1  ;;  %v1742_v45 = vpop.f32.mrf.mxu0 }
 0x215   : > { %v1484_v52 = vadd.f32 %v1397_v3, %v4117_v17  ;;  %v4310_v36 = vadd.f32 %v1742_v45, %v1483_v50 }
 0x216   : > { %v1399_v22 = vpop.f32.mrf.mxu1  ;;  %v1744_v39 = vpop.f32.mrf.mxu0 }
 0x217   : > { %v1485_v8 = vadd.f32 %v1399_v22, %v4121_v41  ;;  %v4313_v6 = vadd.f32 %v1744_v39, %v1484_v52 }
 0x218   : > { %v1403_v25 = vpop.f32.mrf.mxu1  ;;  %v1746_v57 = vpop.f32.mrf.mxu0 }
 0x219   : > { %v1486_v11 = vadd.f32 %v1403_v25, %v4126_v48  ;;  %v4316_v43 = vadd.f32 %v1746_v57, %v1485_v8 }
 0x21a   : > { %v1405_v15 = vpop.f32.mrf.mxu1  ;;  %v1750_v60 = vpop.f32.mrf.mxu0 }
 0x21b   : > { %v1487_v1 = vadd.f32 %v1405_v15, %v4133_v29  ;;  %v4319_v46 = vadd.f32 %v1750_v60, %v1486_v11 }
 0x21c   : > { %v1407_v17 = vpop.f32.mrf.mxu1  ;;  %v1752_v50 = vpop.f32.mrf.mxu0 }
 0x21d   : > { %v1488_v3 = vadd.f32 %v1407_v17, %v4139_v31  ;;  %v4322_v45 = vadd.f32 %v1752_v50, %v1487_v1 }
 0x21e   : > { %v1409_v41 = vpop.f32.mrf.mxu1  ;;  %v1754_v52 = vpop.f32.mrf.mxu0 }
 0x21f   : > { %v1489_v22 = vadd.f32 %v1409_v41, %v4143_v10  ;;  %v4325_v39 = vadd.f32 %v1754_v52, %v1488_v3 }
 0x220   : > { %v1413_v48 = vpop.f32.mrf.mxu1  ;;  %v1756_v8 = vpop.f32.mrf.mxu0 }
 0x221   : > { %v1490_v25 = vadd.f32 %v1413_v48, %v4148_v19  ;;  %v4328_v57 = vadd.f32 %v1756_v8, %v1489_v22 }
 0x222   : > { %v1415_v29 = vpop.f32.mrf.mxu1  ;;  %v1760_v11 = vpop.f32.mrf.mxu0 }
 0x223   : > { %v1491_v15 = vadd.f32 %v1415_v29, %v4155_v56  ;;  %v4331_v60 = vadd.f32 %v1760_v11, %v1490_v25 }
 0x224   : > { %v1417_v31 = vpop.f32.mrf.mxu1  ;;  %v1762_v1 = vpop.f32.mrf.mxu0 }
 0x225   : > { %v1492_v17 = vadd.f32 %v1417_v31, %v4161_v62  ;;  %v4334_v50 = vadd.f32 %v1762_v1, %v1491_v15 }
 0x226   : > { %v1419_v10 = vpop.f32.mrf.mxu1  ;;  %v1764_v3 = vpop.f32.mrf.mxu0 }
 0x227   : > { %v1493_v41 = vadd.f32 %v1419_v10, %v4165_v40  ;;  %v4337_v52 = vadd.f32 %v1764_v3, %v1492_v17 }
 0x228   : > { %v1423_v19 = vpop.f32.mrf.mxu1  ;;  %v1766_v22 = vpop.f32.mrf.mxu0 }
 0x229   : > { %v1494_v48 = vadd.f32 %v1423_v19, %v4170_v44  ;;  %v4340_v8 = vadd.f32 %v1766_v22, %v1493_v41 }
 0x22a   : > { %v1425_v56 = vpop.f32.mrf.mxu1  ;;  %v1770_v25 = vpop.f32.mrf.mxu0 }
 0x22b   : > { %v1495_v29 = vadd.f32 %v1425_v56, %v4177_v35  ;;  %v4343_v11 = vadd.f32 %v1770_v25, %v1494_v48 }
 0x22c   : > { %v1427_v62 = vpop.f32.mrf.mxu1  ;;  %v1772_v15 = vpop.f32.mrf.mxu0 }
 0x22d   : > { %v1496_v31 = vadd.f32 %v1427_v62, %v4183_v38  ;;  %v4346_v1 = vadd.f32 %v1772_v15, %v1495_v29 }
 0x22e   : > { %v1429_v40 = vpop.f32.mrf.mxu1  ;;  %v1774_v17 = vpop.f32.mrf.mxu0 }
 0x22f   : > { %v1497_v10 = vadd.f32 %v1429_v40, %v4187_v53  ;;  %v4349_v3 = vadd.f32 %v1774_v17, %v1496_v31 }
 0x230   : > { %v1433_v44 = vpop.f32.mrf.mxu1  ;;  %v1776_v41 = vpop.f32.mrf.mxu0 }
 0x231   : > { %v1498_v19 = vadd.f32 %v1433_v44, %v4192_v58  ;;  %v4352_v22 = vadd.f32 %v1776_v41, %v1497_v10 }
 0x232   : > { %v1435_v35 = vpop.f32.mrf.mxu1  ;;  %v1780_v48 = vpop.f32.mrf.mxu0 }
 0x233   : > { %v1499_v56 = vadd.f32 %v1435_v35, %v4199_v47  ;;  %v4355_v25 = vadd.f32 %v1780_v48, %v1498_v19 }
 0x234   : > { %v1437_v38 = vpop.f32.mrf.mxu1  ;;  %v1782_v29 = vpop.f32.mrf.mxu0 }
 0x235   : > { %v1500_v62 = vadd.f32 %v1437_v38, %v4205_v51  ;;  %v4358_v15 = vadd.f32 %v1782_v29, %v1499_v56 }
 0x236   : > { %v1439_v53 = vpop.f32.mrf.mxu1  ;;  %v1784_v31 = vpop.f32.mrf.mxu0 }
 0x237   : > { %v1501_v40 = vadd.f32 %v1439_v53, %v4209_v4  ;;  %v4361_v17 = vadd.f32 %v1784_v31, %v1500_v62 }
 0x238   : > { %v1443_v58 = vpop.f32.mrf.mxu1  ;;  %v1786_v10 = vpop.f32.mrf.mxu0 }
 0x239   : > { %v1502_v44 = vadd.f32 %v1443_v58, %v4214_v9  ;;  %v4364_v41 = vadd.f32 %v1786_v10, %v1501_v40 }
 0x23a   : > { %v1445_v47 = vpop.f32.mrf.mxu1  ;;  %v1790_v19 = vpop.f32.mrf.mxu0 }
 0x23b   : > { %v1503_v35 = vadd.f32 %v1445_v47, %v4221_v61  ;;  %v4367_v48 = vadd.f32 %v1790_v19, %v1502_v44 }
 0x23c   : > { %v1447_v51 = vpop.f32.mrf.mxu1  ;;  %v1792_v56 = vpop.f32.mrf.mxu0 }
 0x23d   : > { %v1504_v38 = vadd.f32 %v1447_v51, %v4227_v2  ;;  %v4370_v29 = vadd.f32 %v1792_v56, %v1503_v35 }
 0x23e   : > { %v1449_v4 = vpop.f32.mrf.mxu1  ;;  %v1794_v62 = vpop.f32.mrf.mxu0 }
 0x23f   : > { %v1505_v53 = vadd.f32 %v1449_v4, %v4231_v21  ;;  %v4373_v31 = vadd.f32 %v1794_v62, %v1504_v38 }
 0x240   : > { %v1453_v9 = vpop.f32.mrf.mxu1  ;;  %v1796_v40 = vpop.f32.mrf.mxu0 }
 0x241   : > { %v1506_v58 = vadd.f32 %v1453_v9, %v4235_v28  ;;  %v4376_v10 = vadd.f32 %v1796_v40, %v1505_v53  ;;  %v2558_v40 = vpop.permute.xlu0 %2557 }
 0x242   : > { %v1455_v61 = vpop.f32.mrf.mxu1  ;;  %v1800_v44 = vpop.f32.mrf.mxu0 }
 0x243   : > { %v1507_v47 = vadd.f32 %v1455_v61, %v4238_v12  ;;  %v4379_v2 = vadd.f32 %v1800_v44, %v1506_v58 }
 0x244   : > { %v1457_v19 = vpop.f32.mrf.mxu1  ;;  %v1802_v35 = vpop.f32.mrf.mxu0 }
 0x245   : > { %v1508_v51 = vadd.f32 %v1457_v19, %v4241_v5  ;;  %v4382_v21 = vadd.f32 %v1802_v35, %v1507_v47  ;;  %v2563_v47 = vpop.permute.xlu1 %2562 }
 0x246   : > { %v1459_v56 = vpop.f32.mrf.mxu1  ;;  %v1804_v38 = vpop.f32.mrf.mxu0 }
 0x247   : > { %v1509_v4 = vadd.f32 %v1459_v56, %v4243_v14  ;;  %v4385_v28 = vadd.f32 %v1804_v38, %v1508_v51 }
 0x248   : > { %v1806_v62 = vpop.f32.mrf.mxu0  ;;  %v2027_v53 = vpop.f32.mrf.mxu1 }
 0x249   : > { %4504 = vst [vmem:[#allocation3_spill] sm:$0xff] %v4385_v28  ;;  %v4387_v9 = vadd.f32 %v1806_v62, %v1509_v4  ;;  %v2146_v12 = vadd.f32 %v2027_v53, %v4247_v18 }
 0x24a   : > { %v2029_v58 = vpop.f32.mrf.mxu1  ;;  %v2364_v61 = vpop.f32.mrf.mxu0 }
 0x24b   : > { %4505 = vst [vmem:[#allocation4_spill] sm:$0xff] %v4387_v9  ;;  %v2147_v5 = vadd.f32 %v2029_v58, %v4250_v42  ;;  %v2483_v44 = vadd.f32 %v2364_v61, %v2146_v12 }
 0x24c   : > { %v2031_v19 = vpop.f32.mrf.mxu1  ;;  %v2366_v35 = vpop.f32.mrf.mxu0 }
 0x24d   : > { %v2148_v14 = vadd.f32 %v2031_v19, %v4253_v26  ;;  %v2484_v51 = vadd.f32 %v2366_v35, %v2147_v5  ;;  %v2675_v56 = vadd.f32 %v2558_v40, %v2483_v44  ;;  %v2568_v19 = vpop.permute.xlu1 %2567 }
 0x24e   : > { %v2033_v18 = vpop.f32.mrf.mxu1  ;;  %v2368_v38 = vpop.f32.mrf.mxu0 }
 0x24f   : > { %v2676_v4 = vadd.f32 %v2558_v40, %v2484_v51  ;;  %v2723_v62 = vmax.f32 %v2675_v56, 0.0  ;;  %v2149_v42 = vadd.f32 %v2033_v18, %v4256_v0  ;;  %v2485_v53 = vadd.f32 %v2368_v38, %v2148_v14 }
 0x250   : > { %v2037_v12 = vpop.f32.mrf.mxu1  ;;  %v2370_v58 = vpop.f32.mrf.mxu0 }
 0x251   : > { %v2724_v26 = vmax.f32 %v2676_v4, 0.0  ;;  %2771 = vst [vmem:[%s4396_s11] sm:$0xff] %v2723_v62  ;;  %v2677_v61 = vadd.f32 %v2563_v47, %v2485_v53  ;;  %v2150_v5 = vadd.f32 %v2037_v12, %v4259_v20  ;;  %v2486_v44 = vadd.f32 %v2370_v58, %v2149_v42 }
 0x252   : > { %v2039_v35 = vpop.f32.mrf.mxu1  ;;  %v2374_v9 = vpop.f32.mrf.mxu0 }
 0x253   : > { %2772 = vst [vmem:[%s4396_s11 + $0x8] sm:$0xff] %v2724_v26  ;;  %v2725_v28 = vmax.f32 %v2677_v61, 0.0  ;;  %v2678_v40 = vadd.f32 %v2563_v47, %v2486_v44  ;;  %v2151_v51 = vadd.f32 %v2039_v35, %v4262_v27  ;;  %v2487_v0 = vadd.f32 %v2374_v9, %v2150_v5  ;;  %v2573_v27 = vpop.permute.xlu0 %2572 }
 0x254   : > { %v2041_v14 = vpop.f32.mrf.mxu1  ;;  %v2376_v56 = vpop.f32.mrf.mxu0 }
 0x255   : > { %2773 = vst [vmem:[%s4396_s11 + $0x10] sm:$0xff] %v2725_v28  ;;  %v2726_v18 = vmax.f32 %v2678_v40, 0.0  ;;  %v2679_v38 = vadd.f32 %v2568_v19, %v2487_v0  ;;  %v2152_v4 = vadd.f32 %v2041_v14, %v4265_v37  ;;  %v2488_v20 = vadd.f32 %v2376_v56, %v2151_v51  ;;  %v2578_v0 = vpop.permute.xlu1 %2577 }
 0x256   : > { %v2043_v62 = vpop.f32.mrf.mxu1  ;;  %v2378_v42 = vpop.f32.mrf.mxu0 }
 0x257   : > { %2774 = vst [vmem:[%s4396_s11 + $0x18] sm:$0xff] %v2726_v18  ;;  %v2727_v53 = vmax.f32 %v2679_v38, 0.0  ;;  %v2680_v12 = vadd.f32 %v2568_v19, %v2488_v20  ;;  %v2153_v47 = vadd.f32 %v2043_v62, %v4268_v33  ;;  %v2489_v58 = vadd.f32 %v2378_v42, %v2152_v4 }
 0x258   : > { %v2047_v9 = vpop.f32.mrf.mxu1  ;;  %v2380_v26 = vpop.f32.mrf.mxu0 }
 0x259   : > { %2775 = vst [vmem:[%s4396_s11 + $0x20] sm:$0xff] %v2727_v53  ;;  %v2728_v28 = vmax.f32 %v2680_v12, 0.0  ;;  %v2154_v61 = vadd.f32 %v2047_v9, %v4271_v59  ;;  %v2490_v5 = vadd.f32 %v2380_v26, %v2153_v47  ;;  %v2681_v37 = vadd.f32 %v2573_v27, %v2489_v58  ;;  %v2583_v47 = vpop.permute.xlu0 %2582 }
 0x25a   : > { %v2049_v44 = vpop.f32.mrf.mxu1  ;;  %v2384_v35 = vpop.f32.mrf.mxu0 }
 0x25b   : > { %2776 = vst [vmem:[%s4396_s11 + $0x28] sm:$0xff] %v2728_v28  ;;  %v2682_v40 = vadd.f32 %v2573_v27, %v2490_v5  ;;  %v2729_v51 = vmax.f32 %v2681_v37, 0.0  ;;  %v2155_v19 = vadd.f32 %v2049_v44, %v4274_v32  ;;  %v2491_v33 = vadd.f32 %v2384_v35, %v2154_v61 }
 0x25c   : > { %v2051_v14 = vpop.f32.mrf.mxu1  ;;  %v2386_v56 = vpop.f32.mrf.mxu0 }
 0x25d   : > { %v2730_v18 = vmax.f32 %v2682_v40, 0.0  ;;  %2777 = vst [vmem:[%s4396_s11 + $0x30] sm:$0xff] %v2729_v51  ;;  %v2683_v38 = vadd.f32 %v2578_v0, %v2491_v33  ;;  %v2156_v59 = vadd.f32 %v2051_v14, %v4277_v23  ;;  %v2492_v4 = vadd.f32 %v2386_v56, %v2155_v19  ;;  %v2588_v40 = vpop.permute.xlu1 %2587 }
 0x25e   : > { %v2053_v20 = vpop.f32.mrf.mxu1  ;;  %v2388_v62 = vpop.f32.mrf.mxu0 }
 0x25f   : > { %2778 = vst [vmem:[%s4396_s11 + $0x38] sm:$0xff] %v2730_v18  ;;  %v2731_v42 = vmax.f32 %v2683_v38, 0.0  ;;  %v2684_v53 = vadd.f32 %v2578_v0, %v2492_v4  ;;  %v2157_v12 = vadd.f32 %v2053_v20, %v4280_v55  ;;  %v2493_v32 = vadd.f32 %v2388_v62, %v2156_v59  ;;  %v2593_v4 = vpop.permute.xlu0 %2592 }
 0x260   : > { %v2057_v58 = vpop.f32.mrf.mxu1  ;;  %v2390_v27 = vpop.f32.mrf.mxu0 }
 0x261   : > { %2779 = vst [vmem:[%s4396_s11 + $0x40] sm:$0xff] %v2731_v42  ;;  %v2732_v9 = vmax.f32 %v2684_v53, 0.0  ;;  %v2158_v26 = vadd.f32 %v2057_v58, %v4283_v16  ;;  %v2494_v28 = vadd.f32 %v2390_v27, %v2157_v12  ;;  %v2685_v23 = vadd.f32 %v2583_v47, %v2493_v32 }
 0x262   : > { %v2059_v61 = vpop.f32.mrf.mxu1  ;;  %v2394_v5 = vpop.f32.mrf.mxu0 }
 0x263   : > { %2780 = vst [vmem:[%s4396_s11 + $0x48] sm:$0xff] %v2732_v9  ;;  %v2686_v37 = vadd.f32 %v2583_v47, %v2494_v28  ;;  %v2733_v44 = vmax.f32 %v2685_v23, 0.0  ;;  %v2159_v35 = vadd.f32 %v2059_v61, %v4286_v30  ;;  %v2495_v55 = vadd.f32 %v2394_v5, %v2158_v26  ;;  %v2598_v26 = vpop.permute.xlu1 %2597 }
 0x264   : > { %v2061_v51 = vpop.f32.mrf.mxu1  ;;  %v2396_v19 = vpop.f32.mrf.mxu0 }
 0x265   : > { %v2734_v33 = vmax.f32 %v2686_v37, 0.0  ;;  %2781 = vst [vmem:[%s4396_s11 + $0x50] sm:$0xff] %v2733_v44  ;;  %v2687_v0 = vadd.f32 %v2588_v40, %v2495_v55  ;;  %v2160_v16 = vadd.f32 %v2061_v51, %v4289_v63  ;;  %v2496_v14 = vadd.f32 %v2396_v19, %v2159_v35 }
 0x266   : > { %v2063_v56 = vpop.f32.mrf.mxu1  ;;  %v2398_v18 = vpop.f32.mrf.mxu0 }
 0x267   : > { %2782 = vst [vmem:[%s4396_s11 + $0x58] sm:$0xff] %v2734_v33  ;;  %v2735_v38 = vmax.f32 %v2687_v0, 0.0  ;;  %v2688_v59 = vadd.f32 %v2588_v40, %v2496_v14  ;;  %v2161_v30 = vadd.f32 %v2063_v56, %v4292_v13  ;;  %v2497_v20 = vadd.f32 %v2398_v18, %v2160_v16  ;;  %v2603_v40 = vpop.permute.xlu0 %2602 }
 0x268   : > { %v2067_v62 = vpop.f32.mrf.mxu1  ;;  %v2400_v42 = vpop.f32.mrf.mxu0 }
 0x269   : > { %2783 = vst [vmem:[%s4396_s11 + $0x60] sm:$0xff] %v2735_v38  ;;  %v2736_v53 = vmax.f32 %v2688_v59, 0.0  ;;  %v2689_v12 = vadd.f32 %v2593_v4, %v2497_v20  ;;  %v2162_v32 = vadd.f32 %v2067_v62, %v4295_v49  ;;  %v2498_v63 = vadd.f32 %v2400_v42, %v2161_v30 }
 0x26a   : > { %v2069_v47 = vpop.f32.mrf.mxu1  ;;  %v2404_v58 = vpop.f32.mrf.mxu0 }
 0x26b   : > { %2784 = vst [vmem:[%s4396_s11 + $0x68] sm:$0xff] %v2736_v53  ;;  %v2737_v27 = vmax.f32 %v2689_v12, 0.0  ;;  %v2690_v9 = vadd.f32 %v2593_v4, %v2498_v63  ;;  %v2163_v28 = vadd.f32 %v2069_v47, %v4298_v54  ;;  %v2499_v13 = vadd.f32 %v2404_v58, %v2162_v32  ;;  %v2608_v4 = vpop.permute.xlu1 %2607 }
 0x26c   : > { %v2071_v23 = vpop.f32.mrf.mxu1  ;;  %v2406_v61 = vpop.f32.mrf.mxu0 }
 0x26d   : > { %2785 = vst [vmem:[%s4396_s11 + $0x70] sm:$0xff] %v2737_v27  ;;  %v2738_v5 = vmax.f32 %v2690_v9, 0.0  ;;  %v2691_v37 = vadd.f32 %v2598_v26, %v2499_v13  ;;  %v2164_v44 = vadd.f32 %v2071_v23, %v4301_v7  ;;  %v2500_v49 = vadd.f32 %v2406_v61, %v2163_v28  ;;  %v2613_v27 = vpop.permute.xlu0 %2612 }
 0x26e   : > { %v2073_v35 = vpop.f32.mrf.mxu1  ;;  %v2408_v55 = vpop.f32.mrf.mxu0 }
 0x26f   : > { %2786 = vst [vmem:[%s4396_s11 + $0x78] sm:$0xff] %v2738_v5  ;;  %v2739_v51 = vmax.f32 %v2691_v37, 0.0  ;;  %v2692_v19 = vadd.f32 %v2598_v26, %v2500_v49  ;;  %v2165_v33 = vadd.f32 %v2073_v35, %v4304_v24  ;;  %v2501_v54 = vadd.f32 %v2408_v55, %v2164_v44  ;;  %v2618_v35 = vpop.permute.xlu1 %2617 }
 0x270   : > { %v2077_v0 = vpop.f32.mrf.mxu1  ;;  %v2410_v16 = vpop.f32.mrf.mxu0 }
 0x271   : > { %2787 = vst [vmem:[%s4396_s11 + $0x80] sm:$0xff] %v2739_v51  ;;  %v2740_v14 = vmax.f32 %v2692_v19, 0.0  ;;  %v2693_v56 = vadd.f32 %v2603_v40, %v2501_v54  ;;  %v2166_v18 = vadd.f32 %v2077_v0, %v4307_v34  ;;  %v2502_v7 = vadd.f32 %v2410_v16, %v2165_v33 }
 0x272   : > { %v2079_v38 = vpop.f32.mrf.mxu1  ;;  %v2414_v59 = vpop.f32.mrf.mxu0 }
 0x273   : > { %2788 = vst [vmem:[%s4396_s11 + $0x88] sm:$0xff] %v2740_v14  ;;  %v2741_v30 = vmax.f32 %v2693_v56, 0.0  ;;  %v2694_v20 = vadd.f32 %v2603_v40, %v2502_v7  ;;  %v2167_v62 = vadd.f32 %v2079_v38, %v4310_v36  ;;  %v2503_v24 = vadd.f32 %v2414_v59, %v2166_v18  ;;  %v2623_v18 = vpop.permute.xlu0 %2622 }
 0x274   : > { %v2081_v42 = vpop.f32.mrf.mxu1  ;;  %v2416_v53 = vpop.f32.mrf.mxu0 }
 0x275   : > { %2789 = vst [vmem:[%s4396_s11 + $0x90] sm:$0xff] %v2741_v30  ;;  %v2742_v12 = vmax.f32 %v2694_v20, 0.0  ;;  %v2695_v32 = vadd.f32 %v2608_v4, %v2503_v24  ;;  %v2168_v63 = vadd.f32 %v2081_v42, %v4313_v6  ;;  %v2504_v34 = vadd.f32 %v2416_v53, %v2167_v62 }
 0x276   : > { %v2083_v47 = vpop.f32.mrf.mxu1  ;;  %v2418_v58 = vpop.f32.mrf.mxu0 }
 0x277   : > { %2790 = vst [vmem:[%s4396_s11 + $0x98] sm:$0xff] %v2742_v12  ;;  %v2743_v9 = vmax.f32 %v2695_v32, 0.0  ;;  %v2696_v26 = vadd.f32 %v2608_v4, %v2504_v34  ;;  %v2169_v28 = vadd.f32 %v2083_v47, %v4316_v43  ;;  %v2505_v36 = vadd.f32 %v2418_v58, %v2168_v63  ;;  %v2628_v12 = vpop.permute.xlu1 %2627 }
 0x278   : > { %v2087_v13 = vpop.f32.mrf.mxu1  ;;  %v2420_v23 = vpop.f32.mrf.mxu0 }
 0x279   : > { %2791 = vst [vmem:[%s4396_s11 + $0xa0] sm:$0xff] %v2743_v9  ;;  %v2744_v61 = vmax.f32 %v2696_v26, 0.0  ;;  %v2697_v5 = vadd.f32 %v2613_v27, %v2505_v36  ;;  %v2170_v37 = vadd.f32 %v2087_v13, %v4319_v46  ;;  %v2506_v6 = vadd.f32 %v2420_v23, %v2169_v28  ;;  %v2633_v13 = vpop.permute.xlu0 %2632 }
 0x27a   : > { %v2089_v44 = vpop.f32.mrf.mxu1  ;;  %v2424_v49 = vpop.f32.mrf.mxu0 }
 0x27b   : > { %2792 = vst [vmem:[%s4396_s11 + $0xa8] sm:$0xff] %v2744_v61  ;;  %v2745_v55 = vmax.f32 %v2697_v5, 0.0  ;;  %v2698_v40 = vadd.f32 %v2613_v27, %v2506_v6  ;;  %v2171_v51 = vadd.f32 %v2089_v44, %v4322_v45  ;;  %v2507_v43 = vadd.f32 %v2424_v49, %v2170_v37 }
 0x27c   : > { %v2091_v19 = vpop.f32.mrf.mxu1  ;;  %v2426_v33 = vpop.f32.mrf.mxu0 }
 0x27d   : > { %2793 = vst [vmem:[%s4396_s11 + $0xb0] sm:$0xff] %v2745_v55  ;;  %v2746_v54 = vmax.f32 %v2698_v40, 0.0  ;;  %v2699_v0 = vadd.f32 %v2618_v35, %v2507_v43  ;;  %v2172_v16 = vadd.f32 %v2091_v19, %v4325_v39  ;;  %v2508_v46 = vadd.f32 %v2426_v33, %v2171_v51  ;;  %v2638_v51 = vpop.permute.xlu1 %2637 }
 0x27e   : > { %v2093_v14 = vpop.f32.mrf.mxu1  ;;  %v2428_v56 = vpop.f32.mrf.mxu0 }
 0x27f   : > { %2794 = vst [vmem:[%s4396_s11 + $0xb8] sm:$0xff] %v2746_v54  ;;  %v2747_v7 = vmax.f32 %v2699_v0, 0.0  ;;  %v2700_v38 = vadd.f32 %v2618_v35, %v2508_v46  ;;  %v2173_v59 = vadd.f32 %v2093_v14, %v4328_v57  ;;  %v2509_v45 = vadd.f32 %v2428_v56, %v2172_v16 }
 0x280   : > { %v2097_v4 = vpop.f32.mrf.mxu1  ;;  %v2430_v30 = vpop.f32.mrf.mxu0 }
 0x281   : > { %2795 = vst [vmem:[%s4396_s11 + $0xc0] sm:$0xff] %v2747_v7  ;;  %v2748_v20 = vmax.f32 %v2700_v38, 0.0  ;;  %v2701_v62 = vadd.f32 %v2623_v18, %v2509_v45  ;;  %v2174_v24 = vadd.f32 %v2097_v4, %v4331_v60  ;;  %v2510_v39 = vadd.f32 %v2430_v30, %v2173_v59  ;;  %v2643_v7 = vpop.permute.xlu0 %2642 }
 0x282   : > { %v2099_v42 = vpop.f32.mrf.mxu1  ;;  %v2434_v53 = vpop.f32.mrf.mxu0 }
 0x283   : > { %2796 = vst [vmem:[%s4396_s11 + $0xc8] sm:$0xff] %v2748_v20  ;;  %v2749_v32 = vmax.f32 %v2701_v62, 0.0  ;;  %v2702_v63 = vadd.f32 %v2623_v18, %v2510_v39  ;;  %v2175_v34 = vadd.f32 %v2099_v42, %v4334_v50  ;;  %v2511_v57 = vadd.f32 %v2434_v53, %v2174_v24  ;;  %v2648_v53 = vpop.permute.xlu1 %2647 }
 0x284   : > { %v2101_v47 = vpop.f32.mrf.mxu1  ;;  %v2436_v58 = vpop.f32.mrf.mxu0 }
 0x285   : > { %2797 = vst [vmem:[%s4396_s11 + $0xd0] sm:$0xff] %v2749_v32  ;;  %v2750_v27 = vmax.f32 %v2702_v63, 0.0  ;;  %v2703_v9 = vadd.f32 %v2628_v12, %v2511_v57  ;;  %v2176_v26 = vadd.f32 %v2101_v47, %v4337_v52  ;;  %v2512_v60 = vadd.f32 %v2436_v58, %v2175_v34 }
 0x286   : > { %v2103_v28 = vpop.f32.mrf.mxu1  ;;  %v2438_v36 = vpop.f32.mrf.mxu0 }
 0x287   : > { %2798 = vst [vmem:[%s4396_s11 + $0xd8] sm:$0xff] %v2750_v27  ;;  %v2751_v23 = vmax.f32 %v2703_v9, 0.0  ;;  %v2704_v61 = vadd.f32 %v2628_v12, %v2512_v60  ;;  %v2177_v5 = vadd.f32 %v2103_v28, %v4340_v8  ;;  %v2513_v50 = vadd.f32 %v2438_v36, %v2176_v26  ;;  %v2653_v60 = vpop.permute.xlu0 %2652 }
 0x288   : > { %v2107_v37 = vpop.f32.mrf.mxu1  ;;  %v2440_v6 = vpop.f32.mrf.mxu0 }
 0x289   : > { %2799 = vst [vmem:[%s4396_s11 + $0xe0] sm:$0xff] %v2751_v23  ;;  %v2752_v44 = vmax.f32 %v2704_v61, 0.0  ;;  %v2705_v49 = vadd.f32 %v2633_v13, %v2513_v50  ;;  %v2178_v35 = vadd.f32 %v2107_v37, %v4343_v11  ;;  %v2514_v52 = vadd.f32 %v2440_v6, %v2177_v5 }
 0x28a   : > { %v2109_v55 = vpop.f32.mrf.mxu1  ;;  %v2444_v40 = vpop.f32.mrf.mxu0 }
 0x28b   : > { %2800 = vst [vmem:[%s4396_s11 + $0xe8] sm:$0xff] %v2752_v44  ;;  %v2753_v43 = vmax.f32 %v2705_v49, 0.0  ;;  %v2706_v19 = vadd.f32 %v2633_v13, %v2514_v52  ;;  %v2179_v33 = vadd.f32 %v2109_v55, %v4346_v1  ;;  %v2515_v8 = vadd.f32 %v2444_v40, %v2178_v35  ;;  %v2658_v49 = vpop.permute.xlu1 %2657 }
 0x28c   : > { %v2111_v54 = vpop.f32.mrf.mxu1  ;;  %v2446_v0 = vpop.f32.mrf.mxu0 }
 0x28d   : > { %2801 = vst [vmem:[%s4396_s11 + $0xf0] sm:$0xff] %v2753_v43  ;;  %v2754_v16 = vmax.f32 %v2706_v19, 0.0  ;;  %v2707_v46 = vadd.f32 %v2638_v51, %v2515_v8  ;;  %v2180_v14 = vadd.f32 %v2111_v54, %v4349_v3  ;;  %v2516_v11 = vadd.f32 %v2446_v0, %v2179_v33  ;;  %v2663_v0 = vpop.permute.xlu0 %2662 }
 0x28e   : > { %v2113_v56 = vpop.f32.mrf.mxu1  ;;  %v2448_v18 = vpop.f32.mrf.mxu0 }
 0x28f   : > { %2802 = vst [vmem:[%s4396_s11 + $0xf8] sm:$0xff] %v2754_v16  ;;  %v2755_v38 = vmax.f32 %v2707_v46, 0.0  ;;  %v2708_v59 = vadd.f32 %v2638_v51, %v2516_v11  ;;  %v2181_v45 = vadd.f32 %v2113_v56, %v4352_v22  ;;  %v2517_v1 = vadd.f32 %v2448_v18, %v2180_v14 }
 0x290   : > { %v2117_v4 = vpop.f32.mrf.mxu1  ;;  %v2450_v30 = vpop.f32.mrf.mxu0 }
 0x291   : > { %2803 = vst [vmem:[%s4396_s11 + $0x100] sm:$0xff] %v2755_v38  ;;  %v2756_v20 = vmax.f32 %v2708_v59, 0.0  ;;  %v2709_v62 = vadd.f32 %v2643_v7, %v2517_v1  ;;  %v2182_v24 = vadd.f32 %v2117_v4, %v4355_v25  ;;  %v2518_v3 = vadd.f32 %v2450_v30, %v2181_v45  ;;  %v2668_v1 = vpop.permute.xlu1 %2667 }
 0x292   : > { %v2119_v39 = vpop.f32.mrf.mxu1  ;;  %v2454_v42 = vpop.f32.mrf.mxu0 }
 0x293   : > { %2804 = vst [vmem:[%s4396_s11 + $0x108] sm:$0xff] %v2756_v20  ;;  %v2757_v12 = vmax.f32 %v2709_v62, 0.0  ;;  %v2710_v32 = vadd.f32 %v2643_v7, %v2518_v3  ;;  %v2183_v63 = vadd.f32 %v2119_v39, %v4358_v15  ;;  %v2519_v22 = vadd.f32 %v2454_v42, %v2182_v24  ;;  %v4506_v42 = vld [vmem:[#allocation3_spill] sm:$0xff] }
 0x294   : > { %v2121_v34 = vpop.f32.mrf.mxu1  ;;  %v2456_v57 = vpop.f32.mrf.mxu0 }
 0x295   : > { %2805 = vst [vmem:[%s4396_s11 + $0x110] sm:$0xff] %v2757_v12  ;;  %v2758_v47 = vmax.f32 %v2710_v32, 0.0  ;;  %v2711_v58 = vadd.f32 %v2648_v53, %v2519_v22  ;;  %v2184_v27 = vadd.f32 %v2121_v34, %v4361_v17  ;;  %v2520_v25 = vadd.f32 %v2456_v57, %v2183_v63  ;;  %v4507_v34 = vld [vmem:[#allocation4_spill] sm:$0xff] }
 0x296   : > { %v2123_v9 = vpop.f32.mrf.mxu1  ;;  %v2458_v26 = vpop.f32.mrf.mxu0 }
 0x297   : > { %2806 = vst [vmem:[%s4396_s11 + $0x118] sm:$0xff] %v2758_v47  ;;  %v2759_v28 = vmax.f32 %v2711_v58, 0.0  ;;  %v2712_v36 = vadd.f32 %v2648_v53, %v2520_v25  ;;  %v2185_v13 = vadd.f32 %v2123_v9, %v4364_v41  ;;  %v2521_v15 = vadd.f32 %v2458_v26, %v2184_v27  ;;  %v2673_v47 = vpop.permute.xlu0 %2672 }
 0x298   : > { %v2127_v23 = vpop.f32.mrf.mxu1  ;;  %v2460_v61 = vpop.f32.mrf.mxu0 }
 0x299   : > { %2807 = vst [vmem:[%s4396_s11 + $0x120] sm:$0xff] %v2759_v28  ;;  %v2760_v5 = vmax.f32 %v2712_v36, 0.0  ;;  %v2713_v50 = vadd.f32 %v2653_v60, %v2521_v15  ;;  %v2186_v37 = vadd.f32 %v2127_v23, %v4367_v48  ;;  %v2522_v17 = vadd.f32 %v2460_v61, %v2185_v13 }
 0x29a   : > { %v2129_v6 = vpop.f32.mrf.mxu1  ;;  %v2464_v44 = vpop.f32.mrf.mxu0 }
 0x29b   : > { %2808 = vst [vmem:[%s4396_s11 + $0x128] sm:$0xff] %v2760_v5  ;;  %v2761_v35 = vmax.f32 %v2713_v50, 0.0  ;;  %v2714_v52 = vadd.f32 %v2653_v60, %v2522_v17  ;;  %v2187_v55 = vadd.f32 %v2129_v6, %v4370_v29  ;;  %v2523_v41 = vadd.f32 %v2464_v44, %v2186_v37 }
 0x29c   : > { %v2131_v40 = vpop.f32.mrf.mxu1  ;;  %v2466_v51 = vpop.f32.mrf.mxu0 }
 0x29d   : > { %2809 = vst [vmem:[%s4396_s11 + $0x130] sm:$0xff] %v2761_v35  ;;  %v2762_v43 = vmax.f32 %v2714_v52, 0.0  ;;  %v2715_v19 = vadd.f32 %v2658_v49, %v2523_v41  ;;  %v2188_v33 = vadd.f32 %v2131_v40, %v4373_v31  ;;  %v2524_v48 = vadd.f32 %v2466_v51, %v2187_v55 }
 0x29e   : > { %v2133_v8 = vpop.f32.mrf.mxu1  ;;  %v2468_v54 = vpop.f32.mrf.mxu0 }
 0x29f   : > { %2810 = vst [vmem:[%s4396_s11 + $0x138] sm:$0xff] %v2762_v43  ;;  %v2763_v16 = vmax.f32 %v2715_v19, 0.0  ;;  %v2716_v46 = vadd.f32 %v2658_v49, %v2524_v48  ;;  %v2189_v14 = vadd.f32 %v2133_v8, %v4376_v10  ;;  %v2525_v29 = vadd.f32 %v2468_v54, %v2188_v33 }
 0x2a0   : > { %v2137_v11 = vpop.f32.mrf.mxu1  ;;  %v2470_v56 = vpop.f32.mrf.mxu0 }
 0x2a1   : > { %2811 = vst [vmem:[%s4396_s11 + $0x140] sm:$0xff] %v2763_v16  ;;  %v2764_v18 = vmax.f32 %v2716_v46, 0.0  ;;  %v2717_v7 = vadd.f32 %v2663_v0, %v2525_v29  ;;  %v2190_v38 = vadd.f32 %v2137_v11, %v4379_v2  ;;  %v2526_v31 = vadd.f32 %v2470_v56, %v2189_v14 }
 0x2a2   : > { %v2139_v59 = vpop.f32.mrf.mxu1  ;;  %v2474_v45 = vpop.f32.mrf.mxu0 }
 0x2a3   : > { %2812 = vst [vmem:[%s4396_s11 + $0x148] sm:$0xff] %v2764_v18  ;;  %v2765_v4 = vmax.f32 %v2717_v7, 0.0  ;;  %v2718_v30 = vadd.f32 %v2663_v0, %v2526_v31  ;;  %v2191_v20 = vadd.f32 %v2139_v59, %v4382_v21  ;;  %v2527_v10 = vadd.f32 %v2474_v45, %v2190_v38 }
 0x2a4   : > { %v2141_v62 = vpop.f32.mrf.mxu1  ;;  %v2476_v24 = vpop.f32.mrf.mxu0 }
 0x2a5   : > { %2813 = vst [vmem:[%s4396_s11 + $0x150] sm:$0xff] %v2765_v4  ;;  %v2766_v3 = vmax.f32 %v2718_v30, 0.0  ;;  %v2719_v39 = vadd.f32 %v2668_v1, %v2527_v10  ;;  %v2192_v2 = vadd.f32 %v2141_v62, %v4506_v42  ;;  %v2528_v53 = vadd.f32 %v2476_v24, %v2191_v20 }
 0x2a6   : > { %v2143_v12 = vpop.f32.mrf.mxu1  ;;  %v2478_v32 = vpop.f32.mrf.mxu0 }
 0x2a7   : > { %2814 = vst [vmem:[%s4396_s11 + $0x158] sm:$0xff] %v2766_v3  ;;  %v2767_v63 = vmax.f32 %v2719_v39, 0.0  ;;  %v2720_v22 = vadd.f32 %v2668_v1, %v2528_v53  ;;  %v2193_v21 = vadd.f32 %v2143_v12, %v4507_v34  ;;  %v2529_v57 = vadd.f32 %v2478_v32, %v2192_v2 }
 0x2a8   : > { %v2480_v58 = vpop.f32.mrf.mxu0 }
 0x2a9   : > { %2815 = vst [vmem:[%s4396_s11 + $0x160] sm:$0xff] %v2767_v63  ;;  %v2768_v27 = vmax.f32 %v2720_v22, 0.0  ;;  %v2721_v25 = vadd.f32 %v2673_v47, %v2529_v57  ;;  %v2530_v9 = vadd.f32 %v2480_v58, %v2193_v21 }
 0x2ab   : > { %2816 = vst [vmem:[%s4396_s11 + $0x168] sm:$0xff] %v2768_v27  ;;  %v2769_v26 = vmax.f32 %v2721_v25, 0.0  ;;  %v2722_v60 = vadd.f32 %v2673_v47, %v2530_v9 }
 0x2ad   : > { %2817 = vst [vmem:[%s4396_s11 + $0x170] sm:$0xff] %v2769_v26  ;;  %v2770_v28 = vmax.f32 %v2722_v60, 0.0 }
 0x2af   : > { %2818 = vst [vmem:[%s4396_s11 + $0x178] sm:$0xff] %v2770_v28 }
 0x2b0 PF: > { %s13_s14 = sadd.s32 1, %s3423_s14   ;;  %s4508_s12 = smov %s3419_s13 }
 0x2b1   : > { %p10_p5 = scmp.ge.s32.totalorder %s13_s14, 4   ;;  %s4509_s13 = smov %s4511_s15 }
 0x2b3   :  { %12 = sbr.rel (!%p10_p5) target bundleno = 2 (0x2), region = 78 }

// kernel: inception_c_forward.14
= control target key start
LH: loop header
LB: loop body
LE: loop exit
PB: predicated region body
PF: predicated region fallthrough
CT: control target
= control target key end

     0   :  { %s3731_s15 = smov 0   ;;  %s3733_s16 = smov 0   ;;  %s4848_s0 = inlined_call_operand.vmem [shape: bf16[2,8,256], index: 0, kind: input, shape index: {}]   ;;  %s4849_s1 = inlined_call_operand.vmem [shape: bf16[7,192,8], index: 1, kind: input, shape index: {}]   ;;  %s4850_s2 = inlined_call_operand.vmem [shape: f32[192,1], index: 2, kind: input, shape index: {}]   ;;  %s4851_s3 = inlined_call_operand.vmem [shape: bf16[7,256], index: 3, kind: input, shape index: {}]   ;;  %s4852_s4 = inlined_call_operand.vmem [shape: f32[2,192,256], index: 4, kind: output, shape index: {}]  }
   0x1   :  { %s3735_s17 = smov 0  }
   0x2 LB: > { %s26_s18 = sadd.s32 1, %s3693_s16  ;;  %p3187_p0 = scmp.ge.s32.totalorder %s3697_s17, 1  ;;  %s3697_s17 = sphi %s3735_s17, %s14_s17   ;;  %s3693_s16 = sphi %s3733_s16, %s4867_s16   ;;  %s3689_s15 = sphi %s3731_s15, %s4866_s15  }
   0x3   : > { %p28_p1 = scmp.ge.s32.totalorder %s26_s18, 2  ;;  %p198_p2 = scmp.lt.s32.totalorder %s3697_s17, 3 }
   0x5   : > { %s4869_s18 = smov (%p28_p1, %s26_s18), 0  ;;  %p199_p3 = pnand %p3187_p0, %p198_p2 }
   0x7   : > { %202 = sbr.rel (%p199_p3) target bundleno = 836 (0x344), region = 36 }
   0xc   : > { %v279_v0 = vld [vmem:[%s4851_s3] sm:$0x11]  ;;  %v288_v1 = vlaneseq  ;;  %v936_v2 = vld [vmem:[%s4851_s3] sm:$0x22]  ;;  %p239_p4 = scmp.lt.s32.totalorder %s3689_s15, 1  ;;  %v4853_v12 = vmov 0  }
   0xd   : > { %v3191_v3 = vcombine.low %v279_v0, %v279_v0  ;;  %v3192_v4 = vcombine.high %v279_v0, %v279_v0  ;;  %v3275_v5 = vcombine.low %v936_v2, %v936_v2  ;;  %v3276_v6 = vcombine.high %v936_v2, %v936_v2  ;;  %272 = vst [vmem:[#allocation2] sm:$0xf] %v4853_v12  ;;  %s3700_s27 = smov 127   ;;  %s3701_s28 = smov 126   ;;  %v1651_v38 = vld [vmem:[%s4851_s3] sm:$0x44] }
   0xe   : > { %v3755_v7 = vshrl.u32 %v288_v1, 7  ;;  %s4871_s15 = smov (!%p239_p4, %s3689_s15), 1  ;;  %603 = vmatprep.mubr.bf16.mxu1 %v4853_v12  ;;  %543 = vmatprep.mubr.bf16.mxu0 %v4853_v12  ;;  %s3702_s29 = smov 125   ;;  %vm359_vm0 = vcmask 1031168   ;;  %vm307_vm1 = vcmask 1022976   ;;  %vm273_vm2 = vcmask 19456  }
   0xf   : > { %v337_v8 = vshrl.u32 %v3191_v3, 16  ;;  %v344_v9 = vshrl.u32 %v3192_v4, 16  ;;  %v286_v10 = vpack.i.b16 %v3191_v3, %v3191_v3  ;;  %v293_v11 = vpack.i.b16 %v3192_v4, %v3192_v4  ;;  %3581 = vset.pattern.permute.xlu0 %v4853_v12  ;;  %3582 = vset.pattern.permute.xlu1 %v4853_v12  ;;  %s3546_s23 = sshll.u32 %s4871_s15, 3  ;;  %274 = vst.msk [vmem:[#allocation2 + $0xc] sm:$0xf] %vm273_vm2, %v4853_v12  ;;  %s3703_s6 = smov 2  }
  0x10   : > { %v290_v13 = vsub.s32 0, %v3755_v7  ;;  %v943_v14 = vpack.i.b16 %v3275_v5, %v3275_v5  ;;  %v947_v15 = vsub.s32 1, %v3755_v7  ;;  %v950_v16 = vpack.i.b16 %v3276_v6, %v3276_v6  ;;  %s243_s26 = scalar_lea.vmem %s4848_s0, %s3546_s23  ;;  %s3704_s7 = smov 3  }
  0x11   : > { %v338_v17 = vpack.i.b16 %v337_v8, %v337_v8  ;;  %v345_v18 = vpack.i.b16 %v344_v9, %v344_v9  ;;  %v3770_v25 = vld [vmem:[%s243_s26] sm:$0xff]  ;;  %vm964_vm3 = vcmask 1039360   ;;  %v3784_v45 = vcombine.low %v1651_v38, %v1651_v38  ;;  %s3705_s8 = smov 1   ;;  %v3589_v8 = vld [vmem:[%s4849_s1 + $0x90] sm:$0xff]  }
  0x12   : > { %v948_v19 = vrot.slane %v943_v14, %v947_v15  ;;  %v955_v20 = vrot.slane %v950_v16, %v947_v15  ;;  %v291_v23 = vrot.slane %v286_v10, %v290_v13  ;;  %v298_v24 = vrot.slane %v293_v11, %v290_v13  ;;  %276 = vst [vmem:[#allocation2 + $0x4] sm:$0xff] %v3770_v25  ;;  %v3590_v9 = vld [vmem:[%s4849_s1 + $0x60] sm:$0xff]  }
  0x13   : > { %v343_v21 = vrot.slane %v338_v17, %v290_v13  ;;  %v350_v22 = vrot.slane %v345_v18, %v290_v13  ;;  %v3786_v46 = vcombine.high %v1651_v38, %v1651_v38  ;;  %v1658_v51 = vpack.i.b16 %v3784_v45, %v3784_v45 }
  0x14   : > { %v3277_v26 = vcombine.low %v948_v19, %v955_v20  ;;  %v3193_v28 = vcombine.low %v291_v23, %v298_v24  ;;  %v3794_v52 = vsub.s32 2, %v3755_v7  ;;  %vm464_vm4 = vcmask 15360   ;;  %v3591_v20 = vld [vmem:[%s4849_s1 + $0x98] sm:$0xff]  }
  0x15   : > { %v3194_v27 = vcombine.low %v343_v21, %v350_v22  ;;  %v1665_v53 = vpack.i.b16 %v3786_v46, %v3786_v46  ;;  %vm504_vm5 = vcmask 1043456   ;;  %vm738_vm6 = vcmask 23552   ;;  %v2399_v21 = vld [vmem:[%s4851_s3] sm:$0x88] }
  0x16   : > { %961 = vrot.lane.b32.xlu1 %v3277_v26, %s3700_s27  ;;  %v1663_v57 = vrot.slane %v1658_v51, %v3794_v52  ;;  %vm467_vm7 = vcmask 64512   ;;  %vm1069_vm8 = vcmask 7168   ;;  %v2028_v18 = vshrl.u32 %v3784_v45, 16  ;;  %v3592_v26 = vld [vmem:[%s4849_s1 + $0x68] sm:$0xff]   ;;  %v3593_v45 = vld [vmem:[%s4849_s1 + $0xa0] sm:$0xff]  }
  0x17   : > { %356 = vrot.lane.b32.xlu0 %v3194_v27, %s3701_s28  ;;  %v1670_v58 = vrot.slane %v1665_v53, %v3794_v52  ;;  %v2035_v19 = vshrl.u32 %v3786_v46, 16  ;;  %v3598_v53 = vld [vmem:[%s4849_s1 + $0x78] sm:$0xff]  }
  0x18   : > { %v2029_v27 = vpack.i.b16 %v2028_v18, %v2028_v18  ;;  %v3623_v18 = vld [vmem:[%s4849_s1 + $0x50] sm:$0xff]  }
  0x19   : > { %v277_v30 = vld [vmem:[#allocation2] sm:$0xff]  ;;  %v278_v32 = vld [vmem:[#allocation2 + $0x8] sm:$0xf]  ;;  %v3383_v62 = vcombine.low %v1663_v57, %v1670_v58  ;;  %v3366_v58 = vcombine.low %v3770_v25, %v3770_v25 }
  0x1a   : > { %v3602_v57 = vld [vmem:[%s4849_s1 + $0x88] sm:$0xff]  }
  0x1b   : > { %304 = vrot.lane.b32.xlu0 %v3193_v28, %s3702_s29  ;;  %v2036_v28 = vpack.i.b16 %v2035_v19, %v2035_v19  ;;  %v3624_v19 = vld [vmem:[%s4849_s1 + $0x110] sm:$0xff]  }
  0x1d   : > { %v2041_v38 = vrot.slane %v2036_v28, %v3794_v52 }
  0x88   : > { %v962_v36 = vpop.permute.xlu1 %961 }
  0x89   : > { %v357_v29 = vpop.permute.xlu0 %356  ;;  %v963_v43 = vrot.slane %v962_v36, 4 }
  0x8a   : > { %v358_v31 = vrot.slane %v357_v29, 4 }
  0x8b   : > { %v965_v50 = vsel %vm964_vm3, %v963_v43, %v962_v36  ;;  %v969_v59 = vmul.bf16 %v963_v43, %v278_v32 }
  0x8c   : > { %v360_v33 = vsel %vm359_vm0, %v358_v31, %v357_v29  ;;  %v364_v39 = vmul.bf16 %v358_v31, %v278_v32  ;;  %v968_v54 = vmul.bf16 %v965_v50, %v277_v30  ;;  %v3489_v31 = vcombine.low %v2399_v21, %v2399_v21 }
  0x8d   : > { %v363_v34 = vmul.bf16 %v360_v33, %v277_v30  ;;  %v305_v35 = vpop.permute.xlu0 %304  ;;  %v3316_v63 = vcombine.low %v969_v59, %v969_v59  ;;  %v3603_v59 = vld [vmem:[%s4849_s1] sm:$0xff]  }
  0x8e   : > { %v306_v37 = vrot.slane %v305_v35, 4  ;;  %v3233_v48 = vcombine.low %v364_v39, %v364_v39  ;;  %v3314_v60 = vcombine.low %v968_v54, %v968_v54  ;;  %v3315_v61 = vcombine.high %v968_v54, %v968_v54  ;;  %v3599_v54 = vld [vmem:[%s4849_s1 + $0xb0] sm:$0xff]  }
  0x8f   : > { %v3232_v40 = vcombine.high %v363_v34, %v363_v34  ;;  %v3231_v41 = vcombine.low %v363_v34, %v363_v34  ;;  %v2406_v39 = vpack.i.b16 %v3489_v31, %v3489_v31 }
  0x90   : > { %v308_v42 = vsel %vm307_vm1, %v306_v37, %v305_v35  ;;  %v312_v47 = vmul.bf16 %v306_v37, %v278_v32  ;;  %v3490_v32 = vcombine.high %v2399_v21, %v2399_v21  ;;  %v3839_v35 = vld [vmem:[#allocation2 + $0xc] sm:$0xf]  ;;  %v2034_v37 = vrot.slane %v2029_v27, %v3794_v52 }
  0x91   : > { %v311_v44 = vmul.bf16 %v308_v42, %v277_v30  ;;  %460 = vrot.lane.b32.xlu0 %v3232_v40, %s3703_s6  ;;  %458 = vrot.lane.b32.xlu1 %v3231_v41, %s3703_s6  ;;  %v2410_v40 = vsub.s32 3, %v3755_v7  ;;  %v3367_v42 = vcombine.high %v3770_v25, %v3770_v25  ;;  %v3594_v7 = vld [vmem:[%s4849_s1 + $0x70] sm:$0xff]   ;;  %v3597_v52 = vld [vmem:[%s4849_s1 + $0xa8] sm:$0xff]  }
  0x92   : > { %v3261_v56 = vcombine.low %v312_v47, %v312_v47  ;;  %v2413_v41 = vpack.i.b16 %v3490_v32, %v3490_v32  ;;  %v3436_v47 = vcombine.low %v2034_v37, %v2041_v38 }
  0x93   : > { %v3259_v49 = vcombine.low %v311_v44, %v311_v44  ;;  %v3260_v55 = vcombine.high %v311_v44, %v311_v44 }
  0x95   : > { %462 = vrot.lane.b32.xlu1 %v3233_v48, %s3703_s6  ;;  %732 = vrot.lane.b32.xlu0 %v3259_v49, %s3704_s7  ;;  %v2411_v48 = vrot.slane %v2406_v39, %v2410_v40  ;;  %v2418_v49 = vrot.slane %v2413_v41, %v2410_v40  ;;  %v3627_v40 = vld [vmem:[%s4849_s1 + $0x120] sm:$0xff]  }
  0x97   : > { %v3491_v51 = vcombine.low %v2411_v48, %v2418_v49  ;;  %v3632_v48 = vld [vmem:[%s4849_s1 + $0x190] sm:$0xff]   ;;  %v3633_v49 = vld [vmem:[%s4849_s1 + $0x138] sm:$0xff]  }
  0x99   : > { %734 = vrot.lane.b32.xlu1 %v3260_v55, %s3704_s7  ;;  %736 = vrot.lane.b32.xlu0 %v3261_v56, %s3704_s7  ;;  %v3600_v55 = vld [vmem:[%s4849_s1 + $0x80] sm:$0xff]   ;;  %v3601_v56 = vld [vmem:[%s4849_s1 + $0xb8] sm:$0xff]  }
  0x9d   : > { %1063 = vrot.lane.b32.xlu1 %v3314_v60, %s3705_s8  ;;  %1065 = vrot.lane.b32.xlu0 %v3315_v61, %s3705_s8  ;;  %v3604_v60 = vld [vmem:[%s4849_s1 + $0xc0] sm:$0xff]   ;;  %v1443_v61 = vsel %vm504_vm5, %v3366_v58, 0 }
  0xa1   : > { %1067 = vrot.lane.b32.xlu1 %v3316_v63, %s3705_s8  ;;  %1676 = vrot.lane.b32.xlu0 %v3383_v62, %s3705_s8  ;;  %v3605_v62 = vld [vmem:[%s4849_s1 + $0x8] sm:$0xff]  }
  0xa2   : > { %v3606_v63 = vld [vmem:[%s4849_s1 + $0xc8] sm:$0xff]  }
 0x103   : > { %v461_v0 = vpop.permute.xlu0 %460  ;;  %v459_v1 = vpop.permute.xlu1 %458 }
 0x104   : > { %v465_v2 = vsel %vm464_vm4, %v459_v1, %v461_v0  ;;  %v3608_v1 = vld [vmem:[%s4849_s1 + $0xd0] sm:$0xff]  }
 0x105   : > { %v506_v6 = vsel %vm504_vm5, %v465_v2, 0  ;;  %v3609_v2 = vld [vmem:[%s4849_s1 + $0x18] sm:$0xff]  }
 0x107   : > { %v463_v3 = vpop.permute.xlu1 %462  ;;  %v733_v4 = vpop.permute.xlu0 %732 }
 0x108   : > { %v466_v5 = vsel %vm464_vm4, %v461_v0, %v463_v3  ;;  %v3607_v0 = vld [vmem:[%s4849_s1 + $0x10] sm:$0xff]   ;;  %v3610_v3 = vld [vmem:[%s4849_s1 + $0xd8] sm:$0xff]  }
 0x109   : > { %3234 = vmatprep.subr.msk.bf16.mxu0 %vm504_vm5, %v466_v5  ;;  %3547 = vmatprep.subr.msk.bf16.mxu1 %vm504_vm5, %v466_v5  ;;  %v3612_v5 = vld [vmem:[%s4849_s1 + $0xe0] sm:$0xff]  }
 0x10a   : > { %526 = vmatpush1.bf16.msra.mxu0 %v506_v6  ;;  %3548 = vmatpush1.bf16.msra.mxu1 %v506_v6  ;;  %v3613_v6 = vld [vmem:[%s4849_s1 + $0x28] sm:$0xff]  }
 0x10b   : > { %v735_v10 = vpop.permute.xlu1 %734  ;;  %v737_v11 = vpop.permute.xlu0 %736 }
 0x10c   : > { %v739_v13 = vsel %vm738_vm6, %v733_v4, %v735_v10  ;;  %v740_v14 = vsel %vm738_vm6, %v735_v10, %v737_v11  ;;  %v3611_v4 = vld [vmem:[%s4849_s1 + $0x20] sm:$0xff]   ;;  %v3616_v10 = vld [vmem:[%s4849_s1 + $0xf0] sm:$0xff]   ;;  %v3617_v11 = vld [vmem:[%s4849_s1 + $0x38] sm:$0xff]  }
 0x10d   : > { %v778_v15 = vsel %vm504_vm5, %v739_v13, 0  ;;  %3241 = vmatmul.mubr.msk.bf16.vlgmr.msra.gmra.mxu1 %vm467_vm7, %v3589_v8  ;;  %3262 = vmatprep.subr.msk.bf16.mxu1 %vm504_vm5, %v740_v14  ;;  %v3614_v8 = vld [vmem:[%s4849_s1 + $0xe8] sm:$0xff]   ;;  %v3618_v13 = vld [vmem:[%s4849_s1 + $0xf8] sm:$0xff]   ;;  %v3619_v14 = vld [vmem:[%s4849_s1 + $0x40] sm:$0xff]  }
 0x10e   : > { %798 = vmatpush1.bf16.msra.mxu1 %v778_v15  ;;  %3235 = vmatmul.mubr.msk.bf16.vlgmr.msra.gmra.mxu0 %vm467_vm7, %v3590_v9  ;;  %v3615_v9 = vld [vmem:[%s4849_s1 + $0x30] sm:$0xff]   ;;  %v3620_v15 = vld [vmem:[%s4849_s1 + $0x100] sm:$0xff]  }
 0x10f   : > { %v1064_v16 = vpop.permute.xlu1 %1063  ;;  %v1066_v17 = vpop.permute.xlu0 %1065  ;;  %613 = vmatprep.mubr.bf16.mxu1 %v4853_v12  ;;  %553 = vmatprep.mubr.bf16.mxu0 %v4853_v12 }
 0x110   : > { %v1070_v22 = vsel %vm1069_vm8, %v1064_v16, %v1066_v17  ;;  %3368 = vmatprep.subr.msk.bf16.mxu1 %vm504_vm5, %v3367_v42  ;;  %v3621_v16 = vld [vmem:[%s4849_s1 + $0x48] sm:$0xff]   ;;  %v3628_v42 = vld [vmem:[%s4849_s1 + $0x180] sm:$0xff]  }
 0x111   : > { %v1109_v33 = vsel %vm504_vm5, %v1070_v22, 0 }
 0x113   : > { %v1068_v23 = vpop.permute.xlu1 %1067  ;;  %v1677_v24 = vpop.permute.xlu0 %1676 }
 0x114   : > { %v1071_v29 = vsel %vm1069_vm8, %v1066_v17, %v1068_v23  ;;  %v1678_v30 = vrot.slane %v1677_v24, 4  ;;  %v3622_v17 = vld [vmem:[%s4849_s1 + $0x108] sm:$0xff]  }
 0x115   : > { %3242 = vmatmul.mubr.msk.bf16.gmra.mxu1 %vm467_vm7, %v3591_v20  ;;  %3317 = vmatprep.subr.msk.bf16.mxu0 %vm504_vm5, %v1071_v29  ;;  %v3626_v29 = vld [vmem:[%s4849_s1 + $0x118] sm:$0xff]  }
 0x116   : > { %v1679_v34 = vsel %vm1069_vm8, %v1678_v30, %v1677_v24  ;;  %1129 = vmatpush1.bf16.msra.mxu0 %v1109_v33  ;;  %623 = vmatprep.mubr.bf16.mxu1 %v4853_v12  ;;  %v1683_v46 = vmul.bf16 %v1678_v30, %v3839_v35  ;;  %v3625_v24 = vld [vmem:[%s4849_s1 + $0x58] sm:$0xff]  }
 0x117   : > { %v1682_v36 = vmul.bf16 %v1679_v34, %v3770_v25  ;;  %3236 = vmatmul.mubr.msk.bf16.gmra.mxu0 %vm467_vm7, %v3592_v26 }
 0x118   : > { %563 = vmatprep.mubr.bf16.mxu0 %v4853_v12  ;;  %v3422_v50 = vcombine.low %v1683_v46, %v1683_v46  ;;  %v3629_v46 = vld [vmem:[%s4849_s1 + $0x128] sm:$0xff]  }
 0x119   : > { %v3421_v43 = vcombine.high %v1682_v36, %v1682_v36  ;;  %v3420_v44 = vcombine.low %v1682_v36, %v1682_v36 }
 0x11b   : > { %1779 = vrot.lane.b32.xlu0 %v3421_v43, %s3700_s27  ;;  %1777 = vrot.lane.b32.xlu1 %v3420_v44, %s3700_s27 }
 0x11d   : > { %3243 = vmatmul.mubr.msk.bf16.gmra.mxu1 %vm467_vm7, %v3593_v45 }
 0x11e   : > { %633 = vmatprep.mubr.bf16.mxu1 %v4853_v12 }
 0x11f   : > { %3237 = vmatmul.mubr.msk.bf16.gmra.mxu0 %vm467_vm7, %v3594_v7  ;;  %2047 = vrot.lane.b32.xlu0 %v3436_v47, %s3703_s6  ;;  %v3630_v7 = vld [vmem:[%s4849_s1 + $0x188] sm:$0xff]  }
 0x120   : > { %1781 = vrot.lane.b32.xlu1 %v3422_v50, %s3700_s27  ;;  %573 = vmatprep.mubr.bf16.mxu0 %v4853_v12  ;;  %v3634_v50 = vld [vmem:[%s4849_s1 + $0x198] sm:$0xff]  }
 0x124   : > { %2424 = vrot.lane.b32.xlu1 %v3491_v51, %s3704_s7  ;;  %v3635_v51 = vld [vmem:[%s4849_s1 + $0x140] sm:$0xff]  }
 0x125   : > { %3244 = vmatmul.mubr.msk.bf16.gmra.mxu1 %vm467_vm7, %v3597_v52  ;;  %v3636_v52 = vld [vmem:[%s4849_s1 + $0x1a0] sm:$0xff]  }
 0x126   : > { %643 = vmatprep.mubr.bf16.mxu1 %v4853_v12 }
 0x127   : > { %3238 = vmatmul.mubr.msk.bf16.gmra.mxu0 %vm467_vm7, %v3598_v53  ;;  %v3637_v53 = vld [vmem:[%s4849_s1 + $0x148] sm:$0xff]  }
 0x128   : > { %583 = vmatprep.mubr.bf16.mxu0 %v4853_v12 }
 0x12d   : > { %3245 = vmatmul.mubr.msk.bf16.gmra.mxu1 %vm467_vm7, %v3599_v54  ;;  %v3638_v54 = vld [vmem:[%s4849_s1 + $0x1a8] sm:$0xff]  }
 0x12e   : > { %653 = vmatprep.mubr.bf16.mxu1 %v4853_v12 }
 0x12f   : > { %3239 = vmatmul.mubr.msk.bf16.gmra.mxu0 %vm467_vm7, %v3600_v55  ;;  %v3639_v55 = vld [vmem:[%s4849_s1 + $0x150] sm:$0xff]  }
 0x130   : > { %593 = vmatprep.mubr.bf16.mxu0 %v4853_v12 }
 0x135   : > { %3246 = vmatmul.mubr.msk.bf16.gmra.mxu1 %vm467_vm7, %v3601_v56  ;;  %v3640_v56 = vld [vmem:[%s4849_s1 + $0x1b0] sm:$0xff]  }
 0x136   : > { %815 = vmatprep.mubr.bf16.mxu1 %v4853_v12 }
 0x137   : > { %3240 = vmatmul.mubr.msk.bf16.gmra.mxu0 %vm467_vm7, %v3602_v57 }
 0x138   : > { %1146 = vmatprep.mubr.bf16.mxu0 %v4853_v12 }
 0x13d   : > { %3263 = vmatmul.mubr.msk.bf16.vlgmr.msra.gmra.mxu1 %vm467_vm7, %v3603_v59 }
 0x13e   : > { %825 = vmatprep.mubr.bf16.mxu1 %v4853_v12  ;;  %1463 = vmatpush1.bf16.msra.mxu1 %v1443_v61 }
 0x13f   : > { %3318 = vmatmul.mubr.msk.bf16.vlgmr.msra.gmra.mxu0 %vm467_vm7, %v3604_v60 }
 0x140   : > { %1156 = vmatprep.mubr.bf16.mxu0 %v4853_v12 }
 0x145   : > { %3264 = vmatmul.mubr.msk.bf16.gmra.mxu1 %vm467_vm7, %v3605_v62  ;;  %v3641_v62 = vld [vmem:[%s4849_s1 + $0x158] sm:$0xff]  }
 0x146   : > { %835 = vmatprep.mubr.bf16.mxu1 %v4853_v12 }
 0x147   : > { %3319 = vmatmul.mubr.msk.bf16.gmra.mxu0 %vm467_vm7, %v3606_v63 }
 0x148   : > { %1166 = vmatprep.mubr.bf16.mxu0 %v4853_v12 }
 0x14d   : > { %3265 = vmatmul.mubr.msk.bf16.gmra.mxu1 %vm467_vm7, %v3607_v0 }
 0x14e   : > { %845 = vmatprep.mubr.bf16.mxu1 %v4853_v12 }
 0x14f   : > { %3320 = vmatmul.mubr.msk.bf16.gmra.mxu0 %vm467_vm7, %v3608_v1  ;;  %v3642_v1 = vld [vmem:[%s4849_s1 + $0x1b8] sm:$0xff]  }
 0x150   : > { %1176 = vmatprep.mubr.bf16.mxu0 %v4853_v12 }
 0x155   : > { %3266 = vmatmul.mubr.msk.bf16.gmra.mxu1 %vm467_vm7, %v3609_v2 }
 0x156   : > { %855 = vmatprep.mubr.bf16.mxu1 %v4853_v12 }
 0x157   : > { %3321 = vmatmul.mubr.msk.bf16.gmra.mxu0 %vm467_vm7, %v3610_v3 }
 0x158   : > { %1186 = vmatprep.mubr.bf16.mxu0 %v4853_v12 }
 0x15d   : > { %3267 = vmatmul.mubr.msk.bf16.gmra.mxu1 %vm467_vm7, %v3611_v4 }
 0x15e   : > { %865 = vmatprep.mubr.bf16.mxu1 %v4853_v12 }
 0x15f   : > { %3322 = vmatmul.mubr.msk.bf16.gmra.mxu0 %vm467_vm7, %v3612_v5 }
 0x160   : > { %1196 = vmatprep.mubr.bf16.mxu0 %v4853_v12 }
 0x165   : > { %3268 = vmatmul.mubr.msk.bf16.gmra.mxu1 %vm467_vm7, %v3613_v6 }
 0x166   : > { %875 = vmatprep.mubr.bf16.mxu1 %v4853_v12 }
 0x167   : > { %3323 = vmatmul.mubr.msk.bf16.gmra.mxu0 %vm467_vm7, %v3614_v8 }
 0x168   : > { %1206 = vmatprep.mubr.bf16.mxu0 %v4853_v12 }
 0x16d   : > { %3269 = vmatmul.mubr.msk.bf16.gmra.mxu1 %vm467_vm7, %v3615_v9  ;;  %v3643_v9 = vld [vmem:[%s4849_s1 + $0x160] sm:$0xff]  }
 0x16e   : > { %885 = vmatprep.mubr.bf16.mxu1 %v4853_v12 }
 0x16f   : > { %3324 = vmatmul.mubr.msk.bf16.gmra.mxu0 %vm467_vm7, %v3616_v10 }
 0x170   : > { %1216 = vmatprep.mubr.bf16.mxu0 %v4853_v12 }
 0x175   : > { %3270 = vmatmul.mubr.msk.bf16.gmra.mxu1 %vm467_vm7, %v3617_v11 }
 0x176   : > { %895 = vmatprep.mubr.bf16.mxu1 %v4853_v12 }
 0x177   : > { %3325 = vmatmul.mubr.msk.bf16.gmra.mxu0 %vm467_vm7, %v3618_v13  ;;  %v3644_v13 = vld [vmem:[%s4849_s1 + $0x1c0] sm:$0xff]  }
 0x178   : > { %1226 = vmatprep.mubr.bf16.mxu0 %v4853_v12 }
 0x17d   : > { %3271 = vmatmul.mubr.msk.bf16.gmra.mxu1 %vm467_vm7, %v3619_v14 }
 0x17e   : > { %905 = vmatprep.mubr.bf16.mxu1 %v4853_v12 }
 0x17f   : > { %3326 = vmatmul.mubr.msk.bf16.gmra.mxu0 %vm467_vm7, %v3620_v15 }
 0x180   : > { %1236 = vmatprep.mubr.bf16.mxu0 %v4853_v12 }
 0x185   : > { %3272 = vmatmul.mubr.msk.bf16.gmra.mxu1 %vm467_vm7, %v3621_v16 }
 0x186   : > { %915 = vmatprep.mubr.bf16.mxu1 %v4853_v12 }
 0x187   : > { %3327 = vmatmul.mubr.msk.bf16.gmra.mxu0 %vm467_vm7, %v3622_v17 }
 0x188   : > { %1246 = vmatprep.mubr.bf16.mxu0 %v4853_v12 }
 0x18d   : > { %3273 = vmatmul.mubr.msk.bf16.gmra.mxu1 %vm467_vm7, %v3623_v18  ;;  %v1780_v20 = vpop.permute.xlu0 %1779  ;;  %v1778_v21 = vpop.permute.xlu1 %1777 }
 0x18e   : > { %925 = vmatprep.mubr.bf16.mxu1 %v4853_v12  ;;  %v1783_v22 = vsel %vm964_vm3, %v1778_v21, %v1780_v20 }
 0x18f   : > { %3328 = vmatmul.mubr.msk.bf16.gmra.mxu0 %vm467_vm7, %v3624_v19  ;;  %v1822_v30 = vsel %vm504_vm5, %v1783_v22, 0 }
 0x190   : > { %1256 = vmatprep.mubr.bf16.mxu0 %v4853_v12 }
 0x191   : > { %v2048_v23 = vpop.permute.xlu0 %2047 }
 0x192   : > { %v2049_v26 = vrot.slane %v2048_v23, 4  ;;  %v1782_v27 = vpop.permute.xlu1 %1781 }
 0x193   : > { %v1784_v28 = vsel %vm964_vm3, %v1780_v20, %v1782_v27  ;;  %v3645_v20 = vld [vmem:[%s4849_s1 + $0x168] sm:$0xff]  }
 0x194   : > { %v2050_v31 = vsel %vm464_vm4, %v2049_v26, %v2048_v23  ;;  %v2054_v32 = vmul.bf16 %v2049_v26, %v3839_v35  ;;  %3423 = vmatprep.subr.msk.bf16.mxu0 %vm504_vm5, %v1784_v28  ;;  %v3646_v23 = vld [vmem:[%s4849_s1 + $0x1c8] sm:$0xff]  }
 0x195   : > { %v2053_v33 = vmul.bf16 %v2050_v31, %v3770_v25  ;;  %1842 = vmatpush1.bf16.msra.mxu0 %v1822_v30  ;;  %3274 = vmatmul.mubr.msk.bf16.gmra.mxu1 %vm467_vm7, %v3625_v24  ;;  %v2776_v24 = vld [vmem:[%s4850_s2] sm:$0xff]  ;;  %v2777_v30 = vld [vmem:[%s4850_s2 + $0x8] sm:$0xff] }
 0x196   : > { %v2425_v34 = vpop.permute.xlu1 %2424  ;;  %v3475_v36 = vcombine.low %v2054_v32, %v2054_v32  ;;  %1480 = vmatprep.mubr.bf16.mxu1 %v4853_v12 }
 0x197   : > { %v2426_v37 = vrot.slane %v2425_v34, 4  ;;  %3329 = vmatmul.mubr.msk.bf16.gmra.mxu0 %vm467_vm7, %v3626_v29  ;;  %v3473_v38 = vcombine.low %v2053_v33, %v2053_v33 }
 0x198   : > { %2152 = vrot.lane.b32.xlu0 %v3475_v36, %s3701_s28  ;;  %1859 = vmatprep.mubr.bf16.mxu0 %v4853_v12 }
 0x199   : > { %v2427_v39 = vsel %vm738_vm6, %v2426_v37, %v2425_v34  ;;  %v2431_v45 = vmul.bf16 %v2426_v37, %v3839_v35  ;;  %v3631_v35 = vld [vmem:[%s4849_s1 + $0x130] sm:$0xff]  }
 0x19a   : > { %v2430_v41 = vmul.bf16 %v2427_v39, %v3770_v25  ;;  %v3474_v25 = vcombine.high %v2053_v33, %v2053_v33  ;;  %v3647_v33 = vld [vmem:[%s4849_s1 + $0x170] sm:$0xff]  }
 0x19b   : > { %v3530_v47 = vcombine.low %v2431_v45, %v2431_v45  ;;  %v3648_v37 = vld [vmem:[%s4849_s1 + $0x1d0] sm:$0xff]  }
 0x19c   : > { %2148 = vrot.lane.b32.xlu0 %v3473_v38, %s3701_s28  ;;  %v3528_v43 = vcombine.low %v2430_v41, %v2430_v41  ;;  %v3529_v44 = vcombine.high %v2430_v41, %v2430_v41  ;;  %v2778_v38 = vld [vmem:[%s4850_s2 + $0x10] sm:$0xff]  ;;  %v2779_v41 = vld [vmem:[%s4850_s2 + $0x18] sm:$0xff] }
 0x19d   : > { %3369 = vmatmul.mubr.msk.bf16.vlgmr.msra.gmra.mxu1 %vm467_vm7, %v3627_v40 }
 0x19e   : > { %2525 = vrot.lane.b32.xlu1 %v3528_v43, %s3702_s29  ;;  %1490 = vmatprep.mubr.bf16.mxu1 %v4853_v12 }
 0x19f   : > { %3424 = vmatmul.mubr.msk.bf16.vlgmr.msra.gmra.mxu0 %vm467_vm7, %v3628_v42 }
 0x1a0   : > { %2527 = vrot.lane.b32.xlu0 %v3529_v44, %s3702_s29  ;;  %1869 = vmatprep.mubr.bf16.mxu0 %v4853_v12 }
 0x1a2   : > { %2150 = vrot.lane.b32.xlu1 %v3474_v25, %s3701_s28  ;;  %v3649_v25 = vld [vmem:[%s4849_s1 + $0x178] sm:$0xff]  }
 0x1a4   : > { %2802 = vperm.xlu0 %3581, %v2776_v24  }
 0x1a5   : > { %3370 = vmatmul.mubr.msk.bf16.gmra.mxu1 %vm467_vm7, %v3629_v46  ;;  %v2780_v46 = vld [vmem:[%s4850_s2 + $0x20] sm:$0xff] }
 0x1a6   : > { %2529 = vrot.lane.b32.xlu1 %v3530_v47, %s3702_s29  ;;  %1500 = vmatprep.mubr.bf16.mxu1 %v4853_v12  ;;  %s3549_s29 = smul.u32 384, %s4871_s15 }
 0x1a7   : > { %3425 = vmatmul.mubr.msk.bf16.gmra.mxu0 %vm467_vm7, %v3630_v7  ;;  %v2781_v7 = vld [vmem:[%s4850_s2 + $0x28] sm:$0xff] }
 0x1a8   : > { %1879 = vmatprep.mubr.bf16.mxu0 %v4853_v12  ;;  %2817 = vperm.xlu0 %3581, %v2779_v41   ;;  %s4744_s20 = scalar_lea.vmem %s4852_s4, %s3549_s29 }
 0x1aa   : > { %2807 = vperm.xlu1 %3582, %v2777_v30   ;;  %v2786_v30 = vld [vmem:[%s4850_s2 + $0x50] sm:$0xff] }
 0x1ac   : > { %2827 = vperm.xlu0 %3581, %v2781_v7  }
 0x1ad   : > { %3371 = vmatmul.mubr.msk.bf16.gmra.mxu1 %vm467_vm7, %v3631_v35 }
 0x1ae   : > { %1510 = vmatprep.mubr.bf16.mxu1 %v4853_v12  ;;  %2812 = vperm.xlu1 %3582, %v2778_v38  }
 0x1af   : > { %3426 = vmatmul.mubr.msk.bf16.gmra.mxu0 %vm467_vm7, %v3632_v48  ;;  %v3650_v48 = vld [vmem:[%s4849_s1 + $0x1d8] sm:$0xff]  }
 0x1b0   : > { %1889 = vmatprep.mubr.bf16.mxu0 %v4853_v12 }
 0x1b2   : > { %2822 = vperm.xlu1 %3582, %v2780_v46  }
 0x1b5   : > { %3372 = vmatmul.mubr.msk.bf16.gmra.mxu1 %vm467_vm7, %v3633_v49 }
 0x1b6   : > { %1520 = vmatprep.mubr.bf16.mxu1 %v4853_v12 }
 0x1b7   : > { %3427 = vmatmul.mubr.msk.bf16.gmra.mxu0 %vm467_vm7, %v3634_v50 }
 0x1b8   : > { %1899 = vmatprep.mubr.bf16.mxu0 %v4853_v12 }
 0x1bd   : > { %3373 = vmatmul.mubr.msk.bf16.gmra.mxu1 %vm467_vm7, %v3635_v51  ;;  %v2782_v51 = vld [vmem:[%s4850_s2 + $0x30] sm:$0xff] }
 0x1be   : > { %1530 = vmatprep.mubr.bf16.mxu1 %v4853_v12  ;;  %2832 = vperm.xlu1 %3582, %v2782_v51   ;;  %v2788_v51 = vld [vmem:[%s4850_s2 + $0x60] sm:$0xff] }
 0x1bf   : > { %3428 = vmatmul.mubr.msk.bf16.gmra.mxu0 %vm467_vm7, %v3636_v52  ;;  %v2783_v52 = vld [vmem:[%s4850_s2 + $0x38] sm:$0xff] }
 0x1c0   : > { %1909 = vmatprep.mubr.bf16.mxu0 %v4853_v12  ;;  %2837 = vperm.xlu0 %3581, %v2783_v52   ;;  %v2789_v52 = vld [vmem:[%s4850_s2 + $0x68] sm:$0xff] }
 0x1c5   : > { %3374 = vmatmul.mubr.msk.bf16.gmra.mxu1 %vm467_vm7, %v3637_v53 }
 0x1c6   : > { %1540 = vmatprep.mubr.bf16.mxu1 %v4853_v12 }
 0x1c7   : > { %3429 = vmatmul.mubr.msk.bf16.gmra.mxu0 %vm467_vm7, %v3638_v54 }
 0x1c8   : > { %1919 = vmatprep.mubr.bf16.mxu0 %v4853_v12 }
 0x1cd   : > { %v4101_v57 = vpop.f32.mrf.mxu1  ;;  %3375 = vmatmul.mubr.msk.bf16.gmra.mxu1 %vm467_vm7, %v3639_v55 }
 0x1ce   : > { %v4104_v58 = vpop.f32.mrf.mxu0  ;;  %1550 = vmatprep.mubr.bf16.mxu1 %v4853_v12 }
 0x1cf   : > { %v4107_v59 = vpop.f32.mrf.mxu1  ;;  %3430 = vmatmul.mubr.msk.bf16.gmra.mxu0 %vm467_vm7, %v3640_v56 }
 0x1d0   : > { %v4110_v60 = vpop.f32.mrf.mxu0  ;;  %1929 = vmatprep.mubr.bf16.mxu0 %v4853_v12 }
 0x1d1   : > { %v4113_v61 = vpop.f32.mrf.mxu1 }
 0x1d2   : > { %v4118_v63 = vpop.f32.mrf.mxu0 }
 0x1d3   : > { %v4120_v0 = vpop.f32.mrf.mxu1 }
 0x1d4   : > { %v4125_v2 = vpop.f32.mrf.mxu0 }
 0x1d5   : > { %v4127_v3 = vpop.f32.mrf.mxu1  ;;  %3376 = vmatmul.mubr.msk.bf16.gmra.mxu1 %vm467_vm7, %v3641_v62  ;;  %v2784_v62 = vld [vmem:[%s4850_s2 + $0x40] sm:$0xff] }
 0x1d6   : > { %1560 = vmatprep.mubr.bf16.mxu1 %v4853_v12  ;;  %2842 = vperm.xlu1 %3582, %v2784_v62  }
 0x1d7   : > { %v4131_v4 = vpop.f32.mrf.mxu0  ;;  %v4133_v5 = vpop.f32.mrf.mxu1  ;;  %3431 = vmatmul.mubr.msk.bf16.gmra.mxu0 %vm467_vm7, %v3642_v1  ;;  %v2785_v1 = vld [vmem:[%s4850_s2 + $0x48] sm:$0xff] }
 0x1d8   : > { %1939 = vmatprep.mubr.bf16.mxu0 %v4853_v12  ;;  %2847 = vperm.xlu0 %3581, %v2785_v1  }
 0x1d9   : > { %v4137_v6 = vpop.f32.mrf.mxu0  ;;  %v4139_v8 = vpop.f32.mrf.mxu1 }
 0x1da   : > { %2852 = vperm.xlu1 %3582, %v2786_v30  }
 0x1db   : > { %v4144_v10 = vpop.f32.mrf.mxu0  ;;  %v4146_v11 = vpop.f32.mrf.mxu1 }
 0x1dd   : > { %v4151_v14 = vpop.f32.mrf.mxu0  ;;  %v4153_v15 = vpop.f32.mrf.mxu1  ;;  %3377 = vmatmul.mubr.msk.bf16.gmra.mxu1 %vm467_vm7, %v3643_v9 }
 0x1de   : > { %1570 = vmatprep.mubr.bf16.mxu1 %v4853_v12  ;;  %2862 = vperm.xlu1 %3582, %v2788_v51  }
 0x1df   : > { %v4157_v16 = vpop.f32.mrf.mxu0  ;;  %v4159_v17 = vpop.f32.mrf.mxu1  ;;  %3432 = vmatmul.mubr.msk.bf16.gmra.mxu0 %vm467_vm7, %v3644_v13 }
 0x1e0   : > { %1949 = vmatprep.mubr.bf16.mxu0 %v4853_v12 }
 0x1e1   : > { %v4163_v18 = vpop.f32.mrf.mxu0  ;;  %v4165_v19 = vpop.f32.mrf.mxu1 }
 0x1e3   : > { %v4170_v21 = vpop.f32.mrf.mxu0  ;;  %v4172_v22 = vpop.f32.mrf.mxu1 }
 0x1e5   : > { %v4180_v26 = vpop.f32.mrf.mxu0  ;;  %v4182_v27 = vpop.f32.mrf.mxu1  ;;  %3378 = vmatmul.mubr.msk.bf16.gmra.mxu1 %vm467_vm7, %v3645_v20 }
 0x1e6   : > { %1580 = vmatprep.mubr.bf16.mxu1 %v4853_v12 }
 0x1e7   : > { %v4186_v28 = vpop.f32.mrf.mxu0  ;;  %v4188_v29 = vpop.f32.mrf.mxu1  ;;  %3433 = vmatmul.mubr.msk.bf16.gmra.mxu0 %vm467_vm7, %v3646_v23 }
 0x1e8   : > { %1959 = vmatprep.mubr.bf16.mxu0 %v4853_v12 }
 0x1e9   : > { %v4195_v31 = vpop.f32.mrf.mxu0  ;;  %v4197_v32 = vpop.f32.mrf.mxu1 }
 0x1eb   : > { %v4202_v34 = vpop.f32.mrf.mxu0  ;;  %v4204_v36 = vpop.f32.mrf.mxu1 }
 0x1ed   : > { %v4212_v39 = vpop.f32.mrf.mxu0  ;;  %v4214_v40 = vpop.f32.mrf.mxu1  ;;  %3379 = vmatmul.mubr.msk.bf16.gmra.mxu1 %vm467_vm7, %v3647_v33  ;;  %v2787_v33 = vld [vmem:[%s4850_s2 + $0x58] sm:$0xff] }
 0x1ee   : > { %1590 = vmatprep.mubr.bf16.mxu1 %v4853_v12  ;;  %2857 = vperm.xlu0 %3581, %v2787_v33  }
 0x1ef   : > { %v4221_v42 = vpop.f32.mrf.mxu0  ;;  %v4223_v43 = vpop.f32.mrf.mxu1  ;;  %3434 = vmatmul.mubr.msk.bf16.gmra.mxu0 %vm467_vm7, %v3648_v37 }
 0x1f0   : > { %1969 = vmatprep.mubr.bf16.mxu0 %v4853_v12 }
 0x1f1   : > { %v4227_v44 = vpop.f32.mrf.mxu0  ;;  %v4229_v45 = vpop.f32.mrf.mxu1 }
 0x1f2   : > { %2867 = vperm.xlu0 %3581, %v2789_v52  }
 0x1f3   : > { %v4240_v47 = vpop.f32.mrf.mxu0  ;;  %v4242_v35 = vpop.f32.mrf.mxu1 }
 0x1f5   : > { %v4247_v49 = vpop.f32.mrf.mxu0  ;;  %v4249_v50 = vpop.f32.mrf.mxu1  ;;  %3380 = vmatmul.mubr.msk.bf16.gmra.mxu1 %vm467_vm7, %v3649_v25 }
 0x1f6   : > { %2230 = vmatprep.mubr.bf16.mxu1 %v4853_v12 }
 0x1f7   : > { %v4259_v53 = vpop.f32.mrf.mxu0  ;;  %v4261_v54 = vpop.f32.mrf.mxu1  ;;  %3435 = vmatmul.mubr.msk.bf16.gmra.mxu0 %vm467_vm7, %v3650_v48 }
 0x1f8   : > { %2607 = vmatprep.mubr.bf16.mxu0 %v4853_v12 }
 0x1f9   : > { %v4265_v55 = vpop.f32.mrf.mxu0  ;;  %v4267_v56 = vpop.f32.mrf.mxu1 }
 0x1fb   : > { %v4275_v9 = vpop.f32.mrf.mxu0  ;;  %v4277_v13 = vpop.f32.mrf.mxu1 }
 0x1fd   : > { %v4279_v20 = vpop.f32.mrf.mxu0  ;;  %v817_v23 = vpop.f32.mrf.mxu1 }
 0x1fe   : > { %v818_v24 = vadd.f32 %v817_v23, %v4104_v58 }
 0x1ff   : > { %v819_v37 = vpop.f32.mrf.mxu1  ;;  %v1148_v38 = vpop.f32.mrf.mxu0 }
 0x200   : > { %v820_v41 = vadd.f32 %v819_v37, %v4110_v60  ;;  %v4289_v25 = vadd.f32 %v1148_v38, %v818_v24  ;;  %v2790_v37 = vld [vmem:[%s4850_s2 + $0x70] sm:$0xff]  ;;  %v2791_v38 = vld [vmem:[%s4850_s2 + $0x78] sm:$0xff] }
 0x201   : > { %v821_v46 = vpop.f32.mrf.mxu1  ;;  %v1150_v7 = vpop.f32.mrf.mxu0  ;;  %2872 = vperm.xlu1 %3582, %v2790_v37   ;;  %2877 = vperm.xlu0 %3581, %v2791_v38  }
 0x202   : > { %v822_v58 = vadd.f32 %v821_v46, %v4118_v63  ;;  %v4292_v48 = vadd.f32 %v1150_v7, %v820_v41 }
 0x203   : > { %v823_v62 = vpop.f32.mrf.mxu1  ;;  %v1152_v1 = vpop.f32.mrf.mxu0 }
 0x204   : > { %v824_v60 = vadd.f32 %v823_v62, %v4125_v2  ;;  %v4301_v23 = vadd.f32 %v1152_v1, %v822_v58  ;;  %v2792_v1 = vld [vmem:[%s4850_s2 + $0x80] sm:$0xff] }
 0x205   : > { %v827_v24 = vpop.f32.mrf.mxu1  ;;  %v1154_v63 = vpop.f32.mrf.mxu0  ;;  %2882 = vperm.xlu1 %3582, %v2792_v1  }
 0x206   : > { %v828_v30 = vadd.f32 %v827_v24, %v4131_v4  ;;  %v4304_v33 = vadd.f32 %v1154_v63, %v824_v60  ;;  %v2793_v60 = vld [vmem:[%s4850_s2 + $0x88] sm:$0xff] }
 0x207   : > { %v829_v41 = vpop.f32.mrf.mxu1  ;;  %v1158_v46 = vpop.f32.mrf.mxu0  ;;  %2887 = vperm.xlu0 %3581, %v2793_v60  }
 0x208   : > { %v830_v2 = vadd.f32 %v829_v41, %v4137_v6  ;;  %v4313_v7 = vadd.f32 %v1158_v46, %v828_v30 }
 0x209   : > { %v831_v58 = vpop.f32.mrf.mxu1  ;;  %v1160_v4 = vpop.f32.mrf.mxu0 }
 0x20a   : > { %v832_v51 = vadd.f32 %v831_v58, %v4144_v10  ;;  %v4316_v52 = vadd.f32 %v1160_v4, %v830_v2  ;;  %v2153_v62 = vpop.permute.xlu0 %2152  ;;  %v2794_v2 = vld [vmem:[%s4850_s2 + $0x90] sm:$0xff]  ;;  %v2795_v58 = vld [vmem:[%s4850_s2 + $0x98] sm:$0xff] }
 0x20b   : > { %v833_v24 = vpop.f32.mrf.mxu1  ;;  %v1162_v6 = vpop.f32.mrf.mxu0  ;;  %2892 = vperm.xlu1 %3582, %v2794_v2   ;;  %2897 = vperm.xlu0 %3581, %v2795_v58  }
 0x20c   : > { %v834_v63 = vadd.f32 %v833_v24, %v4151_v14  ;;  %v4325_v30 = vadd.f32 %v1162_v6, %v832_v51 }
 0x20d   : > { %v837_v10 = vpop.f32.mrf.mxu1  ;;  %v1164_v37 = vpop.f32.mrf.mxu0 }
 0x20e   : > { %v838_v38 = vadd.f32 %v837_v10, %v4157_v16  ;;  %v4328_v41 = vadd.f32 %v1164_v37, %v834_v63  ;;  %v2149_v46 = vpop.permute.xlu0 %2148  ;;  %v2796_v10 = vld [vmem:[%s4850_s2 + $0xa0] sm:$0xff]  ;;  %v2797_v37 = vld [vmem:[%s4850_s2 + $0xa8] sm:$0xff] }
 0x20f   : > { %v839_v4 = vpop.f32.mrf.mxu1  ;;  %v1168_v14 = vpop.f32.mrf.mxu0  ;;  %2902 = vperm.xlu1 %3582, %v2796_v10   ;;  %2907 = vperm.xlu0 %3581, %v2797_v37  }
 0x210   : > { %v840_v51 = vadd.f32 %v839_v4, %v4163_v18  ;;  %v4337_v1 = vadd.f32 %v1168_v14, %v838_v38  ;;  %v2526_v60 = vpop.permute.xlu1 %2525 }
 0x211   : > { %v841_v16 = vpop.f32.mrf.mxu1  ;;  %v1170_v24 = vpop.f32.mrf.mxu0 }
 0x212   : > { %4855 = vst [vmem:[#allocation3_spill] sm:$0xff] %v4337_v1  ;;  %v842_v6 = vadd.f32 %v841_v16, %v4170_v21  ;;  %v4340_v63 = vadd.f32 %v1170_v24, %v840_v51  ;;  %v2528_v38 = vpop.permute.xlu0 %2527 }
 0x213   : > { %v843_v2 = vpop.f32.mrf.mxu1  ;;  %v1172_v18 = vpop.f32.mrf.mxu0 }
 0x214   : > { %4856 = vst [vmem:[#allocation4_spill] sm:$0xff] %v4340_v63  ;;  %v844_v58 = vadd.f32 %v843_v2, %v4180_v26  ;;  %v4349_v4 = vadd.f32 %v1172_v18, %v842_v6  ;;  %v2151_v14 = vpop.permute.xlu1 %2150  ;;  %v3651_v26 = vld [vmem:[%s4849_s1 + $0x1e0] sm:$0xff]   ;;  %v2531_v6 = vsel %vm307_vm1, %v2526_v60, %v2528_v38 }
 0x215   : > { %v2154_v21 = vsel %vm359_vm0, %v2149_v46, %v2151_v14  ;;  %v2155_v51 = vsel %vm359_vm0, %v2151_v14, %v2153_v62  ;;  %v847_v16 = vpop.f32.mrf.mxu1  ;;  %v1174_v24 = vpop.f32.mrf.mxu0  ;;  %v2798_v46 = vld [vmem:[%s4850_s2 + $0xb0] sm:$0xff]  ;;  %v2799_v62 = vld [vmem:[%s4850_s2 + $0xb8] sm:$0xff] }
 0x216   : > { %v2193_v12 = vsel %vm504_vm5, %v2154_v21, 0  ;;  %v848_v63 = vadd.f32 %v847_v16, %v4186_v28  ;;  %v4355_v1 = vadd.f32 %v1174_v24, %v844_v58  ;;  %3476 = vmatprep.subr.msk.bf16.mxu1 %vm504_vm5, %v2155_v51  ;;  %2912 = vperm.xlu1 %3582, %v2798_v46   ;;  %v2570_v51 = vsel %vm504_vm5, %v2531_v6, 0 }
 0x217   : > { %2213 = vmatpush1.bf16.msra.mxu1 %v2193_v12  ;;  %v849_v28 = vpop.f32.mrf.mxu1  ;;  %v1178_v10 = vpop.f32.mrf.mxu0  ;;  %2917 = vperm.xlu0 %3581, %v2799_v62   ;;  %v3652_v12 = vld [vmem:[%s4849_s1 + $0x240] sm:$0xff]  }
 0x218   : > { %v850_v37 = vadd.f32 %v849_v28, %v4195_v31  ;;  %v4369_v2 = vadd.f32 %v1178_v10, %v848_v63  ;;  %v2530_v18 = vpop.permute.xlu1 %2529  ;;  %v4857_v63 = vmov 0   ;;  %v3653_v28 = vld [vmem:[%s4849_s1 + $0x1e8] sm:$0xff]  }
 0x219   : > { %v2532_v58 = vsel %vm307_vm1, %v2528_v38, %v2530_v18  ;;  %v851_v14 = vpop.f32.mrf.mxu1  ;;  %v1180_v21 = vpop.f32.mrf.mxu0 }
 0x21a   : > { %v852_v16 = vadd.f32 %v851_v14, %v4202_v34  ;;  %v4374_v24 = vadd.f32 %v1180_v21, %v850_v37  ;;  %3477 = vmatmul.mubr.msk.bf16.vlgmr.msra.gmra.mxu1 %vm467_vm7, %v3651_v26  ;;  %3531 = vmatprep.subr.msk.bf16.mxu0 %vm504_vm5, %v2532_v58 }
 0x21b   : > { %2590 = vmatpush1.bf16.msra.mxu0 %v2570_v51  ;;  %v853_v31 = vpop.f32.mrf.mxu1  ;;  %v1182_v60 = vpop.f32.mrf.mxu0  ;;  %2240 = vmatprep.mubr.bf16.mxu1 %v4857_v63  ;;  %v3654_v51 = vld [vmem:[%s4849_s1 + $0x248] sm:$0xff]  }
 0x21c   : > { %v854_v38 = vadd.f32 %v853_v31, %v4212_v39  ;;  %v4383_v46 = vadd.f32 %v1182_v60, %v852_v16 }
 0x21d   : > { %v857_v34 = vpop.f32.mrf.mxu1  ;;  %v1184_v62 = vpop.f32.mrf.mxu0 }
 0x21e   : > { %v858_v6 = vadd.f32 %v857_v34, %v4221_v42  ;;  %v4386_v26 = vadd.f32 %v1184_v62, %v854_v38  ;;  %3532 = vmatmul.mubr.msk.bf16.vlgmr.msra.gmra.mxu0 %vm467_vm7, %v3652_v12  ;;  %v3655_v62 = vld [vmem:[%s4849_s1 + $0x1f0] sm:$0xff]  }
 0x21f   : > { %v859_v10 = vpop.f32.mrf.mxu1  ;;  %v1188_v37 = vpop.f32.mrf.mxu0  ;;  %2617 = vmatprep.mubr.bf16.mxu0 %v4857_v63 }
 0x220   : > { %v860_v39 = vadd.f32 %v859_v10, %v4227_v44  ;;  %v4394_v18 = vadd.f32 %v1188_v37, %v858_v6 }
 0x221   : > { %v861_v58 = vpop.f32.mrf.mxu1  ;;  %v1190_v14 = vpop.f32.mrf.mxu0 }
 0x222   : > { %v862_v42 = vadd.f32 %v861_v58, %v4240_v47  ;;  %v4397_v21 = vadd.f32 %v1190_v14, %v860_v39  ;;  %3478 = vmatmul.mubr.msk.bf16.gmra.mxu1 %vm467_vm7, %v3653_v28  ;;  %v3656_v14 = vld [vmem:[%s4849_s1 + $0x250] sm:$0xff]  }
 0x223   : > { %v863_v16 = vpop.f32.mrf.mxu1  ;;  %v1192_v12 = vpop.f32.mrf.mxu0  ;;  %2250 = vmatprep.mubr.bf16.mxu1 %v4857_v63 }
 0x224   : > { %v864_v44 = vadd.f32 %v863_v16, %v4247_v49  ;;  %v4405_v31 = vadd.f32 %v1192_v12, %v862_v42 }
 0x225   : > { %v867_v60 = vpop.f32.mrf.mxu1  ;;  %v1194_v38 = vpop.f32.mrf.mxu0 }
 0x226   : > { %v868_v47 = vadd.f32 %v867_v60, %v4259_v53  ;;  %v4408_v34 = vadd.f32 %v1194_v38, %v864_v44  ;;  %3533 = vmatmul.mubr.msk.bf16.gmra.mxu0 %vm467_vm7, %v3654_v51  ;;  %v3657_v38 = vld [vmem:[%s4849_s1 + $0x1f8] sm:$0xff]  }
 0x227   : > { %v869_v6 = vpop.f32.mrf.mxu1  ;;  %v1198_v28 = vpop.f32.mrf.mxu0  ;;  %2627 = vmatprep.mubr.bf16.mxu0 %v4857_v63 }
 0x228   : > { %v870_v49 = vadd.f32 %v869_v6, %v4265_v55  ;;  %v4416_v10 = vadd.f32 %v1198_v28, %v868_v47 }
 0x229   : > { %v871_v37 = vpop.f32.mrf.mxu1  ;;  %v1200_v39 = vpop.f32.mrf.mxu0 }
 0x22a   : > { %v872_v53 = vadd.f32 %v871_v37, %v4275_v9  ;;  %v4419_v58 = vadd.f32 %v1200_v39, %v870_v49  ;;  %3479 = vmatmul.mubr.msk.bf16.gmra.mxu1 %vm467_vm7, %v3655_v62  ;;  %v3658_v39 = vld [vmem:[%s4849_s1 + $0x258] sm:$0xff]  }
 0x22b   : > { %v873_v42 = vpop.f32.mrf.mxu1  ;;  %v1202_v51 = vpop.f32.mrf.mxu0  ;;  %2260 = vmatprep.mubr.bf16.mxu1 %v4857_v63 }
 0x22c   : > { %v874_v55 = vadd.f32 %v873_v42, %v4279_v20  ;;  %v4427_v16 = vadd.f32 %v1202_v51, %v872_v53 }
 0x22d   : > { %v877_v12 = vpop.f32.mrf.mxu1  ;;  %v1204_v44 = vpop.f32.mrf.mxu0 }
 0x22e   : > { %v878_v9 = vadd.f32 %v877_v12, %v4101_v57  ;;  %v4430_v60 = vadd.f32 %v1204_v44, %v874_v55  ;;  %3534 = vmatmul.mubr.msk.bf16.gmra.mxu0 %vm467_vm7, %v3656_v14  ;;  %v3659_v44 = vld [vmem:[%s4849_s1 + $0x200] sm:$0xff]  }
 0x22f   : > { %v879_v47 = vpop.f32.mrf.mxu1  ;;  %v1208_v62 = vpop.f32.mrf.mxu0  ;;  %2637 = vmatprep.mubr.bf16.mxu0 %v4857_v63 }
 0x230   : > { %v880_v20 = vadd.f32 %v879_v47, %v4107_v59  ;;  %v4438_v6 = vadd.f32 %v1208_v62, %v878_v9 }
 0x231   : > { %v881_v28 = vpop.f32.mrf.mxu1  ;;  %v1210_v49 = vpop.f32.mrf.mxu0 }
 0x232   : > { %v882_v57 = vadd.f32 %v881_v28, %v4113_v61  ;;  %v4441_v37 = vadd.f32 %v1210_v49, %v880_v20  ;;  %3480 = vmatmul.mubr.msk.bf16.gmra.mxu1 %vm467_vm7, %v3657_v38  ;;  %v3660_v49 = vld [vmem:[%s4849_s1 + $0x260] sm:$0xff]  }
 0x233   : > { %v883_v53 = vpop.f32.mrf.mxu1  ;;  %v1212_v14 = vpop.f32.mrf.mxu0  ;;  %2270 = vmatprep.mubr.bf16.mxu1 %v4857_v63 }
 0x234   : > { %v884_v59 = vadd.f32 %v883_v53, %v4120_v0  ;;  %v4449_v42 = vadd.f32 %v1212_v14, %v882_v57 }
 0x235   : > { %v887_v51 = vpop.f32.mrf.mxu1  ;;  %v1214_v55 = vpop.f32.mrf.mxu0 }
 0x236   : > { %v888_v61 = vadd.f32 %v887_v51, %v4127_v3  ;;  %v4452_v12 = vadd.f32 %v1214_v55, %v884_v59  ;;  %3535 = vmatmul.mubr.msk.bf16.gmra.mxu0 %vm467_vm7, %v3658_v39  ;;  %v3661_v55 = vld [vmem:[%s4849_s1 + $0x208] sm:$0xff]  }
 0x237   : > { %v889_v9 = vpop.f32.mrf.mxu1  ;;  %v1218_v38 = vpop.f32.mrf.mxu0  ;;  %2647 = vmatprep.mubr.bf16.mxu0 %v4857_v63 }
 0x238   : > { %v890_v0 = vadd.f32 %v889_v9, %v4133_v5  ;;  %v4460_v47 = vadd.f32 %v1218_v38, %v888_v61 }
 0x239   : > { %v891_v62 = vpop.f32.mrf.mxu1  ;;  %v1220_v20 = vpop.f32.mrf.mxu0 }
 0x23a   : > { %v892_v3 = vadd.f32 %v891_v62, %v4139_v8  ;;  %v4463_v28 = vadd.f32 %v1220_v20, %v890_v0  ;;  %3481 = vmatmul.mubr.msk.bf16.gmra.mxu1 %vm467_vm7, %v3659_v44  ;;  %v3662_v20 = vld [vmem:[%s4849_s1 + $0x268] sm:$0xff]  }
 0x23b   : > { %v893_v57 = vpop.f32.mrf.mxu1  ;;  %v1222_v39 = vpop.f32.mrf.mxu0  ;;  %2280 = vmatprep.mubr.bf16.mxu1 %v4857_v63 }
 0x23c   : > { %v894_v5 = vadd.f32 %v893_v57, %v4146_v11  ;;  %v4471_v53 = vadd.f32 %v1222_v39, %v892_v3 }
 0x23d   : > { %v897_v14 = vpop.f32.mrf.mxu1  ;;  %v1224_v59 = vpop.f32.mrf.mxu0 }
 0x23e   : > { %v898_v8 = vadd.f32 %v897_v14, %v4153_v15  ;;  %v4474_v51 = vadd.f32 %v1224_v59, %v894_v5  ;;  %3536 = vmatmul.mubr.msk.bf16.gmra.mxu0 %vm467_vm7, %v3660_v49  ;;  %v3663_v59 = vld [vmem:[%s4849_s1 + $0x210] sm:$0xff]  }
 0x23f   : > { %v899_v61 = vpop.f32.mrf.mxu1  ;;  %v1228_v44 = vpop.f32.mrf.mxu0  ;;  %2657 = vmatprep.mubr.bf16.mxu0 %v4857_v63 }
 0x240   : > { %v900_v11 = vadd.f32 %v899_v61, %v4159_v17  ;;  %v4482_v9 = vadd.f32 %v1228_v44, %v898_v8 }
 0x241   : > { %v901_v38 = vpop.f32.mrf.mxu1  ;;  %v1230_v0 = vpop.f32.mrf.mxu0 }
 0x242   : > { %v902_v15 = vadd.f32 %v901_v38, %v4165_v19  ;;  %v4485_v62 = vadd.f32 %v1230_v0, %v900_v11  ;;  %3482 = vmatmul.mubr.msk.bf16.gmra.mxu1 %vm467_vm7, %v3661_v55  ;;  %v3664_v0 = vld [vmem:[%s4849_s1 + $0x270] sm:$0xff]  }
 0x243   : > { %v903_v3 = vpop.f32.mrf.mxu1  ;;  %v1232_v49 = vpop.f32.mrf.mxu0  ;;  %2290 = vmatprep.mubr.bf16.mxu1 %v4857_v63 }
 0x244   : > { %v904_v17 = vadd.f32 %v903_v3, %v4172_v22  ;;  %v4493_v57 = vadd.f32 %v1232_v49, %v902_v15 }
 0x245   : > { %v907_v39 = vpop.f32.mrf.mxu1  ;;  %v1234_v5 = vpop.f32.mrf.mxu0 }
 0x246   : > { %v908_v19 = vadd.f32 %v907_v39, %v4182_v27  ;;  %v4496_v14 = vadd.f32 %v1234_v5, %v904_v17  ;;  %3537 = vmatmul.mubr.msk.bf16.gmra.mxu0 %vm467_vm7, %v3662_v20  ;;  %v3665_v5 = vld [vmem:[%s4849_s1 + $0x218] sm:$0xff]  }
 0x247   : > { %v909_v8 = vpop.f32.mrf.mxu1  ;;  %v1238_v55 = vpop.f32.mrf.mxu0  ;;  %2667 = vmatprep.mubr.bf16.mxu0 %v4857_v63 }
 0x248   : > { %v910_v22 = vadd.f32 %v909_v8, %v4188_v29  ;;  %v4504_v61 = vadd.f32 %v1238_v55, %v908_v19 }
 0x249   : > { %v911_v44 = vpop.f32.mrf.mxu1  ;;  %v1240_v11 = vpop.f32.mrf.mxu0 }
 0x24a   : > { %v912_v27 = vadd.f32 %v911_v44, %v4197_v32  ;;  %v4507_v38 = vadd.f32 %v1240_v11, %v910_v22  ;;  %3483 = vmatmul.mubr.msk.bf16.gmra.mxu1 %vm467_vm7, %v3663_v59  ;;  %v3666_v11 = vld [vmem:[%s4849_s1 + $0x278] sm:$0xff]  }
 0x24b   : > { %v913_v15 = vpop.f32.mrf.mxu1  ;;  %v1242_v20 = vpop.f32.mrf.mxu0  ;;  %2300 = vmatprep.mubr.bf16.mxu1 %v4857_v63 }
 0x24c   : > { %v914_v29 = vadd.f32 %v913_v15, %v4204_v36  ;;  %v4515_v3 = vadd.f32 %v1242_v20, %v912_v27 }
 0x24d   : > { %v917_v49 = vpop.f32.mrf.mxu1  ;;  %v1244_v17 = vpop.f32.mrf.mxu0 }
 0x24e   : > { %v918_v32 = vadd.f32 %v917_v49, %v4214_v40  ;;  %v4518_v39 = vadd.f32 %v1244_v17, %v914_v29  ;;  %3538 = vmatmul.mubr.msk.bf16.gmra.mxu0 %vm467_vm7, %v3664_v0  ;;  %v3667_v17 = vld [vmem:[%s4849_s1 + $0x220] sm:$0xff]  }
 0x24f   : > { %v919_v19 = vpop.f32.mrf.mxu1  ;;  %v1248_v59 = vpop.f32.mrf.mxu0  ;;  %2677 = vmatprep.mubr.bf16.mxu0 %v4857_v63 }
 0x250   : > { %v920_v36 = vadd.f32 %v919_v19, %v4223_v43  ;;  %v4526_v8 = vadd.f32 %v1248_v59, %v918_v32 }
 0x251   : > { %v921_v55 = vpop.f32.mrf.mxu1  ;;  %v1250_v22 = vpop.f32.mrf.mxu0 }
 0x252   : > { %v922_v40 = vadd.f32 %v921_v55, %v4229_v45  ;;  %v4529_v44 = vadd.f32 %v1250_v22, %v920_v36  ;;  %3484 = vmatmul.mubr.msk.bf16.gmra.mxu1 %vm467_vm7, %v3665_v5  ;;  %v3668_v22 = vld [vmem:[%s4849_s1 + $0x280] sm:$0xff]  }
 0x253   : > { %v923_v27 = vpop.f32.mrf.mxu1  ;;  %v1252_v0 = vpop.f32.mrf.mxu0  ;;  %2310 = vmatprep.mubr.bf16.mxu1 %v4857_v63 }
 0x254   : > { %v924_v43 = vadd.f32 %v923_v27, %v4242_v35  ;;  %v4537_v15 = vadd.f32 %v1252_v0, %v922_v40 }
 0x255   : > { %v927_v20 = vpop.f32.mrf.mxu1  ;;  %v1254_v29 = vpop.f32.mrf.mxu0 }
 0x256   : > { %v928_v45 = vadd.f32 %v927_v20, %v4249_v50  ;;  %v4540_v49 = vadd.f32 %v1254_v29, %v924_v43  ;;  %3539 = vmatmul.mubr.msk.bf16.gmra.mxu0 %vm467_vm7, %v3666_v11  ;;  %v3669_v29 = vld [vmem:[%s4849_s1 + $0x228] sm:$0xff]  }
 0x257   : > { %v929_v32 = vpop.f32.mrf.mxu1  ;;  %v1258_v5 = vpop.f32.mrf.mxu0  ;;  %2687 = vmatprep.mubr.bf16.mxu0 %v4857_v63 }
 0x258   : > { %v930_v35 = vadd.f32 %v929_v32, %v4261_v54  ;;  %v4548_v19 = vadd.f32 %v1258_v5, %v928_v45 }
 0x259   : > { %v931_v59 = vpop.f32.mrf.mxu1  ;;  %v1260_v36 = vpop.f32.mrf.mxu0 }
 0x25a   : > { %v932_v50 = vadd.f32 %v931_v59, %v4267_v56  ;;  %v4551_v55 = vadd.f32 %v1260_v36, %v930_v35  ;;  %3485 = vmatmul.mubr.msk.bf16.gmra.mxu1 %vm467_vm7, %v3667_v17 }
 0x25b   : > { %v933_v40 = vpop.f32.mrf.mxu1  ;;  %v1262_v11 = vpop.f32.mrf.mxu0  ;;  %2320 = vmatprep.mubr.bf16.mxu1 %v4857_v63 }
 0x25c   : > { %v934_v54 = vadd.f32 %v933_v40, %v4277_v13  ;;  %v4559_v27 = vadd.f32 %v1262_v11, %v932_v50 }
 0x25d   : > { %v1264_v0 = vpop.f32.mrf.mxu0  ;;  %v1482_v43 = vpop.f32.mrf.mxu1 }
 0x25e   : > { %v4561_v20 = vadd.f32 %v1264_v0, %v934_v54  ;;  %v1601_v56 = vadd.f32 %v1482_v43, %v4289_v25  ;;  %3540 = vmatmul.mubr.msk.bf16.gmra.mxu0 %vm467_vm7, %v3668_v22  ;;  %v3670_v25 = vld [vmem:[%s4849_s1 + $0x288] sm:$0xff]   ;;  %v3671_v43 = vld [vmem:[%s4849_s1 + $0x230] sm:$0xff]  }
 0x25f   : > { %v1484_v45 = vpop.f32.mrf.mxu1  ;;  %v1861_v17 = vpop.f32.mrf.mxu0  ;;  %2697 = vmatprep.mubr.bf16.mxu0 %v4857_v63 }
 0x260   : > { %v1602_v13 = vadd.f32 %v1484_v45, %v4292_v48  ;;  %v4570_v32 = vadd.f32 %v1861_v17, %v1601_v56 }
 0x261   : > { %v1486_v5 = vpop.f32.mrf.mxu1  ;;  %v1863_v35 = vpop.f32.mrf.mxu0 }
 0x262   : > { %v1603_v59 = vadd.f32 %v1486_v5, %v4301_v23  ;;  %v4573_v36 = vadd.f32 %v1863_v35, %v1602_v13  ;;  %3486 = vmatmul.mubr.msk.bf16.gmra.mxu1 %vm467_vm7, %v3669_v29  ;;  %v3672_v35 = vld [vmem:[%s4849_s1 + $0x290] sm:$0xff]  }
 0x263   : > { %v1488_v50 = vpop.f32.mrf.mxu1  ;;  %v1865_v22 = vpop.f32.mrf.mxu0  ;;  %2330 = vmatprep.mubr.bf16.mxu1 %v4857_v63 }
 0x264   : > { %v1604_v48 = vadd.f32 %v1488_v50, %v4304_v33  ;;  %v4581_v40 = vadd.f32 %v1865_v22, %v1603_v59 }
 0x265   : > { %v1492_v11 = vpop.f32.mrf.mxu1  ;;  %v1867_v54 = vpop.f32.mrf.mxu0 }
 0x266   : > { %v1605_v23 = vadd.f32 %v1492_v11, %v4313_v7  ;;  %v4584_v0 = vadd.f32 %v1867_v54, %v1604_v48  ;;  %3541 = vmatmul.mubr.msk.bf16.gmra.mxu0 %vm467_vm7, %v3670_v25  ;;  %v4858_v11 = vld [vmem:[#allocation3_spill] sm:$0xff] }
 0x267   : > { %v1494_v56 = vpop.f32.mrf.mxu1  ;;  %v1871_v29 = vpop.f32.mrf.mxu0  ;;  %2707 = vmatprep.mubr.bf16.mxu0 %v4857_v63 }
 0x268   : > { %v1606_v33 = vadd.f32 %v1494_v56, %v4316_v52  ;;  %v4592_v45 = vadd.f32 %v1871_v29, %v1605_v23  ;;  %v3673_v23 = vld [vmem:[%s4849_s1 + $0x238] sm:$0xff]  }
 0x269   : > { %v1496_v17 = vpop.f32.mrf.mxu1  ;;  %v1873_v13 = vpop.f32.mrf.mxu0  ;;  %v4859_v29 = vld [vmem:[#allocation4_spill] sm:$0xff] }
 0x26a   : > { %v1607_v7 = vadd.f32 %v1496_v17, %v4325_v30  ;;  %v4595_v5 = vadd.f32 %v1873_v13, %v1606_v33  ;;  %3487 = vmatmul.mubr.msk.bf16.gmra.mxu1 %vm467_vm7, %v3671_v43 }
 0x26b   : > { %v1498_v59 = vpop.f32.mrf.mxu1  ;;  %v1875_v25 = vpop.f32.mrf.mxu0  ;;  %2340 = vmatprep.mubr.bf16.mxu1 %v4857_v63 }
 0x26c   : > { %v1608_v52 = vadd.f32 %v1498_v59, %v4328_v41  ;;  %v4603_v50 = vadd.f32 %v1875_v25, %v1607_v7 }
 0x26d   : > { %v1502_v22 = vpop.f32.mrf.mxu1  ;;  %v1877_v48 = vpop.f32.mrf.mxu0 }
 0x26e   : > { %v1609_v30 = vadd.f32 %v1502_v22, %v4858_v11  ;;  %v4606_v54 = vadd.f32 %v1877_v48, %v1608_v52  ;;  %3542 = vmatmul.mubr.msk.bf16.gmra.mxu0 %vm467_vm7, %v3672_v35  ;;  %v3674_v35 = vld [vmem:[%s4849_s1 + $0x298] sm:$0xff]  }
 0x26f   : > { %v1504_v43 = vpop.f32.mrf.mxu1  ;;  %v1881_v56 = vpop.f32.mrf.mxu0  ;;  %2717 = vmatprep.mubr.bf16.mxu0 %v4857_v63 }
 0x270   : > { %v1610_v41 = vadd.f32 %v1504_v43, %v4859_v29  ;;  %v4614_v33 = vadd.f32 %v1881_v56, %v1609_v30 }
 0x271   : > { %v1506_v17 = vpop.f32.mrf.mxu1  ;;  %v1883_v13 = vpop.f32.mrf.mxu0 }
 0x272   : > { %v1611_v7 = vadd.f32 %v1506_v17, %v4349_v4  ;;  %v4617_v59 = vadd.f32 %v1883_v13, %v1610_v41  ;;  %3488 = vmatmul.mubr.msk.bf16.gmra.mxu1 %vm467_vm7, %v3673_v23 }
 0x273   : > { %v1508_v25 = vpop.f32.mrf.mxu1  ;;  %v1885_v52 = vpop.f32.mrf.mxu0 }
 0x274   : > { %v1612_v63 = vadd.f32 %v1508_v25, %v4355_v1  ;;  %v4624_v22 = vadd.f32 %v1885_v52, %v1611_v7 }
 0x275   : > { %v1512_v48 = vpop.f32.mrf.mxu1  ;;  %v1887_v11 = vpop.f32.mrf.mxu0 }
 0x276   : > { %v1613_v30 = vadd.f32 %v1512_v48, %v4369_v2  ;;  %v4627_v43 = vadd.f32 %v1887_v11, %v1612_v63  ;;  %3543 = vmatmul.mubr.msk.bf16.gmra.mxu0 %vm467_vm7, %v3674_v35 }
 0x277   : > { %v1514_v4 = vpop.f32.mrf.mxu1  ;;  %v1891_v23 = vpop.f32.mrf.mxu0 }
 0x278   : > { %v1614_v56 = vadd.f32 %v1514_v4, %v4374_v24  ;;  %v4631_v29 = vadd.f32 %v1891_v23, %v1613_v30 }
 0x279   : > { %v1516_v41 = vpop.f32.mrf.mxu1  ;;  %v1893_v17 = vpop.f32.mrf.mxu0 }
 0x27a   : > { %v1615_v1 = vadd.f32 %v1516_v41, %v4383_v46  ;;  %v4634_v13 = vadd.f32 %v1893_v17, %v1614_v56 }
 0x27b   : > { %v1518_v7 = vpop.f32.mrf.mxu1  ;;  %v1895_v25 = vpop.f32.mrf.mxu0 }
 0x27c   : > { %v1616_v2 = vadd.f32 %v1518_v7, %v4386_v26  ;;  %v4637_v52 = vadd.f32 %v1895_v25, %v1615_v1 }
 0x27d   : > { %v1522_v63 = vpop.f32.mrf.mxu1  ;;  %v1897_v35 = vpop.f32.mrf.mxu0 }
 0x27e   : > { %v1617_v48 = vadd.f32 %v1522_v63, %v4394_v18  ;;  %v4640_v11 = vadd.f32 %v1897_v35, %v1616_v2 }
 0x27f   : > { %v1524_v24 = vpop.f32.mrf.mxu1  ;;  %v1901_v30 = vpop.f32.mrf.mxu0 }
 0x280   : > { %v1618_v4 = vadd.f32 %v1524_v24, %v4397_v21  ;;  %v4643_v23 = vadd.f32 %v1901_v30, %v1617_v48 }
 0x281   : > { %v1526_v46 = vpop.f32.mrf.mxu1  ;;  %v1903_v56 = vpop.f32.mrf.mxu0 }
 0x282   : > { %v1619_v41 = vadd.f32 %v1526_v46, %v4405_v31  ;;  %v4646_v17 = vadd.f32 %v1903_v56, %v1618_v4 }
 0x283   : > { %v1528_v26 = vpop.f32.mrf.mxu1  ;;  %v1905_v1 = vpop.f32.mrf.mxu0 }
 0x284   : > { %v1620_v7 = vadd.f32 %v1528_v26, %v4408_v34  ;;  %v4649_v25 = vadd.f32 %v1905_v1, %v1619_v41 }
 0x285   : > { %v1532_v18 = vpop.f32.mrf.mxu1  ;;  %v1907_v2 = vpop.f32.mrf.mxu0 }
 0x286   : > { %v1621_v63 = vadd.f32 %v1532_v18, %v4416_v10  ;;  %v4652_v35 = vadd.f32 %v1907_v2, %v1620_v7 }
 0x287   : > { %v1534_v21 = vpop.f32.mrf.mxu1  ;;  %v1911_v48 = vpop.f32.mrf.mxu0 }
 0x288   : > { %v1622_v24 = vadd.f32 %v1534_v21, %v4419_v58  ;;  %v4655_v30 = vadd.f32 %v1911_v48, %v1621_v63 }
 0x289   : > { %v1536_v31 = vpop.f32.mrf.mxu1  ;;  %v1913_v4 = vpop.f32.mrf.mxu0 }
 0x28a   : > { %v1623_v46 = vadd.f32 %v1536_v31, %v4427_v16  ;;  %v4658_v56 = vadd.f32 %v1913_v4, %v1622_v24 }
 0x28b   : > { %v1538_v34 = vpop.f32.mrf.mxu1  ;;  %v1915_v41 = vpop.f32.mrf.mxu0 }
 0x28c   : > { %v1624_v26 = vadd.f32 %v1538_v34, %v4430_v60  ;;  %v4661_v1 = vadd.f32 %v1915_v41, %v1623_v46 }
 0x28d   : > { %v1542_v10 = vpop.f32.mrf.mxu1  ;;  %v1917_v7 = vpop.f32.mrf.mxu0 }
 0x28e   : > { %v1625_v18 = vadd.f32 %v1542_v10, %v4438_v6  ;;  %v4664_v2 = vadd.f32 %v1917_v7, %v1624_v26 }
 0x28f   : > { %v1544_v58 = vpop.f32.mrf.mxu1  ;;  %v1921_v63 = vpop.f32.mrf.mxu0 }
 0x290   : > { %v1626_v21 = vadd.f32 %v1544_v58, %v4441_v37  ;;  %v4667_v48 = vadd.f32 %v1921_v63, %v1625_v18 }
 0x291   : > { %v1546_v16 = vpop.f32.mrf.mxu1  ;;  %v1923_v24 = vpop.f32.mrf.mxu0 }
 0x292   : > { %v1627_v31 = vadd.f32 %v1546_v16, %v4449_v42  ;;  %v4670_v4 = vadd.f32 %v1923_v24, %v1626_v21 }
 0x293   : > { %v1548_v60 = vpop.f32.mrf.mxu1  ;;  %v1925_v46 = vpop.f32.mrf.mxu0 }
 0x294   : > { %v1628_v34 = vadd.f32 %v1548_v60, %v4452_v12  ;;  %v4673_v41 = vadd.f32 %v1925_v46, %v1627_v31 }
 0x295   : > { %v1552_v6 = vpop.f32.mrf.mxu1  ;;  %v1927_v26 = vpop.f32.mrf.mxu0 }
 0x296   : > { %v1629_v10 = vadd.f32 %v1552_v6, %v4460_v47  ;;  %v4676_v7 = vadd.f32 %v1927_v26, %v1628_v34 }
 0x297   : > { %v1554_v37 = vpop.f32.mrf.mxu1  ;;  %v1931_v18 = vpop.f32.mrf.mxu0 }
 0x298   : > { %v1630_v58 = vadd.f32 %v1554_v37, %v4463_v28  ;;  %v4679_v63 = vadd.f32 %v1931_v18, %v1629_v10 }
 0x299   : > { %v1556_v42 = vpop.f32.mrf.mxu1  ;;  %v1933_v21 = vpop.f32.mrf.mxu0 }
 0x29a   : > { %v1631_v16 = vadd.f32 %v1556_v42, %v4471_v53  ;;  %v4682_v24 = vadd.f32 %v1933_v21, %v1630_v58 }
 0x29b   : > { %v1558_v12 = vpop.f32.mrf.mxu1  ;;  %v1935_v31 = vpop.f32.mrf.mxu0 }
 0x29c   : > { %v1632_v60 = vadd.f32 %v1558_v12, %v4474_v51  ;;  %v4685_v46 = vadd.f32 %v1935_v31, %v1631_v16 }
 0x29d   : > { %v1562_v47 = vpop.f32.mrf.mxu1  ;;  %v1937_v34 = vpop.f32.mrf.mxu0 }
 0x29e   : > { %v1633_v6 = vadd.f32 %v1562_v47, %v4482_v9  ;;  %v4688_v26 = vadd.f32 %v1937_v34, %v1632_v60 }
 0x29f   : > { %v1564_v28 = vpop.f32.mrf.mxu1  ;;  %v1941_v10 = vpop.f32.mrf.mxu0 }
 0x2a0   : > { %v1634_v37 = vadd.f32 %v1564_v28, %v4485_v62  ;;  %v4691_v18 = vadd.f32 %v1941_v10, %v1633_v6 }
 0x2a1   : > { %v1566_v53 = vpop.f32.mrf.mxu1  ;;  %v1943_v58 = vpop.f32.mrf.mxu0 }
 0x2a2   : > { %v1635_v42 = vadd.f32 %v1566_v53, %v4493_v57  ;;  %v4694_v21 = vadd.f32 %v1943_v58, %v1634_v37 }
 0x2a3   : > { %v1568_v51 = vpop.f32.mrf.mxu1  ;;  %v1945_v16 = vpop.f32.mrf.mxu0 }
 0x2a4   : > { %v1636_v12 = vadd.f32 %v1568_v51, %v4496_v14  ;;  %v4697_v31 = vadd.f32 %v1945_v16, %v1635_v42 }
 0x2a5   : > { %v1572_v9 = vpop.f32.mrf.mxu1  ;;  %v1947_v60 = vpop.f32.mrf.mxu0 }
 0x2a6   : > { %v1637_v47 = vadd.f32 %v1572_v9, %v4504_v61  ;;  %v4700_v34 = vadd.f32 %v1947_v60, %v1636_v12 }
 0x2a7   : > { %v1574_v62 = vpop.f32.mrf.mxu1  ;;  %v1951_v6 = vpop.f32.mrf.mxu0 }
 0x2a8   : > { %v1638_v28 = vadd.f32 %v1574_v62, %v4507_v38  ;;  %v4703_v10 = vadd.f32 %v1951_v6, %v1637_v47 }
 0x2a9   : > { %v1576_v57 = vpop.f32.mrf.mxu1  ;;  %v1953_v37 = vpop.f32.mrf.mxu0 }
 0x2aa   : > { %v1639_v53 = vadd.f32 %v1576_v57, %v4515_v3  ;;  %v4706_v58 = vadd.f32 %v1953_v37, %v1638_v28 }
 0x2ab   : > { %v1578_v14 = vpop.f32.mrf.mxu1  ;;  %v1955_v42 = vpop.f32.mrf.mxu0 }
 0x2ac   : > { %v1640_v51 = vadd.f32 %v1578_v14, %v4518_v39  ;;  %v4709_v16 = vadd.f32 %v1955_v42, %v1639_v53 }
 0x2ad   : > { %v1582_v61 = vpop.f32.mrf.mxu1  ;;  %v1957_v12 = vpop.f32.mrf.mxu0 }
 0x2ae   : > { %v1641_v9 = vadd.f32 %v1582_v61, %v4526_v8  ;;  %v4712_v60 = vadd.f32 %v1957_v12, %v1640_v51 }
 0x2af   : > { %v1584_v38 = vpop.f32.mrf.mxu1  ;;  %v1961_v47 = vpop.f32.mrf.mxu0 }
 0x2b0   : > { %v1642_v62 = vadd.f32 %v1584_v38, %v4529_v44  ;;  %v4715_v6 = vadd.f32 %v1961_v47, %v1641_v9 }
 0x2b1   : > { %v1586_v3 = vpop.f32.mrf.mxu1  ;;  %v1963_v28 = vpop.f32.mrf.mxu0 }
 0x2b2   : > { %v1643_v57 = vadd.f32 %v1586_v3, %v4537_v15  ;;  %v4718_v37 = vadd.f32 %v1963_v28, %v1642_v62 }
 0x2b3   : > { %v1588_v39 = vpop.f32.mrf.mxu1  ;;  %v1965_v53 = vpop.f32.mrf.mxu0 }
 0x2b4   : > { %v1644_v14 = vadd.f32 %v1588_v39, %v4540_v49  ;;  %v4721_v42 = vadd.f32 %v1965_v53, %v1643_v57 }
 0x2b5   : > { %v1592_v8 = vpop.f32.mrf.mxu1  ;;  %v1967_v51 = vpop.f32.mrf.mxu0 }
 0x2b6   : > { %v1645_v61 = vadd.f32 %v1592_v8, %v4548_v19  ;;  %v4724_v12 = vadd.f32 %v1967_v51, %v1644_v14 }
 0x2b7   : > { %v1594_v44 = vpop.f32.mrf.mxu1  ;;  %v1971_v9 = vpop.f32.mrf.mxu0 }
 0x2b8   : > { %v1646_v38 = vadd.f32 %v1594_v44, %v4551_v55  ;;  %v4727_v15 = vadd.f32 %v1971_v9, %v1645_v61  ;;  %v2803_v61 = vpop.permute.xlu0 %2802 }
 0x2b9   : > { %v1596_v47 = vpop.f32.mrf.mxu1  ;;  %v1973_v62 = vpop.f32.mrf.mxu0 }
 0x2ba   : > { %v1647_v3 = vadd.f32 %v1596_v47, %v4559_v27  ;;  %v4730_v49 = vadd.f32 %v1973_v62, %v1646_v38  ;;  %v2808_v47 = vpop.permute.xlu1 %2807 }
 0x2bb   : > { %v1598_v28 = vpop.f32.mrf.mxu1  ;;  %v1975_v57 = vpop.f32.mrf.mxu0 }
 0x2bc   : > { %4860 = vst [vmem:[#allocation3_spill] sm:$0xff] %v4730_v49  ;;  %v1648_v39 = vadd.f32 %v1598_v28, %v4561_v20  ;;  %v4733_v19 = vadd.f32 %v1975_v57, %v1647_v3 }
 0x2bd   : > { %v1977_v53 = vpop.f32.mrf.mxu0 }
 0x2be   : > { %4861 = vst [vmem:[#allocation4_spill] sm:$0xff] %v4733_v19  ;;  %v4735_v14 = vadd.f32 %v1977_v53, %v1648_v39 }
 0x2c0   : > { %4862 = vst [vmem:[#allocation5_spill] sm:$0xff] %v4735_v14 }
 0x2da   : > { %v2232_v8 = vpop.f32.mrf.mxu1 }
 0x2db   : > { %v2351_v51 = vadd.f32 %v2232_v8, %v4570_v32 }
 0x2dc   : > { %v2234_v55 = vpop.f32.mrf.mxu1 }
 0x2dd   : > { %v2352_v27 = vadd.f32 %v2234_v55, %v4573_v36 }
 0x2de   : > { %v2236_v44 = vpop.f32.mrf.mxu1  ;;  %v2609_v9 = vpop.f32.mrf.mxu0 }
 0x2df   : > { %v2728_v38 = vadd.f32 %v2609_v9, %v2351_v51  ;;  %v2353_v20 = vadd.f32 %v2236_v44, %v4581_v40 }
 0x2e0   : > { %v2238_v62 = vpop.f32.mrf.mxu1  ;;  %v2611_v49 = vpop.f32.mrf.mxu0 }
 0x2e1   : > { %v2920_v3 = vadd.f32 %v2803_v61, %v2728_v38  ;;  %v2729_v28 = vadd.f32 %v2611_v49, %v2352_v27  ;;  %v2354_v36 = vadd.f32 %v2238_v62, %v4584_v0  ;;  %v2813_v27 = vpop.permute.xlu1 %2812 }
 0x2e2   : > { %v2242_v32 = vpop.f32.mrf.mxu1  ;;  %v2613_v57 = vpop.f32.mrf.mxu0 }
 0x2e3   : > { %v2968_v39 = vmax.f32 %v2920_v3, 0.0  ;;  %v2921_v53 = vadd.f32 %v2803_v61, %v2729_v28  ;;  %v2730_v8 = vadd.f32 %v2613_v57, %v2353_v20  ;;  %v2355_v49 = vadd.f32 %v2242_v32, %v4592_v45 }
 0x2e4   : > { %v2244_v55 = vpop.f32.mrf.mxu1  ;;  %v2615_v51 = vpop.f32.mrf.mxu0 }
 0x2e5   : > { %3016 = vst [vmem:[%s4744_s20] sm:$0xff] %v2968_v39  ;;  %v2969_v40 = vmax.f32 %v2921_v53, 0.0  ;;  %v2731_v44 = vadd.f32 %v2615_v51, %v2354_v36  ;;  %v2922_v9 = vadd.f32 %v2808_v47, %v2730_v8  ;;  %v2356_v3 = vadd.f32 %v2244_v55, %v4595_v5  ;;  %v2818_v55 = vpop.permute.xlu0 %2817 }
 0x2e6   : > { %v2246_v38 = vpop.f32.mrf.mxu1  ;;  %v2619_v14 = vpop.f32.mrf.mxu0 }
 0x2e7   : > { %3017 = vst [vmem:[%s4744_s20 + $0x8] sm:$0xff] %v2969_v40  ;;  %v2923_v19 = vadd.f32 %v2808_v47, %v2731_v44  ;;  %v2970_v0 = vmax.f32 %v2922_v9, 0.0  ;;  %v2732_v61 = vadd.f32 %v2619_v14, %v2355_v49  ;;  %v2357_v57 = vadd.f32 %v2246_v38, %v4603_v50 }
 0x2e8   : > { %v2248_v62 = vpop.f32.mrf.mxu1  ;;  %v2621_v20 = vpop.f32.mrf.mxu0 }
 0x2e9   : > { %v2971_v28 = vmax.f32 %v2923_v19, 0.0  ;;  %3018 = vst [vmem:[%s4744_s20 + $0x10] sm:$0xff] %v2970_v0  ;;  %v2733_v45 = vadd.f32 %v2621_v20, %v2356_v3  ;;  %v2924_v32 = vadd.f32 %v2813_v27, %v2732_v61  ;;  %v2358_v53 = vadd.f32 %v2248_v62, %v4606_v54  ;;  %v2823_v0 = vpop.permute.xlu1 %2822 }
 0x2ea   : > { %v2252_v39 = vpop.f32.mrf.mxu1  ;;  %v2623_v36 = vpop.f32.mrf.mxu0 }
 0x2eb   : > { %3019 = vst [vmem:[%s4744_s20 + $0x18] sm:$0xff] %v2971_v28  ;;  %v2925_v8 = vadd.f32 %v2813_v27, %v2733_v45  ;;  %v2972_v5 = vmax.f32 %v2924_v32, 0.0  ;;  %v2734_v47 = vadd.f32 %v2623_v36, %v2357_v57  ;;  %v2359_v40 = vadd.f32 %v2252_v39, %v4614_v33 }
 0x2ec   : > { %v2254_v14 = vpop.f32.mrf.mxu1  ;;  %v2625_v51 = vpop.f32.mrf.mxu0 }
 0x2ed   : > { %v2973_v19 = vmax.f32 %v2925_v8, 0.0  ;;  %3020 = vst [vmem:[%s4744_s20 + $0x20] sm:$0xff] %v2972_v5  ;;  %v2926_v50 = vadd.f32 %v2818_v55, %v2734_v47  ;;  %v2735_v49 = vadd.f32 %v2625_v51, %v2358_v53  ;;  %v2360_v54 = vadd.f32 %v2254_v14, %v4617_v59  ;;  %v2828_v8 = vpop.permute.xlu0 %2827 }
 0x2ee   : > { %v2256_v44 = vpop.f32.mrf.mxu1  ;;  %v2629_v9 = vpop.f32.mrf.mxu0 }
 0x2ef   : > { %3021 = vst [vmem:[%s4744_s20 + $0x28] sm:$0xff] %v2973_v19  ;;  %v2974_v38 = vmax.f32 %v2926_v50, 0.0  ;;  %v2927_v27 = vadd.f32 %v2818_v55, %v2735_v49  ;;  %v2736_v3 = vadd.f32 %v2629_v9, %v2359_v40  ;;  %v2361_v28 = vadd.f32 %v2256_v44, %v4624_v22  ;;  %v2833_v9 = vpop.permute.xlu1 %2832 }
 0x2f0   : > { %v2258_v61 = vpop.f32.mrf.mxu1  ;;  %v2631_v62 = vpop.f32.mrf.mxu0 }
 0x2f1   : > { %3022 = vst [vmem:[%s4744_s20 + $0x30] sm:$0xff] %v2974_v38  ;;  %v2975_v20 = vmax.f32 %v2927_v27, 0.0  ;;  %v2737_v33 = vadd.f32 %v2631_v62, %v2360_v54  ;;  %v2928_v57 = vadd.f32 %v2823_v0, %v2736_v3  ;;  %v2362_v39 = vadd.f32 %v2258_v61, %v4627_v43 }
 0x2f2   : > { %v2262_v45 = vpop.f32.mrf.mxu1  ;;  %v2633_v32 = vpop.f32.mrf.mxu0 }
 0x2f3   : > { %3023 = vst [vmem:[%s4744_s20 + $0x38] sm:$0xff] %v2975_v20  ;;  %v2929_v36 = vadd.f32 %v2823_v0, %v2737_v33  ;;  %v2976_v59 = vmax.f32 %v2928_v57, 0.0  ;;  %v2738_v53 = vadd.f32 %v2633_v32, %v2361_v28  ;;  %v2363_v14 = vadd.f32 %v2262_v45, %v4631_v29  ;;  %v2838_v57 = vpop.permute.xlu0 %2837 }
 0x2f4   : > { %v2264_v5 = vpop.f32.mrf.mxu1  ;;  %v2635_v47 = vpop.f32.mrf.mxu0 }
 0x2f5   : > { %v2977_v55 = vmax.f32 %v2929_v36, 0.0  ;;  %3024 = vst [vmem:[%s4744_s20 + $0x40] sm:$0xff] %v2976_v59  ;;  %v2930_v22 = vadd.f32 %v2828_v8, %v2738_v53  ;;  %v2739_v51 = vadd.f32 %v2635_v47, %v2362_v39  ;;  %v2364_v43 = vadd.f32 %v2264_v5, %v4634_v13 }
 0x2f6   : > { %v2266_v19 = vpop.f32.mrf.mxu1  ;;  %v2639_v40 = vpop.f32.mrf.mxu0 }
 0x2f7   : > { %3025 = vst [vmem:[%s4744_s20 + $0x48] sm:$0xff] %v2977_v55  ;;  %v2978_v50 = vmax.f32 %v2930_v22, 0.0  ;;  %v2931_v49 = vadd.f32 %v2828_v8, %v2739_v51  ;;  %v2740_v44 = vadd.f32 %v2639_v40, %v2363_v14  ;;  %v2365_v3 = vadd.f32 %v2266_v19, %v4637_v52  ;;  %v2843_v14 = vpop.permute.xlu1 %2842 }
 0x2f8   : > { %v2268_v38 = vpop.f32.mrf.mxu1  ;;  %v2641_v54 = vpop.f32.mrf.mxu0 }
 0x2f9   : > { %3026 = vst [vmem:[%s4744_s20 + $0x50] sm:$0xff] %v2978_v50  ;;  %v2979_v27 = vmax.f32 %v2931_v49, 0.0  ;;  %v2741_v29 = vadd.f32 %v2641_v54, %v2364_v43  ;;  %v2932_v0 = vadd.f32 %v2833_v9, %v2740_v44  ;;  %v2366_v20 = vadd.f32 %v2268_v38, %v4640_v11  ;;  %v2848_v54 = vpop.permute.xlu0 %2847 }
 0x2fa   : > { %v2272_v61 = vpop.f32.mrf.mxu1  ;;  %v2643_v62 = vpop.f32.mrf.mxu0 }
 0x2fb   : > { %3027 = vst [vmem:[%s4744_s20 + $0x58] sm:$0xff] %v2979_v27  ;;  %v2933_v28 = vadd.f32 %v2833_v9, %v2741_v29  ;;  %v2980_v13 = vmax.f32 %v2932_v0, 0.0  ;;  %v2742_v33 = vadd.f32 %v2643_v62, %v2365_v3  ;;  %v2367_v36 = vadd.f32 %v2272_v61, %v4643_v23 }
 0x2fc   : > { %v2274_v45 = vpop.f32.mrf.mxu1  ;;  %v2645_v32 = vpop.f32.mrf.mxu0 }
 0x2fd   : > { %v2981_v39 = vmax.f32 %v2933_v28, 0.0  ;;  %3028 = vst [vmem:[%s4744_s20 + $0x60] sm:$0xff] %v2980_v13  ;;  %v2934_v52 = vadd.f32 %v2838_v57, %v2742_v33  ;;  %v2743_v59 = vadd.f32 %v2645_v32, %v2366_v20  ;;  %v2368_v11 = vadd.f32 %v2274_v45, %v4646_v17 }
 0x2fe   : > { %v2276_v53 = vpop.f32.mrf.mxu1  ;;  %v2649_v8 = vpop.f32.mrf.mxu0 }
 0x2ff   : > { %3029 = vst [vmem:[%s4744_s20 + $0x68] sm:$0xff] %v2981_v39  ;;  %v2982_v5 = vmax.f32 %v2934_v52, 0.0  ;;  %v2935_v47 = vadd.f32 %v2838_v57, %v2743_v59  ;;  %v2744_v55 = vadd.f32 %v2649_v8, %v2367_v36  ;;  %v2369_v40 = vadd.f32 %v2276_v53, %v4649_v25  ;;  %v2853_v57 = vpop.permute.xlu1 %2852 }
 0x300   : > { %v2278_v22 = vpop.f32.mrf.mxu1  ;;  %v2651_v51 = vpop.f32.mrf.mxu0 }
 0x301   : > { %3030 = vst [vmem:[%s4744_s20 + $0x70] sm:$0xff] %v2982_v5  ;;  %v2983_v19 = vmax.f32 %v2935_v47, 0.0  ;;  %v2745_v23 = vadd.f32 %v2651_v51, %v2368_v11  ;;  %v2936_v50 = vadd.f32 %v2843_v14, %v2744_v55  ;;  %v2370_v44 = vadd.f32 %v2278_v22, %v4652_v35  ;;  %v2858_v47 = vpop.permute.xlu0 %2857 }
 0x302   : > { %v2282_v43 = vpop.f32.mrf.mxu1  ;;  %v2653_v49 = vpop.f32.mrf.mxu0 }
 0x303   : > { %3031 = vst [vmem:[%s4744_s20 + $0x78] sm:$0xff] %v2983_v19  ;;  %v2937_v9 = vadd.f32 %v2843_v14, %v2745_v23  ;;  %v2984_v17 = vmax.f32 %v2936_v50, 0.0  ;;  %v2746_v38 = vadd.f32 %v2653_v49, %v2369_v40  ;;  %v2371_v0 = vadd.f32 %v2282_v43, %v4655_v30 }
 0x304   : > { %v2284_v27 = vpop.f32.mrf.mxu1  ;;  %v2655_v3 = vpop.f32.mrf.mxu0 }
 0x305   : > { %v2985_v29 = vmax.f32 %v2937_v9, 0.0  ;;  %3032 = vst [vmem:[%s4744_s20 + $0x80] sm:$0xff] %v2984_v17  ;;  %v2938_v25 = vadd.f32 %v2848_v54, %v2746_v38  ;;  %v2747_v61 = vadd.f32 %v2655_v3, %v2370_v44  ;;  %v2372_v35 = vadd.f32 %v2284_v27, %v4658_v56  ;;  %v2863_v44 = vpop.permute.xlu1 %2862 }
 0x306   : > { %v2286_v62 = vpop.f32.mrf.mxu1  ;;  %v2659_v20 = vpop.f32.mrf.mxu0 }
 0x307   : > { %3033 = vst [vmem:[%s4744_s20 + $0x88] sm:$0xff] %v2985_v29  ;;  %v2986_v28 = vmax.f32 %v2938_v25, 0.0  ;;  %v2939_v13 = vadd.f32 %v2848_v54, %v2747_v61  ;;  %v2748_v33 = vadd.f32 %v2659_v20, %v2371_v0  ;;  %v2373_v36 = vadd.f32 %v2286_v62, %v4661_v1  ;;  %v2868_v62 = vpop.permute.xlu0 %2867 }
 0x308   : > { %v2288_v45 = vpop.f32.mrf.mxu1  ;;  %v2661_v32 = vpop.f32.mrf.mxu0 }
 0x309   : > { %3034 = vst [vmem:[%s4744_s20 + $0x90] sm:$0xff] %v2986_v28  ;;  %v2987_v39 = vmax.f32 %v2939_v13, 0.0  ;;  %v2749_v30 = vadd.f32 %v2661_v32, %v2372_v35  ;;  %v2940_v52 = vadd.f32 %v2853_v57, %v2748_v33  ;;  %v2374_v8 = vadd.f32 %v2288_v45, %v4664_v2 }
 0x30a   : > { %v2292_v59 = vpop.f32.mrf.mxu1  ;;  %v2663_v53 = vpop.f32.mrf.mxu0 }
 0x30b   : > { %3035 = vst [vmem:[%s4744_s20 + $0x98] sm:$0xff] %v2987_v39  ;;  %v2941_v5 = vadd.f32 %v2853_v57, %v2749_v30  ;;  %v2988_v56 = vmax.f32 %v2940_v52, 0.0  ;;  %v2750_v11 = vadd.f32 %v2663_v53, %v2373_v36  ;;  %v2375_v51 = vadd.f32 %v2292_v59, %v4667_v48  ;;  %v2873_v30 = vpop.permute.xlu1 %2872 }
 0x30c   : > { %v2294_v55 = vpop.f32.mrf.mxu1  ;;  %v2665_v14 = vpop.f32.mrf.mxu0 }
 0x30d   : > { %v2989_v22 = vmax.f32 %v2941_v5, 0.0  ;;  %3036 = vst [vmem:[%s4744_s20 + $0xa0] sm:$0xff] %v2988_v56  ;;  %v2942_v1 = vadd.f32 %v2858_v47, %v2750_v11  ;;  %v2751_v19 = vadd.f32 %v2665_v14, %v2374_v8  ;;  %v2376_v2 = vadd.f32 %v2294_v55, %v4670_v4 }
 0x30e   : > { %v2296_v40 = vpop.f32.mrf.mxu1  ;;  %v2669_v23 = vpop.f32.mrf.mxu0 }
 0x30f   : > { %3037 = vst [vmem:[%s4744_s20 + $0xa8] sm:$0xff] %v2989_v22  ;;  %v2990_v50 = vmax.f32 %v2942_v1, 0.0  ;;  %v2943_v43 = vadd.f32 %v2858_v47, %v2751_v19  ;;  %v2752_v49 = vadd.f32 %v2669_v23, %v2375_v51  ;;  %v2377_v54 = vadd.f32 %v2296_v40, %v4673_v41  ;;  %v2878_v22 = vpop.permute.xlu0 %2877 }
 0x310   : > { %v2298_v9 = vpop.f32.mrf.mxu1  ;;  %v2671_v17 = vpop.f32.mrf.mxu0 }
 0x311   : > { %3038 = vst [vmem:[%s4744_s20 + $0xb0] sm:$0xff] %v2990_v50  ;;  %v2991_v38 = vmax.f32 %v2943_v43, 0.0  ;;  %v2753_v48 = vadd.f32 %v2671_v17, %v2376_v2  ;;  %v2944_v27 = vadd.f32 %v2863_v44, %v2752_v49  ;;  %v2378_v0 = vadd.f32 %v2298_v9, %v4676_v7  ;;  %v2883_v9 = vpop.permute.xlu1 %2882 }
 0x312   : > { %v2302_v3 = vpop.f32.mrf.mxu1  ;;  %v2673_v29 = vpop.f32.mrf.mxu0 }
 0x313   : > { %3039 = vst [vmem:[%s4744_s20 + $0xb8] sm:$0xff] %v2991_v38  ;;  %v2945_v25 = vadd.f32 %v2863_v44, %v2753_v48  ;;  %v2992_v4 = vmax.f32 %v2944_v27, 0.0  ;;  %v2754_v61 = vadd.f32 %v2673_v29, %v2377_v54  ;;  %v2379_v13 = vadd.f32 %v2302_v3, %v4679_v63 }
 0x314   : > { %v2304_v20 = vpop.f32.mrf.mxu1  ;;  %v2675_v28 = vpop.f32.mrf.mxu0 }
 0x315   : > { %v2993_v35 = vmax.f32 %v2945_v25, 0.0  ;;  %3040 = vst [vmem:[%s4744_s20 + $0xc0] sm:$0xff] %v2992_v4  ;;  %v2946_v41 = vadd.f32 %v2868_v62, %v2754_v61  ;;  %v2755_v33 = vadd.f32 %v2675_v28, %v2378_v0  ;;  %v2380_v7 = vadd.f32 %v2304_v20, %v4682_v24  ;;  %v2888_v61 = vpop.permute.xlu0 %2887 }
 0x316   : > { %v2306_v57 = vpop.f32.mrf.mxu1  ;;  %v2679_v45 = vpop.f32.mrf.mxu0 }
 0x317   : > { %3041 = vst [vmem:[%s4744_s20 + $0xc8] sm:$0xff] %v2993_v35  ;;  %v2994_v32 = vmax.f32 %v2946_v41, 0.0  ;;  %v2947_v39 = vadd.f32 %v2868_v62, %v2755_v33  ;;  %v2756_v36 = vadd.f32 %v2679_v45, %v2379_v13  ;;  %v2381_v8 = vadd.f32 %v2306_v57, %v4685_v46 }
 0x318   : > { %v2308_v52 = vpop.f32.mrf.mxu1  ;;  %v2681_v59 = vpop.f32.mrf.mxu0 }
 0x319   : > { %3042 = vst [vmem:[%s4744_s20 + $0xd0] sm:$0xff] %v2994_v32  ;;  %v2995_v53 = vmax.f32 %v2947_v39, 0.0  ;;  %v2757_v63 = vadd.f32 %v2681_v59, %v2380_v7  ;;  %v2948_v5 = vadd.f32 %v2873_v30, %v2756_v36  ;;  %v2382_v47 = vadd.f32 %v2308_v52, %v4688_v26  ;;  %v2893_v7 = vpop.permute.xlu1 %2892 }
 0x31a   : > { %v2312_v56 = vpop.f32.mrf.mxu1  ;;  %v2683_v11 = vpop.f32.mrf.mxu0 }
 0x31b   : > { %3043 = vst [vmem:[%s4744_s20 + $0xd8] sm:$0xff] %v2995_v53  ;;  %v2949_v55 = vadd.f32 %v2873_v30, %v2757_v63  ;;  %v2996_v24 = vmax.f32 %v2948_v5, 0.0  ;;  %v2758_v14 = vadd.f32 %v2683_v11, %v2381_v8  ;;  %v2383_v40 = vadd.f32 %v2312_v56, %v4691_v18  ;;  %v2898_v11 = vpop.permute.xlu0 %2897 }
 0x31c   : > { %v2314_v51 = vpop.f32.mrf.mxu1  ;;  %v2685_v1 = vpop.f32.mrf.mxu0 }
 0x31d   : > { %v2997_v19 = vmax.f32 %v2949_v55, 0.0  ;;  %3044 = vst [vmem:[%s4744_s20 + $0xe0] sm:$0xff] %v2996_v24  ;;  %v2950_v46 = vadd.f32 %v2878_v22, %v2758_v14  ;;  %v2759_v23 = vadd.f32 %v2685_v1, %v2382_v47  ;;  %v2384_v26 = vadd.f32 %v2314_v51, %v4694_v21 }
 0x31e   : > { %v2316_v50 = vpop.f32.mrf.mxu1  ;;  %v2689_v2 = vpop.f32.mrf.mxu0 }
 0x31f   : > { %3045 = vst [vmem:[%s4744_s20 + $0xe8] sm:$0xff] %v2997_v19  ;;  %v2998_v43 = vmax.f32 %v2950_v46, 0.0  ;;  %v2951_v49 = vadd.f32 %v2878_v22, %v2759_v23  ;;  %v2760_v44 = vadd.f32 %v2689_v2, %v2383_v40  ;;  %v2385_v48 = vadd.f32 %v2316_v50, %v4697_v31  ;;  %v2903_v23 = vpop.permute.xlu1 %2902 }
 0x320   : > { %v2318_v17 = vpop.f32.mrf.mxu1  ;;  %v2691_v38 = vpop.f32.mrf.mxu0 }
 0x321   : > { %3046 = vst [vmem:[%s4744_s20 + $0xf0] sm:$0xff] %v2998_v43  ;;  %v2999_v54 = vmax.f32 %v2951_v49, 0.0  ;;  %v2761_v18 = vadd.f32 %v2691_v38, %v2384_v26  ;;  %v2952_v27 = vadd.f32 %v2883_v9, %v2760_v44  ;;  %v2386_v0 = vadd.f32 %v2318_v17, %v4700_v34 }
 0x322   : > { %v2322_v3 = vpop.f32.mrf.mxu1  ;;  %v2693_v29 = vpop.f32.mrf.mxu0 }
 0x323   : > { %3047 = vst [vmem:[%s4744_s20 + $0xf8] sm:$0xff] %v2999_v54  ;;  %v2953_v25 = vadd.f32 %v2883_v9, %v2761_v18  ;;  %v3000_v21 = vmax.f32 %v2952_v27, 0.0  ;;  %v2762_v4 = vadd.f32 %v2693_v29, %v2385_v48  ;;  %v2387_v35 = vadd.f32 %v2322_v3, %v4703_v10  ;;  %v2908_v48 = vpop.permute.xlu0 %2907 }
 0x324   : > { %v2324_v62 = vpop.f32.mrf.mxu1  ;;  %v2695_v20 = vpop.f32.mrf.mxu0 }
 0x325   : > { %v3001_v28 = vmax.f32 %v2953_v25, 0.0  ;;  %3048 = vst [vmem:[%s4744_s20 + $0x100] sm:$0xff] %v3000_v21  ;;  %v2954_v31 = vadd.f32 %v2888_v61, %v2762_v4  ;;  %v2763_v13 = vadd.f32 %v2695_v20, %v2386_v0  ;;  %v2388_v34 = vadd.f32 %v2324_v62, %v4706_v58 }
 0x326   : > { %v2326_v41 = vpop.f32.mrf.mxu1  ;;  %v2699_v33 = vpop.f32.mrf.mxu0 }
 0x327   : > { %3049 = vst [vmem:[%s4744_s20 + $0x108] sm:$0xff] %v3001_v28  ;;  %v3002_v57 = vmax.f32 %v2954_v31, 0.0  ;;  %v2955_v45 = vadd.f32 %v2888_v61, %v2763_v13  ;;  %v2764_v32 = vadd.f32 %v2699_v33, %v2387_v35  ;;  %v2389_v52 = vadd.f32 %v2326_v41, %v4709_v16  ;;  %v4863_v61 = vld [vmem:[#allocation3_spill] sm:$0xff]  ;;  %v2913_v28 = vpop.permute.xlu1 %2912  ;;  %v4864_v41 = vld [vmem:[#allocation4_spill] sm:$0xff] }
 0x328   : > { %v2328_v39 = vpop.f32.mrf.mxu1  ;;  %v2701_v36 = vpop.f32.mrf.mxu0 }
 0x329   : > { %3050 = vst [vmem:[%s4744_s20 + $0x110] sm:$0xff] %v3002_v57  ;;  %v3003_v30 = vmax.f32 %v2955_v45, 0.0  ;;  %v2765_v10 = vadd.f32 %v2701_v36, %v2388_v34  ;;  %v2956_v59 = vadd.f32 %v2893_v7, %v2764_v32  ;;  %v2390_v63 = vadd.f32 %v2328_v39, %v4712_v60  ;;  %v4865_v45 = vld [vmem:[#allocation5_spill] sm:$0xff] }
 0x32a   : > { %v2332_v53 = vpop.f32.mrf.mxu1  ;;  %v2703_v8 = vpop.f32.mrf.mxu0 }
 0x32b   : > { %3051 = vst [vmem:[%s4744_s20 + $0x118] sm:$0xff] %v3003_v30  ;;  %v2957_v5 = vadd.f32 %v2893_v7, %v2765_v10  ;;  %v3004_v58 = vmax.f32 %v2956_v59, 0.0  ;;  %v2766_v56 = vadd.f32 %v2703_v8, %v2389_v52  ;;  %v2391_v14 = vadd.f32 %v2332_v53, %v4715_v6  ;;  %v2918_v30 = vpop.permute.xlu0 %2917 }
 0x32c   : > { %v2334_v47 = vpop.f32.mrf.mxu1  ;;  %v2705_v55 = vpop.f32.mrf.mxu0 }
 0x32d   : > { %v3005_v24 = vmax.f32 %v2957_v5, 0.0  ;;  %3052 = vst [vmem:[%s4744_s20 + $0x120] sm:$0xff] %v3004_v58  ;;  %v2958_v16 = vadd.f32 %v2898_v11, %v2766_v56  ;;  %v2767_v22 = vadd.f32 %v2705_v55, %v2390_v63  ;;  %v2392_v60 = vadd.f32 %v2334_v47, %v4718_v37 }
 0x32e   : > { %v2336_v51 = vpop.f32.mrf.mxu1  ;;  %v2709_v1 = vpop.f32.mrf.mxu0 }
 0x32f   : > { %3053 = vst [vmem:[%s4744_s20 + $0x128] sm:$0xff] %v3005_v24  ;;  %v3006_v19 = vmax.f32 %v2958_v16, 0.0  ;;  %v2959_v40 = vadd.f32 %v2898_v11, %v2767_v22  ;;  %v2768_v46 = vadd.f32 %v2709_v1, %v2391_v14  ;;  %v2393_v26 = vadd.f32 %v2336_v51, %v4721_v42 }
 0x330   : > { %v2338_v50 = vpop.f32.mrf.mxu1  ;;  %v2711_v2 = vpop.f32.mrf.mxu0 }
 0x331   : > { %3054 = vst [vmem:[%s4744_s20 + $0x130] sm:$0xff] %v3006_v19  ;;  %v3007_v43 = vmax.f32 %v2959_v40, 0.0  ;;  %v2769_v6 = vadd.f32 %v2711_v2, %v2392_v60  ;;  %v2960_v49 = vadd.f32 %v2903_v23, %v2768_v46  ;;  %v2394_v17 = vadd.f32 %v2338_v50, %v4724_v12 }
 0x332   : > { %v2342_v44 = vpop.f32.mrf.mxu1  ;;  %v2713_v9 = vpop.f32.mrf.mxu0 }
 0x333   : > { %3055 = vst [vmem:[%s4744_s20 + $0x138] sm:$0xff] %v3007_v43  ;;  %v2961_v38 = vadd.f32 %v2903_v23, %v2769_v6  ;;  %v3008_v37 = vmax.f32 %v2960_v49, 0.0  ;;  %v2770_v54 = vadd.f32 %v2713_v9, %v2393_v26  ;;  %v2395_v29 = vadd.f32 %v2342_v44, %v4727_v15 }
 0x334   : > { %v2344_v18 = vpop.f32.mrf.mxu1  ;;  %v2715_v27 = vpop.f32.mrf.mxu0 }
 0x335   : > { %v3009_v3 = vmax.f32 %v2961_v38, 0.0  ;;  %3056 = vst [vmem:[%s4744_s20 + $0x140] sm:$0xff] %v3008_v37  ;;  %v2962_v42 = vadd.f32 %v2908_v48, %v2770_v54  ;;  %v2771_v0 = vadd.f32 %v2715_v27, %v2394_v17  ;;  %v2396_v12 = vadd.f32 %v2344_v18, %v4863_v61 }
 0x336   : > { %v2346_v25 = vpop.f32.mrf.mxu1  ;;  %v2719_v21 = vpop.f32.mrf.mxu0 }
 0x337   : > { %3057 = vst [vmem:[%s4744_s20 + $0x148] sm:$0xff] %v3009_v3  ;;  %v3010_v4 = vmax.f32 %v2962_v42, 0.0  ;;  %v2963_v62 = vadd.f32 %v2908_v48, %v2771_v0  ;;  %v2772_v20 = vadd.f32 %v2719_v21, %v2395_v29  ;;  %v2397_v15 = vadd.f32 %v2346_v25, %v4864_v41 }
 0x338   : > { %v2348_v35 = vpop.f32.mrf.mxu1  ;;  %v2721_v31 = vpop.f32.mrf.mxu0 }
 0x339   : > { %3058 = vst [vmem:[%s4744_s20 + $0x150] sm:$0xff] %v3010_v4  ;;  %v3011_v13 = vmax.f32 %v2963_v62, 0.0  ;;  %v2773_v33 = vadd.f32 %v2721_v31, %v2396_v12  ;;  %v2964_v57 = vadd.f32 %v2913_v28, %v2772_v20  ;;  %v2398_v32 = vadd.f32 %v2348_v35, %v4865_v45 }
 0x33a   : > { %v2723_v34 = vpop.f32.mrf.mxu0 }
 0x33b   : > { %3059 = vst [vmem:[%s4744_s20 + $0x158] sm:$0xff] %v3011_v13  ;;  %v2965_v7 = vadd.f32 %v2913_v28, %v2773_v33  ;;  %v3012_v39 = vmax.f32 %v2964_v57, 0.0  ;;  %v2774_v36 = vadd.f32 %v2723_v34, %v2397_v15 }
 0x33c   : > { %v2725_v52 = vpop.f32.mrf.mxu0 }
 0x33d   : > { %v3013_v10 = vmax.f32 %v2965_v7, 0.0  ;;  %3060 = vst [vmem:[%s4744_s20 + $0x160] sm:$0xff] %v3012_v39  ;;  %v2966_v59 = vadd.f32 %v2918_v30, %v2774_v36  ;;  %v2775_v53 = vadd.f32 %v2725_v52, %v2398_v32 }
 0x33f   : > { %3061 = vst [vmem:[%s4744_s20 + $0x168] sm:$0xff] %v3013_v10  ;;  %v3014_v8 = vmax.f32 %v2966_v59, 0.0  ;;  %v2967_v63 = vadd.f32 %v2918_v30, %v2775_v53 }
 0x341   : > { %3062 = vst [vmem:[%s4744_s20 + $0x170] sm:$0xff] %v3014_v8  ;;  %v3015_v5 = vmax.f32 %v2967_v63, 0.0 }
 0x343   : > { %3063 = vst [vmem:[%s4744_s20 + $0x178] sm:$0xff] %v3015_v5 }
 0x344 PF: > { %s14_s17 = sadd.s32 1, %s3697_s17   ;;  %s4866_s15 = smov %s3693_s16 }
 0x345   : > { %p11_p5 = scmp.ge.s32.totalorder %s14_s17, 4   ;;  %s4867_s16 = smov %s4869_s18 }
 0x347   :  { %13 = sbr.rel (!%p11_p5) target bundleno = 2 (0x2), region = 82 }

</bundles_post_ra>
